<compile_context>
chip_gen: v7x
topology: tpu7x:2x2x1
jax: 0.10.0
libtpu: 0.0.40
codegen_flags: <defaults>
</compile_context>

<pallas_src>
import functools

import jax
import jax.numpy as jnp
from jax.experimental import pallas as pl
from jax.experimental.pallas import tpu as pltpu


def _round_up(x, m):
    return (x + m - 1) // m * m


# ----------------------------------------------------------------------------
# Pallas kernel bodies
# ----------------------------------------------------------------------------
def _matmul_stats_kernel(a_ref, b_ref, o_ref, stat_ref):
    """(tm, K) @ (K, N) -> (tm, N) f32 on the MXU (bf16 inputs), plus a fused
    epilogue writing per-column sum / sum-of-squares (rows 0/1 of an (8, N)
    stats block) so BatchNorm never needs a second full HBM pass."""
    y = jnp.dot(a_ref[...].astype(jnp.bfloat16), b_ref[...],
                preferred_element_type=jnp.float32)
    o_ref[...] = y
    s = jnp.sum(y, axis=0, keepdims=True)
    ss = jnp.sum(y * y, axis=0, keepdims=True)
    stat_ref[...] = jnp.concatenate(
        [s, ss, jnp.zeros((6, y.shape[1]), jnp.float32)], axis=0)


def _conv3_kernel(x_ref, w_ref, s_ref, b_ref, o_ref, stat_ref, *, fuse_act):
    """Fused 3x3x3 / stride-1 / 'same' conv for one batch element.

    x_ref is the whole zero-padded volume (D+2, H+2, W+2, Cin) resident in VMEM
    (each input byte is DMA'd from HBM exactly once); the kernel loops over the
    D output depth slabs with pl.loop.  For every slab, 27 shifted
    (H*W, Cin)@(Cin, Cout) bf16 matmuls accumulate into an f32 accumulator --
    no im2col is ever materialized in HBM.

    When fuse_act=True, the previous layer's BatchNorm+ReLU is applied on the
    fly to every loaded input slab (relu(x*s + b)), and an interior mask forces
    the padded halo back to exactly zero so 'same'-padding semantics match the
    reference (conv(pad0(relu(bn(h))))) bit-for-bit.

    Per-channel sum / sum^2 of the conv output are accumulated into stat_ref
    (rows 0/1) as a fused epilogue for the following BatchNorm."""
    Dp, Hp, Wp, Cin = x_ref.shape
    D, H, W = Dp - 2, Hp - 2, Wp - 2
    Cout = w_ref.shape[-1]

    stat_ref[...] = jnp.zeros_like(stat_ref)

    if fuse_act:
        scale = s_ref[0]                                   # (Cin,)
        shift = b_ref[0]                                   # (Cin,)
        hh = jax.lax.broadcasted_iota(jnp.int32, (Hp, Wp, 1), 0)
        ww = jax.lax.broadcasted_iota(jnp.int32, (Hp, Wp, 1), 1)
        interior_hw = (hh >= 1) & (hh <= H) & (ww >= 1) & (ww <= W)

    @pl.loop(0, D)
    def _depth(d):
        acc = jnp.zeros((H * W, Cout), jnp.float32)
        for kd in range(3):
            slab = x_ref[d + kd]                           # (Hp, Wp, Cin) f32
            if fuse_act:
                act = jnp.maximum(slab * scale + shift, 0.0)
                dz_ok = jnp.logical_and(d + kd >= 1, d + kd <= D)
                slab = jnp.where(jnp.logical_and(interior_hw, dz_ok), act, 0.0)
            for kh in range(3):
                for kw in range(3):
                    xs = slab[kh:kh + H, kw:kw + W, :].reshape(H * W, Cin)
                    acc = acc + jnp.dot(xs.astype(jnp.bfloat16),
                                        w_ref[(kd * 3 + kh) * 3 + kw],
                                        preferred_element_type=jnp.float32)
        o_ref[pl.ds(d, 1), :, :] = acc.reshape(1, H * W, Cout)
        stat_ref[0:1, :] = stat_ref[0:1, :] + jnp.sum(acc, axis=0, keepdims=True)
        stat_ref[1:2, :] = stat_ref[1:2, :] + jnp.sum(acc * acc, axis=0,
                                                      keepdims=True)


def _affine_kernel(x_ref, s_ref, b_ref, o_ref, *, relu):
    y = x_ref[...] * s_ref[...] + b_ref[...]
    if relu:
        y = jnp.maximum(y, 0.0)
    o_ref[...] = y


def _affine_add_kernel(h_ref, s1_ref, b1_ref, d_ref, s2_ref, b2_ref, o_ref):
    """out = relu(h*s1 + b1) + (d*s2 + b2): fuses a ResBlock's second BN+ReLU,
    the shortcut BN and the residual add into a single elementwise pass."""
    y = jnp.maximum(h_ref[...] * s1_ref[...] + b1_ref[...], 0.0)
    o_ref[...] = y + (d_ref[...] * s2_ref[...] + b2_ref[...])


# ----------------------------------------------------------------------------
# Pallas-call wrappers
# ----------------------------------------------------------------------------
def pallas_matmul_stats(a, b, *, tm=512):
    """a: (M, K) f32, b: (K, N) bf16 -> (y (M, N) f32, col_sum (N,), col_sumsq (N,))."""
    M, K = a.shape
    N = b.shape[1]
    tm = min(tm, _round_up(M, 8))
    Mpad = _round_up(M, tm)
    if Mpad != M:
        a = jnp.pad(a, ((0, Mpad - M), (0, 0)))   # zero rows: no effect on stats
    steps = Mpad // tm
    y, stats = pl.pallas_call(
        _matmul_stats_kernel,
        out_shape=(jax.ShapeDtypeStruct((Mpad, N), jnp.float32),
                   jax.ShapeDtypeStruct((steps * 8, N), jnp.float32)),
        grid=(steps,),
        in_specs=[pl.BlockSpec((tm, K), lambda i: (i, 0)),
                  pl.BlockSpec((K, N), lambda i: (0, 0))],
        out_specs=(pl.BlockSpec((tm, N), lambda i: (i, 0)),
                   pl.BlockSpec((8, N), lambda i: (i, 0))),
        compiler_params=pltpu.CompilerParams(
            dimension_semantics=("parallel",)),
    )(a, b)
    stats = stats.reshape(steps, 8, N)
    return y[:M], jnp.sum(stats[:, 0, :], axis=0), jnp.sum(stats[:, 1, :], axis=0)


def conv3d_k3s1_stats(x, w27, in_scale=None, in_shift=None):
    """Fused 3x3x3 / stride-1 / 'same' conv with BN-stat epilogue.

    x: (B, D, H, W, Cin) f32, w27: (27, Cin, Cout) bf16.
    If (in_scale, in_shift) are given, relu(x*scale + shift) is applied to the
    input inside the kernel (previous BatchNorm+ReLU fused into the conv load),
    with the zero halo preserved exactly."""
    B, D, H, W, Cin = x.shape
    Cout = w27.shape[-1]
    fuse = in_scale is not None
    if fuse:
        s = in_scale.reshape(1, Cin).astype(jnp.float32)
        b = in_shift.reshape(1, Cin).astype(jnp.float32)
    else:
        s = jnp.ones((1, Cin), jnp.float32)
        b = jnp.zeros((1, Cin), jnp.float32)
    xp = jnp.pad(x, ((0, 0), (1, 1), (1, 1), (1, 1), (0, 0)))
    y, stats = pl.pallas_call(
        functools.partial(_conv3_kernel, fuse_act=fuse),
        out_shape=(jax.ShapeDtypeStruct((B, D, H * W, Cout), jnp.float32),
                   jax.ShapeDtypeStruct((B, 8, Cout), jnp.float32)),
        grid=(B,),
        in_specs=[
            pl.BlockSpec((None, D + 2, H + 2, W + 2, Cin),
                         lambda bb: (bb, 0, 0, 0, 0)),
            pl.BlockSpec((27, Cin, Cout), lambda bb: (0, 0, 0)),
            pl.BlockSpec((1, Cin), lambda bb: (0, 0)),
            pl.BlockSpec((1, Cin), lambda bb: (0, 0)),
        ],
        out_specs=(
            pl.BlockSpec((None, D, H * W, Cout), lambda bb: (bb, 0, 0, 0)),
            pl.BlockSpec((None, 8, Cout), lambda bb: (bb, 0, 0)),
        ),
        compiler_params=pltpu.CompilerParams(
            dimension_semantics=("parallel",),
            vmem_limit_bytes=32 * 1024 * 1024),
    )(xp, w27, s, b)
    col_sum = jnp.sum(stats[:, 0, :], axis=0)
    col_sumsq = jnp.sum(stats[:, 1, :], axis=0)
    return y.reshape(B, D, H, W, Cout), col_sum, col_sumsq


def _affine_pack(x2d):
    """(M, C) -> lane-dense (M//8, 8*C) reinterpretation when possible.
    Pure row-major reshape (free); makes affine-kernel stores full 128-lane."""
    M, C = x2d.shape
    pack = 8 if (M % 8 == 0 and C < 128) else 1
    return x2d.reshape(M // pack, C * pack), pack


def pallas_bn_act(x2d, scale, shift, *, relu, tm=1024):
    """Per-channel BatchNorm affine + optional ReLU, lane-dense and big-tiled."""
    M, C = x2d.shape
    xp, pack = _affine_pack(x2d)
    Mp, Cp = xp.shape
    sp = jnp.tile(scale, pack).reshape(1, Cp)
    bp = jnp.tile(shift, pack).reshape(1, Cp)
    tm = min(tm, Mp)
    Mpad = _round_up(Mp, tm)
    if Mpad != Mp:
        xp = jnp.pad(xp, ((0, Mpad - Mp), (0, 0)))
    out = pl.pallas_call(
        functools.partial(_affine_kernel, relu=relu),
        out_shape=jax.ShapeDtypeStruct((Mpad, Cp), jnp.float32),
        grid=(Mpad // tm,),
        in_specs=[pl.BlockSpec((tm, Cp), lambda i: (i, 0)),
                  pl.BlockSpec((1, Cp), lambda i: (0, 0)),
                  pl.BlockSpec((1, Cp), lambda i: (0, 0))],
        out_specs=pl.BlockSpec((tm, Cp), lambda i: (i, 0)),
        compiler_params=pltpu.CompilerParams(dimension_semantics=("parallel",)),
    )(xp, sp, bp)
    return out[:Mp].reshape(M, C)


def pallas_bn_relu_add(h2d, s1, b1, d2d, s2, b2, *, tm=1024):
    """out = relu(h*s1+b1) + (d*s2+b2), lane-dense packed; fuses the ResBlock tail."""
    M, C = h2d.shape
    hp, pack = _affine_pack(h2d)
    dp = d2d.reshape(hp.shape)
    Mp, Cp = hp.shape
    tile = lambda v: jnp.tile(v, pack).reshape(1, Cp)
    tm = min(tm, Mp)
    Mpad = _round_up(Mp, tm)
    if Mpad != Mp:
        hp = jnp.pad(hp, ((0, Mpad - Mp), (0, 0)))
        dp = jnp.pad(dp, ((0, Mpad - Mp), (0, 0)))
    dat = pl.BlockSpec((tm, Cp), lambda i: (i, 0))
    vec = pl.BlockSpec((1, Cp), lambda i: (0, 0))
    out = pl.pallas_call(
        _affine_add_kernel,
        out_shape=jax.ShapeDtypeStruct((Mpad, Cp), jnp.float32),
        grid=(Mpad // tm,),
        in_specs=[dat, vec, vec, dat, vec, vec],
        out_specs=dat,
        compiler_params=pltpu.CompilerParams(dimension_semantics=("parallel",)),
    )(hp, tile(s1), tile(b1), dp, tile(s2), tile(b2))
    return out[:Mp].reshape(M, C)


# ----------------------------------------------------------------------------
# BatchNorm parameter math (tiny per-channel vectors; plain-JAX glue)
# ----------------------------------------------------------------------------
def _bn_scale_shift(col_sum, col_sumsq, count, gamma, beta, eps=1e-5):
    mean = col_sum / count
    var = jnp.maximum(col_sumsq / count - mean * mean, 0.0)   # clamp: no sqrt(<0)
    scale = gamma * jax.lax.rsqrt(var + eps)
    shift = beta - mean * scale
    return scale, shift


def conv_transpose_k2s2_bn_relu(x, w_flat, gamma, beta, eps=1e-5):
    """ConvTranspose3d(k=2, s=2, bias=False) + BatchNorm + ReLU.
    x: (B, D, H, W, Cin) f32, w_flat: (Cin, 8*Cout) bf16 -> (B, 2D, 2H, 2W, Cout)."""
    B, D, H, W, Cin = x.shape
    Cout = w_flat.shape[1] // 8
    a = x.reshape(B * D * H * W, Cin)
    y, csum, csumsq = pallas_matmul_stats(a, w_flat)           # (M, 8*Cout), lane-dense
    count = a.shape[0] * 8                                     # == B*2D*2H*2W voxels
    scale, shift = _bn_scale_shift(jnp.sum(csum.reshape(8, Cout), axis=0),
                                   jnp.sum(csumsq.reshape(8, Cout), axis=0),
                                   count, gamma, beta, eps)
    # BN+ReLU on the pre-scatter (M, 8*Cout) layout: unmasked 128-lane stores, and
    # the offset-interleave transpose below touches already-activated data once.
    y = pallas_bn_act(y, jnp.tile(scale, 8), jnp.tile(shift, 8), relu=True)
    y = y.reshape(B, D, H, W, 2, 2, 2, Cout).transpose(0, 1, 4, 2, 5, 3, 6, 7)
    return y.reshape(B, 2 * D, 2 * H, 2 * W, Cout)


# ----------------------------------------------------------------------------
# ResNetUp module (parameters initialized deterministically in-script)
# ----------------------------------------------------------------------------
class ResNetUpPallas:
    def __init__(self, up_conv_nn, kernel_size=2, stride=2, N=1,
                 skip_first=False, key=None):
        # only the default sparse-decoder configuration (k=2, s=2) is implemented
        assert kernel_size == 2 and stride == 2
        self.skip_first = skip_first
        if skip_first:
            nc_in, nc_out = up_conv_nn
            nc_stride_out = nc_in if stride > 1 and N > 0 else nc_out
            nc_block_in = nc_stride_out
        else:
            nc_in, nc_skip_in, nc_out = up_conv_nn
            nc_stride_out = nc_in if stride > 1 and N > 0 else nc_out
            nc_block_in = nc_stride_out + nc_skip_in
        self.nc_out = nc_out
        self.N = N

        keys = jax.random.split(key, 2 + 3 * max(N, 1))

        def winit(k, shape, fan_in):
            return (jax.random.normal(k, shape, jnp.float32)
                    * (1.0 / jnp.sqrt(float(fan_in))))

        # conv_in: ConvTranspose3d(nc_in -> nc_stride_out, k=2, s=2, bias=False)
        # stored pre-flattened (Cin, 8*Cout) and in bf16 for the MXU.
        w = winit(keys[0], (nc_in, 2, 2, 2, nc_stride_out), nc_in * 8)
        self.conv_in_w = w.reshape(nc_in, 8 * nc_stride_out).astype(jnp.bfloat16)
        self.bn_in = (jnp.ones((nc_stride_out,), jnp.float32),
                      jnp.zeros((nc_stride_out,), jnp.float32))

        # ResBlocks.  NOTE: CONVOLUTION='Conv3dTranspose' with stride=1 keeps
        # coordinates; its dense analog is a 'same' 3x3x3 conv.
        self.blocks = []
        c_in = nc_block_in
        for n in range(N):
            k1, k2, kd = keys[2 + 3 * n], keys[3 + 3 * n], keys[4 + 3 * n]
            blk = {
                "w1": winit(k1, (3, 3, 3, c_in, nc_out), 27 * c_in)
                      .reshape(27, c_in, nc_out).astype(jnp.bfloat16),
                "bn1": (jnp.ones((nc_out,), jnp.float32),
                        jnp.zeros((nc_out,), jnp.float32)),
                "w2": winit(k2, (3, 3, 3, nc_out, nc_out), 27 * nc_out)
                      .reshape(27, nc_out, nc_out).astype(jnp.bfloat16),
                "bn2": (jnp.ones((nc_out,), jnp.float32),
                        jnp.zeros((nc_out,), jnp.float32)),
                "wd": (winit(kd, (c_in, nc_out), c_in).astype(jnp.bfloat16)
                       if c_in != nc_out else None),
                "bnd": (jnp.ones((nc_out,), jnp.float32),
                        jnp.zeros((nc_out,), jnp.float32)),
            }
            self.blocks.append(blk)
            c_in = nc_out

    def _res_block(self, y, blk):
        B, D, H, W, C = y.shape
        M = B * D * H * W
        Cout = self.nc_out
        # conv1 -> fused BN stats.  BN1+ReLU is never materialized in HBM: it is
        # applied inside conv2's input load (exact, halo-masked).
        h, s1, ss1 = conv3d_k3s1_stats(y, blk["w1"])
        sc1, sh1 = _bn_scale_shift(s1, ss1, M, *blk["bn1"])
        # conv2 with fused BN1+ReLU on its input; its own BN2+ReLU is fused with
        # the shortcut BN and the residual add below.
        h2, s2, ss2 = conv3d_k3s1_stats(h, blk["w2"], in_scale=sc1, in_shift=sh1)
        sc2, sh2 = _bn_scale_shift(s2, ss2, M, *blk["bn2"])
        # shortcut: 1x1x1 conv + BN when channels differ, identity otherwise
        if blk["wd"] is not None:
            d2d, sd, ssd = pallas_matmul_stats(y.reshape(M, C), blk["wd"])
            scd, shd = _bn_scale_shift(sd, ssd, M, *blk["bnd"])
        else:
            d2d = y.reshape(M, C)
            scd = jnp.ones((Cout,), jnp.float32)
            shd = jnp.zeros((Cout,), jnp.float32)
        out = pallas_bn_relu_add(h2.reshape(M, Cout), sc2, sh2, d2d, scd, shd)
        return out.reshape(B, D, H, W, Cout)

    def __call__(self, x, skip):
        if self.skip_first:
            if skip is not None:
                x = jnp.concatenate([x, skip], axis=-1)
            y = conv_transpose_k2s2_bn_relu(x, self.conv_in_w, *self.bn_in)
        else:
            y = conv_transpose_k2s2_bn_relu(x, self.conv_in_w, *self.bn_in)
            if skip is not None:
                y = jnp.concatenate([y, skip], axis=-1)        # snn.cat(x, skip)
        for blk in self.blocks:
            y = self._res_block(y, blk)
        return y


# ----------------------------------------------------------------------------
if __name__ == "__main__":
    key = jax.random.PRNGKey(0)
    kx, ks, kp = jax.random.split(key, 3)

    B, D, H, W = 2, 4, 4, 4
    nc_in, nc_skip, nc_out = 16, 8, 16

    # x is the coarse decoder feature map; skip comes from the encoder at 2x res.
    x = jax.random.normal(kx, (B, D, H, W, nc_in), jnp.float32)
    skip = jax.random.normal(ks, (B, 2 * D, 2 * H, 2 * W, nc_skip), jnp.float32)

    model = ResNetUpPallas(up_conv_nn=(nc_in, nc_skip, nc_out),
                           kernel_size=2, stride=2, N=1, skip_first=False, key=kp)

    fwd = jax.jit(lambda a, b: model(a, b))
    out = jax.block_until_ready(fwd(x, skip))
    assert out.shape == (B, 2 * D, 2 * H, 2 * W, nc_out), out.shape
    assert bool(jnp.all(jnp.isfinite(out)))
    print("KERNEL_OK")
</pallas_src>

<mosaic_0001>
module attributes {stable_mosaic.version = 11 : i64} {
  func.func @_matmul_stats_kernel(%arg0: i32, %arg1: memref<128x16xf32, #tpu.memory_space<vmem>>, %arg2: memref<16x128xbf16, #tpu.memory_space<vmem>>, %arg3: memref<128x128xf32, #tpu.memory_space<vmem>>, %arg4: memref<8x128xf32, #tpu.memory_space<vmem>>) attributes {dimension_semantics = [#tpu.dimension_semantics<parallel>], iteration_bounds = array<i64: 1>, scalar_prefetch = 0 : i64, scratch_operands = 0 : i64, tpu.core_type = #tpu.core_type<tc>, window_params = [{transform_indices = @transform_0, window_bounds = array<i64: 128, 16>}, {pipeline_mode = #tpu.pipeline_mode<synchronous>, transform_indices = @transform_1, window_bounds = array<i64: 16, 128>}, {transform_indices = @transform_2, window_bounds = array<i64: 128, 128>}, {transform_indices = @transform_3, window_bounds = array<i64: 8, 128>}]} {
    %c0 = arith.constant 0 : index
    %c0_0 = arith.constant 0 : index
    %0 = vector.load %arg1[%c0, %c0_0] : memref<128x16xf32, #tpu.memory_space<vmem>>, vector<128x16xf32>
    %1 = arith.truncf %0 : vector<128x16xf32> to vector<128x16xbf16>
    %c0_1 = arith.constant 0 : index
    %c0_2 = arith.constant 0 : index
    %2 = vector.load %arg2[%c0_1, %c0_2] : memref<16x128xbf16, #tpu.memory_space<vmem>>, vector<16x128xbf16>
    %cst = arith.constant dense<0.000000e+00> : vector<128x128xf32>
    %3 = tpu.matmul %1, %2, %cst {dimension_numbers = #tpu.dot_dimension_numbers<[1], [0], [0], [1], [0, 0, 1, 1], [], []>} : vector<128x16xbf16>, vector<16x128xbf16>, vector<128x128xf32> -> vector<128x128xf32>
    %c0_3 = arith.constant 0 : index
    %c0_4 = arith.constant 0 : index
    %4 = vector.load %arg3[%c0_3, %c0_4] : memref<128x128xf32, #tpu.memory_space<vmem>>, vector<128x128xf32>
    tpu.vector_store %arg3[%c0_3, %c0_4], %3 {strides = array<i32>} : memref<128x128xf32, #tpu.memory_space<vmem>>, vector<128x128xf32>,
    %cst_5 = arith.constant dense<0.000000e+00> : vector<128xf32>
    %5 = vector.multi_reduction <add>, %3, %cst_5 [0] : vector<128x128xf32> to vector<128xf32>
    %6 = vector.shape_cast %5 : vector<128xf32> to vector<1x128xf32>
    %7 = arith.mulf %3, %3 : vector<128x128xf32>
    %cst_6 = arith.constant dense<0.000000e+00> : vector<128xf32>
    %8 = vector.multi_reduction <add>, %7, %cst_6 [0] : vector<128x128xf32> to vector<128xf32>
    %9 = vector.shape_cast %8 : vector<128xf32> to vector<1x128xf32>
    %cst_7 = arith.constant 0.000000e+00 : f32
    %10 = vector.broadcast %cst_7 : f32 to vector<6x128xf32>
    %11 = tpu.concatenate %6, %9, %10 in 0 : vector<1x128xf32>, vector<1x128xf32>, vector<6x128xf32> -> vector<8x128xf32>
    %c0_8 = arith.constant 0 : index
    %c0_9 = arith.constant 0 : index
    %12 = vector.load %arg4[%c0_8, %c0_9] : memref<8x128xf32, #tpu.memory_space<vmem>>, vector<8x128xf32>
    tpu.vector_store %arg4[%c0_8, %c0_9], %11 {strides = array<i32>} : memref<8x128xf32, #tpu.memory_space<vmem>>, vector<8x128xf32>,
    return
  }
  func.func @transform_0(%arg0: i32) -> (i32, i32) {
    %c0_i32 = arith.constant 0 : i32
    %c0_i32_0 = arith.constant 0 : i32
    return %arg0, %c0_i32 : i32, i32
  }
  func.func @transform_1(%arg0: i32) -> (i32, i32) {
    %c0_i32 = arith.constant 0 : i32
    %c0_i32_0 = arith.constant 0 : i32
    %c0_i32_1 = arith.constant 0 : i32
    return %c0_i32, %c0_i32_0 : i32, i32
  }
  func.func @transform_2(%arg0: i32) -> (i32, i32) {
    %c0_i32 = arith.constant 0 : i32
    %c0_i32_0 = arith.constant 0 : i32
    return %arg0, %c0_i32 : i32, i32
  }
  func.func @transform_3(%arg0: i32) -> (i32, i32) {
    %c0_i32 = arith.constant 0 : i32
    %c0_i32_0 = arith.constant 0 : i32
    return %arg0, %c0_i32 : i32, i32
  }
}

module attributes {stable_mosaic.version = 11 : i64} {
  func.func @_affine_kernel(%arg0: i32, %arg1: memref<128x128xf32, #tpu.memory_space<vmem>>, %arg2: memref<1x128xf32, #tpu.memory_space<vmem>>, %arg3: memref<1x128xf32, #tpu.memory_space<vmem>>, %arg4: memref<128x128xf32, #tpu.memory_space<vmem>>) attributes {dimension_semantics = [#tpu.dimension_semantics<parallel>], iteration_bounds = array<i64: 1>, scalar_prefetch = 0 : i64, scratch_operands = 0 : i64, tpu.core_type = #tpu.core_type<tc>, window_params = [{transform_indices = @transform_0, window_bounds = array<i64: 128, 128>}, {pipeline_mode = #tpu.pipeline_mode<synchronous>, transform_indices = @transform_1, window_bounds = array<i64: 1, 128>}, {pipeline_mode = #tpu.pipeline_mode<synchronous>, transform_indices = @transform_2, window_bounds = array<i64: 1, 128>}, {transform_indices = @transform_3, window_bounds = array<i64: 128, 128>}]} {
    %c0 = arith.constant 0 : index
    %c0_0 = arith.constant 0 : index
    %0 = vector.load %arg1[%c0, %c0_0] : memref<128x128xf32, #tpu.memory_space<vmem>>, vector<128x128xf32>
    %c0_1 = arith.constant 0 : index
    %c0_2 = arith.constant 0 : index
    %1 = vector.load %arg2[%c0_1, %c0_2] : memref<1x128xf32, #tpu.memory_space<vmem>>, vector<1x128xf32>
    %2 = vector.broadcast %1 : vector<1x128xf32> to vector<128x128xf32>
    %3 = arith.mulf %0, %2 : vector<128x128xf32>
    %c0_3 = arith.constant 0 : index
    %c0_4 = arith.constant 0 : index
    %4 = vector.load %arg3[%c0_3, %c0_4] : memref<1x128xf32, #tpu.memory_space<vmem>>, vector<1x128xf32>
    %5 = vector.broadcast %4 : vector<1x128xf32> to vector<128x128xf32>
    %6 = arith.addf %3, %5 : vector<128x128xf32>
    %cst = arith.constant 0.000000e+00 : f32
    %7 = vector.broadcast %cst : f32 to vector<128x128xf32>
    %8 = arith.maximumf %6, %7 : vector<128x128xf32>
    %c0_5 = arith.constant 0 : index
    %c0_6 = arith.constant 0 : index
    %9 = vector.load %arg4[%c0_5, %c0_6] : memref<128x128xf32, #tpu.memory_space<vmem>>, vector<128x128xf32>
    tpu.vector_store %arg4[%c0_5, %c0_6], %8 {strides = array<i32>} : memref<128x128xf32, #tpu.memory_space<vmem>>, vector<128x128xf32>,
    return
  }
  func.func @transform_0(%arg0: i32) -> (i32, i32) {
    %c0_i32 = arith.constant 0 : i32
    %c0_i32_0 = arith.constant 0 : i32
    return %arg0, %c0_i32 : i32, i32
  }
  func.func @transform_1(%arg0: i32) -> (i32, i32) {
    %c0_i32 = arith.constant 0 : i32
    %c0_i32_0 = arith.constant 0 : i32
    %c0_i32_1 = arith.constant 0 : i32
    return %c0_i32, %c0_i32_0 : i32, i32
  }
  func.func @transform_2(%arg0: i32) -> (i32, i32) {
    %c0_i32 = arith.constant 0 : i32
    %c0_i32_0 = arith.constant 0 : i32
    %c0_i32_1 = arith.constant 0 : i32
    return %c0_i32, %c0_i32_0 : i32, i32
  }
  func.func @transform_3(%arg0: i32) -> (i32, i32) {
    %c0_i32 = arith.constant 0 : i32
    %c0_i32_0 = arith.constant 0 : i32
    return %arg0, %c0_i32 : i32, i32
  }
}

module attributes {stable_mosaic.version = 11 : i64} {
  func.func @_matmul_stats_kernel(%arg0: i32, %arg1: memref<512x24xf32, #tpu.memory_space<vmem>>, %arg2: memref<24x16xbf16, #tpu.memory_space<vmem>>, %arg3: memref<512x16xf32, #tpu.memory_space<vmem>>, %arg4: memref<8x16xf32, #tpu.memory_space<vmem>>) attributes {dimension_semantics = [#tpu.dimension_semantics<parallel>], iteration_bounds = array<i64: 2>, scalar_prefetch = 0 : i64, scratch_operands = 0 : i64, tpu.core_type = #tpu.core_type<tc>, window_params = [{transform_indices = @transform_0, window_bounds = array<i64: 512, 24>}, {pipeline_mode = #tpu.pipeline_mode<synchronous>, transform_indices = @transform_1, window_bounds = array<i64: 24, 16>}, {transform_indices = @transform_2, window_bounds = array<i64: 512, 16>}, {transform_indices = @transform_3, window_bounds = array<i64: 8, 16>}]} {
    %c0 = arith.constant 0 : index
    %c0_0 = arith.constant 0 : index
    %0 = vector.load %arg1[%c0, %c0_0] : memref<512x24xf32, #tpu.memory_space<vmem>>, vector<512x24xf32>
    %1 = arith.truncf %0 : vector<512x24xf32> to vector<512x24xbf16>
    %c0_1 = arith.constant 0 : index
    %c0_2 = arith.constant 0 : index
    %2 = vector.load %arg2[%c0_1, %c0_2] : memref<24x16xbf16, #tpu.memory_space<vmem>>, vector<24x16xbf16>
    %cst = arith.constant dense<0.000000e+00> : vector<512x16xf32>
    %3 = tpu.matmul %1, %2, %cst {dimension_numbers = #tpu.dot_dimension_numbers<[1], [0], [0], [1], [0, 0, 1, 1], [], []>} : vector<512x24xbf16>, vector<24x16xbf16>, vector<512x16xf32> -> vector<512x16xf32>
    %c0_3 = arith.constant 0 : index
    %c0_4 = arith.constant 0 : index
    %4 = vector.load %arg3[%c0_3, %c0_4] : memref<512x16xf32, #tpu.memory_space<vmem>>, vector<512x16xf32>
    tpu.vector_store %arg3[%c0_3, %c0_4], %3 {strides = array<i32>} : memref<512x16xf32, #tpu.memory_space<vmem>>, vector<512x16xf32>,
    %cst_5 = arith.constant dense<0.000000e+00> : vector<16xf32>
    %5 = vector.multi_reduction <add>, %3, %cst_5 [0] : vector<512x16xf32> to vector<16xf32>
    %6 = vector.shape_cast %5 : vector<16xf32> to vector<1x16xf32>
    %7 = arith.mulf %3, %3 : vector<512x16xf32>
    %cst_6 = arith.constant dense<0.000000e+00> : vector<16xf32>
    %8 = vector.multi_reduction <add>, %7, %cst_6 [0] : vector<512x16xf32> to vector<16xf32>
    %9 = vector.shape_cast %8 : vector<16xf32> to vector<1x16xf32>
    %cst_7 = arith.constant 0.000000e+00 : f32
    %10 = vector.broadcast %cst_7 : f32 to vector<6x16xf32>
    %11 = tpu.concatenate %6, %9, %10 in 0 : vector<1x16xf32>, vector<1x16xf32>, vector<6x16xf32> -> vector<8x16xf32>
    %c0_8 = arith.constant 0 : index
    %c0_9 = arith.constant 0 : index
    %12 = vector.load %arg4[%c0_8, %c0_9] : memref<8x16xf32, #tpu.memory_space<vmem>>, vector<8x16xf32>
    tpu.vector_store %arg4[%c0_8, %c0_9], %11 {strides = array<i32>} : memref<8x16xf32, #tpu.memory_space<vmem>>, vector<8x16xf32>,
    return
  }
  func.func @transform_0(%arg0: i32) -> (i32, i32) {
    %c0_i32 = arith.constant 0 : i32
    %c0_i32_0 = arith.constant 0 : i32
    return %arg0, %c0_i32 : i32, i32
  }
  func.func @transform_1(%arg0: i32) -> (i32, i32) {
    %c0_i32 = arith.constant 0 : i32
    %c0_i32_0 = arith.constant 0 : i32
    %c0_i32_1 = arith.constant 0 : i32
    return %c0_i32, %c0_i32_0 : i32, i32
  }
  func.func @transform_2(%arg0: i32) -> (i32, i32) {
    %c0_i32 = arith.constant 0 : i32
    %c0_i32_0 = arith.constant 0 : i32
    return %arg0, %c0_i32 : i32, i32
  }
  func.func @transform_3(%arg0: i32) -> (i32, i32) {
    %c0_i32 = arith.constant 0 : i32
    %c0_i32_0 = arith.constant 0 : i32
    return %arg0, %c0_i32 : i32, i32
  }
}

module attributes {stable_mosaic.version = 11 : i64} {
  func.func @_conv3_kernel(%arg0: i32, %arg1: memref<1x10x10x10x24xf32, #tpu.memory_space<vmem>>, %arg2: memref<27x24x16xbf16, #tpu.memory_space<vmem>>, %arg3: memref<1x24xf32, #tpu.memory_space<vmem>>, %arg4: memref<1x24xf32, #tpu.memory_space<vmem>>, %arg5: memref<1x8x64x16xf32, #tpu.memory_space<vmem>>, %arg6: memref<1x8x16xf32, #tpu.memory_space<vmem>>) attributes {dimension_semantics = [#tpu.dimension_semantics<parallel>], iteration_bounds = array<i64: 2>, scalar_prefetch = 0 : i64, scratch_operands = 0 : i64, tpu.core_type = #tpu.core_type<tc>, window_params = [{transform_indices = @transform_0, window_bounds = array<i64: 1, 10, 10, 10, 24>}, {pipeline_mode = #tpu.pipeline_mode<synchronous>, transform_indices = @transform_1, window_bounds = array<i64: 27, 24, 16>}, {pipeline_mode = #tpu.pipeline_mode<synchronous>, transform_indices = @transform_2, window_bounds = array<i64: 1, 24>}, {pipeline_mode = #tpu.pipeline_mode<synchronous>, transform_indices = @transform_3, window_bounds = array<i64: 1, 24>}, {transform_indices = @transform_4, window_bounds = array<i64: 1, 8, 64, 16>}, {transform_indices = @transform_5, window_bounds = array<i64: 1, 8, 16>}]} {
    %cst = arith.constant 0.000000e+00 : f32
    %0 = vector.broadcast %cst : f32 to vector<8x16xf32>
    %c0 = arith.constant 0 : index
    %c0_0 = arith.constant 0 : index
    %c0_1 = arith.constant 0 : index
    %1 = vector.load %arg6[%c0, %c0_0, %c0_1] : memref<1x8x16xf32, #tpu.memory_space<vmem>>, vector<1x8x16xf32>
    %2 = vector.shape_cast %1 : vector<1x8x16xf32> to vector<8x16xf32>
    %3 = vector.shape_cast %0 : vector<8x16xf32> to vector<1x8x16xf32>
    tpu.vector_store %arg6[%c0, %c0_0, %c0_1], %3 {strides = array<i32>} : memref<1x8x16xf32, #tpu.memory_space<vmem>>, vector<1x8x16xf32>,
    %c0_i32 = arith.constant 0 : i32
    %c8_i32 = arith.constant 8 : i32
    %4 = arith.addi %c0_i32, %c8_i32 : i32
    %c1_i32 = arith.constant 1 : i32
    scf.for %arg7 = %c0_i32 to %4 step %c1_i32  : i32 {
      %c1_i32_3 = arith.constant 1 : i32
      %5 = arith.muli %arg7, %c1_i32_3 : i32
      %c0_i32_4 = arith.constant 0 : i32
      %6 = arith.addi %c0_i32_4, %5 : i32
      %cst_5 = arith.constant 0.000000e+00 : f32
      %7 = vector.broadcast %cst_5 : f32 to vector<64x16xf32>
      %c0_i32_6 = arith.constant 0 : i32
      %8 = arith.addi %6, %c0_i32_6 : i32
      %c0_7 = arith.constant 0 : index
      %9 = arith.index_cast %8 : i32 to index
      %c0_8 = arith.constant 0 : index
      %c0_9 = arith.constant 0 : index
      %c0_10 = arith.constant 0 : index
      %10 = vector.load %arg1[%c0_7, %9, %c0_8, %c0_9, %c0_10] : memref<1x10x10x10x24xf32, #tpu.memory_space<vmem>>, vector<1x1x10x10x24xf32>
      %11 = vector.shape_cast %10 : vector<1x1x10x10x24xf32> to vector<10x10x24xf32>
      %12 = vector.extract_strided_slice %11 {offsets = [0, 0, 0], sizes = [8, 8, 24], strides = [1, 1, 1]} : vector<10x10x24xf32> to vector<8x8x24xf32>
      %13 = vector.shape_cast %12 : vector<8x8x24xf32> to vector<64x24xf32>
      %14 = arith.truncf %13 : vector<64x24xf32> to vector<64x24xbf16>
      %c0_11 = arith.constant 0 : index
      %c0_12 = arith.constant 0 : index
      %c0_13 = arith.constant 0 : index
      %15 = vector.load %arg2[%c0_11, %c0_12, %c0_13] : memref<27x24x16xbf16, #tpu.memory_space<vmem>>, vector<1x24x16xbf16>
      %16 = vector.shape_cast %15 : vector<1x24x16xbf16> to vector<24x16xbf16>
      %cst_14 = arith.constant dense<0.000000e+00> : vector<64x16xf32>
      %17 = tpu.matmul %14, %16, %cst_14 {dimension_numbers = #tpu.dot_dimension_numbers<[1], [0], [0], [1], [0, 0, 1, 1], [], []>} : vector<64x24xbf16>, vector<24x16xbf16>, vector<64x16xf32> -> vector<64x16xf32>
      %18 = arith.addf %7, %17 : vector<64x16xf32>
      %19 = vector.extract_strided_slice %11 {offsets = [0, 1, 0], sizes = [8, 8, 24], strides = [1, 1, 1]} : vector<10x10x24xf32> to vector<8x8x24xf32>
      %20 = vector.shape_cast %19 : vector<8x8x24xf32> to vector<64x24xf32>
      %21 = arith.truncf %20 : vector<64x24xf32> to vector<64x24xbf16>
      %c1 = arith.constant 1 : index
      %c0_15 = arith.constant 0 : index
      %c0_16 = arith.constant 0 : index
      %22 = vector.load %arg2[%c1, %c0_15, %c0_16] : memref<27x24x16xbf16, #tpu.memory_space<vmem>>, vector<1x24x16xbf16>
      %23 = vector.shape_cast %22 : vector<1x24x16xbf16> to vector<24x16xbf16>
      %cst_17 = arith.constant dense<0.000000e+00> : vector<64x16xf32>
      %24 = tpu.matmul %21, %23, %cst_17 {dimension_numbers = #tpu.dot_dimension_numbers<[1], [0], [0], [1], [0, 0, 1, 1], [], []>} : vector<64x24xbf16>, vector<24x16xbf16>, vector<64x16xf32> -> vector<64x16xf32>
      %25 = arith.addf %18, %24 : vector<64x16xf32>
      %26 = vector.extract_strided_slice %11 {offsets = [0, 2, 0], sizes = [8, 8, 24], strides = [1, 1, 1]} : vector<10x10x24xf32> to vector<8x8x24xf32>
      %27 = vector.shape_cast %26 : vector<8x8x24xf32> to vector<64x24xf32>
      %28 = arith.truncf %27 : vector<64x24xf32> to vector<64x24xbf16>
      %c2 = arith.constant 2 : index
      %c0_18 = arith.constant 0 : index
      %c0_19 = arith.constant 0 : index
      %29 = vector.load %arg2[%c2, %c0_18, %c0_19] : memref<27x24x16xbf16, #tpu.memory_space<vmem>>, vector<1x24x16xbf16>
      %30 = vector.shape_cast %29 : vector<1x24x16xbf16> to vector<24x16xbf16>
      %cst_20 = arith.constant dense<0.000000e+00> : vector<64x16xf32>
      %31 = tpu.matmul %28, %30, %cst_20 {dimension_numbers = #tpu.dot_dimension_numbers<[1], [0], [0], [1], [0, 0, 1, 1], [], []>} : vector<64x24xbf16>, vector<24x16xbf16>, vector<64x16xf32> -> vector<64x16xf32>
      %32 = arith.addf %25, %31 : vector<64x16xf32>
      %33 = vector.extract_strided_slice %11 {offsets = [1, 0, 0], sizes = [8, 8, 24], strides = [1, 1, 1]} : vector<10x10x24xf32> to vector<8x8x24xf32>
      %34 = vector.shape_cast %33 : vector<8x8x24xf32> to vector<64x24xf32>
      %35 = arith.truncf %34 : vector<64x24xf32> to vector<64x24xbf16>
      %c3 = arith.constant 3 : index
      %c0_21 = arith.constant 0 : index
      %c0_22 = arith.constant 0 : index
      %36 = vector.load %arg2[%c3, %c0_21, %c0_22] : memref<27x24x16xbf16, #tpu.memory_space<vmem>>, vector<1x24x16xbf16>
      %37 = vector.shape_cast %36 : vector<1x24x16xbf16> to vector<24x16xbf16>
      %cst_23 = arith.constant dense<0.000000e+00> : vector<64x16xf32>
      %38 = tpu.matmul %35, %37, %cst_23 {dimension_numbers = #tpu.dot_dimension_numbers<[1], [0], [0], [1], [0, 0, 1, 1], [], []>} : vector<64x24xbf16>, vector<24x16xbf16>, vector<64x16xf32> -> vector<64x16xf32>
      %39 = arith.addf %32, %38 : vector<64x16xf32>
      %40 = vector.extract_strided_slice %11 {offsets = [1, 1, 0], sizes = [8, 8, 24], strides = [1, 1, 1]} : vector<10x10x24xf32> to vector<8x8x24xf32>
      %41 = vector.shape_cast %40 : vector<8x8x24xf32> to vector<64x24xf32>
      %42 = arith.truncf %41 : vector<64x24xf32> to vector<64x24xbf16>
      %c4 = arith.constant 4 : index
      %c0_24 = arith.constant 0 : index
      %c0_25 = arith.constant 0 : index
      %43 = vector.load %arg2[%c4, %c0_24, %c0_25] : memref<27x24x16xbf16, #tpu.memory_space<vmem>>, vector<1x24x16xbf16>
      %44 = vector.shape_cast %43 : vector<1x24x16xbf16> to vector<24x16xbf16>
      %cst_26 = arith.constant dense<0.000000e+00> : vector<64x16xf32>
      %45 = tpu.matmul %42, %44, %cst_26 {dimension_numbers = #tpu.dot_dimension_numbers<[1], [0], [0], [1], [0, 0, 1, 1], [], []>} : vector<64x24xbf16>, vector<24x16xbf16>, vector<64x16xf32> -> vector<64x16xf32>
      %46 = arith.addf %39, %45 : vector<64x16xf32>
      %47 = vector.extract_strided_slice %11 {offsets = [1, 2, 0], sizes = [8, 8, 24], strides = [1, 1, 1]} : vector<10x10x24xf32> to vector<8x8x24xf32>
      %48 = vector.shape_cast %47 : vector<8x8x24xf32> to vector<64x24xf32>
      %49 = arith.truncf %48 : vector<64x24xf32> to vector<64x24xbf16>
      %c5 = arith.constant 5 : index
      %c0_27 = arith.constant 0 : index
      %c0_28 = arith.constant 0 : index
      %50 = vector.load %arg2[%c5, %c0_27, %c0_28] : memref<27x24x16xbf16, #tpu.memory_space<vmem>>, vector<1x24x16xbf16>
      %51 = vector.shape_cast %50 : vector<1x24x16xbf16> to vector<24x16xbf16>
      %cst_29 = arith.constant dense<0.000000e+00> : vector<64x16xf32>
      %52 = tpu.matmul %49, %51, %cst_29 {dimension_numbers = #tpu.dot_dimension_numbers<[1], [0], [0], [1], [0, 0, 1, 1], [], []>} : vector<64x24xbf16>, vector<24x16xbf16>, vector<64x16xf32> -> vector<64x16xf32>
      %53 = arith.addf %46, %52 : vector<64x16xf32>
      %54 = vector.extract_strided_slice %11 {offsets = [2, 0, 0], sizes = [8, 8, 24], strides = [1, 1, 1]} : vector<10x10x24xf32> to vector<8x8x24xf32>
      %55 = vector.shape_cast %54 : vector<8x8x24xf32> to vector<64x24xf32>
      %56 = arith.truncf %55 : vector<64x24xf32> to vector<64x24xbf16>
      %c6 = arith.constant 6 : index
      %c0_30 = arith.constant 0 : index
      %c0_31 = arith.constant 0 : index
      %57 = vector.load %arg2[%c6, %c0_30, %c0_31] : memref<27x24x16xbf16, #tpu.memory_space<vmem>>, vector<1x24x16xbf16>
      %58 = vector.shape_cast %57 : vector<1x24x16xbf16> to vector<24x16xbf16>
      %cst_32 = arith.constant dense<0.000000e+00> : vector<64x16xf32>
      %59 = tpu.matmul %56, %58, %cst_32 {dimension_numbers = #tpu.dot_dimension_numbers<[1], [0], [0], [1], [0, 0, 1, 1], [], []>} : vector<64x24xbf16>, vector<24x16xbf16>, vector<64x16xf32> -> vector<64x16xf32>
      %60 = arith.addf %53, %59 : vector<64x16xf32>
      %61 = vector.extract_strided_slice %11 {offsets = [2, 1, 0], sizes = [8, 8, 24], strides = [1, 1, 1]} : vector<10x10x24xf32> to vector<8x8x24xf32>
      %62 = vector.shape_cast %61 : vector<8x8x24xf32> to vector<64x24xf32>
      %63 = arith.truncf %62 : vector<64x24xf32> to vector<64x24xbf16>
      %c7 = arith.constant 7 : index
      %c0_33 = arith.constant 0 : index
      %c0_34 = arith.constant 0 : index
      %64 = vector.load %arg2[%c7, %c0_33, %c0_34] : memref<27x24x16xbf16, #tpu.memory_space<vmem>>, vector<1x24x16xbf16>
      %65 = vector.shape_cast %64 : vector<1x24x16xbf16> to vector<24x16xbf16>
      %cst_35 = arith.constant dense<0.000000e+00> : vector<64x16xf32>
      %66 = tpu.matmul %63, %65, %cst_35 {dimension_numbers = #tpu.dot_dimension_numbers<[1], [0], [0], [1], [0, 0, 1, 1], [], []>} : vector<64x24xbf16>, vector<24x16xbf16>, vector<64x16xf32> -> vector<64x16xf32>
      %67 = arith.addf %60, %66 : vector<64x16xf32>
      %68 = vector.extract_strided_slice %11 {offsets = [2, 2, 0], sizes = [8, 8, 24], strides = [1, 1, 1]} : vector<10x10x24xf32> to vector<8x8x24xf32>
      %69 = vector.shape_cast %68 : vector<8x8x24xf32> to vector<64x24xf32>
      %70 = arith.truncf %69 : vector<64x24xf32> to vector<64x24xbf16>
      %c8 = arith.constant 8 : index
      %c0_36 = arith.constant 0 : index
      %c0_37 = arith.constant 0 : index
      %71 = vector.load %arg2[%c8, %c0_36, %c0_37] : memref<27x24x16xbf16, #tpu.memory_space<vmem>>, vector<1x24x16xbf16>
      %72 = vector.shape_cast %71 : vector<1x24x16xbf16> to vector<24x16xbf16>
      %cst_38 = arith.constant dense<0.000000e+00> : vector<64x16xf32>
      %73 = tpu.matmul %70, %72, %cst_38 {dimension_numbers = #tpu.dot_dimension_numbers<[1], [0], [0], [1], [0, 0, 1, 1], [], []>} : vector<64x24xbf16>, vector<24x16xbf16>, vector<64x16xf32> -> vector<64x16xf32>
      %74 = arith.addf %67, %73 : vector<64x16xf32>
      %c1_i32_39 = arith.constant 1 : i32
      %75 = arith.addi %6, %c1_i32_39 : i32
      %c0_40 = arith.constant 0 : index
      %76 = arith.index_cast %75 : i32 to index
      %c0_41 = arith.constant 0 : index
      %c0_42 = arith.constant 0 : index
      %c0_43 = arith.constant 0 : index
      %77 = vector.load %arg1[%c0_40, %76, %c0_41, %c0_42, %c0_43] : memref<1x10x10x10x24xf32, #tpu.memory_space<vmem>>, vector<1x1x10x10x24xf32>
      %78 = vector.shape_cast %77 : vector<1x1x10x10x24xf32> to vector<10x10x24xf32>
      %79 = vector.extract_strided_slice %78 {offsets = [0, 0, 0], sizes = [8, 8, 24], strides = [1, 1, 1]} : vector<10x10x24xf32> to vector<8x8x24xf32>
      %80 = vector.shape_cast %79 : vector<8x8x24xf32> to vector<64x24xf32>
      %81 = arith.truncf %80 : vector<64x24xf32> to vector<64x24xbf16>
      %c9 = arith.constant 9 : index
      %c0_44 = arith.constant 0 : index
      %c0_45 = arith.constant 0 : index
      %82 = vector.load %arg2[%c9, %c0_44, %c0_45] : memref<27x24x16xbf16, #tpu.memory_space<vmem>>, vector<1x24x16xbf16>
      %83 = vector.shape_cast %82 : vector<1x24x16xbf16> to vector<24x16xbf16>
      %cst_46 = arith.constant dense<0.000000e+00> : vector<64x16xf32>
      %84 = tpu.matmul %81, %83, %cst_46 {dimension_numbers = #tpu.dot_dimension_numbers<[1], [0], [0], [1], [0, 0, 1, 1], [], []>} : vector<64x24xbf16>, vector<24x16xbf16>, vector<64x16xf32> -> vector<64x16xf32>
      %85 = arith.addf %74, %84 : vector<64x16xf32>
      %86 = vector.extract_strided_slice %78 {offsets = [0, 1, 0], sizes = [8, 8, 24], strides = [1, 1, 1]} : vector<10x10x24xf32> to vector<8x8x24xf32>
      %87 = vector.shape_cast %86 : vector<8x8x24xf32> to vector<64x24xf32>
      %88 = arith.truncf %87 : vector<64x24xf32> to vector<64x24xbf16>
      %c10 = arith.constant 10 : index
      %c0_47 = arith.constant 0 : index
      %c0_48 = arith.constant 0 : index
      %89 = vector.load %arg2[%c10, %c0_47, %c0_48] : memref<27x24x16xbf16, #tpu.memory_space<vmem>>, vector<1x24x16xbf16>
      %90 = vector.shape_cast %89 : vector<1x24x16xbf16> to vector<24x16xbf16>
      %cst_49 = arith.constant dense<0.000000e+00> : vector<64x16xf32>
      %91 = tpu.matmul %88, %90, %cst_49 {dimension_numbers = #tpu.dot_dimension_numbers<[1], [0], [0], [1], [0, 0, 1, 1], [], []>} : vector<64x24xbf16>, vector<24x16xbf16>, vector<64x16xf32> -> vector<64x16xf32>
      %92 = arith.addf %85, %91 : vector<64x16xf32>
      %93 = vector.extract_strided_slice %78 {offsets = [0, 2, 0], sizes = [8, 8, 24], strides = [1, 1, 1]} : vector<10x10x24xf32> to vector<8x8x24xf32>
      %94 = vector.shape_cast %93 : vector<8x8x24xf32> to vector<64x24xf32>
      %95 = arith.truncf %94 : vector<64x24xf32> to vector<64x24xbf16>
      %c11 = arith.constant 11 : index
      %c0_50 = arith.constant 0 : index
      %c0_51 = arith.constant 0 : index
      %96 = vector.load %arg2[%c11, %c0_50, %c0_51] : memref<27x24x16xbf16, #tpu.memory_space<vmem>>, vector<1x24x16xbf16>
      %97 = vector.shape_cast %96 : vector<1x24x16xbf16> to vector<24x16xbf16>
      %cst_52 = arith.constant dense<0.000000e+00> : vector<64x16xf32>
      %98 = tpu.matmul %95, %97, %cst_52 {dimension_numbers = #tpu.dot_dimension_numbers<[1], [0], [0], [1], [0, 0, 1, 1], [], []>} : vector<64x24xbf16>, vector<24x16xbf16>, vector<64x16xf32> -> vector<64x16xf32>
      %99 = arith.addf %92, %98 : vector<64x16xf32>
      %100 = vector.extract_strided_slice %78 {offsets = [1, 0, 0], sizes = [8, 8, 24], strides = [1, 1, 1]} : vector<10x10x24xf32> to vector<8x8x24xf32>
      %101 = vector.shape_cast %100 : vector<8x8x24xf32> to vector<64x24xf32>
      %102 = arith.truncf %101 : vector<64x24xf32> to vector<64x24xbf16>
      %c12 = arith.constant 12 : index
      %c0_53 = arith.constant 0 : index
      %c0_54 = arith.constant 0 : index
      %103 = vector.load %arg2[%c12, %c0_53, %c0_54] : memref<27x24x16xbf16, #tpu.memory_space<vmem>>, vector<1x24x16xbf16>
      %104 = vector.shape_cast %103 : vector<1x24x16xbf16> to vector<24x16xbf16>
      %cst_55 = arith.constant dense<0.000000e+00> : vector<64x16xf32>
      %105 = tpu.matmul %102, %104, %cst_55 {dimension_numbers = #tpu.dot_dimension_numbers<[1], [0], [0], [1], [0, 0, 1, 1], [], []>} : vector<64x24xbf16>, vector<24x16xbf16>, vector<64x16xf32> -> vector<64x16xf32>
      %106 = arith.addf %99, %105 : vector<64x16xf32>
      %107 = vector.extract_strided_slice %78 {offsets = [1, 1, 0], sizes = [8, 8, 24], strides = [1, 1, 1]} : vector<10x10x24xf32> to vector<8x8x24xf32>
      %108 = vector.shape_cast %107 : vector<8x8x24xf32> to vector<64x24xf32>
      %109 = arith.truncf %108 : vector<64x24xf32> to vector<64x24xbf16>
      %c13 = arith.constant 13 : index
      %c0_56 = arith.constant 0 : index
      %c0_57 = arith.constant 0 : index
      %110 = vector.load %arg2[%c13, %c0_56, %c0_57] : memref<27x24x16xbf16, #tpu.memory_space<vmem>>, vector<1x24x16xbf16>
      %111 = vector.shape_cast %110 : vector<1x24x16xbf16> to vector<24x16xbf16>
      %cst_58 = arith.constant dense<0.000000e+00> : vector<64x16xf32>
      %112 = tpu.matmul %109, %111, %cst_58 {dimension_numbers = #tpu.dot_dimension_numbers<[1], [0], [0], [1], [0, 0, 1, 1], [], []>} : vector<64x24xbf16>, vector<24x16xbf16>, vector<64x16xf32> -> vector<64x16xf32>
      %113 = arith.addf %106, %112 : vector<64x16xf32>
      %114 = vector.extract_strided_slice %78 {offsets = [1, 2, 0], sizes = [8, 8, 24], strides = [1, 1, 1]} : vector<10x10x24xf32> to vector<8x8x24xf32>
      %115 = vector.shape_cast %114 : vector<8x8x24xf32> to vector<64x24xf32>
      %116 = arith.truncf %115 : vector<64x24xf32> to vector<64x24xbf16>
      %c14 = arith.constant 14 : index
      %c0_59 = arith.constant 0 : index
      %c0_60 = arith.constant 0 : index
      %117 = vector.load %arg2[%c14, %c0_59, %c0_60] : memref<27x24x16xbf16, #tpu.memory_space<vmem>>, vector<1x24x16xbf16>
      %118 = vector.shape_cast %117 : vector<1x24x16xbf16> to vector<24x16xbf16>
      %cst_61 = arith.constant dense<0.000000e+00> : vector<64x16xf32>
      %119 = tpu.matmul %116, %118, %cst_61 {dimension_numbers = #tpu.dot_dimension_numbers<[1], [0], [0], [1], [0, 0, 1, 1], [], []>} : vector<64x24xbf16>, vector<24x16xbf16>, vector<64x16xf32> -> vector<64x16xf32>
      %120 = arith.addf %113, %119 : vector<64x16xf32>
      %121 = vector.extract_strided_slice %78 {offsets = [2, 0, 0], sizes = [8, 8, 24], strides = [1, 1, 1]} : vector<10x10x24xf32> to vector<8x8x24xf32>
      %122 = vector.shape_cast %121 : vector<8x8x24xf32> to vector<64x24xf32>
      %123 = arith.truncf %122 : vector<64x24xf32> to vector<64x24xbf16>
      %c15 = arith.constant 15 : index
      %c0_62 = arith.constant 0 : index
      %c0_63 = arith.constant 0 : index
      %124 = vector.load %arg2[%c15, %c0_62, %c0_63] : memref<27x24x16xbf16, #tpu.memory_space<vmem>>, vector<1x24x16xbf16>
      %125 = vector.shape_cast %124 : vector<1x24x16xbf16> to vector<24x16xbf16>
      %cst_64 = arith.constant dense<0.000000e+00> : vector<64x16xf32>
      %126 = tpu.matmul %123, %125, %cst_64 {dimension_numbers = #tpu.dot_dimension_numbers<[1], [0], [0], [1], [0, 0, 1, 1], [], []>} : vector<64x24xbf16>, vector<24x16xbf16>, vector<64x16xf32> -> vector<64x16xf32>
      %127 = arith.addf %120, %126 : vector<64x16xf32>
      %128 = vector.extract_strided_slice %78 {offsets = [2, 1, 0], sizes = [8, 8, 24], strides = [1, 1, 1]} : vector<10x10x24xf32> to vector<8x8x24xf32>
      %129 = vector.shape_cast %128 : vector<8x8x24xf32> to vector<64x24xf32>
      %130 = arith.truncf %129 : vector<64x24xf32> to vector<64x24xbf16>
      %c16 = arith.constant 16 : index
      %c0_65 = arith.constant 0 : index
      %c0_66 = arith.constant 0 : index
      %131 = vector.load %arg2[%c16, %c0_65, %c0_66] : memref<27x24x16xbf16, #tpu.memory_space<vmem>>, vector<1x24x16xbf16>
      %132 = vector.shape_cast %131 : vector<1x24x16xbf16> to vector<24x16xbf16>
      %cst_67 = arith.constant dense<0.000000e+00> : vector<64x16xf32>
      %133 = tpu.matmul %130, %132, %cst_67 {dimension_numbers = #tpu.dot_dimension_numbers<[1], [0], [0], [1], [0, 0, 1, 1], [], []>} : vector<64x24xbf16>, vector<24x16xbf16>, vector<64x16xf32> -> vector<64x16xf32>
      %134 = arith.addf %127, %133 : vector<64x16xf32>
      %135 = vector.extract_strided_slice %78 {offsets = [2, 2, 0], sizes = [8, 8, 24], strides = [1, 1, 1]} : vector<10x10x24xf32> to vector<8x8x24xf32>
      %136 = vector.shape_cast %135 : vector<8x8x24xf32> to vector<64x24xf32>
      %137 = arith.truncf %136 : vector<64x24xf32> to vector<64x24xbf16>
      %c17 = arith.constant 17 : index
      %c0_68 = arith.constant 0 : index
      %c0_69 = arith.constant 0 : index
      %138 = vector.load %arg2[%c17, %c0_68, %c0_69] : memref<27x24x16xbf16, #tpu.memory_space<vmem>>, vector<1x24x16xbf16>
      %139 = vector.shape_cast %138 : vector<1x24x16xbf16> to vector<24x16xbf16>
      %cst_70 = arith.constant dense<0.000000e+00> : vector<64x16xf32>
      %140 = tpu.matmul %137, %139, %cst_70 {dimension_numbers = #tpu.dot_dimension_numbers<[1], [0], [0], [1], [0, 0, 1, 1], [], []>} : vector<64x24xbf16>, vector<24x16xbf16>, vector<64x16xf32> -> vector<64x16xf32>
      %141 = arith.addf %134, %140 : vector<64x16xf32>
      %c2_i32 = arith.constant 2 : i32
      %142 = arith.addi %6, %c2_i32 : i32
      %c0_71 = arith.constant 0 : index
      %143 = arith.index_cast %142 : i32 to index
      %c0_72 = arith.constant 0 : index
      %c0_73 = arith.constant 0 : index
      %c0_74 = arith.constant 0 : index
      %144 = vector.load %arg1[%c0_71, %143, %c0_72, %c0_73, %c0_74] : memref<1x10x10x10x24xf32, #tpu.memory_space<vmem>>, vector<1x1x10x10x24xf32>
      %145 = vector.shape_cast %144 : vector<1x1x10x10x24xf32> to vector<10x10x24xf32>
      %146 = vector.extract_strided_slice %145 {offsets = [0, 0, 0], sizes = [8, 8, 24], strides = [1, 1, 1]} : vector<10x10x24xf32> to vector<8x8x24xf32>
      %147 = vector.shape_cast %146 : vector<8x8x24xf32> to vector<64x24xf32>
      %148 = arith.truncf %147 : vector<64x24xf32> to vector<64x24xbf16>
      %c18 = arith.constant 18 : index
      %c0_75 = arith.constant 0 : index
      %c0_76 = arith.constant 0 : index
      %149 = vector.load %arg2[%c18, %c0_75, %c0_76] : memref<27x24x16xbf16, #tpu.memory_space<vmem>>, vector<1x24x16xbf16>
      %150 = vector.shape_cast %149 : vector<1x24x16xbf16> to vector<24x16xbf16>
      %cst_77 = arith.constant dense<0.000000e+00> : vector<64x16xf32>
      %151 = tpu.matmul %148, %150, %cst_77 {dimension_numbers = #tpu.dot_dimension_numbers<[1], [0], [0], [1], [0, 0, 1, 1], [], []>} : vector<64x24xbf16>, vector<24x16xbf16>, vector<64x16xf32> -> vector<64x16xf32>
      %152 = arith.addf %141, %151 : vector<64x16xf32>
      %153 = vector.extract_strided_slice %145 {offsets = [0, 1, 0], sizes = [8, 8, 24], strides = [1, 1, 1]} : vector<10x10x24xf32> to vector<8x8x24xf32>
      %154 = vector.shape_cast %153 : vector<8x8x24xf32> to vector<64x24xf32>
      %155 = arith.truncf %154 : vector<64x24xf32> to vector<64x24xbf16>
      %c19 = arith.constant 19 : index
      %c0_78 = arith.constant 0 : index
      %c0_79 = arith.constant 0 : index
      %156 = vector.load %arg2[%c19, %c0_78, %c0_79] : memref<27x24x16xbf16, #tpu.memory_space<vmem>>, vector<1x24x16xbf16>
      %157 = vector.shape_cast %156 : vector<1x24x16xbf16> to vector<24x16xbf16>
      %cst_80 = arith.constant dense<0.000000e+00> : vector<64x16xf32>
      %158 = tpu.matmul %155, %157, %cst_80 {dimension_numbers = #tpu.dot_dimension_numbers<[1], [0], [0], [1], [0, 0, 1, 1], [], []>} : vector<64x24xbf16>, vector<24x16xbf16>, vector<64x16xf32> -> vector<64x16xf32>
      %159 = arith.addf %152, %158 : vector<64x16xf32>
      %160 = vector.extract_strided_slice %145 {offsets = [0, 2, 0], sizes = [8, 8, 24], strides = [1, 1, 1]} : vector<10x10x24xf32> to vector<8x8x24xf32>
      %161 = vector.shape_cast %160 : vector<8x8x24xf32> to vector<64x24xf32>
      %162 = arith.truncf %161 : vector<64x24xf32> to vector<64x24xbf16>
      %c20 = arith.constant 20 : index
      %c0_81 = arith.constant 0 : index
      %c0_82 = arith.constant 0 : index
      %163 = vector.load %arg2[%c20, %c0_81, %c0_82] : memref<27x24x16xbf16, #tpu.memory_space<vmem>>, vector<1x24x16xbf16>
      %164 = vector.shape_cast %163 : vector<1x24x16xbf16> to vector<24x16xbf16>
      %cst_83 = arith.constant dense<0.000000e+00> : vector<64x16xf32>
      %165 = tpu.matmul %162, %164, %cst_83 {dimension_numbers = #tpu.dot_dimension_numbers<[1], [0], [0], [1], [0, 0, 1, 1], [], []>} : vector<64x24xbf16>, vector<24x16xbf16>, vector<64x16xf32> -> vector<64x16xf32>
      %166 = arith.addf %159, %165 : vector<64x16xf32>
      %167 = vector.extract_strided_slice %145 {offsets = [1, 0, 0], sizes = [8, 8, 24], strides = [1, 1, 1]} : vector<10x10x24xf32> to vector<8x8x24xf32>
      %168 = vector.shape_cast %167 : vector<8x8x24xf32> to vector<64x24xf32>
      %169 = arith.truncf %168 : vector<64x24xf32> to vector<64x24xbf16>
      %c21 = arith.constant 21 : index
      %c0_84 = arith.constant 0 : index
      %c0_85 = arith.constant 0 : index
      %170 = vector.load %arg2[%c21, %c0_84, %c0_85] : memref<27x24x16xbf16, #tpu.memory_space<vmem>>, vector<1x24x16xbf16>
      %171 = vector.shape_cast %170 : vector<1x24x16xbf16> to vector<24x16xbf16>
      %cst_86 = arith.constant dense<0.000000e+00> : vector<64x16xf32>
      %172 = tpu.matmul %169, %171, %cst_86 {dimension_numbers = #tpu.dot_dimension_numbers<[1], [0], [0], [1], [0, 0, 1, 1], [], []>} : vector<64x24xbf16>, vector<24x16xbf16>, vector<64x16xf32> -> vector<64x16xf32>
      %173 = arith.addf %166, %172 : vector<64x16xf32>
      %174 = vector.extract_strided_slice %145 {offsets = [1, 1, 0], sizes = [8, 8, 24], strides = [1, 1, 1]} : vector<10x10x24xf32> to vector<8x8x24xf32>
      %175 = vector.shape_cast %174 : vector<8x8x24xf32> to vector<64x24xf32>
      %176 = arith.truncf %175 : vector<64x24xf32> to vector<64x24xbf16>
      %c22 = arith.constant 22 : index
      %c0_87 = arith.constant 0 : index
      %c0_88 = arith.constant 0 : index
      %177 = vector.load %arg2[%c22, %c0_87, %c0_88] : memref<27x24x16xbf16, #tpu.memory_space<vmem>>, vector<1x24x16xbf16>
      %178 = vector.shape_cast %177 : vector<1x24x16xbf16> to vector<24x16xbf16>
      %cst_89 = arith.constant dense<0.000000e+00> : vector<64x16xf32>
      %179 = tpu.matmul %176, %178, %cst_89 {dimension_numbers = #tpu.dot_dimension_numbers<[1], [0], [0], [1], [0, 0, 1, 1], [], []>} : vector<64x24xbf16>, vector<24x16xbf16>, vector<64x16xf32> -> vector<64x16xf32>
      %180 = arith.addf %173, %179 : vector<64x16xf32>
      %181 = vector.extract_strided_slice %145 {offsets = [1, 2, 0], sizes = [8, 8, 24], strides = [1, 1, 1]} : vector<10x10x24xf32> to vector<8x8x24xf32>
      %182 = vector.shape_cast %181 : vector<8x8x24xf32> to vector<64x24xf32>
      %183 = arith.truncf %182 : vector<64x24xf32> to vector<64x24xbf16>
      %c23 = arith.constant 23 : index
      %c0_90 = arith.constant 0 : index
      %c0_91 = arith.constant 0 : index
      %184 = vector.load %arg2[%c23, %c0_90, %c0_91] : memref<27x24x16xbf16, #tpu.memory_space<vmem>>, vector<1x24x16xbf16>
      %185 = vector.shape_cast %184 : vector<1x24x16xbf16> to vector<24x16xbf16>
      %cst_92 = arith.constant dense<0.000000e+00> : vector<64x16xf32>
      %186 = tpu.matmul %183, %185, %cst_92 {dimension_numbers = #tpu.dot_dimension_numbers<[1], [0], [0], [1], [0, 0, 1, 1], [], []>} : vector<64x24xbf16>, vector<24x16xbf16>, vector<64x16xf32> -> vector<64x16xf32>
      %187 = arith.addf %180, %186 : vector<64x16xf32>
      %188 = vector.extract_strided_slice %145 {offsets = [2, 0, 0], sizes = [8, 8, 24], strides = [1, 1, 1]} : vector<10x10x24xf32> to vector<8x8x24xf32>
      %189 = vector.shape_cast %188 : vector<8x8x24xf32> to vector<64x24xf32>
      %190 = arith.truncf %189 : vector<64x24xf32> to vector<64x24xbf16>
      %c24 = arith.constant 24 : index
      %c0_93 = arith.constant 0 : index
      %c0_94 = arith.constant 0 : index
      %191 = vector.load %arg2[%c24, %c0_93, %c0_94] : memref<27x24x16xbf16, #tpu.memory_space<vmem>>, vector<1x24x16xbf16>
      %192 = vector.shape_cast %191 : vector<1x24x16xbf16> to vector<24x16xbf16>
      %cst_95 = arith.constant dense<0.000000e+00> : vector<64x16xf32>
      %193 = tpu.matmul %190, %192, %cst_95 {dimension_numbers = #tpu.dot_dimension_numbers<[1], [0], [0], [1], [0, 0, 1, 1], [], []>} : vector<64x24xbf16>, vector<24x16xbf16>, vector<64x16xf32> -> vector<64x16xf32>
      %194 = arith.addf %187, %193 : vector<64x16xf32>
      %195 = vector.extract_strided_slice %145 {offsets = [2, 1, 0], sizes = [8, 8, 24], strides = [1, 1, 1]} : vector<10x10x24xf32> to vector<8x8x24xf32>
      %196 = vector.shape_cast %195 : vector<8x8x24xf32> to vector<64x24xf32>
      %197 = arith.truncf %196 : vector<64x24xf32> to vector<64x24xbf16>
      %c25 = arith.constant 25 : index
      %c0_96 = arith.constant 0 : index
      %c0_97 = arith.constant 0 : index
      %198 = vector.load %arg2[%c25, %c0_96, %c0_97] : memref<27x24x16xbf16, #tpu.memory_space<vmem>>, vector<1x24x16xbf16>
      %199 = vector.shape_cast %198 : vector<1x24x16xbf16> to vector<24x16xbf16>
      %cst_98 = arith.constant dense<0.000000e+00> : vector<64x16xf32>
      %200 = tpu.matmul %197, %199, %cst_98 {dimension_numbers = #tpu.dot_dimension_numbers<[1], [0], [0], [1], [0, 0, 1, 1], [], []>} : vector<64x24xbf16>, vector<24x16xbf16>, vector<64x16xf32> -> vector<64x16xf32>
      %201 = arith.addf %194, %200 : vector<64x16xf32>
      %202 = vector.extract_strided_slice %145 {offsets = [2, 2, 0], sizes = [8, 8, 24], strides = [1, 1, 1]} : vector<10x10x24xf32> to vector<8x8x24xf32>
      %203 = vector.shape_cast %202 : vector<8x8x24xf32> to vector<64x24xf32>
      %204 = arith.truncf %203 : vector<64x24xf32> to vector<64x24xbf16>
      %c26 = arith.constant 26 : index
      %c0_99 = arith.constant 0 : index
      %c0_100 = arith.constant 0 : index
      %205 = vector.load %arg2[%c26, %c0_99, %c0_100] : memref<27x24x16xbf16, #tpu.memory_space<vmem>>, vector<1x24x16xbf16>
      %206 = vector.shape_cast %205 : vector<1x24x16xbf16> to vector<24x16xbf16>
      %cst_101 = arith.constant dense<0.000000e+00> : vector<64x16xf32>
      %207 = tpu.matmul %204, %206, %cst_101 {dimension_numbers = #tpu.dot_dimension_numbers<[1], [0], [0], [1], [0, 0, 1, 1], [], []>} : vector<64x24xbf16>, vector<24x16xbf16>, vector<64x16xf32> -> vector<64x16xf32>
      %208 = arith.addf %201, %207 : vector<64x16xf32>
      %209 = vector.shape_cast %208 : vector<64x16xf32> to vector<1x64x16xf32>
      %c0_102 = arith.constant 0 : index
      %210 = arith.index_cast %6 : i32 to index
      %c0_103 = arith.constant 0 : index
      %c0_104 = arith.constant 0 : index
      %211 = vector.load %arg5[%c0_102, %210, %c0_103, %c0_104] : memref<1x8x64x16xf32, #tpu.memory_space<vmem>>, vector<1x1x64x16xf32>
      %212 = vector.shape_cast %211 : vector<1x1x64x16xf32> to vector<1x64x16xf32>
      %213 = vector.shape_cast %209 : vector<1x64x16xf32> to vector<1x1x64x16xf32>
      tpu.vector_store %arg5[%c0_102, %210, %c0_103, %c0_104], %213 {strides = array<i32>} : memref<1x8x64x16xf32, #tpu.memory_space<vmem>>, vector<1x1x64x16xf32>,
      %c0_105 = arith.constant 0 : index
      %c0_106 = arith.constant 0 : index
      %c0_107 = arith.constant 0 : index
      %214 = vector.load %arg6[%c0_105, %c0_106, %c0_107] : memref<1x8x16xf32, #tpu.memory_space<vmem>>, vector<1x1x16xf32>
      %215 = vector.shape_cast %214 : vector<1x1x16xf32> to vector<1x16xf32>
      %cst_108 = arith.constant dense<0.000000e+00> : vector<16xf32>
      %216 = vector.multi_reduction <add>, %208, %cst_108 [0] : vector<64x16xf32> to vector<16xf32>
      %217 = vector.shape_cast %216 : vector<16xf32> to vector<1x16xf32>
      %218 = arith.addf %215, %217 : vector<1x16xf32>
      %c0_109 = arith.constant 0 : index
      %c0_110 = arith.constant 0 : index
      %c0_111 = arith.constant 0 : index
      %219 = vector.load %arg6[%c0_109, %c0_110, %c0_111] : memref<1x8x16xf32, #tpu.memory_space<vmem>>, vector<1x1x16xf32>
      %220 = vector.shape_cast %219 : vector<1x1x16xf32> to vector<1x16xf32>
      %221 = vector.shape_cast %218 : vector<1x16xf32> to vector<1x1x16xf32>
      tpu.vector_store %arg6[%c0_109, %c0_110, %c0_111], %221 {strides = array<i32>} : memref<1x8x16xf32, #tpu.memory_space<vmem>>, vector<1x1x16xf32>,
      %c0_112 = arith.constant 0 : index
      %c1_113 = arith.constant 1 : index
      %c0_114 = arith.constant 0 : index
      %222 = vector.load %arg6[%c0_112, %c1_113, %c0_114] : memref<1x8x16xf32, #tpu.memory_space<vmem>>, vector<1x1x16xf32>
      %223 = vector.shape_cast %222 : vector<1x1x16xf32> to vector<1x16xf32>
      %224 = arith.mulf %208, %208 : vector<64x16xf32>
      %cst_115 = arith.constant dense<0.000000e+00> : vector<16xf32>
      %225 = vector.multi_reduction <add>, %224, %cst_115 [0] : vector<64x16xf32> to vector<16xf32>
      %226 = vector.shape_cast %225 : vector<16xf32> to vector<1x16xf32>
      %227 = arith.addf %223, %226 : vector<1x16xf32>
      %c0_116 = arith.constant 0 : index
      %c1_117 = arith.constant 1 : index
      %c0_118 = arith.constant 0 : index
      %228 = vector.load %arg6[%c0_116, %c1_117, %c0_118] : memref<1x8x16xf32, #tpu.memory_space<vmem>>, vector<1x1x16xf32>
      %229 = vector.shape_cast %228 : vector<1x1x16xf32> to vector<1x16xf32>
      %230 = vector.shape_cast %227 : vector<1x16xf32> to vector<1x1x16xf32>
      tpu.vector_store %arg6[%c0_116, %c1_117, %c0_118], %230 {strides = array<i32>} : memref<1x8x16xf32, #tpu.memory_space<vmem>>, vector<1x1x16xf32>,
    }
    %c8_i32_2 = arith.constant 8 : i32
    return
  }
  func.func @transform_0(%arg0: i32) -> (i32, i32, i32, i32, i32) {
    %c0_i32 = arith.constant 0 : i32
    %c0_i32_0 = arith.constant 0 : i32
    %c0_i32_1 = arith.constant 0 : i32
    %c0_i32_2 = arith.constant 0 : i32
    %c0_i32_3 = arith.constant 0 : i32
    return %arg0, %c0_i32, %c0_i32_0, %c0_i32_1, %c0_i32_2 : i32, i32, i32, i32, i32
  }
  func.func @transform_1(%arg0: i32) -> (i32, i32, i32) {
    %c0_i32 = arith.constant 0 : i32
    %c0_i32_0 = arith.constant 0 : i32
    %c0_i32_1 = arith.constant 0 : i32
    %c0_i32_2 = arith.constant 0 : i32
    return %c0_i32, %c0_i32_0, %c0_i32_1 : i32, i32, i32
  }
  func.func @transform_2(%arg0: i32) -> (i32, i32) {
    %c0_i32 = arith.constant 0 : i32
    %c0_i32_0 = arith.constant 0 : i32
    %c0_i32_1 = arith.constant 0 : i32
    return %c0_i32, %c0_i32_0 : i32, i32
  }
  func.func @transform_3(%arg0: i32) -> (i32, i32) {
    %c0_i32 = arith.constant 0 : i32
    %c0_i32_0 = arith.constant 0 : i32
    %c0_i32_1 = arith.constant 0 : i32
    return %c0_i32, %c0_i32_0 : i32, i32
  }
  func.func @transform_4(%arg0: i32) -> (i32, i32, i32, i32) {
    %c0_i32 = arith.constant 0 : i32
    %c0_i32_0 = arith.constant 0 : i32
    %c0_i32_1 = arith.constant 0 : i32
    %c0_i32_2 = arith.constant 0 : i32
    return %arg0, %c0_i32, %c0_i32_0, %c0_i32_1 : i32, i32, i32, i32
  }
  func.func @transform_5(%arg0: i32) -> (i32, i32, i32) {
    %c0_i32 = arith.constant 0 : i32
    %c0_i32_0 = arith.constant 0 : i32
    %c0_i32_1 = arith.constant 0 : i32
    return %arg0, %c0_i32, %c0_i32_0 : i32, i32, i32
  }
}

module attributes {stable_mosaic.version = 11 : i64} {
  func.func @_conv3_kernel(%arg0: i32, %arg1: memref<1x10x10x10x16xf32, #tpu.memory_space<vmem>>, %arg2: memref<27x16x16xbf16, #tpu.memory_space<vmem>>, %arg3: memref<1x16xf32, #tpu.memory_space<vmem>>, %arg4: memref<1x16xf32, #tpu.memory_space<vmem>>, %arg5: memref<1x8x64x16xf32, #tpu.memory_space<vmem>>, %arg6: memref<1x8x16xf32, #tpu.memory_space<vmem>>) attributes {dimension_semantics = [#tpu.dimension_semantics<parallel>], iteration_bounds = array<i64: 2>, scalar_prefetch = 0 : i64, scratch_operands = 0 : i64, tpu.core_type = #tpu.core_type<tc>, window_params = [{transform_indices = @transform_0, window_bounds = array<i64: 1, 10, 10, 10, 16>}, {pipeline_mode = #tpu.pipeline_mode<synchronous>, transform_indices = @transform_1, window_bounds = array<i64: 27, 16, 16>}, {pipeline_mode = #tpu.pipeline_mode<synchronous>, transform_indices = @transform_2, window_bounds = array<i64: 1, 16>}, {pipeline_mode = #tpu.pipeline_mode<synchronous>, transform_indices = @transform_3, window_bounds = array<i64: 1, 16>}, {transform_indices = @transform_4, window_bounds = array<i64: 1, 8, 64, 16>}, {transform_indices = @transform_5, window_bounds = array<i64: 1, 8, 16>}]} {
    %cst = arith.constant 0.000000e+00 : f32
    %0 = vector.broadcast %cst : f32 to vector<8x16xf32>
    %c0 = arith.constant 0 : index
    %c0_0 = arith.constant 0 : index
    %c0_1 = arith.constant 0 : index
    %1 = vector.load %arg6[%c0, %c0_0, %c0_1] : memref<1x8x16xf32, #tpu.memory_space<vmem>>, vector<1x8x16xf32>
    %2 = vector.shape_cast %1 : vector<1x8x16xf32> to vector<8x16xf32>
    %3 = vector.shape_cast %0 : vector<8x16xf32> to vector<1x8x16xf32>
    tpu.vector_store %arg6[%c0, %c0_0, %c0_1], %3 {strides = array<i32>} : memref<1x8x16xf32, #tpu.memory_space<vmem>>, vector<1x8x16xf32>,
    %c0_2 = arith.constant 0 : index
    %c0_3 = arith.constant 0 : index
    %4 = vector.load %arg3[%c0_2, %c0_3] : memref<1x16xf32, #tpu.memory_space<vmem>>, vector<1x16xf32>
    %5 = vector.shape_cast %4 : vector<1x16xf32> to vector<16xf32>
    %c0_4 = arith.constant 0 : index
    %c0_5 = arith.constant 0 : index
    %6 = vector.load %arg4[%c0_4, %c0_5] : memref<1x16xf32, #tpu.memory_space<vmem>>, vector<1x16xf32>
    %7 = vector.shape_cast %6 : vector<1x16xf32> to vector<16xf32>
    %8 = tpu.iota {dimensions = array<i32: 0>} : vector<10x10x1xi32>
    %9 = tpu.iota {dimensions = array<i32: 1>} : vector<10x10x1xi32>
    %c1_i32 = arith.constant 1 : i32
    %10 = vector.broadcast %c1_i32 : i32 to vector<10x10x1xi32>
    %11 = arith.cmpi sge, %8, %10 : vector<10x10x1xi32>
    %c8_i32 = arith.constant 8 : i32
    %12 = vector.broadcast %c8_i32 : i32 to vector<10x10x1xi32>
    %13 = arith.cmpi sle, %8, %12 : vector<10x10x1xi32>
    %14 = arith.andi %11, %13 : vector<10x10x1xi1>
    %c1_i32_6 = arith.constant 1 : i32
    %15 = vector.broadcast %c1_i32_6 : i32 to vector<10x10x1xi32>
    %16 = arith.cmpi sge, %9, %15 : vector<10x10x1xi32>
    %17 = arith.andi %14, %16 : vector<10x10x1xi1>
    %c8_i32_7 = arith.constant 8 : i32
    %18 = vector.broadcast %c8_i32_7 : i32 to vector<10x10x1xi32>
    %19 = arith.cmpi sle, %9, %18 : vector<10x10x1xi32>
    %20 = arith.andi %17, %19 : vector<10x10x1xi1>
    %c0_i32 = arith.constant 0 : i32
    %c8_i32_8 = arith.constant 8 : i32
    %21 = arith.addi %c0_i32, %c8_i32_8 : i32
    %c1_i32_9 = arith.constant 1 : i32
    scf.for %arg7 = %c0_i32 to %21 step %c1_i32_9  : i32 {
      %c1_i32_11 = arith.constant 1 : i32
      %22 = arith.muli %arg7, %c1_i32_11 : i32
      %c0_i32_12 = arith.constant 0 : i32
      %23 = arith.addi %c0_i32_12, %22 : i32
      %cst_13 = arith.constant 0.000000e+00 : f32
      %24 = vector.broadcast %cst_13 : f32 to vector<64x16xf32>
      %c0_i32_14 = arith.constant 0 : i32
      %25 = arith.addi %23, %c0_i32_14 : i32
      %c0_15 = arith.constant 0 : index
      %26 = arith.index_cast %25 : i32 to index
      %c0_16 = arith.constant 0 : index
      %c0_17 = arith.constant 0 : index
      %c0_18 = arith.constant 0 : index
      %27 = vector.load %arg1[%c0_15, %26, %c0_16, %c0_17, %c0_18] : memref<1x10x10x10x16xf32, #tpu.memory_space<vmem>>, vector<1x1x10x10x16xf32>
      %28 = vector.shape_cast %27 : vector<1x1x10x10x16xf32> to vector<10x10x16xf32>
      %29 = vector.shape_cast %5 : vector<16xf32> to vector<1x1x16xf32>
      %30 = vector.broadcast %29 : vector<1x1x16xf32> to vector<10x10x16xf32>
      %31 = arith.mulf %28, %30 : vector<10x10x16xf32>
      %32 = vector.shape_cast %7 : vector<16xf32> to vector<1x1x16xf32>
      %33 = vector.broadcast %32 : vector<1x1x16xf32> to vector<10x10x16xf32>
      %34 = arith.addf %31, %33 : vector<10x10x16xf32>
      %cst_19 = arith.constant 0.000000e+00 : f32
      %35 = vector.broadcast %cst_19 : f32 to vector<10x10x16xf32>
      %36 = arith.maximumf %34, %35 : vector<10x10x16xf32>
      %c0_i32_20 = arith.constant 0 : i32
      %37 = arith.addi %23, %c0_i32_20 : i32
      %c1_i32_21 = arith.constant 1 : i32
      %38 = arith.cmpi sge, %37, %c1_i32_21 : i32
      %c0_i32_22 = arith.constant 0 : i32
      %39 = arith.addi %23, %c0_i32_22 : i32
      %c8_i32_23 = arith.constant 8 : i32
      %40 = arith.cmpi sle, %39, %c8_i32_23 : i32
      %41 = arith.andi %38, %40 : i1
      %42 = vector.broadcast %41 : i1 to vector<10x10x1xi1>
      %43 = arith.andi %20, %42 : vector<10x10x1xi1>
      %cst_24 = arith.constant 0.000000e+00 : f32
      %44 = vector.shape_cast %43 : vector<10x10x1xi1> to vector<10x10x1xi1>
      %45 = vector.broadcast %44 : vector<10x10x1xi1> to vector<10x10x16xi1>
      %46 = vector.broadcast %cst_24 : f32 to vector<10x10x16xf32>
      %47 = arith.select %45, %36, %46 : vector<10x10x16xi1>, vector<10x10x16xf32>
      %48 = vector.extract_strided_slice %47 {offsets = [0, 0, 0], sizes = [8, 8, 16], strides = [1, 1, 1]} : vector<10x10x16xf32> to vector<8x8x16xf32>
      %49 = vector.shape_cast %48 : vector<8x8x16xf32> to vector<64x16xf32>
      %50 = arith.truncf %49 : vector<64x16xf32> to vector<64x16xbf16>
      %c0_25 = arith.constant 0 : index
      %c0_26 = arith.constant 0 : index
      %c0_27 = arith.constant 0 : index
      %51 = vector.load %arg2[%c0_25, %c0_26, %c0_27] : memref<27x16x16xbf16, #tpu.memory_space<vmem>>, vector<1x16x16xbf16>
      %52 = vector.shape_cast %51 : vector<1x16x16xbf16> to vector<16x16xbf16>
      %cst_28 = arith.constant dense<0.000000e+00> : vector<64x16xf32>
      %53 = tpu.matmul %50, %52, %cst_28 {dimension_numbers = #tpu.dot_dimension_numbers<[1], [0], [0], [1], [0, 0, 1, 1], [], []>} : vector<64x16xbf16>, vector<16x16xbf16>, vector<64x16xf32> -> vector<64x16xf32>
      %54 = arith.addf %24, %53 : vector<64x16xf32>
      %55 = vector.extract_strided_slice %47 {offsets = [0, 1, 0], sizes = [8, 8, 16], strides = [1, 1, 1]} : vector<10x10x16xf32> to vector<8x8x16xf32>
      %56 = vector.shape_cast %55 : vector<8x8x16xf32> to vector<64x16xf32>
      %57 = arith.truncf %56 : vector<64x16xf32> to vector<64x16xbf16>
      %c1 = arith.constant 1 : index
      %c0_29 = arith.constant 0 : index
      %c0_30 = arith.constant 0 : index
      %58 = vector.load %arg2[%c1, %c0_29, %c0_30] : memref<27x16x16xbf16, #tpu.memory_space<vmem>>, vector<1x16x16xbf16>
      %59 = vector.shape_cast %58 : vector<1x16x16xbf16> to vector<16x16xbf16>
      %cst_31 = arith.constant dense<0.000000e+00> : vector<64x16xf32>
      %60 = tpu.matmul %57, %59, %cst_31 {dimension_numbers = #tpu.dot_dimension_numbers<[1], [0], [0], [1], [0, 0, 1, 1], [], []>} : vector<64x16xbf16>, vector<16x16xbf16>, vector<64x16xf32> -> vector<64x16xf32>
      %61 = arith.addf %54, %60 : vector<64x16xf32>
      %62 = vector.extract_strided_slice %47 {offsets = [0, 2, 0], sizes = [8, 8, 16], strides = [1, 1, 1]} : vector<10x10x16xf32> to vector<8x8x16xf32>
      %63 = vector.shape_cast %62 : vector<8x8x16xf32> to vector<64x16xf32>
      %64 = arith.truncf %63 : vector<64x16xf32> to vector<64x16xbf16>
      %c2 = arith.constant 2 : index
      %c0_32 = arith.constant 0 : index
      %c0_33 = arith.constant 0 : index
      %65 = vector.load %arg2[%c2, %c0_32, %c0_33] : memref<27x16x16xbf16, #tpu.memory_space<vmem>>, vector<1x16x16xbf16>
      %66 = vector.shape_cast %65 : vector<1x16x16xbf16> to vector<16x16xbf16>
      %cst_34 = arith.constant dense<0.000000e+00> : vector<64x16xf32>
      %67 = tpu.matmul %64, %66, %cst_34 {dimension_numbers = #tpu.dot_dimension_numbers<[1], [0], [0], [1], [0, 0, 1, 1], [], []>} : vector<64x16xbf16>, vector<16x16xbf16>, vector<64x16xf32> -> vector<64x16xf32>
      %68 = arith.addf %61, %67 : vector<64x16xf32>
      %69 = vector.extract_strided_slice %47 {offsets = [1, 0, 0], sizes = [8, 8, 16], strides = [1, 1, 1]} : vector<10x10x16xf32> to vector<8x8x16xf32>
      %70 = vector.shape_cast %69 : vector<8x8x16xf32> to vector<64x16xf32>
      %71 = arith.truncf %70 : vector<64x16xf32> to vector<64x16xbf16>
      %c3 = arith.constant 3 : index
      %c0_35 = arith.constant 0 : index
      %c0_36 = arith.constant 0 : index
      %72 = vector.load %arg2[%c3, %c0_35, %c0_36] : memref<27x16x16xbf16, #tpu.memory_space<vmem>>, vector<1x16x16xbf16>
      %73 = vector.shape_cast %72 : vector<1x16x16xbf16> to vector<16x16xbf16>
      %cst_37 = arith.constant dense<0.000000e+00> : vector<64x16xf32>
      %74 = tpu.matmul %71, %73, %cst_37 {dimension_numbers = #tpu.dot_dimension_numbers<[1], [0], [0], [1], [0, 0, 1, 1], [], []>} : vector<64x16xbf16>, vector<16x16xbf16>, vector<64x16xf32> -> vector<64x16xf32>
      %75 = arith.addf %68, %74 : vector<64x16xf32>
      %76 = vector.extract_strided_slice %47 {offsets = [1, 1, 0], sizes = [8, 8, 16], strides = [1, 1, 1]} : vector<10x10x16xf32> to vector<8x8x16xf32>
      %77 = vector.shape_cast %76 : vector<8x8x16xf32> to vector<64x16xf32>
      %78 = arith.truncf %77 : vector<64x16xf32> to vector<64x16xbf16>
      %c4 = arith.constant 4 : index
      %c0_38 = arith.constant 0 : index
      %c0_39 = arith.constant 0 : index
      %79 = vector.load %arg2[%c4, %c0_38, %c0_39] : memref<27x16x16xbf16, #tpu.memory_space<vmem>>, vector<1x16x16xbf16>
      %80 = vector.shape_cast %79 : vector<1x16x16xbf16> to vector<16x16xbf16>
      %cst_40 = arith.constant dense<0.000000e+00> : vector<64x16xf32>
      %81 = tpu.matmul %78, %80, %cst_40 {dimension_numbers = #tpu.dot_dimension_numbers<[1], [0], [0], [1], [0, 0, 1, 1], [], []>} : vector<64x16xbf16>, vector<16x16xbf16>, vector<64x16xf32> -> vector<64x16xf32>
      %82 = arith.addf %75, %81 : vector<64x16xf32>
      %83 = vector.extract_strided_slice %47 {offsets = [1, 2, 0], sizes = [8, 8, 16], strides = [1, 1, 1]} : vector<10x10x16xf32> to vector<8x8x16xf32>
      %84 = vector.shape_cast %83 : vector<8x8x16xf32> to vector<64x16xf32>
      %85 = arith.truncf %84 : vector<64x16xf32> to vector<64x16xbf16>
      %c5 = arith.constant 5 : index
      %c0_41 = arith.constant 0 : index
      %c0_42 = arith.constant 0 : index
      %86 = vector.load %arg2[%c5, %c0_41, %c0_42] : memref<27x16x16xbf16, #tpu.memory_space<vmem>>, vector<1x16x16xbf16>
      %87 = vector.shape_cast %86 : vector<1x16x16xbf16> to vector<16x16xbf16>
      %cst_43 = arith.constant dense<0.000000e+00> : vector<64x16xf32>
      %88 = tpu.matmul %85, %87, %cst_43 {dimension_numbers = #tpu.dot_dimension_numbers<[1], [0], [0], [1], [0, 0, 1, 1], [], []>} : vector<64x16xbf16>, vector<16x16xbf16>, vector<64x16xf32> -> vector<64x16xf32>
      %89 = arith.addf %82, %88 : vector<64x16xf32>
      %90 = vector.extract_strided_slice %47 {offsets = [2, 0, 0], sizes = [8, 8, 16], strides = [1, 1, 1]} : vector<10x10x16xf32> to vector<8x8x16xf32>
      %91 = vector.shape_cast %90 : vector<8x8x16xf32> to vector<64x16xf32>
      %92 = arith.truncf %91 : vector<64x16xf32> to vector<64x16xbf16>
      %c6 = arith.constant 6 : index
      %c0_44 = arith.constant 0 : index
      %c0_45 = arith.constant 0 : index
      %93 = vector.load %arg2[%c6, %c0_44, %c0_45] : memref<27x16x16xbf16, #tpu.memory_space<vmem>>, vector<1x16x16xbf16>
      %94 = vector.shape_cast %93 : vector<1x16x16xbf16> to vector<16x16xbf16>
      %cst_46 = arith.constant dense<0.000000e+00> : vector<64x16xf32>
      %95 = tpu.matmul %92, %94, %cst_46 {dimension_numbers = #tpu.dot_dimension_numbers<[1], [0], [0], [1], [0, 0, 1, 1], [], []>} : vector<64x16xbf16>, vector<16x16xbf16>, vector<64x16xf32> -> vector<64x16xf32>
      %96 = arith.addf %89, %95 : vector<64x16xf32>
      %97 = vector.extract_strided_slice %47 {offsets = [2, 1, 0], sizes = [8, 8, 16], strides = [1, 1, 1]} : vector<10x10x16xf32> to vector<8x8x16xf32>
      %98 = vector.shape_cast %97 : vector<8x8x16xf32> to vector<64x16xf32>
      %99 = arith.truncf %98 : vector<64x16xf32> to vector<64x16xbf16>
      %c7 = arith.constant 7 : index
      %c0_47 = arith.constant 0 : index
      %c0_48 = arith.constant 0 : index
      %100 = vector.load %arg2[%c7, %c0_47, %c0_48] : memref<27x16x16xbf16, #tpu.memory_space<vmem>>, vector<1x16x16xbf16>
      %101 = vector.shape_cast %100 : vector<1x16x16xbf16> to vector<16x16xbf16>
      %cst_49 = arith.constant dense<0.000000e+00> : vector<64x16xf32>
      %102 = tpu.matmul %99, %101, %cst_49 {dimension_numbers = #tpu.dot_dimension_numbers<[1], [0], [0], [1], [0, 0, 1, 1], [], []>} : vector<64x16xbf16>, vector<16x16xbf16>, vector<64x16xf32> -> vector<64x16xf32>
      %103 = arith.addf %96, %102 : vector<64x16xf32>
      %104 = vector.extract_strided_slice %47 {offsets = [2, 2, 0], sizes = [8, 8, 16], strides = [1, 1, 1]} : vector<10x10x16xf32> to vector<8x8x16xf32>
      %105 = vector.shape_cast %104 : vector<8x8x16xf32> to vector<64x16xf32>
      %106 = arith.truncf %105 : vector<64x16xf32> to vector<64x16xbf16>
      %c8 = arith.constant 8 : index
      %c0_50 = arith.constant 0 : index
      %c0_51 = arith.constant 0 : index
      %107 = vector.load %arg2[%c8, %c0_50, %c0_51] : memref<27x16x16xbf16, #tpu.memory_space<vmem>>, vector<1x16x16xbf16>
      %108 = vector.shape_cast %107 : vector<1x16x16xbf16> to vector<16x16xbf16>
      %cst_52 = arith.constant dense<0.000000e+00> : vector<64x16xf32>
      %109 = tpu.matmul %106, %108, %cst_52 {dimension_numbers = #tpu.dot_dimension_numbers<[1], [0], [0], [1], [0, 0, 1, 1], [], []>} : vector<64x16xbf16>, vector<16x16xbf16>, vector<64x16xf32> -> vector<64x16xf32>
      %110 = arith.addf %103, %109 : vector<64x16xf32>
      %c1_i32_53 = arith.constant 1 : i32
      %111 = arith.addi %23, %c1_i32_53 : i32
      %c0_54 = arith.constant 0 : index
      %112 = arith.index_cast %111 : i32 to index
      %c0_55 = arith.constant 0 : index
      %c0_56 = arith.constant 0 : index
      %c0_57 = arith.constant 0 : index
      %113 = vector.load %arg1[%c0_54, %112, %c0_55, %c0_56, %c0_57] : memref<1x10x10x10x16xf32, #tpu.memory_space<vmem>>, vector<1x1x10x10x16xf32>
      %114 = vector.shape_cast %113 : vector<1x1x10x10x16xf32> to vector<10x10x16xf32>
      %115 = vector.shape_cast %5 : vector<16xf32> to vector<1x1x16xf32>
      %116 = vector.broadcast %115 : vector<1x1x16xf32> to vector<10x10x16xf32>
      %117 = arith.mulf %114, %116 : vector<10x10x16xf32>
      %118 = vector.shape_cast %7 : vector<16xf32> to vector<1x1x16xf32>
      %119 = vector.broadcast %118 : vector<1x1x16xf32> to vector<10x10x16xf32>
      %120 = arith.addf %117, %119 : vector<10x10x16xf32>
      %cst_58 = arith.constant 0.000000e+00 : f32
      %121 = vector.broadcast %cst_58 : f32 to vector<10x10x16xf32>
      %122 = arith.maximumf %120, %121 : vector<10x10x16xf32>
      %c1_i32_59 = arith.constant 1 : i32
      %123 = arith.addi %23, %c1_i32_59 : i32
      %c1_i32_60 = arith.constant 1 : i32
      %124 = arith.cmpi sge, %123, %c1_i32_60 : i32
      %c1_i32_61 = arith.constant 1 : i32
      %125 = arith.addi %23, %c1_i32_61 : i32
      %c8_i32_62 = arith.constant 8 : i32
      %126 = arith.cmpi sle, %125, %c8_i32_62 : i32
      %127 = arith.andi %124, %126 : i1
      %128 = vector.broadcast %127 : i1 to vector<10x10x1xi1>
      %129 = arith.andi %20, %128 : vector<10x10x1xi1>
      %cst_63 = arith.constant 0.000000e+00 : f32
      %130 = vector.shape_cast %129 : vector<10x10x1xi1> to vector<10x10x1xi1>
      %131 = vector.broadcast %130 : vector<10x10x1xi1> to vector<10x10x16xi1>
      %132 = vector.broadcast %cst_63 : f32 to vector<10x10x16xf32>
      %133 = arith.select %131, %122, %132 : vector<10x10x16xi1>, vector<10x10x16xf32>
      %134 = vector.extract_strided_slice %133 {offsets = [0, 0, 0], sizes = [8, 8, 16], strides = [1, 1, 1]} : vector<10x10x16xf32> to vector<8x8x16xf32>
      %135 = vector.shape_cast %134 : vector<8x8x16xf32> to vector<64x16xf32>
      %136 = arith.truncf %135 : vector<64x16xf32> to vector<64x16xbf16>
      %c9 = arith.constant 9 : index
      %c0_64 = arith.constant 0 : index
      %c0_65 = arith.constant 0 : index
      %137 = vector.load %arg2[%c9, %c0_64, %c0_65] : memref<27x16x16xbf16, #tpu.memory_space<vmem>>, vector<1x16x16xbf16>
      %138 = vector.shape_cast %137 : vector<1x16x16xbf16> to vector<16x16xbf16>
      %cst_66 = arith.constant dense<0.000000e+00> : vector<64x16xf32>
      %139 = tpu.matmul %136, %138, %cst_66 {dimension_numbers = #tpu.dot_dimension_numbers<[1], [0], [0], [1], [0, 0, 1, 1], [], []>} : vector<64x16xbf16>, vector<16x16xbf16>, vector<64x16xf32> -> vector<64x16xf32>
      %140 = arith.addf %110, %139 : vector<64x16xf32>
      %141 = vector.extract_strided_slice %133 {offsets = [0, 1, 0], sizes = [8, 8, 16], strides = [1, 1, 1]} : vector<10x10x16xf32> to vector<8x8x16xf32>
      %142 = vector.shape_cast %141 : vector<8x8x16xf32> to vector<64x16xf32>
      %143 = arith.truncf %142 : vector<64x16xf32> to vector<64x16xbf16>
      %c10 = arith.constant 10 : index
      %c0_67 = arith.constant 0 : index
      %c0_68 = arith.constant 0 : index
      %144 = vector.load %arg2[%c10, %c0_67, %c0_68] : memref<27x16x16xbf16, #tpu.memory_space<vmem>>, vector<1x16x16xbf16>
      %145 = vector.shape_cast %144 : vector<1x16x16xbf16> to vector<16x16xbf16>
      %cst_69 = arith.constant dense<0.000000e+00> : vector<64x16xf32>
      %146 = tpu.matmul %143, %145, %cst_69 {dimension_numbers = #tpu.dot_dimension_numbers<[1], [0], [0], [1], [0, 0, 1, 1], [], []>} : vector<64x16xbf16>, vector<16x16xbf16>, vector<64x16xf32> -> vector<64x16xf32>
      %147 = arith.addf %140, %146 : vector<64x16xf32>
      %148 = vector.extract_strided_slice %133 {offsets = [0, 2, 0], sizes = [8, 8, 16], strides = [1, 1, 1]} : vector<10x10x16xf32> to vector<8x8x16xf32>
      %149 = vector.shape_cast %148 : vector<8x8x16xf32> to vector<64x16xf32>
      %150 = arith.truncf %149 : vector<64x16xf32> to vector<64x16xbf16>
      %c11 = arith.constant 11 : index
      %c0_70 = arith.constant 0 : index
      %c0_71 = arith.constant 0 : index
      %151 = vector.load %arg2[%c11, %c0_70, %c0_71] : memref<27x16x16xbf16, #tpu.memory_space<vmem>>, vector<1x16x16xbf16>
      %152 = vector.shape_cast %151 : vector<1x16x16xbf16> to vector<16x16xbf16>
      %cst_72 = arith.constant dense<0.000000e+00> : vector<64x16xf32>
      %153 = tpu.matmul %150, %152, %cst_72 {dimension_numbers = #tpu.dot_dimension_numbers<[1], [0], [0], [1], [0, 0, 1, 1], [], []>} : vector<64x16xbf16>, vector<16x16xbf16>, vector<64x16xf32> -> vector<64x16xf32>
      %154 = arith.addf %147, %153 : vector<64x16xf32>
      %155 = vector.extract_strided_slice %133 {offsets = [1, 0, 0], sizes = [8, 8, 16], strides = [1, 1, 1]} : vector<10x10x16xf32> to vector<8x8x16xf32>
      %156 = vector.shape_cast %155 : vector<8x8x16xf32> to vector<64x16xf32>
      %157 = arith.truncf %156 : vector<64x16xf32> to vector<64x16xbf16>
      %c12 = arith.constant 12 : index
      %c0_73 = arith.constant 0 : index
      %c0_74 = arith.constant 0 : index
      %158 = vector.load %arg2[%c12, %c0_73, %c0_74] : memref<27x16x16xbf16, #tpu.memory_space<vmem>>, vector<1x16x16xbf16>
      %159 = vector.shape_cast %158 : vector<1x16x16xbf16> to vector<16x16xbf16>
      %cst_75 = arith.constant dense<0.000000e+00> : vector<64x16xf32>
      %160 = tpu.matmul %157, %159, %cst_75 {dimension_numbers = #tpu.dot_dimension_numbers<[1], [0], [0], [1], [0, 0, 1, 1], [], []>} : vector<64x16xbf16>, vector<16x16xbf16>, vector<64x16xf32> -> vector<64x16xf32>
      %161 = arith.addf %154, %160 : vector<64x16xf32>
      %162 = vector.extract_strided_slice %133 {offsets = [1, 1, 0], sizes = [8, 8, 16], strides = [1, 1, 1]} : vector<10x10x16xf32> to vector<8x8x16xf32>
      %163 = vector.shape_cast %162 : vector<8x8x16xf32> to vector<64x16xf32>
      %164 = arith.truncf %163 : vector<64x16xf32> to vector<64x16xbf16>
      %c13 = arith.constant 13 : index
      %c0_76 = arith.constant 0 : index
      %c0_77 = arith.constant 0 : index
      %165 = vector.load %arg2[%c13, %c0_76, %c0_77] : memref<27x16x16xbf16, #tpu.memory_space<vmem>>, vector<1x16x16xbf16>
      %166 = vector.shape_cast %165 : vector<1x16x16xbf16> to vector<16x16xbf16>
      %cst_78 = arith.constant dense<0.000000e+00> : vector<64x16xf32>
      %167 = tpu.matmul %164, %166, %cst_78 {dimension_numbers = #tpu.dot_dimension_numbers<[1], [0], [0], [1], [0, 0, 1, 1], [], []>} : vector<64x16xbf16>, vector<16x16xbf16>, vector<64x16xf32> -> vector<64x16xf32>
      %168 = arith.addf %161, %167 : vector<64x16xf32>
      %169 = vector.extract_strided_slice %133 {offsets = [1, 2, 0], sizes = [8, 8, 16], strides = [1, 1, 1]} : vector<10x10x16xf32> to vector<8x8x16xf32>
      %170 = vector.shape_cast %169 : vector<8x8x16xf32> to vector<64x16xf32>
      %171 = arith.truncf %170 : vector<64x16xf32> to vector<64x16xbf16>
      %c14 = arith.constant 14 : index
      %c0_79 = arith.constant 0 : index
      %c0_80 = arith.constant 0 : index
      %172 = vector.load %arg2[%c14, %c0_79, %c0_80] : memref<27x16x16xbf16, #tpu.memory_space<vmem>>, vector<1x16x16xbf16>
      %173 = vector.shape_cast %172 : vector<1x16x16xbf16> to vector<16x16xbf16>
      %cst_81 = arith.constant dense<0.000000e+00> : vector<64x16xf32>
      %174 = tpu.matmul %171, %173, %cst_81 {dimension_numbers = #tpu.dot_dimension_numbers<[1], [0], [0], [1], [0, 0, 1, 1], [], []>} : vector<64x16xbf16>, vector<16x16xbf16>, vector<64x16xf32> -> vector<64x16xf32>
      %175 = arith.addf %168, %174 : vector<64x16xf32>
      %176 = vector.extract_strided_slice %133 {offsets = [2, 0, 0], sizes = [8, 8, 16], strides = [1, 1, 1]} : vector<10x10x16xf32> to vector<8x8x16xf32>
      %177 = vector.shape_cast %176 : vector<8x8x16xf32> to vector<64x16xf32>
      %178 = arith.truncf %177 : vector<64x16xf32> to vector<64x16xbf16>
      %c15 = arith.constant 15 : index
      %c0_82 = arith.constant 0 : index
      %c0_83 = arith.constant 0 : index
      %179 = vector.load %arg2[%c15, %c0_82, %c0_83] : memref<27x16x16xbf16, #tpu.memory_space<vmem>>, vector<1x16x16xbf16>
      %180 = vector.shape_cast %179 : vector<1x16x16xbf16> to vector<16x16xbf16>
      %cst_84 = arith.constant dense<0.000000e+00> : vector<64x16xf32>
      %181 = tpu.matmul %178, %180, %cst_84 {dimension_numbers = #tpu.dot_dimension_numbers<[1], [0], [0], [1], [0, 0, 1, 1], [], []>} : vector<64x16xbf16>, vector<16x16xbf16>, vector<64x16xf32> -> vector<64x16xf32>
      %182 = arith.addf %175, %181 : vector<64x16xf32>
      %183 = vector.extract_strided_slice %133 {offsets = [2, 1, 0], sizes = [8, 8, 16], strides = [1, 1, 1]} : vector<10x10x16xf32> to vector<8x8x16xf32>
      %184 = vector.shape_cast %183 : vector<8x8x16xf32> to vector<64x16xf32>
      %185 = arith.truncf %184 : vector<64x16xf32> to vector<64x16xbf16>
      %c16 = arith.constant 16 : index
      %c0_85 = arith.constant 0 : index
      %c0_86 = arith.constant 0 : index
      %186 = vector.load %arg2[%c16, %c0_85, %c0_86] : memref<27x16x16xbf16, #tpu.memory_space<vmem>>, vector<1x16x16xbf16>
      %187 = vector.shape_cast %186 : vector<1x16x16xbf16> to vector<16x16xbf16>
      %cst_87 = arith.constant dense<0.000000e+00> : vector<64x16xf32>
      %188 = tpu.matmul %185, %187, %cst_87 {dimension_numbers = #tpu.dot_dimension_numbers<[1], [0], [0], [1], [0, 0, 1, 1], [], []>} : vector<64x16xbf16>, vector<16x16xbf16>, vector<64x16xf32> -> vector<64x16xf32>
      %189 = arith.addf %182, %188 : vector<64x16xf32>
      %190 = vector.extract_strided_slice %133 {offsets = [2, 2, 0], sizes = [8, 8, 16], strides = [1, 1, 1]} : vector<10x10x16xf32> to vector<8x8x16xf32>
      %191 = vector.shape_cast %190 : vector<8x8x16xf32> to vector<64x16xf32>
      %192 = arith.truncf %191 : vector<64x16xf32> to vector<64x16xbf16>
      %c17 = arith.constant 17 : index
      %c0_88 = arith.constant 0 : index
      %c0_89 = arith.constant 0 : index
      %193 = vector.load %arg2[%c17, %c0_88, %c0_89] : memref<27x16x16xbf16, #tpu.memory_space<vmem>>, vector<1x16x16xbf16>
      %194 = vector.shape_cast %193 : vector<1x16x16xbf16> to vector<16x16xbf16>
      %cst_90 = arith.constant dense<0.000000e+00> : vector<64x16xf32>
      %195 = tpu.matmul %192, %194, %cst_90 {dimension_numbers = #tpu.dot_dimension_numbers<[1], [0], [0], [1], [0, 0, 1, 1], [], []>} : vector<64x16xbf16>, vector<16x16xbf16>, vector<64x16xf32> -> vector<64x16xf32>
      %196 = arith.addf %189, %195 : vector<64x16xf32>
      %c2_i32 = arith.constant 2 : i32
      %197 = arith.addi %23, %c2_i32 : i32
      %c0_91 = arith.constant 0 : index
      %198 = arith.index_cast %197 : i32 to index
      %c0_92 = arith.constant 0 : index
      %c0_93 = arith.constant 0 : index
      %c0_94 = arith.constant 0 : index
      %199 = vector.load %arg1[%c0_91, %198, %c0_92, %c0_93, %c0_94] : memref<1x10x10x10x16xf32, #tpu.memory_space<vmem>>, vector<1x1x10x10x16xf32>
      %200 = vector.shape_cast %199 : vector<1x1x10x10x16xf32> to vector<10x10x16xf32>
      %201 = vector.shape_cast %5 : vector<16xf32> to vector<1x1x16xf32>
      %202 = vector.broadcast %201 : vector<1x1x16xf32> to vector<10x10x16xf32>
      %203 = arith.mulf %200, %202 : vector<10x10x16xf32>
      %204 = vector.shape_cast %7 : vector<16xf32> to vector<1x1x16xf32>
      %205 = vector.broadcast %204 : vector<1x1x16xf32> to vector<10x10x16xf32>
      %206 = arith.addf %203, %205 : vector<10x10x16xf32>
      %cst_95 = arith.constant 0.000000e+00 : f32
      %207 = vector.broadcast %cst_95 : f32 to vector<10x10x16xf32>
      %208 = arith.maximumf %206, %207 : vector<10x10x16xf32>
      %c2_i32_96 = arith.constant 2 : i32
      %209 = arith.addi %23, %c2_i32_96 : i32
      %c1_i32_97 = arith.constant 1 : i32
      %210 = arith.cmpi sge, %209, %c1_i32_97 : i32
      %c2_i32_98 = arith.constant 2 : i32
      %211 = arith.addi %23, %c2_i32_98 : i32
      %c8_i32_99 = arith.constant 8 : i32
      %212 = arith.cmpi sle, %211, %c8_i32_99 : i32
      %213 = arith.andi %210, %212 : i1
      %214 = vector.broadcast %213 : i1 to vector<10x10x1xi1>
      %215 = arith.andi %20, %214 : vector<10x10x1xi1>
      %cst_100 = arith.constant 0.000000e+00 : f32
      %216 = vector.shape_cast %215 : vector<10x10x1xi1> to vector<10x10x1xi1>
      %217 = vector.broadcast %216 : vector<10x10x1xi1> to vector<10x10x16xi1>
      %218 = vector.broadcast %cst_100 : f32 to vector<10x10x16xf32>
      %219 = arith.select %217, %208, %218 : vector<10x10x16xi1>, vector<10x10x16xf32>
      %220 = vector.extract_strided_slice %219 {offsets = [0, 0, 0], sizes = [8, 8, 16], strides = [1, 1, 1]} : vector<10x10x16xf32> to vector<8x8x16xf32>
      %221 = vector.shape_cast %220 : vector<8x8x16xf32> to vector<64x16xf32>
      %222 = arith.truncf %221 : vector<64x16xf32> to vector<64x16xbf16>
      %c18 = arith.constant 18 : index
      %c0_101 = arith.constant 0 : index
      %c0_102 = arith.constant 0 : index
      %223 = vector.load %arg2[%c18, %c0_101, %c0_102] : memref<27x16x16xbf16, #tpu.memory_space<vmem>>, vector<1x16x16xbf16>
      %224 = vector.shape_cast %223 : vector<1x16x16xbf16> to vector<16x16xbf16>
      %cst_103 = arith.constant dense<0.000000e+00> : vector<64x16xf32>
      %225 = tpu.matmul %222, %224, %cst_103 {dimension_numbers = #tpu.dot_dimension_numbers<[1], [0], [0], [1], [0, 0, 1, 1], [], []>} : vector<64x16xbf16>, vector<16x16xbf16>, vector<64x16xf32> -> vector<64x16xf32>
      %226 = arith.addf %196, %225 : vector<64x16xf32>
      %227 = vector.extract_strided_slice %219 {offsets = [0, 1, 0], sizes = [8, 8, 16], strides = [1, 1, 1]} : vector<10x10x16xf32> to vector<8x8x16xf32>
      %228 = vector.shape_cast %227 : vector<8x8x16xf32> to vector<64x16xf32>
      %229 = arith.truncf %228 : vector<64x16xf32> to vector<64x16xbf16>
      %c19 = arith.constant 19 : index
      %c0_104 = arith.constant 0 : index
      %c0_105 = arith.constant 0 : index
      %230 = vector.load %arg2[%c19, %c0_104, %c0_105] : memref<27x16x16xbf16, #tpu.memory_space<vmem>>, vector<1x16x16xbf16>
      %231 = vector.shape_cast %230 : vector<1x16x16xbf16> to vector<16x16xbf16>
      %cst_106 = arith.constant dense<0.000000e+00> : vector<64x16xf32>
      %232 = tpu.matmul %229, %231, %cst_106 {dimension_numbers = #tpu.dot_dimension_numbers<[1], [0], [0], [1], [0, 0, 1, 1], [], []>} : vector<64x16xbf16>, vector<16x16xbf16>, vector<64x16xf32> -> vector<64x16xf32>
      %233 = arith.addf %226, %232 : vector<64x16xf32>
      %234 = vector.extract_strided_slice %219 {offsets = [0, 2, 0], sizes = [8, 8, 16], strides = [1, 1, 1]} : vector<10x10x16xf32> to vector<8x8x16xf32>
      %235 = vector.shape_cast %234 : vector<8x8x16xf32> to vector<64x16xf32>
      %236 = arith.truncf %235 : vector<64x16xf32> to vector<64x16xbf16>
      %c20 = arith.constant 20 : index
      %c0_107 = arith.constant 0 : index
      %c0_108 = arith.constant 0 : index
      %237 = vector.load %arg2[%c20, %c0_107, %c0_108] : memref<27x16x16xbf16, #tpu.memory_space<vmem>>, vector<1x16x16xbf16>
      %238 = vector.shape_cast %237 : vector<1x16x16xbf16> to vector<16x16xbf16>
      %cst_109 = arith.constant dense<0.000000e+00> : vector<64x16xf32>
      %239 = tpu.matmul %236, %238, %cst_109 {dimension_numbers = #tpu.dot_dimension_numbers<[1], [0], [0], [1], [0, 0, 1, 1], [], []>} : vector<64x16xbf16>, vector<16x16xbf16>, vector<64x16xf32> -> vector<64x16xf32>
      %240 = arith.addf %233, %239 : vector<64x16xf32>
      %241 = vector.extract_strided_slice %219 {offsets = [1, 0, 0], sizes = [8, 8, 16], strides = [1, 1, 1]} : vector<10x10x16xf32> to vector<8x8x16xf32>
      %242 = vector.shape_cast %241 : vector<8x8x16xf32> to vector<64x16xf32>
      %243 = arith.truncf %242 : vector<64x16xf32> to vector<64x16xbf16>
      %c21 = arith.constant 21 : index
      %c0_110 = arith.constant 0 : index
      %c0_111 = arith.constant 0 : index
      %244 = vector.load %arg2[%c21, %c0_110, %c0_111] : memref<27x16x16xbf16, #tpu.memory_space<vmem>>, vector<1x16x16xbf16>
      %245 = vector.shape_cast %244 : vector<1x16x16xbf16> to vector<16x16xbf16>
      %cst_112 = arith.constant dense<0.000000e+00> : vector<64x16xf32>
      %246 = tpu.matmul %243, %245, %cst_112 {dimension_numbers = #tpu.dot_dimension_numbers<[1], [0], [0], [1], [0, 0, 1, 1], [], []>} : vector<64x16xbf16>, vector<16x16xbf16>, vector<64x16xf32> -> vector<64x16xf32>
      %247 = arith.addf %240, %246 : vector<64x16xf32>
      %248 = vector.extract_strided_slice %219 {offsets = [1, 1, 0], sizes = [8, 8, 16], strides = [1, 1, 1]} : vector<10x10x16xf32> to vector<8x8x16xf32>
      %249 = vector.shape_cast %248 : vector<8x8x16xf32> to vector<64x16xf32>
      %250 = arith.truncf %249 : vector<64x16xf32> to vector<64x16xbf16>
      %c22 = arith.constant 22 : index
      %c0_113 = arith.constant 0 : index
      %c0_114 = arith.constant 0 : index
      %251 = vector.load %arg2[%c22, %c0_113, %c0_114] : memref<27x16x16xbf16, #tpu.memory_space<vmem>>, vector<1x16x16xbf16>
      %252 = vector.shape_cast %251 : vector<1x16x16xbf16> to vector<16x16xbf16>
      %cst_115 = arith.constant dense<0.000000e+00> : vector<64x16xf32>
      %253 = tpu.matmul %250, %252, %cst_115 {dimension_numbers = #tpu.dot_dimension_numbers<[1], [0], [0], [1], [0, 0, 1, 1], [], []>} : vector<64x16xbf16>, vector<16x16xbf16>, vector<64x16xf32> -> vector<64x16xf32>
      %254 = arith.addf %247, %253 : vector<64x16xf32>
      %255 = vector.extract_strided_slice %219 {offsets = [1, 2, 0], sizes = [8, 8, 16], strides = [1, 1, 1]} : vector<10x10x16xf32> to vector<8x8x16xf32>
      %256 = vector.shape_cast %255 : vector<8x8x16xf32> to vector<64x16xf32>
      %257 = arith.truncf %256 : vector<64x16xf32> to vector<64x16xbf16>
      %c23 = arith.constant 23 : index
      %c0_116 = arith.constant 0 : index
      %c0_117 = arith.constant 0 : index
      %258 = vector.load %arg2[%c23, %c0_116, %c0_117] : memref<27x16x16xbf16, #tpu.memory_space<vmem>>, vector<1x16x16xbf16>
      %259 = vector.shape_cast %258 : vector<1x16x16xbf16> to vector<16x16xbf16>
      %cst_118 = arith.constant dense<0.000000e+00> : vector<64x16xf32>
      %260 = tpu.matmul %257, %259, %cst_118 {dimension_numbers = #tpu.dot_dimension_numbers<[1], [0], [0], [1], [0, 0, 1, 1], [], []>} : vector<64x16xbf16>, vector<16x16xbf16>, vector<64x16xf32> -> vector<64x16xf32>
      %261 = arith.addf %254, %260 : vector<64x16xf32>
      %262 = vector.extract_strided_slice %219 {offsets = [2, 0, 0], sizes = [8, 8, 16], strides = [1, 1, 1]} : vector<10x10x16xf32> to vector<8x8x16xf32>
      %263 = vector.shape_cast %262 : vector<8x8x16xf32> to vector<64x16xf32>
      %264 = arith.truncf %263 : vector<64x16xf32> to vector<64x16xbf16>
      %c24 = arith.constant 24 : index
      %c0_119 = arith.constant 0 : index
      %c0_120 = arith.constant 0 : index
      %265 = vector.load %arg2[%c24, %c0_119, %c0_120] : memref<27x16x16xbf16, #tpu.memory_space<vmem>>, vector<1x16x16xbf16>
      %266 = vector.shape_cast %265 : vector<1x16x16xbf16> to vector<16x16xbf16>
      %cst_121 = arith.constant dense<0.000000e+00> : vector<64x16xf32>
      %267 = tpu.matmul %264, %266, %cst_121 {dimension_numbers = #tpu.dot_dimension_numbers<[1], [0], [0], [1], [0, 0, 1, 1], [], []>} : vector<64x16xbf16>, vector<16x16xbf16>, vector<64x16xf32> -> vector<64x16xf32>
      %268 = arith.addf %261, %267 : vector<64x16xf32>
      %269 = vector.extract_strided_slice %219 {offsets = [2, 1, 0], sizes = [8, 8, 16], strides = [1, 1, 1]} : vector<10x10x16xf32> to vector<8x8x16xf32>
      %270 = vector.shape_cast %269 : vector<8x8x16xf32> to vector<64x16xf32>
      %271 = arith.truncf %270 : vector<64x16xf32> to vector<64x16xbf16>
      %c25 = arith.constant 25 : index
      %c0_122 = arith.constant 0 : index
      %c0_123 = arith.constant 0 : index
      %272 = vector.load %arg2[%c25, %c0_122, %c0_123] : memref<27x16x16xbf16, #tpu.memory_space<vmem>>, vector<1x16x16xbf16>
      %273 = vector.shape_cast %272 : vector<1x16x16xbf16> to vector<16x16xbf16>
      %cst_124 = arith.constant dense<0.000000e+00> : vector<64x16xf32>
      %274 = tpu.matmul %271, %273, %cst_124 {dimension_numbers = #tpu.dot_dimension_numbers<[1], [0], [0], [1], [0, 0, 1, 1], [], []>} : vector<64x16xbf16>, vector<16x16xbf16>, vector<64x16xf32> -> vector<64x16xf32>
      %275 = arith.addf %268, %274 : vector<64x16xf32>
      %276 = vector.extract_strided_slice %219 {offsets = [2, 2, 0], sizes = [8, 8, 16], strides = [1, 1, 1]} : vector<10x10x16xf32> to vector<8x8x16xf32>
      %277 = vector.shape_cast %276 : vector<8x8x16xf32> to vector<64x16xf32>
      %278 = arith.truncf %277 : vector<64x16xf32> to vector<64x16xbf16>
      %c26 = arith.constant 26 : index
      %c0_125 = arith.constant 0 : index
      %c0_126 = arith.constant 0 : index
      %279 = vector.load %arg2[%c26, %c0_125, %c0_126] : memref<27x16x16xbf16, #tpu.memory_space<vmem>>, vector<1x16x16xbf16>
      %280 = vector.shape_cast %279 : vector<1x16x16xbf16> to vector<16x16xbf16>
      %cst_127 = arith.constant dense<0.000000e+00> : vector<64x16xf32>
      %281 = tpu.matmul %278, %280, %cst_127 {dimension_numbers = #tpu.dot_dimension_numbers<[1], [0], [0], [1], [0, 0, 1, 1], [], []>} : vector<64x16xbf16>, vector<16x16xbf16>, vector<64x16xf32> -> vector<64x16xf32>
      %282 = arith.addf %275, %281 : vector<64x16xf32>
      %283 = vector.shape_cast %282 : vector<64x16xf32> to vector<1x64x16xf32>
      %c0_128 = arith.constant 0 : index
      %284 = arith.index_cast %23 : i32 to index
      %c0_129 = arith.constant 0 : index
      %c0_130 = arith.constant 0 : index
      %285 = vector.load %arg5[%c0_128, %284, %c0_129, %c0_130] : memref<1x8x64x16xf32, #tpu.memory_space<vmem>>, vector<1x1x64x16xf32>
      %286 = vector.shape_cast %285 : vector<1x1x64x16xf32> to vector<1x64x16xf32>
      %287 = vector.shape_cast %283 : vector<1x64x16xf32> to vector<1x1x64x16xf32>
      tpu.vector_store %arg5[%c0_128, %284, %c0_129, %c0_130], %287 {strides = array<i32>} : memref<1x8x64x16xf32, #tpu.memory_space<vmem>>, vector<1x1x64x16xf32>,
      %c0_131 = arith.constant 0 : index
      %c0_132 = arith.constant 0 : index
      %c0_133 = arith.constant 0 : index
      %288 = vector.load %arg6[%c0_131, %c0_132, %c0_133] : memref<1x8x16xf32, #tpu.memory_space<vmem>>, vector<1x1x16xf32>
      %289 = vector.shape_cast %288 : vector<1x1x16xf32> to vector<1x16xf32>
      %cst_134 = arith.constant dense<0.000000e+00> : vector<16xf32>
      %290 = vector.multi_reduction <add>, %282, %cst_134 [0] : vector<64x16xf32> to vector<16xf32>
      %291 = vector.shape_cast %290 : vector<16xf32> to vector<1x16xf32>
      %292 = arith.addf %289, %291 : vector<1x16xf32>
      %c0_135 = arith.constant 0 : index
      %c0_136 = arith.constant 0 : index
      %c0_137 = arith.constant 0 : index
      %293 = vector.load %arg6[%c0_135, %c0_136, %c0_137] : memref<1x8x16xf32, #tpu.memory_space<vmem>>, vector<1x1x16xf32>
      %294 = vector.shape_cast %293 : vector<1x1x16xf32> to vector<1x16xf32>
      %295 = vector.shape_cast %292 : vector<1x16xf32> to vector<1x1x16xf32>
      tpu.vector_store %arg6[%c0_135, %c0_136, %c0_137], %295 {strides = array<i32>} : memref<1x8x16xf32, #tpu.memory_space<vmem>>, vector<1x1x16xf32>,
      %c0_138 = arith.constant 0 : index
      %c1_139 = arith.constant 1 : index
      %c0_140 = arith.constant 0 : index
      %296 = vector.load %arg6[%c0_138, %c1_139, %c0_140] : memref<1x8x16xf32, #tpu.memory_space<vmem>>, vector<1x1x16xf32>
      %297 = vector.shape_cast %296 : vector<1x1x16xf32> to vector<1x16xf32>
      %298 = arith.mulf %282, %282 : vector<64x16xf32>
      %cst_141 = arith.constant dense<0.000000e+00> : vector<16xf32>
      %299 = vector.multi_reduction <add>, %298, %cst_141 [0] : vector<64x16xf32> to vector<16xf32>
      %300 = vector.shape_cast %299 : vector<16xf32> to vector<1x16xf32>
      %301 = arith.addf %297, %300 : vector<1x16xf32>
      %c0_142 = arith.constant 0 : index
      %c1_143 = arith.constant 1 : index
      %c0_144 = arith.constant 0 : index
      %302 = vector.load %arg6[%c0_142, %c1_143, %c0_144] : memref<1x8x16xf32, #tpu.memory_space<vmem>>, vector<1x1x16xf32>
      %303 = vector.shape_cast %302 : vector<1x1x16xf32> to vector<1x16xf32>
      %304 = vector.shape_cast %301 : vector<1x16xf32> to vector<1x1x16xf32>
      tpu.vector_store %arg6[%c0_142, %c1_143, %c0_144], %304 {strides = array<i32>} : memref<1x8x16xf32, #tpu.memory_space<vmem>>, vector<1x1x16xf32>,
    }
    %c8_i32_10 = arith.constant 8 : i32
    return
  }
  func.func @transform_0(%arg0: i32) -> (i32, i32, i32, i32, i32) {
    %c0_i32 = arith.constant 0 : i32
    %c0_i32_0 = arith.constant 0 : i32
    %c0_i32_1 = arith.constant 0 : i32
    %c0_i32_2 = arith.constant 0 : i32
    %c0_i32_3 = arith.constant 0 : i32
    return %arg0, %c0_i32, %c0_i32_0, %c0_i32_1, %c0_i32_2 : i32, i32, i32, i32, i32
  }
  func.func @transform_1(%arg0: i32) -> (i32, i32, i32) {
    %c0_i32 = arith.constant 0 : i32
    %c0_i32_0 = arith.constant 0 : i32
    %c0_i32_1 = arith.constant 0 : i32
    %c0_i32_2 = arith.constant 0 : i32
    return %c0_i32, %c0_i32_0, %c0_i32_1 : i32, i32, i32
  }
  func.func @transform_2(%arg0: i32) -> (i32, i32) {
    %c0_i32 = arith.constant 0 : i32
    %c0_i32_0 = arith.constant 0 : i32
    %c0_i32_1 = arith.constant 0 : i32
    return %c0_i32, %c0_i32_0 : i32, i32
  }
  func.func @transform_3(%arg0: i32) -> (i32, i32) {
    %c0_i32 = arith.constant 0 : i32
    %c0_i32_0 = arith.constant 0 : i32
    %c0_i32_1 = arith.constant 0 : i32
    return %c0_i32, %c0_i32_0 : i32, i32
  }
  func.func @transform_4(%arg0: i32) -> (i32, i32, i32, i32) {
    %c0_i32 = arith.constant 0 : i32
    %c0_i32_0 = arith.constant 0 : i32
    %c0_i32_1 = arith.constant 0 : i32
    %c0_i32_2 = arith.constant 0 : i32
    return %arg0, %c0_i32, %c0_i32_0, %c0_i32_1 : i32, i32, i32, i32
  }
  func.func @transform_5(%arg0: i32) -> (i32, i32, i32) {
    %c0_i32 = arith.constant 0 : i32
    %c0_i32_0 = arith.constant 0 : i32
    %c0_i32_1 = arith.constant 0 : i32
    return %arg0, %c0_i32, %c0_i32_0 : i32, i32, i32
  }
}

module attributes {stable_mosaic.version = 11 : i64} {
  func.func @_affine_add_kernel(%arg0: i32, %arg1: memref<128x128xf32, #tpu.memory_space<vmem>>, %arg2: memref<1x128xf32, #tpu.memory_space<vmem>>, %arg3: memref<1x128xf32, #tpu.memory_space<vmem>>, %arg4: memref<128x128xf32, #tpu.memory_space<vmem>>, %arg5: memref<1x128xf32, #tpu.memory_space<vmem>>, %arg6: memref<1x128xf32, #tpu.memory_space<vmem>>, %arg7: memref<128x128xf32, #tpu.memory_space<vmem>>) attributes {dimension_semantics = [#tpu.dimension_semantics<parallel>], iteration_bounds = array<i64: 1>, scalar_prefetch = 0 : i64, scratch_operands = 0 : i64, tpu.core_type = #tpu.core_type<tc>, window_params = [{transform_indices = @transform_0, window_bounds = array<i64: 128, 128>}, {pipeline_mode = #tpu.pipeline_mode<synchronous>, transform_indices = @transform_1, window_bounds = array<i64: 1, 128>}, {pipeline_mode = #tpu.pipeline_mode<synchronous>, transform_indices = @transform_2, window_bounds = array<i64: 1, 128>}, {transform_indices = @transform_3, window_bounds = array<i64: 128, 128>}, {pipeline_mode = #tpu.pipeline_mode<synchronous>, transform_indices = @transform_4, window_bounds = array<i64: 1, 128>}, {pipeline_mode = #tpu.pipeline_mode<synchronous>, transform_indices = @transform_5, window_bounds = array<i64: 1, 128>}, {transform_indices = @transform_6, window_bounds = array<i64: 128, 128>}]} {
    %c0 = arith.constant 0 : index
    %c0_0 = arith.constant 0 : index
    %0 = vector.load %arg1[%c0, %c0_0] : memref<128x128xf32, #tpu.memory_space<vmem>>, vector<128x128xf32>
    %c0_1 = arith.constant 0 : index
    %c0_2 = arith.constant 0 : index
    %1 = vector.load %arg2[%c0_1, %c0_2] : memref<1x128xf32, #tpu.memory_space<vmem>>, vector<1x128xf32>
    %2 = vector.broadcast %1 : vector<1x128xf32> to vector<128x128xf32>
    %3 = arith.mulf %0, %2 : vector<128x128xf32>
    %c0_3 = arith.constant 0 : index
    %c0_4 = arith.constant 0 : index
    %4 = vector.load %arg3[%c0_3, %c0_4] : memref<1x128xf32, #tpu.memory_space<vmem>>, vector<1x128xf32>
    %5 = vector.broadcast %4 : vector<1x128xf32> to vector<128x128xf32>
    %6 = arith.addf %3, %5 : vector<128x128xf32>
    %cst = arith.constant 0.000000e+00 : f32
    %7 = vector.broadcast %cst : f32 to vector<128x128xf32>
    %8 = arith.maximumf %6, %7 : vector<128x128xf32>
    %c0_5 = arith.constant 0 : index
    %c0_6 = arith.constant 0 : index
    %9 = vector.load %arg4[%c0_5, %c0_6] : memref<128x128xf32, #tpu.memory_space<vmem>>, vector<128x128xf32>
    %c0_7 = arith.constant 0 : index
    %c0_8 = arith.constant 0 : index
    %10 = vector.load %arg5[%c0_7, %c0_8] : memref<1x128xf32, #tpu.memory_space<vmem>>, vector<1x128xf32>
    %11 = vector.broadcast %10 : vector<1x128xf32> to vector<128x128xf32>
    %12 = arith.mulf %9, %11 : vector<128x128xf32>
    %c0_9 = arith.constant 0 : index
    %c0_10 = arith.constant 0 : index
    %13 = vector.load %arg6[%c0_9, %c0_10] : memref<1x128xf32, #tpu.memory_space<vmem>>, vector<1x128xf32>
    %14 = vector.broadcast %13 : vector<1x128xf32> to vector<128x128xf32>
    %15 = arith.addf %12, %14 : vector<128x128xf32>
    %16 = arith.addf %8, %15 : vector<128x128xf32>
    %c0_11 = arith.constant 0 : index
    %c0_12 = arith.constant 0 : index
    %17 = vector.load %arg7[%c0_11, %c0_12] : memref<128x128xf32, #tpu.memory_space<vmem>>, vector<128x128xf32>
    tpu.vector_store %arg7[%c0_11, %c0_12], %16 {strides = array<i32>} : memref<128x128xf32, #tpu.memory_space<vmem>>, vector<128x128xf32>,
    return
  }
  func.func @transform_0(%arg0: i32) -> (i32, i32) {
    %c0_i32 = arith.constant 0 : i32
    %c0_i32_0 = arith.constant 0 : i32
    return %arg0, %c0_i32 : i32, i32
  }
  func.func @transform_1(%arg0: i32) -> (i32, i32) {
    %c0_i32 = arith.constant 0 : i32
    %c0_i32_0 = arith.constant 0 : i32
    %c0_i32_1 = arith.constant 0 : i32
    return %c0_i32, %c0_i32_0 : i32, i32
  }
  func.func @transform_2(%arg0: i32) -> (i32, i32) {
    %c0_i32 = arith.constant 0 : i32
    %c0_i32_0 = arith.constant 0 : i32
    %c0_i32_1 = arith.constant 0 : i32
    return %c0_i32, %c0_i32_0 : i32, i32
  }
  func.func @transform_3(%arg0: i32) -> (i32, i32) {
    %c0_i32 = arith.constant 0 : i32
    %c0_i32_0 = arith.constant 0 : i32
    return %arg0, %c0_i32 : i32, i32
  }
  func.func @transform_4(%arg0: i32) -> (i32, i32) {
    %c0_i32 = arith.constant 0 : i32
    %c0_i32_0 = arith.constant 0 : i32
    %c0_i32_1 = arith.constant 0 : i32
    return %c0_i32, %c0_i32_0 : i32, i32
  }
  func.func @transform_5(%arg0: i32) -> (i32, i32) {
    %c0_i32 = arith.constant 0 : i32
    %c0_i32_0 = arith.constant 0 : i32
    %c0_i32_1 = arith.constant 0 : i32
    return %c0_i32, %c0_i32_0 : i32, i32
  }
  func.func @transform_6(%arg0: i32) -> (i32, i32) {
    %c0_i32 = arith.constant 0 : i32
    %c0_i32_0 = arith.constant 0 : i32
    return %arg0, %c0_i32 : i32, i32
  }
}

</mosaic_0001>

<bundles_post_ra>
// kernel: tile.37
= control target key start
LH: loop header
LB: loop body
LE: loop exit
PB: predicated region body
PF: predicated region fallthrough
CT: control target
= control target key end

     0   :  { %s22_s0 = inlined_call_operand.vmem [shape: f32[16], index: 0, kind: input, shape index: {}]   ;;  %s23_s1 = inlined_call_operand.vmem [shape: f32[8,16], index: 1, kind: output, shape index: {}]  }
   0x1   :  { %v4_v0 = vld [vmem:[%s22_s0] ss:$0 sm:$0xff] }
   0x2   :  { %5 = vst [vmem:[%s23_s1] sm:$0xff] %v4_v0 }

// kernel: tile.39
= control target key start
LH: loop header
LB: loop body
LE: loop exit
PB: predicated region body
PF: predicated region fallthrough
CT: control target
= control target key end

     0   :  { %s67_s10 = smov 112   ;;  %s68_s11 = smov 80   ;;  %vm3_vm0 = vcmask 130048   ;;  %vm9_vm1 = vcmask 1048448   ;;  %vm15_vm2 = vcmask 917248   ;;  %vm21_vm3 = vcmask 786048   ;;  %s111_s0 = inlined_call_operand.vmem [shape: f32[8,16], index: 0, kind: input, shape index: {}]   ;;  %s112_s1 = inlined_call_operand.vmem [shape: f32[1,128], index: 1, kind: output, shape index: {}]  }
   0x1   :  { %v53_v0 = vld [vmem:[%s111_s0 + $0x7] sm:$0x1]   ;;  %v55_v1 = vld [vmem:[%s111_s0 + $0x5] sm:$0x1]   ;;  %v54_v2 = vld [vmem:[%s111_s0 + $0x6] sm:$0x1]  }
   0x2   :  { %7 = vrot.lane.b32.xlu0 %v53_v0, %s67_s10  ;;  %19 = vrot.lane.b32.xlu1 %v55_v1, %s68_s11  ;;  %v56_v3 = vld [vmem:[%s111_s0 + $0x4] sm:$0x1]   ;;  %v2_v4 = vld [vmem:[%s111_s0] sm:$0x1]   ;;  %s69_s18 = smov 96   ;;  %s70_s19 = smov 64  }
   0x3   :  { %4 = vst.msk [vmem:[#allocation0] sm:$0x1] %vm3_vm0, %v2_v4   ;;  %v57_v5 = vld [vmem:[%s111_s0 + $0x3] sm:$0x1]   ;;  %v58_v6 = vld [vmem:[%s111_s0 + $0x2] sm:$0x1]  }
   0x4   :  { %s71_s24 = smov 48   ;;  %s72_s25 = smov 32   ;;  %v59_v7 = vld [vmem:[%s111_s0 + $0x1] sm:$0x1]   ;;  %vm27_vm4 = vcmask 654848   ;;  %vm33_vm5 = vcmask 523648  }
   0x5   :  { %s73_s0 = smov 16   ;;  %vm39_vm6 = vcmask 392448   ;;  %vm45_vm7 = vcmask 261248  }
   0x6   :  { %13 = vrot.lane.b32.xlu0 %v54_v2, %s69_s18  ;;  %25 = vrot.lane.b32.xlu1 %v56_v3, %s70_s19 }
   0xa   :  { %31 = vrot.lane.b32.xlu0 %v57_v5, %s71_s24  ;;  %37 = vrot.lane.b32.xlu1 %v58_v6, %s72_s25 }
   0xe   :  { %43 = vrot.lane.b32.xlu0 %v59_v7, %s73_s0 }
  0x74   :  { %v8_v8 = vpop.permute.xlu0 %7   ;;  %v20_v9 = vpop.permute.xlu1 %19  }
  0x75   :  { %10 = vst.msk [vmem:[#allocation0] sm:$0x1] %vm9_vm1, %v8_v8  }
  0x78   :  { %v14_v10 = vpop.permute.xlu0 %13   ;;  %v26_v11 = vpop.permute.xlu1 %25  }
  0x79   :  { %16 = vst.msk [vmem:[#allocation0] sm:$0x1] %vm15_vm2, %v14_v10  }
  0x7a   :  { %22 = vst.msk [vmem:[#allocation0] sm:$0x1] %vm21_vm3, %v20_v9  }
  0x7b   :  { %28 = vst.msk [vmem:[#allocation0] sm:$0x1] %vm27_vm4, %v26_v11  }
  0x7c   :  { %v32_v12 = vpop.permute.xlu0 %31   ;;  %v38_v13 = vpop.permute.xlu1 %37  }
  0x7d   :  { %34 = vst.msk [vmem:[#allocation0] sm:$0x1] %vm33_vm5, %v32_v12  }
  0x7e   :  { %40 = vst.msk [vmem:[#allocation0] sm:$0x1] %vm39_vm6, %v38_v13  }
  0x80   :  { %v44_v14 = vpop.permute.xlu0 %43  }
  0x81   :  { %46 = vst.msk [vmem:[#allocation0] sm:$0x1] %vm45_vm7, %v44_v14  }
  0x88   :  { %v50_v15 = vld [vmem:[#allocation0] sm:$0x1] }
  0x89   :  { %52 = vst [vmem:[%s112_s1] sm:$0x1] %v50_v15 }

// kernel: _lambda_.7
= control target key start
LH: loop header
LB: loop body
LE: loop exit
PB: predicated region body
PF: predicated region fallthrough
CT: control target
= control target key end

     0   :  { %s254_s0 = inlined_call_operand.vmem [shape: f32[128,128], index: 0, kind: input, shape index: {}]   ;;  %s255_s1 = inlined_call_operand.vmem [shape: f32[1,128], index: 1, kind: input, shape index: {}]   ;;  %s256_s2 = inlined_call_operand.vmem [shape: f32[1,128], index: 2, kind: input, shape index: {}]   ;;  %s257_s3 = inlined_call_operand.vmem [shape: f32[128,128], index: 3, kind: output, shape index: {}]  }
   0x1   :  { %v14_v0 = vld [vmem:[%s254_s0] sm:$0xff]  ;;  %v15_v4 = vld [vmem:[%s254_s0 + $0x8] sm:$0xff]  ;;  %v16_v5 = vld [vmem:[%s254_s0 + $0x10] sm:$0xff] }
   0x2   :  { %v112_v1 = vld [vmem:[%s255_s1] ss:$0 sm:$0xff]  ;;  %v17_v6 = vld [vmem:[%s254_s0 + $0x18] sm:$0xff]  ;;  %v19_v11 = vld [vmem:[%s254_s0 + $0x28] sm:$0xff] }
   0x3   :  { %v143_v2 = vld [vmem:[%s256_s2] ss:$0 sm:$0xff]  ;;  %v37_v3 = vmul.f32 %v112_v1, %v14_v0  ;;  %v38_v7 = vmul.f32 %v112_v1, %v15_v4  ;;  %v39_v8 = vmul.f32 %v112_v1, %v16_v5  ;;  %v40_v9 = vmul.f32 %v112_v1, %v17_v6  ;;  %v20_v12 = vld [vmem:[%s254_s0 + $0x30] sm:$0xff]  ;;  %v21_v17 = vld [vmem:[%s254_s0 + $0x38] sm:$0xff] }
   0x4   :  { %v18_v10 = vld [vmem:[%s254_s0 + $0x20] sm:$0xff]  ;;  %v42_v15 = vmul.f32 %v112_v1, %v19_v11  ;;  %v43_v16 = vmul.f32 %v112_v1, %v20_v12  ;;  %v44_v21 = vmul.f32 %v112_v1, %v21_v17  ;;  %v23_v27 = vld [vmem:[%s254_s0 + $0x48] sm:$0xff]  ;;  %v24_v28 = vld [vmem:[%s254_s0 + $0x50] sm:$0xff] }
   0x5   :  { %v60_v13 = vadd.f32 %v143_v2, %v37_v3  ;;  %v41_v14 = vmul.f32 %v112_v1, %v18_v10  ;;  %v61_v18 = vadd.f32 %v143_v2, %v38_v7  ;;  %v62_v19 = vadd.f32 %v143_v2, %v39_v8  ;;  %v22_v22 = vld [vmem:[%s254_s0 + $0x40] sm:$0xff]  ;;  %v25_v29 = vld [vmem:[%s254_s0 + $0x58] sm:$0xff]  ;;  %v27_v35 = vld [vmem:[%s254_s0 + $0x68] sm:$0xff] }
   0x6   :  { %v63_v20 = vadd.f32 %v143_v2, %v40_v9  ;;  %v65_v25 = vadd.f32 %v143_v2, %v42_v15  ;;  %v66_v26 = vadd.f32 %v143_v2, %v43_v16  ;;  %v67_v33 = vadd.f32 %v143_v2, %v44_v21  ;;  %v26_v34 = vld [vmem:[%s254_s0 + $0x60] sm:$0xff]  ;;  %v28_v36 = vld [vmem:[%s254_s0 + $0x70] sm:$0xff]  ;;  %v29_v41 = vld [vmem:[%s254_s0 + $0x78] sm:$0xff] }
   0x7   :  { %v76_v23 = vmax.f32 %v60_v13, 0.0  ;;  %v64_v24 = vadd.f32 %v143_v2, %v41_v14  ;;  %v77_v30 = vmax.f32 %v61_v18, 0.0  ;;  %v78_v31 = vmax.f32 %v62_v19, 0.0 }
   0x8   :  { %v79_v32 = vmax.f32 %v63_v20, 0.0  ;;  %v81_v38 = vmax.f32 %v65_v25, 0.0  ;;  %v82_v39 = vmax.f32 %v66_v26, 0.0  ;;  %v45_v40 = vmul.f32 %v112_v1, %v22_v22 }
   0x9   :  { %92 = vst [vmem:[%s257_s3] sm:$0xff] %v76_v23  ;;  %v80_v37 = vmax.f32 %v64_v24, 0.0  ;;  %93 = vst [vmem:[%s257_s3 + $0x8] sm:$0xff] %v77_v30  ;;  %v83_v42 = vmax.f32 %v67_v33, 0.0  ;;  %v46_v43 = vmul.f32 %v112_v1, %v23_v27  ;;  %v47_v44 = vmul.f32 %v112_v1, %v24_v28 }
   0xa   :  { %94 = vst [vmem:[%s257_s3 + $0x10] sm:$0xff] %v78_v31  ;;  %95 = vst [vmem:[%s257_s3 + $0x18] sm:$0xff] %v79_v32  ;;  %v48_v45 = vmul.f32 %v112_v1, %v25_v29  ;;  %v68_v46 = vadd.f32 %v143_v2, %v45_v40  ;;  %v49_v47 = vmul.f32 %v112_v1, %v26_v34 }
   0xb   :  { %96 = vst [vmem:[%s257_s3 + $0x20] sm:$0xff] %v80_v37  ;;  %97 = vst [vmem:[%s257_s3 + $0x28] sm:$0xff] %v81_v38  ;;  %v50_v48 = vmul.f32 %v112_v1, %v27_v35  ;;  %v51_v49 = vmul.f32 %v112_v1, %v28_v36  ;;  %v69_v50 = vadd.f32 %v143_v2, %v46_v43 }
   0xc   :  { %98 = vst [vmem:[%s257_s3 + $0x30] sm:$0xff] %v82_v39  ;;  %99 = vst [vmem:[%s257_s3 + $0x38] sm:$0xff] %v83_v42  ;;  %v70_v51 = vadd.f32 %v143_v2, %v47_v44  ;;  %v71_v52 = vadd.f32 %v143_v2, %v48_v45  ;;  %v52_v53 = vmul.f32 %v112_v1, %v29_v41  ;;  %v84_v54 = vmax.f32 %v68_v46, 0.0 }
   0xd   :  { %v72_v55 = vadd.f32 %v143_v2, %v49_v47  ;;  %v73_v56 = vadd.f32 %v143_v2, %v50_v48  ;;  %v74_v57 = vadd.f32 %v143_v2, %v51_v49  ;;  %v85_v58 = vmax.f32 %v69_v50, 0.0 }
   0xe   :  { %v86_v59 = vmax.f32 %v70_v51, 0.0  ;;  %v87_v60 = vmax.f32 %v71_v52, 0.0  ;;  %v75_v61 = vadd.f32 %v143_v2, %v52_v53  ;;  %100 = vst [vmem:[%s257_s3 + $0x40] sm:$0xff] %v84_v54 }
   0xf   :  { %v88_v62 = vmax.f32 %v72_v55, 0.0  ;;  %v89_v63 = vmax.f32 %v73_v56, 0.0  ;;  %v90_v0 = vmax.f32 %v74_v57, 0.0  ;;  %101 = vst [vmem:[%s257_s3 + $0x48] sm:$0xff] %v85_v58 }
  0x10   :  { %102 = vst [vmem:[%s257_s3 + $0x50] sm:$0xff] %v86_v59  ;;  %103 = vst [vmem:[%s257_s3 + $0x58] sm:$0xff] %v87_v60  ;;  %v91_v1 = vmax.f32 %v75_v61, 0.0 }
  0x11   :  { %104 = vst [vmem:[%s257_s3 + $0x60] sm:$0xff] %v88_v62  ;;  %105 = vst [vmem:[%s257_s3 + $0x68] sm:$0xff] %v89_v63 }
  0x12   :  { %106 = vst [vmem:[%s257_s3 + $0x70] sm:$0xff] %v90_v0  ;;  %107 = vst [vmem:[%s257_s3 + $0x78] sm:$0xff] %v91_v1 }

// kernel: _lambda_.6
= control target key start
LH: loop header
LB: loop body
LE: loop exit
PB: predicated region body
PF: predicated region fallthrough
CT: control target
= control target key end

     0   :  { %9 = vsyncpa [#allocation3], 0  ;;  %s487_s0 = inlined_call_operand.hbm [shape: f32[128,16], index: 0, kind: input, shape index: {}]   ;;  %s488_s1 = inlined_call_operand.hbm [shape: bf16[16,128], index: 1, kind: input, shape index: {}]   ;;  %s489_s2 = inlined_call_operand.vmem [shape: f32[128,128], index: 2, kind: output, shape index: {0}]   ;;  %s490_s3 = inlined_call_operand.vmem [shape: f32[8,128], index: 3, kind: output, shape index: {1}]  }
   0x1   :  { %10 = vsyncpa [#allocation5], 0  ;;  %s378_s12 = smov [#allocation2]   ;;  %s330_s16 = scalar_lea.hbm %s487_s0, 2048 }
   0x2   :  { %s16_s13 = sshll.u32 %s378_s12, 4  ;;  %p331_p0 = scmp.ne.s32.totalorder %s487_s0, %s330_s16  ;;  %s17_s13 = int_to_ptr.vmem [resolvable:$true] %s16_s13 }
   0x3   :  { %p334_p1 = scmp.lt.u32.totalorder %s330_s16, %s487_s0 }
   0x5   :  { %p336_p2 = pnand %p334_p1, %p331_p0 }
   0x7   :  { %339 = shalt.err (!%p336_p2)
}
   0x8   :  { %s340_s21 = scalar_lea.vmem %s17_s13, 2048  ;;  %p345_p4 = scmp.lt.s32.totalorder %s17_s13, %s17_s13 }
   0x9   :  { %p341_p3 = scmp.ne.s32.totalorder %s17_s13, %s340_s21  ;;  %p346_p5 = scmp.lt.s32.totalorder %s340_s21, %s340_s21 }
   0xb   :  { %p347_p6 = por %p346_p5, %p345_p4 }
   0xd   :  { %p348_p7 = pnand %p347_p6, %p341_p3 }
   0xf   :  { %351 = shalt.err (!%p348_p7)
}
  0x10   :  { %s379_s22 = smov 128   ;;  %s380_s23 = smov 8  }
  0x11   :  { %22 = dma.hbm_to_vmem [thread:$0]  %s487_s0, 2048, %s17_s13, [#allocation3], %s379_s22, %s379_s22, %s380_s23  }
  0x12   :  { %s381_s26 = smov [#allocation4]   ;;  %s352_s30 = scalar_lea.hbm %s488_s1, 128 }
  0x13   :  { %s28_s27 = sshll.u32 %s381_s26, 4  ;;  %p353_p8 = scmp.ne.s32.totalorder %s488_s1, %s352_s30  ;;  %s29_s27 = int_to_ptr.vmem [resolvable:$true] %s28_s27 }
  0x14   :  { %p356_p9 = scmp.lt.u32.totalorder %s352_s30, %s488_s1 }
  0x16   :  { %p358_p10 = pnand %p356_p9, %p353_p8 }
  0x18   :  { %361 = shalt.err (!%p358_p10)
}
  0x19   :  { %s362_s8 = scalar_lea.vmem %s29_s27, 128  ;;  %p367_p12 = scmp.lt.s32.totalorder %s29_s27, %s29_s27 }
  0x1a   :  { %p363_p11 = scmp.ne.s32.totalorder %s29_s27, %s362_s8  ;;  %p368_p13 = scmp.lt.s32.totalorder %s362_s8, %s362_s8 }
  0x1c   :  { %p369_p0 = por %p368_p13, %p367_p12 }
  0x1e   :  { %p370_p1 = pnand %p369_p0, %p363_p11 }
  0x20   :  { %373 = shalt.err (!%p370_p1)
}
  0x21   :  { %s382_s0 = smov 64   ;;  %s383_s9 = smov 4  }
  0x22   :  { %34 = dma.hbm_to_vmem [thread:$0]  %s488_s1, 128, %s29_s27, [#allocation5], %s382_s0, %s382_s0, %s383_s9  }
  0x23   :  { %374 = dma.done.wait [#allocation3], 2048  }
  0x24   :  { %375 = vsyncadd [#allocation3], 4294965248 }
  0x25   :  { %376 = dma.done.wait [#allocation5], 128  }
  0x26   :  { %377 = vsyncadd [#allocation5], 4294967168  ;;  %v329_v0 = vld [vmem:[#allocation4] sm:$0xff]   ;;  %v43_v2 = vld [vmem:[#allocation2 + $0x8] sm:$0xff]  ;;  %vm74_vm0 = vcmask 130048   ;;  %vm270_vm1 = vcmask 1040384  }
  0x27   :  { %v42_v1 = vld [vmem:[#allocation2] sm:$0xff]  ;;  %v44_v3 = vld [vmem:[#allocation2 + $0x10] sm:$0xff]  ;;  %303 = vmatprep.subr.bf16.mxu0 %v329_v0  ;;  %v45_v5 = vld [vmem:[#allocation2 + $0x18] sm:$0xff]  ;;  %321 = vmatprep.subr.bf16.mxu1 %v329_v0  ;;  %vm272_vm2 = vcmask 1041408  }
  0x28   :  { %v58_v4 = vpack.c.bf16 %v43_v2, %v42_v1  ;;  %v46_v6 = vld [vmem:[#allocation2 + $0x20] sm:$0xff]  ;;  %v47_v7 = vld [vmem:[#allocation2 + $0x28] sm:$0xff]  ;;  %304 = vmatpush3.bf16.msra.mxu0 %v329_v0  ;;  %v59_v8 = vpack.c.bf16 %v45_v5, %v44_v3  ;;  %322 = vmatpush3.bf16.msra.mxu1 %v329_v0  ;;  %v52_v12 = vld [vmem:[#allocation2 + $0x50] sm:$0xff] }
  0x29   :  { %v60_v9 = vpack.c.bf16 %v47_v7, %v46_v6  ;;  %v50_v10 = vld [vmem:[#allocation2 + $0x40] sm:$0xff]  ;;  %v51_v11 = vld [vmem:[#allocation2 + $0x48] sm:$0xff]  ;;  %v53_v13 = vld [vmem:[#allocation2 + $0x58] sm:$0xff] }
  0x2a   :  { %305 = vmatprep.mubr.msk.bf16.mxu0 %vm74_vm0, %v58_v4  ;;  %v62_v14 = vpack.c.bf16 %v51_v11, %v50_v10  ;;  %v63_v15 = vpack.c.bf16 %v53_v13, %v52_v12  ;;  %v54_v16 = vld [vmem:[#allocation2 + $0x60] sm:$0xff]  ;;  %v55_v17 = vld [vmem:[#allocation2 + $0x68] sm:$0xff]  ;;  %v48_v19 = vld [vmem:[#allocation2 + $0x30] sm:$0xff] }
  0x2b   :  { %306 = vmatmul.mubr.msk.bf16.vlgmr.msra.gmra.mrb[0].mxu0 %vm74_vm0, %v59_v8  ;;  %v64_v18 = vpack.c.bf16 %v55_v17, %v54_v16  ;;  %v49_v20 = vld [vmem:[#allocation2 + $0x38] sm:$0xff]  ;;  %v56_v21 = vld [vmem:[#allocation2 + $0x70] sm:$0xff] }
  0x2c   :  { %309 = vmatprep.mubr.msk.bf16.mxu0 %vm74_vm0, %v60_v9  ;;  %313 = vmatprep.mubr.msk.bf16.mxu1 %vm74_vm0, %v62_v14  ;;  %v57_v22 = vld [vmem:[#allocation2 + $0x78] sm:$0xff]  ;;  %v61_v23 = vpack.c.bf16 %v49_v20, %v48_v19 }
  0x2d   :  { %314 = vmatmul.mubr.msk.bf16.vlgmr.msra.gmra.mrb[0].mxu1 %vm74_vm0, %v63_v15  ;;  %v65_v24 = vpack.c.bf16 %v57_v22, %v56_v21 }
  0x2e   :  { %317 = vmatprep.mubr.msk.bf16.mxu1 %vm74_vm0, %v64_v18 }
  0x33   :  { %310 = vmatmul.mubr.msk.bf16.gmra.mrb[4].mxu0 %vm74_vm0, %v61_v23 }
  0x35   :  { %318 = vmatmul.mubr.msk.bf16.gmra.mrb[4].mxu1 %vm74_vm0, %v65_v24 }
  0xfe   :  { %v307_v25 = vpop.f32.mrb[0].mxu0 }
  0xff   :  { %198 = vst [vmem:[%s489_s2 + $0x10] sm:$0xff] %v307_v25  ;;  %v133_v26 = vpop.f32.mrb[1].mxu0  ;;  %v235_v36 = vmul.f32 %v307_v25, %v307_v25 }
 0x100   :  { %196 = vst [vmem:[%s489_s2] sm:$0xff] %v133_v26  ;;  %v308_v27 = vpop.f32.mrb[2].mxu0  ;;  %v315_v28 = vpop.f32.mrb[0].mxu1  ;;  %v233_v31 = vmul.f32 %v133_v26, %v133_v26 }
 0x101   :  { %199 = vst [vmem:[%s489_s2 + $0x18] sm:$0xff] %v308_v27  ;;  %v136_v29 = vpop.f32.mrb[3].mxu0  ;;  %206 = vst [vmem:[%s489_s2 + $0x50] sm:$0xff] %v315_v28  ;;  %v165_v30 = vpop.f32.mrb[1].mxu1  ;;  %v236_v39 = vmul.f32 %v308_v27, %v308_v27  ;;  %v243_v4 = vmul.f32 %v315_v28, %v315_v28 }
 0x102   :  { %197 = vst [vmem:[%s489_s2 + $0x8] sm:$0xff] %v136_v29  ;;  %v212_v32 = vadd.f32 %v136_v29, %v133_v26  ;;  %v234_v33 = vmul.f32 %v136_v29, %v136_v29  ;;  %204 = vst [vmem:[%s489_s2 + $0x40] sm:$0xff] %v165_v30  ;;  %v316_v34 = vpop.f32.mrb[2].mxu1  ;;  %v241_v62 = vmul.f32 %v165_v30, %v165_v30 }
 0x103   :  { %207 = vst [vmem:[%s489_s2 + $0x58] sm:$0xff] %v316_v34  ;;  %v168_v35 = vpop.f32.mrb[3].mxu1  ;;  %v244_v7 = vmul.f32 %v316_v34, %v316_v34 }
 0x104   :  { %v213_v37 = vadd.f32 %v307_v25, %v212_v32  ;;  %v249_v38 = vadd.f32 %v234_v33, %v233_v31  ;;  %205 = vst [vmem:[%s489_s2 + $0x48] sm:$0xff] %v168_v35  ;;  %v242_v3 = vmul.f32 %v168_v35, %v168_v35 }
 0x106   :  { %v250_v40 = vadd.f32 %v249_v38, %v235_v36  ;;  %v311_v41 = vpop.f32.mrb[4].mxu0  ;;  %v214_v42 = vadd.f32 %v308_v27, %v213_v37 }
 0x107   :  { %202 = vst [vmem:[%s489_s2 + $0x30] sm:$0xff] %v311_v41  ;;  %v149_v43 = vpop.f32.mrb[5].mxu0  ;;  %v239_v56 = vmul.f32 %v311_v41, %v311_v41 }
 0x108   :  { %200 = vst [vmem:[%s489_s2 + $0x20] sm:$0xff] %v149_v43  ;;  %v215_v44 = vadd.f32 %v214_v42, %v149_v43  ;;  %v237_v45 = vmul.f32 %v149_v43, %v149_v43  ;;  %v251_v46 = vadd.f32 %v250_v40, %v236_v39  ;;  %v312_v47 = vpop.f32.mrb[6].mxu0  ;;  %v319_v48 = vpop.f32.mrb[4].mxu1 }
 0x109   :  { %203 = vst [vmem:[%s489_s2 + $0x38] sm:$0xff] %v312_v47  ;;  %v152_v49 = vpop.f32.mrb[7].mxu0  ;;  %210 = vst [vmem:[%s489_s2 + $0x70] sm:$0xff] %v319_v48  ;;  %v181_v50 = vpop.f32.mrb[5].mxu1  ;;  %v240_v59 = vmul.f32 %v312_v47, %v312_v47  ;;  %v247_v16 = vmul.f32 %v319_v48, %v319_v48 }
 0x10a   :  { %v252_v51 = vadd.f32 %v251_v46, %v237_v45  ;;  %201 = vst [vmem:[%s489_s2 + $0x28] sm:$0xff] %v152_v49  ;;  %v216_v52 = vadd.f32 %v215_v44, %v152_v49  ;;  %v238_v53 = vmul.f32 %v152_v49, %v152_v49  ;;  %208 = vst [vmem:[%s489_s2 + $0x60] sm:$0xff] %v181_v50  ;;  %v320_v54 = vpop.f32.mrb[6].mxu1 }
 0x10b   :  { %211 = vst [vmem:[%s489_s2 + $0x78] sm:$0xff] %v320_v54  ;;  %v184_v55 = vpop.f32.mrb[7].mxu1  ;;  %v245_v10 = vmul.f32 %v181_v50, %v181_v50  ;;  %v248_v19 = vmul.f32 %v320_v54, %v320_v54 }
 0x10c   :  { %v217_v57 = vadd.f32 %v311_v41, %v216_v52  ;;  %v253_v58 = vadd.f32 %v252_v51, %v238_v53  ;;  %209 = vst [vmem:[%s489_s2 + $0x68] sm:$0xff] %v184_v55  ;;  %v246_v15 = vmul.f32 %v184_v55, %v184_v55 }
 0x10e   :  { %v254_v60 = vadd.f32 %v253_v58, %v239_v56  ;;  %v218_v61 = vadd.f32 %v312_v47, %v217_v57 }
 0x110   :  { %v219_v63 = vadd.f32 %v218_v61, %v165_v30  ;;  %v255_v0 = vadd.f32 %v254_v60, %v240_v59 }
 0x112   :  { %v256_v1 = vadd.f32 %v255_v0, %v241_v62  ;;  %v220_v2 = vadd.f32 %v219_v63, %v168_v35 }
 0x114   :  { %v221_v5 = vadd.f32 %v315_v28, %v220_v2  ;;  %v257_v6 = vadd.f32 %v256_v1, %v242_v3 }
 0x116   :  { %v258_v8 = vadd.f32 %v257_v6, %v243_v4  ;;  %v222_v9 = vadd.f32 %v316_v34, %v221_v5 }
 0x118   :  { %v223_v11 = vadd.f32 %v222_v9, %v181_v50  ;;  %v259_v12 = vadd.f32 %v258_v8, %v244_v7 }
 0x11a   :  { %v260_v13 = vadd.f32 %v259_v12, %v245_v10  ;;  %v224_v14 = vadd.f32 %v223_v11, %v184_v55 }
 0x11c   :  { %v225_v17 = vadd.f32 %v319_v48, %v224_v14  ;;  %v261_v18 = vadd.f32 %v260_v13, %v246_v15 }
 0x11e   :  { %v226_v20 = vadd.f32 %v320_v54, %v225_v17  ;;  %v262_v21 = vadd.f32 %v261_v18, %v247_v16 }
 0x120   :  { %v227_v22 = vrot.slane %v226_v20, 4  ;;  %v263_v23 = vadd.f32 %v262_v21, %v248_v19 }
 0x122   :  { %v228_v24 = vadd.f32 %v227_v22, %v226_v20  ;;  %v264_v25 = vrot.slane %v263_v23, 4 }
 0x124   :  { %v229_v26 = vrot.slane %v228_v24, 2  ;;  %v265_v27 = vadd.f32 %v264_v25, %v263_v23 }
 0x126   :  { %v230_v28 = vadd.f32 %v229_v26, %v228_v24  ;;  %v266_v29 = vrot.slane %v265_v27, 2 }
 0x128   :  { %v231_v30 = vrot.slane %v230_v28, 1  ;;  %v267_v31 = vadd.f32 %v266_v29, %v265_v27 }
 0x12a   :  { %v268_v32 = vrot.slane %v267_v31, 1  ;;  %v232_v33 = vadd.f32 %v231_v30, %v230_v28 }
 0x12c   :  { %v269_v34 = vadd.f32 %v268_v32, %v267_v31 }
 0x12e   :  { %v271_v35 = vsel %vm270_vm1, %v232_v33, %v269_v34 }
 0x12f   :  { %v273_v36 = vsel %vm272_vm2, %v271_v35, 0.0 }
 0x130   :  { %274 = vst [vmem:[%s490_s3] sm:$0xff] %v273_v36 }
 0x131   :  { %283 = vsyncpa [#allocation3], 1 }
 0x132   :  { %284 = vsyncpa [#allocation5], 1 }

// kernel: _lambda_.10
= control target key start
LH: loop header
LB: loop body
LE: loop exit
PB: predicated region body
PF: predicated region fallthrough
CT: control target
= control target key end

     0   :  { %s1363_s12 = smov 0   ;;  %s1950_s0 = inlined_call_operand.vmem [shape: f32[1024,24], index: 0, kind: input, shape index: {}]   ;;  %s1951_s1 = inlined_call_operand.vmem [shape: bf16[24,16], index: 1, kind: input, shape index: {}]   ;;  %s1952_s2 = inlined_call_operand.vmem [shape: f32[1024,16], index: 2, kind: output, shape index: {0}]   ;;  %s1953_s3 = inlined_call_operand.vmem [shape: f32[16,16], index: 3, kind: output, shape index: {1}]  }
   0x1 LB: > { %s1369_s13 = sadd.s32 4294967295, %s1341_s12   ;;  %p1175_p0 = scmp.ge.s32.totalorder %s1341_s12, 1  ;;  %s1341_s12 = sphi %s1363_s12, %s14_s12  }
   0x2   : > { %p141_p1 = scmp.lt.s32.totalorder %s1341_s12, 3 }
   0x4   : > { %p142_p2 = pnand %p1175_p0, %p141_p1 }
   0x5   : > { %v1333_v0 = vld [vmem:[%s1951_s1] sm:$0xff] (!%p142_p2)   ;;  %v1334_v1 = vld [vmem:[%s1951_s1 + $0x8] ss:$0 sps:$4 sm:$0xff] (!%p142_p2)   ;;  %vm391_vm0 = vcmask (!%p142_p2), 1043456   ;;  %s1176_s18 = sshll.u32 (!%p142_p2), %s1369_s13, 6  ;;  %vm294_vm1 = vcmask (!%p142_p2), 195584  }
   0x6   : > { %145 = sbr.rel (%p142_p2) target bundleno = 379 (0x17b), region = 28  ;;  %1251 = vmatprep.subr.bf16.mxu0 (!%p142_p2), %v1333_v0  ;;  %p170_p3 = scmp.lt.s32.totalorder (!%p142_p2), %s1176_s18, 127  ;;  %1319 = vmatprep.subr.bf16.mxu1 (!%p142_p2), %v1333_v0  ;;  %v393_v2 = vsel (!%p142_p2), %vm391_vm0, %v1334_v1, 0  ;;  %vm684_vm2 = vcmask (!%p142_p2), 130048   ;;  %vm1079_vm3 = vcmask (!%p142_p2), 1040384   ;;  %vm1081_vm4 = vcmask (!%p142_p2), 1041408  }
   0x7   : > { %1252 = vmatpush3.bf16.msra.mxu0 (!%p142_p2), %v1333_v0  ;;  %1321 = vmatpush3.bf16.msra.mxu1 (!%p142_p2), %v1333_v0  ;;  %p181_p4 = scmp.lt.s32.totalorder (!%p142_p2), %s1369_s13, 1 }
   0x8   : > { %1323 = vmatprep.subr.msk.bf16.mxu0 (!%p142_p2), %vm391_vm0, %v1334_v1  ;;  %1324 = vmatprep.subr.msk.bf16.mxu1 (!%p142_p2), %vm391_vm0, %v1334_v1 }
   0xb   : > { %1254 = vmatpush3.bf16.msra.mxu0 (!%p142_p2), %v393_v2  ;;  %1322 = vmatpush3.bf16.msra.mxu1 (!%p142_p2), %v393_v2 }
   0xd   : > { %s1955_s18 = smov (!%p170_p3, %s1176_s18), 127  ;;  %s1957_s13 = smov (!%p181_p4, %s1369_s13), 1 }
   0xe   : > { %s1177_s19 = sshll.u32 %s1955_s18, 3  ;;  %s1180_s26 = sshll.u32 %s1957_s13, 3 }
   0xf   : > { %s1388_s22 = scalar_lea.vmem %s1950_s0, %s1177_s19  ;;  %s1491_s25 = scalar_lea.vmem %s1952_s2, %s1177_s19 }
  0x10   : > { %v186_v3 = vld [vmem:[%s1388_s22] sm:$0xff]  ;;  %v187_v4 = vld [vmem:[%s1388_s22 + $0x8] sm:$0xff]  ;;  %v188_v5 = vld [vmem:[%s1388_s22 + $0x10] sm:$0xff]  ;;  %s184_s29 = scalar_lea.vmem %s1953_s3, %s1180_s26 }
  0x11   : > { %v250_v6 = vpack.c.bf16 %v187_v4, %v186_v3  ;;  %v189_v7 = vld [vmem:[%s1388_s22 + $0x18] sm:$0xff]  ;;  %v190_v8 = vld [vmem:[%s1388_s22 + $0x20] sm:$0xff]  ;;  %v191_v9 = vld [vmem:[%s1388_s22 + $0x28] sm:$0xff] }
  0x12   : > { %v251_v10 = vpack.c.bf16 %v189_v7, %v188_v5  ;;  %v252_v11 = vpack.c.bf16 %v191_v9, %v190_v8  ;;  %v192_v12 = vld [vmem:[%s1388_s22 + $0x30] sm:$0xff]  ;;  %v193_v13 = vld [vmem:[%s1388_s22 + $0x38] sm:$0xff]  ;;  %v194_v14 = vld [vmem:[%s1388_s22 + $0x40] sm:$0xff] }
  0x13   : > { %1255 = vmatprep.mubr.msk.bf16.mxu0 %vm294_vm1, %v250_v6  ;;  %v195_v15 = vld [vmem:[%s1388_s22 + $0x48] sm:$0xff]  ;;  %v253_v16 = vpack.c.bf16 %v193_v13, %v192_v12  ;;  %v218_v18 = vld [vmem:[%s1388_s22 + $0x100] sm:$0xff]  ;;  %v220_v20 = vld [vmem:[%s1388_s22 + $0x110] sm:$0xff] }
  0x14   : > { %1256 = vmatmul.mubr.msk.bf16.vlgmr.msra.gmra.mrb[0].mxu0 %vm294_vm1, %v251_v10  ;;  %v254_v17 = vpack.c.bf16 %v195_v15, %v194_v14  ;;  %v219_v19 = vld [vmem:[%s1388_s22 + $0x108] sm:$0xff]  ;;  %v221_v21 = vld [vmem:[%s1388_s22 + $0x118] sm:$0xff]  ;;  %v222_v24 = vld [vmem:[%s1388_s22 + $0x120] sm:$0xff] }
  0x15   : > { %1259 = vmatprep.mubr.msk.bf16.mxu0 %vm294_vm1, %v252_v11  ;;  %v266_v22 = vpack.c.bf16 %v219_v19, %v218_v18  ;;  %v267_v23 = vpack.c.bf16 %v221_v21, %v220_v20  ;;  %v223_v25 = vld [vmem:[%s1388_s22 + $0x128] sm:$0xff]  ;;  %v196_v26 = vld [vmem:[%s1388_s22 + $0x50] sm:$0xff]  ;;  %v197_v27 = vld [vmem:[%s1388_s22 + $0x58] sm:$0xff] }
  0x16   : > { %v268_v28 = vpack.c.bf16 %v223_v25, %v222_v24  ;;  %v198_v29 = vld [vmem:[%s1388_s22 + $0x60] sm:$0xff]  ;;  %v199_v30 = vld [vmem:[%s1388_s22 + $0x68] sm:$0xff]  ;;  %v255_v31 = vpack.c.bf16 %v197_v27, %v196_v26  ;;  %v224_v32 = vld [vmem:[%s1388_s22 + $0x130] sm:$0xff] }
  0x17   : > { %1287 = vmatprep.mubr.msk.bf16.mxu1 %vm294_vm1, %v266_v22  ;;  %v225_v33 = vld [vmem:[%s1388_s22 + $0x138] sm:$0xff]  ;;  %v256_v34 = vpack.c.bf16 %v199_v30, %v198_v29  ;;  %v226_v35 = vld [vmem:[%s1388_s22 + $0x140] sm:$0xff]  ;;  %v227_v36 = vld [vmem:[%s1388_s22 + $0x148] sm:$0xff] }
  0x18   : > { %1288 = vmatmul.mubr.msk.bf16.vlgmr.msra.gmra.mrb[0].mxu1 %vm294_vm1, %v267_v23  ;;  %v269_v37 = vpack.c.bf16 %v225_v33, %v224_v32  ;;  %v270_v38 = vpack.c.bf16 %v227_v36, %v226_v35  ;;  %v200_v39 = vld [vmem:[%s1388_s22 + $0x70] sm:$0xff]  ;;  %v201_v40 = vld [vmem:[%s1388_s22 + $0x78] sm:$0xff]  ;;  %v202_v41 = vld [vmem:[%s1388_s22 + $0x80] sm:$0xff] }
  0x19   : > { %1291 = vmatprep.mubr.msk.bf16.mxu1 %vm294_vm1, %v268_v28  ;;  %v203_v42 = vld [vmem:[%s1388_s22 + $0x88] sm:$0xff]  ;;  %v257_v43 = vpack.c.bf16 %v201_v40, %v200_v39  ;;  %v228_v44 = vld [vmem:[%s1388_s22 + $0x150] sm:$0xff]  ;;  %v229_v45 = vld [vmem:[%s1388_s22 + $0x158] sm:$0xff] }
  0x1a   : > { %v258_v46 = vpack.c.bf16 %v203_v42, %v202_v41  ;;  %v230_v47 = vld [vmem:[%s1388_s22 + $0x160] sm:$0xff]  ;;  %v231_v48 = vld [vmem:[%s1388_s22 + $0x168] sm:$0xff]  ;;  %v271_v49 = vpack.c.bf16 %v229_v45, %v228_v44  ;;  %v204_v51 = vld [vmem:[%s1388_s22 + $0x90] sm:$0xff] }
  0x1b   : > { %v272_v50 = vpack.c.bf16 %v231_v48, %v230_v47  ;;  %v205_v52 = vld [vmem:[%s1388_s22 + $0x98] sm:$0xff]  ;;  %v206_v53 = vld [vmem:[%s1388_s22 + $0xa0] sm:$0xff]  ;;  %v207_v54 = vld [vmem:[%s1388_s22 + $0xa8] sm:$0xff] }
  0x1c   : > { %1260 = vmatmul.mubr.msk.bf16.gmra.mrb[4].mxu0 %vm294_vm1, %v253_v16  ;;  %v259_v55 = vpack.c.bf16 %v205_v52, %v204_v51  ;;  %v232_v56 = vld [vmem:[%s1388_s22 + $0x170] sm:$0xff]  ;;  %v233_v57 = vld [vmem:[%s1388_s22 + $0x178] sm:$0xff]  ;;  %v260_v58 = vpack.c.bf16 %v207_v54, %v206_v53  ;;  %v234_v59 = vld [vmem:[%s1388_s22 + $0x180] sm:$0xff] }
  0x1d   : > { %1263 = vmatprep.mubr.msk.bf16.mxu0 %vm294_vm1, %v254_v17  ;;  %v235_v60 = vld [vmem:[%s1388_s22 + $0x188] sm:$0xff]  ;;  %v273_v61 = vpack.c.bf16 %v233_v57, %v232_v56  ;;  %v208_v63 = vld [vmem:[%s1388_s22 + $0xb0] sm:$0xff]  ;;  %v209_v0 = vld [vmem:[%s1388_s22 + $0xb8] sm:$0xff] }
  0x1e   : > { %v274_v62 = vpack.c.bf16 %v235_v60, %v234_v59  ;;  %v210_v1 = vld [vmem:[%s1388_s22 + $0xc0] sm:$0xff]  ;;  %v211_v2 = vld [vmem:[%s1388_s22 + $0xc8] sm:$0xff]  ;;  %v261_v3 = vpack.c.bf16 %v209_v0, %v208_v63  ;;  %v236_v4 = vld [vmem:[%s1388_s22 + $0x190] sm:$0xff] }
  0x1f   : > { %v237_v5 = vld [vmem:[%s1388_s22 + $0x198] sm:$0xff]  ;;  %v262_v6 = vpack.c.bf16 %v211_v2, %v210_v1  ;;  %v238_v7 = vld [vmem:[%s1388_s22 + $0x1a0] sm:$0xff]  ;;  %v239_v8 = vld [vmem:[%s1388_s22 + $0x1a8] sm:$0xff] }
  0x20   : > { %1292 = vmatmul.mubr.msk.bf16.gmra.mrb[4].mxu1 %vm294_vm1, %v269_v37  ;;  %v275_v9 = vpack.c.bf16 %v237_v5, %v236_v4  ;;  %v276_v10 = vpack.c.bf16 %v239_v8, %v238_v7  ;;  %v212_v11 = vld [vmem:[%s1388_s22 + $0xd0] sm:$0xff]  ;;  %v213_v12 = vld [vmem:[%s1388_s22 + $0xd8] sm:$0xff]  ;;  %v214_v13 = vld [vmem:[%s1388_s22 + $0xe0] sm:$0xff] }
  0x21   : > { %1295 = vmatprep.mubr.msk.bf16.mxu1 %vm294_vm1, %v270_v38  ;;  %v215_v14 = vld [vmem:[%s1388_s22 + $0xe8] sm:$0xff]  ;;  %v263_v15 = vpack.c.bf16 %v213_v12, %v212_v11  ;;  %v240_v16 = vld [vmem:[%s1388_s22 + $0x1b0] sm:$0xff]  ;;  %v241_v17 = vld [vmem:[%s1388_s22 + $0x1b8] sm:$0xff] }
  0x22   : > { %v264_v18 = vpack.c.bf16 %v215_v14, %v214_v13  ;;  %v242_v19 = vld [vmem:[%s1388_s22 + $0x1c0] sm:$0xff]  ;;  %v243_v20 = vld [vmem:[%s1388_s22 + $0x1c8] sm:$0xff]  ;;  %v277_v21 = vpack.c.bf16 %v241_v17, %v240_v16  ;;  %v216_v23 = vld [vmem:[%s1388_s22 + $0xf0] sm:$0xff] }
  0x23   : > { %v278_v22 = vpack.c.bf16 %v243_v20, %v242_v19  ;;  %v217_v24 = vld [vmem:[%s1388_s22 + $0xf8] sm:$0xff]  ;;  %v244_v26 = vld [vmem:[%s1388_s22 + $0x1d0] sm:$0xff]  ;;  %v246_v28 = vld [vmem:[%s1388_s22 + $0x1e0] sm:$0xff] }
  0x24   : > { %1264 = vmatmul.mubr.msk.bf16.gmra.mrb[8].mxu0 %vm294_vm1, %v255_v31  ;;  %v265_v25 = vpack.c.bf16 %v217_v24, %v216_v23  ;;  %v245_v27 = vld [vmem:[%s1388_s22 + $0x1d8] sm:$0xff]  ;;  %v247_v29 = vld [vmem:[%s1388_s22 + $0x1e8] sm:$0xff]  ;;  %v248_v32 = vld [vmem:[%s1388_s22 + $0x1f0] sm:$0xff] }
  0x25   : > { %1267 = vmatprep.mubr.msk.bf16.mxu0 %vm294_vm1, %v256_v34  ;;  %v279_v30 = vpack.c.bf16 %v245_v27, %v244_v26  ;;  %v280_v31 = vpack.c.bf16 %v247_v29, %v246_v28  ;;  %v249_v33 = vld [vmem:[%s1388_s22 + $0x1f8] sm:$0xff] }
  0x26   : > { %v281_v34 = vpack.c.bf16 %v249_v33, %v248_v32 }
  0x28   : > { %1296 = vmatmul.mubr.msk.bf16.gmra.mrb[8].mxu1 %vm294_vm1, %v271_v49 }
  0x29   : > { %1299 = vmatprep.mubr.msk.bf16.mxu1 %vm294_vm1, %v272_v50 }
  0x2c   : > { %1268 = vmatmul.mubr.msk.bf16.gmra.mrb[12].mxu0 %vm294_vm1, %v257_v43 }
  0x2d   : > { %1271 = vmatprep.mubr.msk.bf16.mxu0 %vm294_vm1, %v258_v46 }
  0x30   : > { %1300 = vmatmul.mubr.msk.bf16.gmra.mrb[12].mxu1 %vm294_vm1, %v273_v61 }
  0x31   : > { %1303 = vmatprep.mubr.msk.bf16.mxu1 %vm294_vm1, %v274_v62 }
  0x34   : > { %1272 = vmatmul.mubr.msk.bf16.gmra.mrb[16].mxu0 %vm294_vm1, %v259_v55 }
  0x35   : > { %1275 = vmatprep.mubr.msk.bf16.mxu0 %vm294_vm1, %v260_v58 }
  0x38   : > { %1304 = vmatmul.mubr.msk.bf16.gmra.mrb[16].mxu1 %vm294_vm1, %v275_v9 }
  0x39   : > { %1307 = vmatprep.mubr.msk.bf16.mxu1 %vm294_vm1, %v276_v10 }
  0x3c   : > { %1276 = vmatmul.mubr.msk.bf16.gmra.mrb[20].mxu0 %vm294_vm1, %v261_v3 }
  0x3d   : > { %1279 = vmatprep.mubr.msk.bf16.mxu0 %vm294_vm1, %v262_v6 }
  0x40   : > { %1308 = vmatmul.mubr.msk.bf16.gmra.mrb[20].mxu1 %vm294_vm1, %v277_v21 }
  0x41   : > { %1311 = vmatprep.mubr.msk.bf16.mxu1 %vm294_vm1, %v278_v22 }
  0x44   : > { %1280 = vmatmul.mubr.msk.bf16.gmra.mrb[24].mxu0 %vm294_vm1, %v263_v15 }
  0x45   : > { %1283 = vmatprep.mubr.msk.bf16.mxu0 %vm294_vm1, %v264_v18 }
  0x48   : > { %1312 = vmatmul.mubr.msk.bf16.gmra.mrb[24].mxu1 %vm294_vm1, %v279_v30 }
  0x49   : > { %1315 = vmatprep.mubr.msk.bf16.mxu1 %vm294_vm1, %v280_v31 }
  0x4c   : > { %1284 = vmatmul.mubr.msk.bf16.gmra.mrb[28].mxu0 %vm294_vm1, %v265_v25 }
  0x50   : > { %1316 = vmatmul.mubr.msk.bf16.gmra.mrb[28].mxu1 %vm294_vm1, %v281_v34 }
  0xe7   : > { %v1257_v35 = vpop.f32.mrb[0].mxu0 }
  0xe8   : > { %687 = vst.msk [vmem:[%s1491_s25 + $0x10] sm:$0xff] %vm684_vm2, %v1257_v35  ;;  %v429_v36 = vpop.f32.mrb[1].mxu0  ;;  %v884_v40 = vmul.f32 %v1257_v35, %v1257_v35  ;;  %v752_v45 = vsel %vm684_vm2, %v1257_v35, 0.0 }
  0xe9   : > { %685 = vst.msk [vmem:[%s1491_s25] sm:$0xff] %vm684_vm2, %v429_v36  ;;  %v882_v37 = vmul.f32 %v429_v36, %v429_v36  ;;  %v1258_v38 = vpop.f32.mrb[2].mxu0  ;;  %v749_v41 = vsel %vm684_vm2, %v429_v36, 0.0 }
  0xea   : > { %688 = vst.msk [vmem:[%s1491_s25 + $0x18] sm:$0xff] %vm684_vm2, %v1258_v38  ;;  %v432_v39 = vpop.f32.mrb[3].mxu0  ;;  %v885_v47 = vmul.f32 %v1258_v38, %v1258_v38  ;;  %v949_v51 = vsel %vm684_vm2, %v884_v40, 0.0  ;;  %v754_v52 = vsel %vm684_vm2, %v1258_v38, 0.0 }
  0xeb   : > { %686 = vst.msk [vmem:[%s1491_s25 + $0x8] sm:$0xff] %vm684_vm2, %v432_v39  ;;  %v750_v42 = vsel %vm684_vm2, %v432_v39, 0.0  ;;  %v883_v43 = vmul.f32 %v432_v39, %v432_v39  ;;  %v946_v46 = vsel %vm684_vm2, %v882_v37, 0.0  ;;  %v1516_v0 = vpop.f32.mrb[0].mxu1 }
  0xec   : > { %v751_v44 = vadd.f32 %v750_v42, %v749_v41  ;;  %v951_v57 = vsel %vm684_vm2, %v885_v47, 0.0  ;;  %719 = vst.msk [vmem:[%s1491_s25 + $0x110] sm:$0xff] %vm684_vm2, %v1516_v0  ;;  %v1525_v5 = vpop.f32.mrb[1].mxu1 }
  0xed   : > { %v947_v48 = vsel %vm684_vm2, %v883_v43, 0.0  ;;  %717 = vst.msk [vmem:[%s1491_s25 + $0x100] sm:$0xff] %vm684_vm2, %v1525_v5  ;;  %v1530_v8 = vpop.f32.mrb[2].mxu1 }
  0xee   : > { %v753_v49 = vadd.f32 %v752_v45, %v751_v44  ;;  %v948_v50 = vadd.f32 %v947_v48, %v946_v46  ;;  %720 = vst.msk [vmem:[%s1491_s25 + $0x118] sm:$0xff] %vm684_vm2, %v1530_v8  ;;  %v1537_v12 = vpop.f32.mrb[3].mxu1 }
  0xef   : > { %v1261_v53 = vpop.f32.mrb[4].mxu0  ;;  %718 = vst.msk [vmem:[%s1491_s25 + $0x108] sm:$0xff] %vm684_vm2, %v1537_v12 }
  0xf0   : > { %v950_v54 = vadd.f32 %v949_v51, %v948_v50  ;;  %691 = vst.msk [vmem:[%s1491_s25 + $0x30] sm:$0xff] %vm684_vm2, %v1261_v53  ;;  %v445_v55 = vpop.f32.mrb[5].mxu0  ;;  %v755_v56 = vadd.f32 %v754_v52, %v753_v49  ;;  %v888_v1 = vmul.f32 %v1261_v53, %v1261_v53  ;;  %v760_v9 = vsel %vm684_vm2, %v1261_v53, 0.0 }
  0xf1   : > { %689 = vst.msk [vmem:[%s1491_s25 + $0x20] sm:$0xff] %vm684_vm2, %v445_v55  ;;  %v756_v58 = vsel %vm684_vm2, %v445_v55, 0.0  ;;  %v886_v59 = vmul.f32 %v445_v55, %v445_v55  ;;  %v1262_v60 = vpop.f32.mrb[6].mxu0 }
  0xf2   : > { %v757_v61 = vadd.f32 %v756_v58, %v755_v56  ;;  %v952_v62 = vadd.f32 %v951_v57, %v950_v54  ;;  %692 = vst.msk [vmem:[%s1491_s25 + $0x38] sm:$0xff] %vm684_vm2, %v1262_v60  ;;  %v448_v63 = vpop.f32.mrb[7].mxu0  ;;  %v889_v10 = vmul.f32 %v1262_v60, %v1262_v60  ;;  %v957_v15 = vsel %vm684_vm2, %v888_v1, 0.0 }
  0xf3   : > { %v953_v2 = vsel %vm684_vm2, %v886_v59, 0.0  ;;  %690 = vst.msk [vmem:[%s1491_s25 + $0x28] sm:$0xff] %vm684_vm2, %v448_v63  ;;  %v758_v3 = vsel %vm684_vm2, %v448_v63, 0.0  ;;  %v887_v4 = vmul.f32 %v448_v63, %v448_v63  ;;  %v762_v16 = vsel %vm684_vm2, %v1262_v60, 0.0  ;;  %v1552_v28 = vpop.f32.mrb[4].mxu1 }
  0xf4   : > { %v954_v6 = vadd.f32 %v953_v2, %v952_v62  ;;  %v759_v7 = vadd.f32 %v758_v3, %v757_v61  ;;  %v959_v21 = vsel %vm684_vm2, %v889_v10, 0.0  ;;  %723 = vst.msk [vmem:[%s1491_s25 + $0x130] sm:$0xff] %vm684_vm2, %v1552_v28  ;;  %v1561_v33 = vpop.f32.mrb[5].mxu1 }
  0xf5   : > { %v955_v11 = vsel %vm684_vm2, %v887_v4, 0.0  ;;  %721 = vst.msk [vmem:[%s1491_s25 + $0x120] sm:$0xff] %vm684_vm2, %v1561_v33  ;;  %v1566_v36 = vpop.f32.mrb[6].mxu1 }
  0xf6   : > { %v761_v13 = vadd.f32 %v760_v9, %v759_v7  ;;  %v956_v14 = vadd.f32 %v955_v11, %v954_v6  ;;  %724 = vst.msk [vmem:[%s1491_s25 + $0x138] sm:$0xff] %vm684_vm2, %v1566_v36  ;;  %v1573_v40 = vpop.f32.mrb[7].mxu1 }
  0xf7   : > { %v1265_v17 = vpop.f32.mrb[8].mxu0  ;;  %722 = vst.msk [vmem:[%s1491_s25 + $0x128] sm:$0xff] %vm684_vm2, %v1573_v40 }
  0xf8   : > { %v958_v18 = vadd.f32 %v957_v15, %v956_v14  ;;  %695 = vst.msk [vmem:[%s1491_s25 + $0x50] sm:$0xff] %vm684_vm2, %v1265_v17  ;;  %v461_v19 = vpop.f32.mrb[9].mxu0  ;;  %v763_v20 = vadd.f32 %v762_v16, %v761_v13  ;;  %v892_v29 = vmul.f32 %v1265_v17, %v1265_v17  ;;  %v768_v37 = vsel %vm684_vm2, %v1265_v17, 0.0 }
  0xf9   : > { %693 = vst.msk [vmem:[%s1491_s25 + $0x40] sm:$0xff] %vm684_vm2, %v461_v19  ;;  %v764_v22 = vsel %vm684_vm2, %v461_v19, 0.0  ;;  %v890_v23 = vmul.f32 %v461_v19, %v461_v19  ;;  %v1266_v24 = vpop.f32.mrb[10].mxu0 }
  0xfa   : > { %v765_v25 = vadd.f32 %v764_v22, %v763_v20  ;;  %v960_v26 = vadd.f32 %v959_v21, %v958_v18  ;;  %696 = vst.msk [vmem:[%s1491_s25 + $0x58] sm:$0xff] %vm684_vm2, %v1266_v24  ;;  %v464_v27 = vpop.f32.mrb[11].mxu0  ;;  %v893_v38 = vmul.f32 %v1266_v24, %v1266_v24  ;;  %v965_v43 = vsel %vm684_vm2, %v892_v29, 0.0 }
  0xfb   : > { %v961_v30 = vsel %vm684_vm2, %v890_v23, 0.0  ;;  %694 = vst.msk [vmem:[%s1491_s25 + $0x48] sm:$0xff] %vm684_vm2, %v464_v27  ;;  %v766_v31 = vsel %vm684_vm2, %v464_v27, 0.0  ;;  %v891_v32 = vmul.f32 %v464_v27, %v464_v27  ;;  %v770_v44 = vsel %vm684_vm2, %v1266_v24, 0.0  ;;  %v1588_v56 = vpop.f32.mrb[8].mxu1 }
  0xfc   : > { %v962_v34 = vadd.f32 %v961_v30, %v960_v26  ;;  %v767_v35 = vadd.f32 %v766_v31, %v765_v25  ;;  %v967_v49 = vsel %vm684_vm2, %v893_v38, 0.0  ;;  %727 = vst.msk [vmem:[%s1491_s25 + $0x150] sm:$0xff] %vm684_vm2, %v1588_v56  ;;  %v1597_v61 = vpop.f32.mrb[9].mxu1 }
  0xfd   : > { %v963_v39 = vsel %vm684_vm2, %v891_v32, 0.0  ;;  %725 = vst.msk [vmem:[%s1491_s25 + $0x140] sm:$0xff] %vm684_vm2, %v1597_v61  ;;  %v1602_v1 = vpop.f32.mrb[10].mxu1 }
  0xfe   : > { %v769_v41 = vadd.f32 %v768_v37, %v767_v35  ;;  %v964_v42 = vadd.f32 %v963_v39, %v962_v34  ;;  %728 = vst.msk [vmem:[%s1491_s25 + $0x158] sm:$0xff] %vm684_vm2, %v1602_v1  ;;  %v1609_v6 = vpop.f32.mrb[11].mxu1 }
  0xff   : > { %v1269_v45 = vpop.f32.mrb[12].mxu0  ;;  %726 = vst.msk [vmem:[%s1491_s25 + $0x148] sm:$0xff] %vm684_vm2, %v1609_v6 }
 0x100   : > { %v966_v46 = vadd.f32 %v965_v43, %v964_v42  ;;  %699 = vst.msk [vmem:[%s1491_s25 + $0x70] sm:$0xff] %vm684_vm2, %v1269_v45  ;;  %v477_v47 = vpop.f32.mrb[13].mxu0  ;;  %v771_v48 = vadd.f32 %v770_v44, %v769_v41  ;;  %v896_v57 = vmul.f32 %v1269_v45, %v1269_v45  ;;  %v776_v2 = vsel %vm684_vm2, %v1269_v45, 0.0 }
 0x101   : > { %697 = vst.msk [vmem:[%s1491_s25 + $0x60] sm:$0xff] %vm684_vm2, %v477_v47  ;;  %v772_v50 = vsel %vm684_vm2, %v477_v47, 0.0  ;;  %v894_v51 = vmul.f32 %v477_v47, %v477_v47  ;;  %v1270_v52 = vpop.f32.mrb[14].mxu0 }
 0x102   : > { %v773_v53 = vadd.f32 %v772_v50, %v771_v48  ;;  %v968_v54 = vadd.f32 %v967_v49, %v966_v46  ;;  %700 = vst.msk [vmem:[%s1491_s25 + $0x78] sm:$0xff] %vm684_vm2, %v1270_v52  ;;  %v480_v55 = vpop.f32.mrb[15].mxu0  ;;  %v897_v3 = vmul.f32 %v1270_v52, %v1270_v52  ;;  %v973_v10 = vsel %vm684_vm2, %v896_v57, 0.0 }
 0x103   : > { %v969_v58 = vsel %vm684_vm2, %v894_v51, 0.0  ;;  %698 = vst.msk [vmem:[%s1491_s25 + $0x68] sm:$0xff] %vm684_vm2, %v480_v55  ;;  %v774_v59 = vsel %vm684_vm2, %v480_v55, 0.0  ;;  %v895_v60 = vmul.f32 %v480_v55, %v480_v55  ;;  %v778_v11 = vsel %vm684_vm2, %v1270_v52, 0.0  ;;  %v1624_v24 = vpop.f32.mrb[12].mxu1 }
 0x104   : > { %v970_v62 = vadd.f32 %v969_v58, %v968_v54  ;;  %v775_v63 = vadd.f32 %v774_v59, %v773_v53  ;;  %v975_v17 = vsel %vm684_vm2, %v897_v3, 0.0  ;;  %731 = vst.msk [vmem:[%s1491_s25 + $0x170] sm:$0xff] %vm684_vm2, %v1624_v24  ;;  %v1633_v30 = vpop.f32.mrb[13].mxu1 }
 0x105   : > { %v971_v4 = vsel %vm684_vm2, %v895_v60, 0.0  ;;  %729 = vst.msk [vmem:[%s1491_s25 + $0x160] sm:$0xff] %vm684_vm2, %v1633_v30  ;;  %v1638_v34 = vpop.f32.mrb[14].mxu1 }
 0x106   : > { %v777_v7 = vadd.f32 %v776_v2, %v775_v63  ;;  %v972_v9 = vadd.f32 %v971_v4, %v970_v62  ;;  %732 = vst.msk [vmem:[%s1491_s25 + $0x178] sm:$0xff] %vm684_vm2, %v1638_v34  ;;  %v1645_v39 = vpop.f32.mrb[15].mxu1 }
 0x107   : > { %v1273_v13 = vpop.f32.mrb[16].mxu0  ;;  %730 = vst.msk [vmem:[%s1491_s25 + $0x168] sm:$0xff] %vm684_vm2, %v1645_v39 }
 0x108   : > { %v974_v14 = vadd.f32 %v973_v10, %v972_v9  ;;  %703 = vst.msk [vmem:[%s1491_s25 + $0x90] sm:$0xff] %vm684_vm2, %v1273_v13  ;;  %v493_v15 = vpop.f32.mrb[17].mxu0  ;;  %v779_v16 = vadd.f32 %v778_v11, %v777_v7  ;;  %v900_v25 = vmul.f32 %v1273_v13, %v1273_v13  ;;  %v784_v35 = vsel %vm684_vm2, %v1273_v13, 0.0 }
 0x109   : > { %701 = vst.msk [vmem:[%s1491_s25 + $0x80] sm:$0xff] %vm684_vm2, %v493_v15  ;;  %v780_v18 = vsel %vm684_vm2, %v493_v15, 0.0  ;;  %v898_v19 = vmul.f32 %v493_v15, %v493_v15  ;;  %v1274_v20 = vpop.f32.mrb[18].mxu0 }
 0x10a   : > { %v781_v21 = vadd.f32 %v780_v18, %v779_v16  ;;  %v976_v22 = vadd.f32 %v975_v17, %v974_v14  ;;  %704 = vst.msk [vmem:[%s1491_s25 + $0x98] sm:$0xff] %vm684_vm2, %v1274_v20  ;;  %v496_v23 = vpop.f32.mrb[19].mxu0  ;;  %v901_v37 = vmul.f32 %v1274_v20, %v1274_v20  ;;  %v981_v43 = vsel %vm684_vm2, %v900_v25, 0.0 }
 0x10b   : > { %v977_v26 = vsel %vm684_vm2, %v898_v19, 0.0  ;;  %702 = vst.msk [vmem:[%s1491_s25 + $0x88] sm:$0xff] %vm684_vm2, %v496_v23  ;;  %v782_v27 = vsel %vm684_vm2, %v496_v23, 0.0  ;;  %v899_v29 = vmul.f32 %v496_v23, %v496_v23  ;;  %v786_v44 = vsel %vm684_vm2, %v1274_v20, 0.0  ;;  %v1660_v57 = vpop.f32.mrb[16].mxu1 }
 0x10c   : > { %v978_v31 = vadd.f32 %v977_v26, %v976_v22  ;;  %v783_v32 = vadd.f32 %v782_v27, %v781_v21  ;;  %v983_v49 = vsel %vm684_vm2, %v901_v37, 0.0  ;;  %735 = vst.msk [vmem:[%s1491_s25 + $0x190] sm:$0xff] %vm684_vm2, %v1660_v57  ;;  %v1669_v63 = vpop.f32.mrb[17].mxu1 }
 0x10d   : > { %v979_v38 = vsel %vm684_vm2, %v899_v29, 0.0  ;;  %733 = vst.msk [vmem:[%s1491_s25 + $0x180] sm:$0xff] %vm684_vm2, %v1669_v63  ;;  %v1674_v4 = vpop.f32.mrb[18].mxu1 }
 0x10e   : > { %v785_v41 = vadd.f32 %v784_v35, %v783_v32  ;;  %v980_v42 = vadd.f32 %v979_v38, %v978_v31  ;;  %736 = vst.msk [vmem:[%s1491_s25 + $0x198] sm:$0xff] %vm684_vm2, %v1674_v4  ;;  %v1681_v11 = vpop.f32.mrb[19].mxu1 }
 0x10f   : > { %v1277_v45 = vpop.f32.mrb[20].mxu0  ;;  %734 = vst.msk [vmem:[%s1491_s25 + $0x188] sm:$0xff] %vm684_vm2, %v1681_v11 }
 0x110   : > { %v982_v46 = vadd.f32 %v981_v43, %v980_v42  ;;  %707 = vst.msk [vmem:[%s1491_s25 + $0xb0] sm:$0xff] %vm684_vm2, %v1277_v45  ;;  %v509_v47 = vpop.f32.mrb[21].mxu0  ;;  %v787_v48 = vadd.f32 %v786_v44, %v785_v41  ;;  %v904_v58 = vmul.f32 %v1277_v45, %v1277_v45  ;;  %v792_v7 = vsel %vm684_vm2, %v1277_v45, 0.0 }
 0x111   : > { %705 = vst.msk [vmem:[%s1491_s25 + $0xa0] sm:$0xff] %vm684_vm2, %v509_v47  ;;  %v788_v50 = vsel %vm684_vm2, %v509_v47, 0.0  ;;  %v902_v51 = vmul.f32 %v509_v47, %v509_v47  ;;  %v1278_v52 = vpop.f32.mrb[22].mxu0 }
 0x112   : > { %v789_v53 = vadd.f32 %v788_v50, %v787_v48  ;;  %v984_v54 = vadd.f32 %v983_v49, %v982_v46  ;;  %708 = vst.msk [vmem:[%s1491_s25 + $0xb8] sm:$0xff] %vm684_vm2, %v1278_v52  ;;  %v512_v55 = vpop.f32.mrb[23].mxu0  ;;  %v905_v9 = vmul.f32 %v1278_v52, %v1278_v52  ;;  %v989_v15 = vsel %vm684_vm2, %v904_v58, 0.0 }
 0x113   : > { %v985_v59 = vsel %vm684_vm2, %v902_v51, 0.0  ;;  %706 = vst.msk [vmem:[%s1491_s25 + $0xa8] sm:$0xff] %vm684_vm2, %v512_v55  ;;  %v790_v60 = vsel %vm684_vm2, %v512_v55, 0.0  ;;  %v903_v62 = vmul.f32 %v512_v55, %v512_v55  ;;  %v794_v16 = vsel %vm684_vm2, %v1278_v52, 0.0  ;;  %v1696_v31 = vpop.f32.mrb[20].mxu1 }
 0x114   : > { %v986_v2 = vadd.f32 %v985_v59, %v984_v54  ;;  %v791_v3 = vadd.f32 %v790_v60, %v789_v53  ;;  %v991_v21 = vsel %vm684_vm2, %v905_v9, 0.0  ;;  %739 = vst.msk [vmem:[%s1491_s25 + $0x1b0] sm:$0xff] %vm684_vm2, %v1696_v31  ;;  %v1705_v41 = vpop.f32.mrb[21].mxu1 }
 0x115   : > { %v987_v10 = vsel %vm684_vm2, %v903_v62, 0.0  ;;  %737 = vst.msk [vmem:[%s1491_s25 + $0x1a0] sm:$0xff] %vm684_vm2, %v1705_v41  ;;  %v1710_v44 = vpop.f32.mrb[22].mxu1 }
 0x116   : > { %v793_v13 = vadd.f32 %v792_v7, %v791_v3  ;;  %v988_v14 = vadd.f32 %v987_v10, %v986_v2  ;;  %740 = vst.msk [vmem:[%s1491_s25 + $0x1b8] sm:$0xff] %vm684_vm2, %v1710_v44  ;;  %v1717_v48 = vpop.f32.mrb[23].mxu1 }
 0x117   : > { %v1281_v17 = vpop.f32.mrb[24].mxu0  ;;  %738 = vst.msk [vmem:[%s1491_s25 + $0x1a8] sm:$0xff] %vm684_vm2, %v1717_v48 }
 0x118   : > { %v990_v18 = vadd.f32 %v989_v15, %v988_v14  ;;  %711 = vst.msk [vmem:[%s1491_s25 + $0xd0] sm:$0xff] %vm684_vm2, %v1281_v17  ;;  %v525_v19 = vpop.f32.mrb[25].mxu0  ;;  %v795_v20 = vadd.f32 %v794_v16, %v793_v13  ;;  %v908_v32 = vmul.f32 %v1281_v17, %v1281_v17  ;;  %v800_v45 = vsel %vm684_vm2, %v1281_v17, 0.0 }
 0x119   : > { %709 = vst.msk [vmem:[%s1491_s25 + $0xc0] sm:$0xff] %vm684_vm2, %v525_v19  ;;  %v796_v22 = vsel %vm684_vm2, %v525_v19, 0.0  ;;  %v906_v23 = vmul.f32 %v525_v19, %v525_v19  ;;  %v1282_v25 = vpop.f32.mrb[26].mxu0 }
 0x11a   : > { %v797_v26 = vadd.f32 %v796_v22, %v795_v20  ;;  %v992_v27 = vadd.f32 %v991_v21, %v990_v18  ;;  %712 = vst.msk [vmem:[%s1491_s25 + $0xd8] sm:$0xff] %vm684_vm2, %v1282_v25  ;;  %v528_v29 = vpop.f32.mrb[27].mxu0  ;;  %v909_v46 = vmul.f32 %v1282_v25, %v1282_v25  ;;  %v997_v51 = vsel %vm684_vm2, %v908_v32, 0.0 }
 0x11b   : > { %v993_v35 = vsel %vm684_vm2, %v906_v23, 0.0  ;;  %710 = vst.msk [vmem:[%s1491_s25 + $0xc8] sm:$0xff] %vm684_vm2, %v528_v29  ;;  %v798_v37 = vsel %vm684_vm2, %v528_v29, 0.0  ;;  %v907_v38 = vmul.f32 %v528_v29, %v528_v29  ;;  %v802_v52 = vsel %vm684_vm2, %v1282_v25, 0.0  ;;  %v1732_v10 = vpop.f32.mrb[24].mxu1 }
 0x11c   : > { %v994_v42 = vadd.f32 %v993_v35, %v992_v27  ;;  %v799_v43 = vadd.f32 %v798_v37, %v797_v26  ;;  %v999_v59 = vsel %vm684_vm2, %v909_v46, 0.0  ;;  %743 = vst.msk [vmem:[%s1491_s25 + $0x1d0] sm:$0xff] %vm684_vm2, %v1732_v10  ;;  %v1741_v17 = vpop.f32.mrb[25].mxu1  ;;  %v914_v25 = vmul.f32 %v1525_v5, %v1525_v5 }
 0x11d   : > { %v995_v47 = vsel %vm684_vm2, %v907_v38, 0.0  ;;  %741 = vst.msk [vmem:[%s1491_s25 + $0x1c0] sm:$0xff] %vm684_vm2, %v1741_v17  ;;  %v1746_v20 = vpop.f32.mrb[26].mxu1  ;;  %v812_v37 = vsel %vm684_vm2, %v1525_v5, 0.0  ;;  %v915_v46 = vmul.f32 %v1537_v12, %v1537_v12  ;;  %v814_v5 = vsel %vm684_vm2, %v1537_v12, 0.0 }
 0x11e   : > { %v801_v49 = vadd.f32 %v800_v45, %v799_v43  ;;  %v996_v50 = vadd.f32 %v995_v47, %v994_v42  ;;  %744 = vst.msk [vmem:[%s1491_s25 + $0x1d8] sm:$0xff] %vm684_vm2, %v1746_v20  ;;  %v1755_v26 = vpop.f32.mrb[27].mxu1  ;;  %v1009_v45 = vsel %vm684_vm2, %v914_v25, 0.0 }
 0x11f   : > { %v1285_v53 = vpop.f32.mrb[28].mxu0  ;;  %742 = vst.msk [vmem:[%s1491_s25 + $0x1c8] sm:$0xff] %vm684_vm2, %v1755_v26  ;;  %v1011_v12 = vsel %vm684_vm2, %v915_v46, 0.0 }
 0x120   : > { %v998_v54 = vadd.f32 %v997_v51, %v996_v50  ;;  %715 = vst.msk [vmem:[%s1491_s25 + $0xf0] sm:$0xff] %vm684_vm2, %v1285_v53  ;;  %v541_v55 = vpop.f32.mrb[29].mxu0  ;;  %v803_v58 = vadd.f32 %v802_v52, %v801_v49  ;;  %v912_v13 = vmul.f32 %v1285_v53, %v1285_v53  ;;  %v808_v21 = vsel %vm684_vm2, %v1285_v53, 0.0 }
 0x121   : > { %713 = vst.msk [vmem:[%s1491_s25 + $0xe0] sm:$0xff] %vm684_vm2, %v541_v55  ;;  %v804_v60 = vsel %vm684_vm2, %v541_v55, 0.0  ;;  %v910_v62 = vmul.f32 %v541_v55, %v541_v55  ;;  %v1286_v2 = vpop.f32.mrb[30].mxu0  ;;  %v916_v51 = vmul.f32 %v1516_v0, %v1516_v0 }
 0x122   : > { %v805_v3 = vadd.f32 %v804_v60, %v803_v58  ;;  %v1000_v7 = vadd.f32 %v999_v59, %v998_v54  ;;  %716 = vst.msk [vmem:[%s1491_s25 + $0xf8] sm:$0xff] %vm684_vm2, %v1286_v2  ;;  %v544_v9 = vpop.f32.mrb[31].mxu0  ;;  %v913_v22 = vmul.f32 %v1286_v2, %v1286_v2  ;;  %v1005_v32 = vsel %vm684_vm2, %v912_v13, 0.0 }
 0x123   : > { %v1001_v14 = vsel %vm684_vm2, %v910_v62, 0.0  ;;  %714 = vst.msk [vmem:[%s1491_s25 + $0xe8] sm:$0xff] %vm684_vm2, %v544_v9  ;;  %v806_v15 = vsel %vm684_vm2, %v544_v9, 0.0  ;;  %v911_v16 = vmul.f32 %v544_v9, %v544_v9  ;;  %v810_v35 = vsel %vm684_vm2, %v1286_v2, 0.0  ;;  %v1768_v50 = vpop.f32.mrb[28].mxu1 }
 0x124   : > { %v1002_v18 = vadd.f32 %v1001_v14, %v1000_v7  ;;  %v807_v19 = vadd.f32 %v806_v15, %v805_v3  ;;  %v1007_v43 = vsel %vm684_vm2, %v913_v22, 0.0  ;;  %747 = vst.msk [vmem:[%s1491_s25 + $0x1f0] sm:$0xff] %vm684_vm2, %v1768_v50  ;;  %v1777_v52 = vpop.f32.mrb[29].mxu1  ;;  %v816_v58 = vsel %vm684_vm2, %v1516_v0, 0.0 }
 0x125   : > { %v1003_v23 = vsel %vm684_vm2, %v911_v16, 0.0  ;;  %745 = vst.msk [vmem:[%s1491_s25 + $0x1e0] sm:$0xff] %vm684_vm2, %v1777_v52  ;;  %v1782_v55 = vpop.f32.mrb[30].mxu1  ;;  %v917_v59 = vmul.f32 %v1530_v8, %v1530_v8  ;;  %v918_v60 = vmul.f32 %v1561_v33, %v1561_v33  ;;  %v1013_v0 = vsel %vm684_vm2, %v916_v51, 0.0 }
 0x126   : > { %v809_v27 = vadd.f32 %v808_v21, %v807_v19  ;;  %v1004_v29 = vadd.f32 %v1003_v23, %v1002_v18  ;;  %748 = vst.msk [vmem:[%s1491_s25 + $0x1f8] sm:$0xff] %vm684_vm2, %v1782_v55  ;;  %v1794_v62 = vpop.f32.mrb[31].mxu1  ;;  %v818_v7 = vsel %vm684_vm2, %v1530_v8, 0.0  ;;  %v820_v9 = vsel %vm684_vm2, %v1561_v33, 0.0 }
 0x127   : > { %746 = vst.msk [vmem:[%s1491_s25 + $0x1e8] sm:$0xff] %vm684_vm2, %v1794_v62  ;;  %v1015_v15 = vsel %vm684_vm2, %v917_v59, 0.0  ;;  %v1017_v16 = vsel %vm684_vm2, %v918_v60, 0.0  ;;  %v919_v18 = vmul.f32 %v1573_v40, %v1573_v40  ;;  %v920_v22 = vmul.f32 %v1552_v28, %v1552_v28 }
 0x128   : > { %v1006_v38 = vadd.f32 %v1005_v32, %v1004_v29  ;;  %v811_v42 = vadd.f32 %v810_v35, %v809_v27  ;;  %v822_v8 = vsel %vm684_vm2, %v1573_v40, 0.0  ;;  %v824_v33 = vsel %vm684_vm2, %v1552_v28, 0.0 }
 0x129   : > { %v921_v27 = vmul.f32 %v1566_v36, %v1566_v36  ;;  %v1019_v29 = vsel %vm684_vm2, %v919_v18, 0.0  ;;  %v922_v32 = vmul.f32 %v1597_v61, %v1597_v61  ;;  %v826_v40 = vsel %vm684_vm2, %v1566_v36, 0.0 }
 0x12a   : > { %v813_v47 = vadd.f32 %v812_v37, %v811_v42  ;;  %v1008_v49 = vadd.f32 %v1007_v43, %v1006_v38  ;;  %v1021_v38 = vsel %vm684_vm2, %v920_v22, 0.0  ;;  %v828_v42 = vsel %vm684_vm2, %v1597_v61, 0.0 }
 0x12b   : > { %v1025_v46 = vsel %vm684_vm2, %v922_v32, 0.0  ;;  %v830_v36 = vsel %vm684_vm2, %v1609_v6, 0.0  ;;  %v832_v61 = vsel %vm684_vm2, %v1588_v56, 0.0  ;;  %v928_v18 = vmul.f32 %v1624_v24, %v1624_v24 }
 0x12c   : > { %v1010_v53 = vadd.f32 %v1009_v45, %v1008_v49  ;;  %v815_v54 = vadd.f32 %v814_v5, %v813_v47  ;;  %v1023_v45 = vsel %vm684_vm2, %v921_v27, 0.0  ;;  %v923_v47 = vmul.f32 %v1609_v6, %v1609_v6 }
 0x12d   : > { %v924_v5 = vmul.f32 %v1588_v56, %v1588_v56  ;;  %v834_v6 = vsel %vm684_vm2, %v1602_v1, 0.0  ;;  %v929_v22 = vmul.f32 %v1638_v34, %v1638_v34  ;;  %v1037_v27 = vsel %vm684_vm2, %v928_v18, 0.0 }
 0x12e   : > { %v817_v2 = vadd.f32 %v816_v58, %v815_v54  ;;  %v1012_v3 = vadd.f32 %v1011_v12, %v1010_v53  ;;  %v925_v58 = vmul.f32 %v1602_v1, %v1602_v1  ;;  %v1027_v59 = vsel %vm684_vm2, %v923_v47, 0.0 }
 0x12f   : > { %v926_v12 = vmul.f32 %v1633_v30, %v1633_v30  ;;  %v838_v1 = vsel %vm684_vm2, %v1645_v39, 0.0 }
 0x130   : > { %v1014_v13 = vadd.f32 %v1013_v0, %v1012_v3  ;;  %v819_v14 = vadd.f32 %v818_v7, %v817_v2  ;;  %v1029_v3 = vsel %vm684_vm2, %v924_v5, 0.0  ;;  %v836_v0 = vsel %vm684_vm2, %v1633_v30, 0.0 }
 0x131   : > { %v840_v30 = vsel %vm684_vm2, %v1624_v24, 0.0 }
 0x132   : > { %v821_v19 = vadd.f32 %v820_v9, %v819_v14  ;;  %v1016_v21 = vadd.f32 %v1015_v15, %v1014_v13  ;;  %v1031_v9 = vsel %vm684_vm2, %v925_v58, 0.0  ;;  %v1033_v13 = vsel %vm684_vm2, %v926_v12, 0.0 }
 0x133   : > { %v927_v14 = vmul.f32 %v1645_v39, %v1645_v39  ;;  %v842_v39 = vsel %vm684_vm2, %v1638_v34, 0.0  ;;  %v846_v34 = vsel %vm684_vm2, %v1681_v11, 0.0 }
 0x134   : > { %v1018_v23 = vadd.f32 %v1017_v16, %v1016_v21  ;;  %v823_v25 = vadd.f32 %v822_v8, %v821_v19 }
 0x135   : > { %v1035_v8 = vsel %vm684_vm2, %v927_v14, 0.0 }
 0x136   : > { %v825_v35 = vadd.f32 %v824_v33, %v823_v25  ;;  %v1020_v37 = vadd.f32 %v1019_v29, %v1018_v23  ;;  %v930_v23 = vmul.f32 %v1669_v63, %v1669_v63  ;;  %v844_v29 = vsel %vm684_vm2, %v1669_v63, 0.0 }
 0x137   : > { %v848_v63 = vsel %vm684_vm2, %v1660_v57, 0.0 }
 0x138   : > { %v1022_v43 = vadd.f32 %v1021_v38, %v1020_v37  ;;  %v827_v28 = vadd.f32 %v826_v40, %v825_v35  ;;  %v1039_v35 = vsel %vm684_vm2, %v929_v22, 0.0  ;;  %v1041_v37 = vsel %vm684_vm2, %v930_v23, 0.0 }
 0x139   : > { %v931_v38 = vmul.f32 %v1681_v11, %v1681_v11  ;;  %v850_v11 = vsel %vm684_vm2, %v1674_v4, 0.0  ;;  %v940_v22 = vmul.f32 %v1732_v10, %v1732_v10 }
 0x13a   : > { %v829_v49 = vadd.f32 %v828_v42, %v827_v28  ;;  %v1024_v51 = vadd.f32 %v1023_v45, %v1022_v43  ;;  %v932_v43 = vmul.f32 %v1660_v57, %v1660_v57 }
 0x13b   : > { %v1043_v47 = vsel %vm684_vm2, %v931_v38, 0.0 }
 0x13c   : > { %v1026_v53 = vadd.f32 %v1025_v46, %v1024_v51  ;;  %v831_v54 = vadd.f32 %v830_v36, %v829_v49  ;;  %v933_v46 = vmul.f32 %v1674_v4, %v1674_v4  ;;  %v934_v49 = vmul.f32 %v1705_v41, %v1705_v41 }
 0x13d   : > { %v1045_v36 = vsel %vm684_vm2, %v932_v43, 0.0  ;;  %v854_v4 = vsel %vm684_vm2, %v1717_v48, 0.0 }
 0x13e   : > { %v833_v60 = vadd.f32 %v832_v61, %v831_v54  ;;  %v1028_v2 = vadd.f32 %v1027_v59, %v1026_v53  ;;  %v852_v53 = vsel %vm684_vm2, %v1705_v41, 0.0  ;;  %v1047_v61 = vsel %vm684_vm2, %v933_v46, 0.0 }
 0x13f   : > { %v1049_v58 = vsel %vm684_vm2, %v934_v49, 0.0  ;;  %v935_v59 = vmul.f32 %v1717_v48, %v1717_v48  ;;  %v856_v41 = vsel %vm684_vm2, %v1696_v31, 0.0  ;;  %v858_v48 = vsel %vm684_vm2, %v1710_v44, 0.0 }
 0x140   : > { %v1030_v7 = vadd.f32 %v1029_v3, %v1028_v2  ;;  %v835_v56 = vadd.f32 %v834_v6, %v833_v60  ;;  %v936_v2 = vmul.f32 %v1696_v31, %v1696_v31 }
 0x142   : > { %v837_v15 = vadd.f32 %v836_v0, %v835_v56  ;;  %v1032_v16 = vadd.f32 %v1031_v9, %v1030_v7  ;;  %v937_v0 = vmul.f32 %v1710_v44, %v1710_v44  ;;  %v1051_v7 = vsel %vm684_vm2, %v935_v59, 0.0 }
 0x143   : > { %v938_v56 = vmul.f32 %v1741_v17, %v1741_v17  ;;  %v1053_v14 = vsel %vm684_vm2, %v936_v2, 0.0  ;;  %v862_v44 = vsel %vm684_vm2, %v1755_v26, 0.0 }
 0x144   : > { %v1034_v19 = vadd.f32 %v1033_v13, %v1032_v16  ;;  %v839_v21 = vadd.f32 %v838_v1, %v837_v15  ;;  %v860_v15 = vsel %vm684_vm2, %v1741_v17, 0.0  ;;  %v1055_v18 = vsel %vm684_vm2, %v937_v0, 0.0 }
 0x145   : > { %v1057_v1 = vsel %vm684_vm2, %v938_v56, 0.0  ;;  %v864_v17 = vsel %vm684_vm2, %v1732_v10, 0.0 }
 0x146   : > { %v841_v25 = vadd.f32 %v840_v30, %v839_v21  ;;  %v1036_v33 = vadd.f32 %v1035_v8, %v1034_v19  ;;  %v939_v19 = vmul.f32 %v1755_v26, %v1755_v26  ;;  %v866_v26 = vsel %vm684_vm2, %v1746_v20, 0.0 }
 0x148   : > { %v1038_v32 = vadd.f32 %v1037_v27, %v1036_v33  ;;  %v843_v24 = vadd.f32 %v842_v39, %v841_v25  ;;  %v941_v25 = vmul.f32 %v1746_v20, %v1746_v20  ;;  %v1059_v33 = vsel %vm684_vm2, %v939_v19, 0.0 }
 0x149   : > { %v942_v27 = vmul.f32 %v1777_v52, %v1777_v52  ;;  %v870_v20 = vsel %vm684_vm2, %v1794_v62, 0.0 }
 0x14a   : > { %v845_v40 = vadd.f32 %v844_v29, %v843_v24  ;;  %v1040_v42 = vadd.f32 %v1039_v35, %v1038_v32  ;;  %v1061_v32 = vsel %vm684_vm2, %v940_v22, 0.0  ;;  %v868_v24 = vsel %vm684_vm2, %v1777_v52, 0.0 }
 0x14b   : > { %v1065_v38 = vsel %vm684_vm2, %v942_v27, 0.0 }
 0x14c   : > { %v1042_v28 = vadd.f32 %v1041_v37, %v1040_v42  ;;  %v847_v45 = vadd.f32 %v846_v34, %v845_v40  ;;  %v1063_v37 = vsel %vm684_vm2, %v941_v25, 0.0  ;;  %v943_v40 = vmul.f32 %v1794_v62, %v1794_v62 }
 0x14d   : > { %v944_v34 = vmul.f32 %v1768_v50, %v1768_v50 }
 0x14e   : > { %v849_v51 = vadd.f32 %v848_v63, %v847_v45  ;;  %v1044_v5 = vadd.f32 %v1043_v47, %v1042_v28  ;;  %v872_v45 = vsel %vm684_vm2, %v1768_v50, 0.0  ;;  %v945_v63 = vmul.f32 %v1782_v55, %v1782_v55 }
 0x14f   : > { %v1067_v46 = vsel %vm684_vm2, %v943_v40, 0.0 }
 0x150   : > { %v1046_v54 = vadd.f32 %v1045_v36, %v1044_v5  ;;  %v851_v57 = vadd.f32 %v850_v11, %v849_v51  ;;  %v1069_v51 = vsel %vm684_vm2, %v944_v34, 0.0  ;;  %v874_v5 = vsel %vm684_vm2, %v1782_v55, 0.0 }
 0x151   : > { %v1071_v11 = vsel %vm684_vm2, %v945_v63, 0.0 }
 0x152   : > { %v853_v12 = vadd.f32 %v852_v53, %v851_v57  ;;  %v1048_v60 = vadd.f32 %v1047_v61, %v1046_v54 }
 0x154   : > { %v1050_v3 = vadd.f32 %v1049_v58, %v1048_v60  ;;  %v855_v6 = vadd.f32 %v854_v4, %v853_v12 }
 0x156   : > { %v857_v9 = vadd.f32 %v856_v41, %v855_v6  ;;  %v1052_v13 = vadd.f32 %v1051_v7, %v1050_v3 }
 0x158   : > { %v1054_v16 = vadd.f32 %v1053_v14, %v1052_v13  ;;  %v859_v31 = vadd.f32 %v858_v48, %v857_v9 }
 0x15a   : > { %v861_v21 = vadd.f32 %v860_v15, %v859_v31  ;;  %v1056_v30 = vadd.f32 %v1055_v18, %v1054_v16 }
 0x15c   : > { %v1058_v8 = vadd.f32 %v1057_v1, %v1056_v30  ;;  %v863_v23 = vadd.f32 %v862_v44, %v861_v21 }
 0x15e   : > { %v865_v39 = vadd.f32 %v864_v17, %v863_v23  ;;  %v1060_v29 = vadd.f32 %v1059_v33, %v1058_v8 }
 0x160   : > { %v1062_v35 = vadd.f32 %v1061_v32, %v1060_v29  ;;  %v867_v10 = vadd.f32 %v866_v26, %v865_v39 }
 0x162   : > { %v869_v42 = vadd.f32 %v868_v24, %v867_v10  ;;  %v1064_v43 = vadd.f32 %v1063_v37, %v1062_v35 }
 0x164   : > { %v1066_v28 = vadd.f32 %v1065_v38, %v1064_v43  ;;  %v871_v52 = vadd.f32 %v870_v20, %v869_v42 }
 0x166   : > { %v873_v47 = vadd.f32 %v872_v45, %v871_v52  ;;  %v1068_v49 = vadd.f32 %v1067_v46, %v1066_v28 }
 0x168   : > { %v875_v36 = vadd.f32 %v874_v5, %v873_v47  ;;  %v1070_v62 = vadd.f32 %v1069_v51, %v1068_v49 }
 0x16a   : > { %v876_v53 = vrot.slane %v875_v36, 4  ;;  %v1072_v54 = vadd.f32 %v1071_v11, %v1070_v62 }
 0x16c   : > { %v877_v50 = vadd.f32 %v876_v53, %v875_v36  ;;  %v1073_v57 = vrot.slane %v1072_v54, 4 }
 0x16e   : > { %v878_v61 = vrot.slane %v877_v50, 2  ;;  %v1074_v58 = vadd.f32 %v1073_v57, %v1072_v54 }
 0x170   : > { %v879_v59 = vadd.f32 %v878_v61, %v877_v50  ;;  %v1075_v12 = vrot.slane %v1074_v58, 2 }
 0x172   : > { %v880_v60 = vrot.slane %v879_v59, 1  ;;  %v1076_v2 = vadd.f32 %v1075_v12, %v1074_v58 }
 0x174   : > { %v1077_v4 = vrot.slane %v1076_v2, 1  ;;  %v881_v55 = vadd.f32 %v880_v60, %v879_v59 }
 0x176   : > { %v1078_v3 = vadd.f32 %v1077_v4, %v1076_v2 }
 0x178   : > { %v1080_v6 = vsel %vm1079_vm3, %v881_v55, %v1078_v3 }
 0x179   : > { %v1082_v41 = vsel %vm1081_vm4, %v1080_v6, 0.0 }
 0x17a   : > { %1083 = vst.msk [vmem:[%s184_s29] sm:$0xff] %vm684_vm2, %v1082_v41 }
 0x17b PF: > { %s14_s12 = sadd.s32 1, %s1341_s12  }
 0x17c   : > { %p11_p5 = scmp.ge.s32.totalorder %s14_s12, 4  }
 0x17e   :  { %13 = sbr.rel (!%p11_p5) target bundleno = 1 (0x1), region = 70 }

// kernel: _lambda_.8
= control target key start
LH: loop header
LB: loop body
LE: loop exit
PB: predicated region body
PF: predicated region fallthrough
CT: control target
= control target key end

     0   :  { %s4639_s18 = smov 0   ;;  %s5751_s0 = inlined_call_operand.vmem [shape: f32[2,10,10,10,24], index: 0, kind: input, shape index: {}]   ;;  %s5752_s1 = inlined_call_operand.vmem [shape: bf16[27,24,16], index: 1, kind: input, shape index: {}]   ;;  %s5753_s2 = inlined_call_operand.vmem [shape: f32[1,24], index: 2, kind: input, shape index: {}]   ;;  %s5754_s3 = inlined_call_operand.vmem [shape: f32[1,24], index: 3, kind: input, shape index: {}]   ;;  %s5755_s4 = inlined_call_operand.vmem [shape: f32[2,8,64,16], index: 4, kind: output, shape index: {0}]   ;;  %s5756_s5 = inlined_call_operand.vmem [shape: f32[2,8,16], index: 5, kind: output, shape index: {1}]  }
   0x1 LB: > { %s3495_s2 = sadd.s32 4294967295, %s4602_s18   ;;  %p3499_p0 = scmp.ge.s32.totalorder %s4602_s18, 1  ;;  %s4602_s18 = sphi %s4639_s18, %s16_s18  }
   0x2   : > { %p190_p1 = scmp.lt.s32.totalorder %s4602_s18, 3 }
   0x4   : > { %p191_p2 = pnand %p3499_p0, %p190_p1 }
   0x5   : > { %p222_p3 = scmp.lt.s32.totalorder (!%p191_p2), %s3495_s2, 1  ;;  %vm237_vm0 = vcmask (!%p191_p2), 130048   ;;  %v4608_v0 = vmov (!%p191_p2), 0.0   ;;  %s4664_s30 = smov (!%p191_p2), 0  }
   0x6   : > { %194 = sbr.rel (%p191_p2) target bundleno = 488 (0x1e8), region = 36 }
   0xd   : > { %s5782_s2 = smov (!%p222_p3, %s3495_s2), 1 }
   0xe   : > { %s4514_s3 = smul.u32 1600, %s5782_s2  ;;  %s3787_s19 = sshll.u32 %s5782_s2, 9 }
   0xf   : > { %s4650_s22 = scalar_lea.vmem %s5755_s4, %s3787_s19  ;;  %s3503_s23 = sshll.u32 %s5782_s2, 3 }
  0x10   : > { %s4655_s26 = scalar_lea.vmem %s5751_s0, %s4514_s3  ;;  %s4660_s29 = scalar_lea.vmem %s5756_s5, %s3503_s23 }
  0x11   : > { %238 = vst.msk [vmem:[%s4660_s29] sm:$0xff] %vm237_vm0, %v4608_v0 }
  0x12 LB: >> { %v4532_v1 = vld [vmem:[%s5752_s1 + $0xc] sm:$0xff]   ;;  %v4533_v2 = vld [vmem:[%s5752_s1 + $0x9c] sm:$0xff]   ;;  %vm353_vm1 = vcmask 1043456   ;;  %v4534_v3 = vld [vmem:[%s5752_s1 + $0x14] ss:$0 sps:$4 sm:$0xff]   ;;  %s245_s14 = smul.u32 160, %s4606_s30  ;;  %s4606_s30 = sphi %s4664_s30, %s244_s30  }
  0x13   : >> { %3950 = vmatprep.subr.bf16.mxu1 %v4532_v1  ;;  %4106 = vmatprep.subr.bf16.mxu0 %v4533_v2  ;;  %v4535_v4 = vld [vmem:[%s5752_s1 + $0xa4] ss:$0 sps:$4 sm:$0xff]   ;;  %v355_v5 = vsel %vm353_vm1, %v4534_v3, 0  ;;  %v4697_v8 = vld [vmem:[%s5752_s1 + $0xa8] sm:$0xff]   ;;  %vm290_vm2 = vcmask 1046528   ;;  %vm340_vm3 = vcmask 195584  }
  0x14   : >> { %3951 = vmatpush3.bf16.msra.mxu1 %v4532_v1  ;;  %4107 = vmatpush3.bf16.msra.mxu0 %v4533_v2  ;;  %v4536_v6 = vld [vmem:[%s5752_s1] sm:$0xff]   ;;  %v4689_v7 = vsel %vm353_vm1, %v4535_v4, 0  ;;  %s4692_s17 = scalar_lea.vmem %s4655_s26, %s245_s14  ;;  %v4538_v49 = vld [vmem:[%s5752_s1 + $0xb0] ss:$0 sps:$4 sm:$0xff]   ;;  %v4539_v50 = vld [vmem:[%s5752_s1 + $0x8] ss:$0 sps:$4 sm:$0xff]  }
  0x15   : >> { %4486 = vmatprep.subr.msk.bf16.mxu1 %vm353_vm1, %v4534_v3  ;;  %4499 = vmatprep.subr.msk.bf16.mxu0 %vm353_vm1, %v4535_v4  ;;  %5764 = vst [vmem:[#allocation2_spill] sm:$0xff] %v4689_v7  ;;  %v4700_v9 = vld [vmem:[%s4692_s17] sm:$0xff]  ;;  %v4703_v10 = vld [vmem:[%s4692_s17 + $0x8] sm:$0x3]  ;;  %v4706_v11 = vld [vmem:[%s4692_s17 + $0x10] sm:$0xff]  ;;  %vm511_vm4 = vcmask 1045504  }
  0x16   : >> { %v4709_v12 = vld [vmem:[%s4692_s17 + $0x18] sm:$0x3]  ;;  %v4712_v13 = vld [vmem:[%s4692_s17 + $0x20] sm:$0xff]  ;;  %v4715_v14 = vld [vmem:[%s4692_s17 + $0x28] sm:$0x3]  ;;  %v291_v15 = vrot.slane %v4700_v9, 1 }
  0x17   : >> { %v4720_v16 = vld [vmem:[%s4692_s17 + $0x30] sm:$0xff]  ;;  %v4723_v17 = vld [vmem:[%s4692_s17 + $0x38] sm:$0x3]  ;;  %v292_v18 = vrot.slane %v4703_v10, 1  ;;  %v294_v19 = vrot.slane %v4706_v11, 1  ;;  %v295_v20 = vrot.slane %v4709_v12, 1 }
  0x18   : >> { %3953 = vmatpush3.bf16.msra.mxu1 %v355_v5  ;;  %4109 = vmatpush3.bf16.msra.mxu0 %v4689_v7  ;;  %v297_v21 = vrot.slane %v4712_v13, 1  ;;  %v298_v22 = vrot.slane %v4715_v14, 1  ;;  %v300_v24 = vrot.slane %v4720_v16, 1  ;;  %v301_v25 = vrot.slane %v4723_v17, 1  ;;  %v4741_v28 = vld [vmem:[%s4692_s17 + $0x40] sm:$0xff]  ;;  %v4751_v32 = vld [vmem:[%s4692_s17 + $0xb0] sm:$0xff] }
  0x19   : >> { %3962 = vmatprep.subr.bf16.mxu1 %v4536_v6  ;;  %4118 = vmatprep.subr.bf16.mxu0 %v4697_v8  ;;  %v293_v23 = vsel %vm290_vm2, %v291_v15, %v292_v18  ;;  %v4735_v26 = vsel %vm290_vm2, %v294_v19, %v295_v20  ;;  %v4744_v29 = vld [vmem:[%s4692_s17 + $0x48] sm:$0x3]  ;;  %v4758_v34 = vld [vmem:[%s4692_s17 + $0xb8] sm:$0x3]  ;;  %v4761_v35 = vld [vmem:[%s4692_s17 + $0xc0] sm:$0xff]  ;;  %v303_v39 = vrot.slane %v4741_v28, 1 }
  0x1a   : >> { %v4738_v27 = vsel %vm290_vm2, %v297_v21, %v298_v22  ;;  %v4747_v30 = vsel %vm290_vm2, %v300_v24, %v301_v25  ;;  %v323_v31 = vpack.c.bf16 %v4735_v26, %v293_v23  ;;  %v4764_v36 = vld [vmem:[%s4692_s17 + $0xc8] sm:$0x3]  ;;  %v4768_v37 = vld [vmem:[%s4692_s17 + $0xd0] sm:$0xff]  ;;  %v4771_v38 = vld [vmem:[%s4692_s17 + $0xd8] sm:$0x3]  ;;  %v1410_v42 = vrot.slane %v4751_v32, 1 }
  0x1b   : >> { %v4755_v33 = vpack.c.bf16 %v4747_v30, %v4738_v27  ;;  %5765 = vst [vmem:[#allocation3_spill] sm:$0xff] %v4768_v37  ;;  %v4775_v40 = vld [vmem:[%s4692_s17 + $0xe0] sm:$0xff]  ;;  %v4778_v41 = vld [vmem:[%s4692_s17 + $0xe8] sm:$0x3]  ;;  %v304_v43 = vrot.slane %v4744_v29, 1  ;;  %v1411_v44 = vrot.slane %v4758_v34, 1 }
  0x1c   : >> { %3954 = vmatprep.mubr.msk.bf16.mxu1 %vm340_vm3, %v323_v31  ;;  %v1413_v45 = vrot.slane %v4761_v35, 1  ;;  %v1414_v46 = vrot.slane %v4764_v36, 1  ;;  %v1416_v47 = vrot.slane %v4768_v37, 1  ;;  %v1417_v48 = vrot.slane %v4771_v38, 1  ;;  %v4798_v53 = vld [vmem:[%s4692_s17 + $0x50] sm:$0xff]  ;;  %v4811_v57 = vld [vmem:[%s4692_s17 + $0x60] sm:$0xff] }
  0x1d   : >> { %3955 = vmatmul.mubr.msk.bf16.vlgmr.msra.gmra.mrb[0].mxu1 %vm340_vm3, %v4755_v33  ;;  %v1419_v51 = vrot.slane %v4775_v40, 1  ;;  %v1420_v52 = vrot.slane %v4778_v41, 1  ;;  %v4801_v54 = vld [vmem:[%s4692_s17 + $0x58] sm:$0x3]  ;;  %v4804_v55 = vsel %vm290_vm2, %v1410_v42, %v1411_v44  ;;  %v4814_v58 = vld [vmem:[%s4692_s17 + $0x68] sm:$0x3]  ;;  %v4826_v62 = vsel %vm290_vm2, %v303_v39, %v304_v43 }
  0x1e   : >> { %3963 = vmatpush3.bf16.msra.mxu1 %v4536_v6  ;;  %5766 = vst [vmem:[#allocation4_spill] sm:$0xff] %v4804_v55  ;;  %v4807_v56 = vsel %vm290_vm2, %v1413_v45, %v1414_v46  ;;  %v4817_v59 = vsel %vm290_vm2, %v1416_v47, %v1417_v48  ;;  %v4823_v61 = vld [vmem:[%s4692_s17 + $0x78] sm:$0x3]  ;;  %v1548_v63 = vrot.slane %v4758_v34, 2  ;;  %v1551_v0 = vrot.slane %v4764_v36, 2  ;;  %v4832_v2 = vld [vmem:[%s4692_s17 + $0x70] sm:$0xff] }
  0x1f   : >> { %4487 = vmatprep.subr.msk.bf16.mxu1 %vm353_vm1, %v4539_v50  ;;  %v4820_v60 = vsel %vm290_vm2, %v1419_v51, %v1420_v52  ;;  %v1553_v1 = vrot.slane %v4768_v37, 2  ;;  %v1554_v3 = vrot.slane %v4771_v38, 2  ;;  %v1557_v4 = vrot.slane %v4778_v41, 2  ;;  %v4541_v25 = vld [vmem:[%s5752_s1 + $0x18] sm:$0xff]   ;;  %v4854_v31 = vld [vmem:[%s4692_s17 + $0xf0] sm:$0xff]  ;;  %v4882_v46 = vld [vmem:[%s4692_s17 + $0x100] sm:$0xff] }
  0x20   : >> { %v1792_v6 = vpack.c.bf16 %v4807_v56, %v4804_v55  ;;  %v1793_v15 = vpack.c.bf16 %v4820_v60, %v4817_v59  ;;  %v1931_v18 = vsel %vm353_vm1, %v4538_v49, 0  ;;  %v306_v19 = vrot.slane %v4798_v53, 1  ;;  %v4857_v34 = vld [vmem:[%s4692_s17 + $0xf8] sm:$0x3]  ;;  %v4885_v47 = vld [vmem:[%s4692_s17 + $0x108] sm:$0x3] }
  0x21   : >> { %v307_v20 = vrot.slane %v4801_v54, 1  ;;  %v309_v21 = vrot.slane %v4811_v57, 1  ;;  %v310_v22 = vrot.slane %v4814_v58, 1  ;;  %v312_v23 = vrot.slane %v4832_v2, 1  ;;  %v4540_v42 = vld [vmem:[%s5752_s1 + $0xb4] sm:$0xff]   ;;  %s3784_s13 = sshll.u32 %s4606_s30, 6 }
  0x22   : >> { %4110 = vmatprep.mubr.msk.bf16.mxu0 %vm340_vm3, %v1792_v6  ;;  %v313_v24 = vrot.slane %v4823_v61, 1  ;;  %v444_v38 = vsel %vm353_vm1, %v4539_v50, 0  ;;  %v1547_v39 = vrot.slane %v4751_v32, 2  ;;  %v1550_v41 = vrot.slane %v4761_v35, 2  ;;  %s5707_s14 = scalar_lea.vmem %s4650_s22, %s3784_s13  ;;  %s244_s30 = sadd.s32 1, %s4606_s30  }
  0x23   : >> { %4111 = vmatmul.mubr.msk.bf16.vlgmr.msra.gmra.mrb[0].mxu0 %vm340_vm3, %v1793_v15  ;;  %v4861_v36 = vsel %vm290_vm2, %v306_v19, %v307_v20  ;;  %v4875_v44 = vsel %vm290_vm2, %v309_v21, %v310_v22  ;;  %3965 = vmatpush3.bf16.msra.mxu1 %v444_v38  ;;  %v1556_v32 = vrot.slane %v4775_v40, 2  ;;  %v267_v51 = vpack.c.bf16 %v4706_v11, %v4700_v9  ;;  %v4918_v20 = vld [vmem:[%s4692_s17 + $0x110] sm:$0xff]  ;;  %v4921_v21 = vld [vmem:[%s4692_s17 + $0x120] sm:$0xff]  ;;  %v3597_v22 = vld [vmem:[%s4692_s17 + $0x118] sm:$0x3]  ;;  %p241_p4 = scmp.ge.s32.totalorder %s244_s30, 8  }
  0x24   : >> { %4119 = vmatpush3.bf16.msra.mxu0 %v4697_v8  ;;  %v4872_v43 = vpack.c.bf16 %v4861_v36, %v4826_v62  ;;  %v4878_v45 = vsel %vm290_vm2, %v312_v23, %v313_v24  ;;  %v4893_v48 = vsel %vm511_vm4, %v1547_v39, %v1548_v63  ;;  %v4896_v50 = vsel %vm511_vm4, %v1550_v41, %v1551_v0  ;;  %v3599_v23 = vld [vmem:[%s4692_s17 + $0x128] sm:$0x3] }
  0x25   : >> { %4501 = vmatprep.subr.msk.bf16.mxu0 %vm353_vm1, %v4538_v49  ;;  %v4890_v8 = vpack.c.bf16 %v4878_v45, %v4875_v44  ;;  %5767 = vst [vmem:[#allocation5_spill] sm:$0xff] %v4893_v48  ;;  %v1901_v49 = vpack.c.bf16 %v4896_v50, %v4893_v48  ;;  %3974 = vmatprep.subr.bf16.mxu1 %v4541_v25  ;;  %v1559_v52 = vrot.slane %v4854_v31, 2  ;;  %v1560_v63 = vrot.slane %v4857_v34, 2 }
  0x26   : >> { %3958 = vmatprep.mubr.msk.bf16.mxu1 %vm340_vm3, %v4872_v43  ;;  %v1562_v0 = vrot.slane %v4882_v46, 2  ;;  %v1563_v6 = vrot.slane %v4885_v47, 2  ;;  %v4912_v15 = vsel %vm511_vm4, %v1553_v1, %v1554_v3  ;;  %v4915_v19 = vsel %vm511_vm4, %v1556_v32, %v1557_v4  ;;  %5768 = vst [vmem:[#allocation6_spill] sm:$0xff] %v4918_v20 }
  0x27   : >> { %3959 = vmatmul.mubr.msk.bf16.gmra.mrb[4].mxu1 %vm340_vm3, %v4890_v8  ;;  %4122 = vmatprep.mubr.msk.bf16.mxu0 %vm340_vm3, %v1901_v49  ;;  %v4927_v24 = vsel %vm511_vm4, %v1559_v52, %v1560_v63  ;;  %v4934_v1 = vpack.c.bf16 %v4720_v16, %v4712_v13  ;;  %v512_v3 = vrot.slane %v4700_v9, 2  ;;  %v513_v4 = vrot.slane %v4703_v10, 2  ;;  %v4542_v9 = vld [vmem:[%s5752_s1 + $0xbc] ss:$0 sps:$4 sm:$0xff]   ;;  %v4543_v10 = vld [vmem:[%s5752_s1 + $0x20] ss:$0 sps:$4 sm:$0xff]  }
  0x28   : >> { %4121 = vmatpush3.bf16.msra.mxu0 %v1931_v18  ;;  %3966 = vmatprep.mubr.msk.bf16.mxu1 %vm340_vm3, %v267_v51  ;;  %v4930_v18 = vsel %vm511_vm4, %v1562_v0, %v1563_v6  ;;  %v1902_v38 = vpack.c.bf16 %v4915_v19, %v4912_v15  ;;  %v1565_v39 = vrot.slane %v4918_v20, 2  ;;  %v1566_v41 = vrot.slane %v3597_v22, 2 }
  0x29   : >> { %4130 = vmatprep.subr.bf16.mxu0 %v4540_v42  ;;  %v1897_v32 = vrot.slane %v4921_v21, 2  ;;  %v1898_v51 = vrot.slane %v3599_v23, 2  ;;  %v516_v49 = vrot.slane %v4709_v12, 2  ;;  %v1903_v52 = vpack.c.bf16 %v4930_v18, %v4927_v24 }
  0x2a   : >> { %v515_v63 = vrot.slane %v4706_v11, 2  ;;  %v4954_v0 = vpack.c.bf16 %v4798_v53, %v4741_v28  ;;  %v4960_v12 = vsel %vm511_vm4, %v1565_v39, %v1566_v41  ;;  %v2024_v5 = vsel %vm353_vm1, %v4542_v9, 0  ;;  %v4545_v39 = vld [vmem:[%s5752_s1 + $0x24] sm:$0xff]  }
  0x2b   : >> { %v4963_v6 = vsel %vm511_vm4, %v1897_v32, %v1898_v51  ;;  %v574_v7 = vsel %vm353_vm1, %v4543_v10, 0  ;;  %v518_v41 = vrot.slane %v4712_v13, 2  ;;  %v519_v32 = vrot.slane %v4715_v14, 2 }
  0x2c   : >> { %v4986_v51 = vpack.c.bf16 %v4832_v2, %v4811_v57  ;;  %v521_v14 = vrot.slane %v4720_v16, 2  ;;  %vm3360_vm5 = vcmask 122880  }
  0x2f   : >> { %4123 = vmatmul.mubr.msk.bf16.vlgmr.msra.gmra.mrb[0].mxu0 %vm340_vm3, %v1902_v38  ;;  %3967 = vmatmul.mubr.msk.bf16.vlgmr.msra.gmra.mrb[0].mxu1 %vm340_vm3, %v4934_v1  ;;  %v4544_v38 = vld [vmem:[%s5752_s1 + $0xc0] sm:$0xff]  }
  0x30   : >> { %4131 = vmatpush3.bf16.msra.mxu0 %v4540_v42  ;;  %3975 = vmatpush3.bf16.msra.mxu1 %v4541_v25  ;;  %v514_v25 = vsel %vm511_vm4, %v512_v3, %v513_v4  ;;  %v4974_v42 = vsel %vm511_vm4, %v515_v63, %v516_v49  ;;  %v1428_v3 = vrot.slane %v4918_v20, 1  ;;  %v1904_v4 = vpack.c.bf16 %v4963_v6, %v4960_v12 }
  0x31   : >> { %4126 = vmatprep.mubr.msk.bf16.mxu0 %vm340_vm3, %v1903_v52  ;;  %4502 = vmatprep.subr.msk.bf16.mxu0 %vm353_vm1, %v4542_v9  ;;  %v1429_v49 = vrot.slane %v3597_v22, 1  ;;  %v1788_v52 = vrot.slane %v4921_v21, 1  ;;  %v1789_v9 = vrot.slane %v3599_v23, 1  ;;  %v522_v63 = vrot.slane %v4723_v17, 2 }
  0x32   : >> { %3970 = vmatprep.mubr.msk.bf16.mxu1 %vm340_vm3, %v4954_v0  ;;  %4488 = vmatprep.subr.msk.bf16.mxu1 %vm353_vm1, %v4543_v10  ;;  %v4996_v10 = vpack.c.bf16 %v4768_v37, %v4761_v35  ;;  %v544_v48 = vpack.c.bf16 %v4974_v42, %v514_v25  ;;  %v525_v17 = vrot.slane %v4744_v29, 2  ;;  %v527_v35 = vrot.slane %v4798_v53, 2 }
  0x33   : >> { %v5000_v55 = vsel %vm290_vm2, %v1428_v3, %v1429_v49  ;;  %v5003_v22 = vsel %vm290_vm2, %v1788_v52, %v1789_v9  ;;  %v5015_v25 = vsel %vm511_vm4, %v518_v41, %v519_v32  ;;  %v5018_v3 = vsel %vm511_vm4, %v521_v14, %v522_v63  ;;  %v4546_v14 = vld [vmem:[%s5752_s1 + $0xc8] ss:$0 sps:$4 sm:$0xff]   ;;  %v4547_v63 = vld [vmem:[%s5752_s1 + $0x2c] ss:$0 sps:$4 sm:$0xff]  }
  0x34   : >> { %4133 = vmatpush3.bf16.msra.mxu0 %v2024_v5  ;;  %3977 = vmatpush3.bf16.msra.mxu1 %v574_v7  ;;  %5769 = vst [vmem:[#allocation7_spill] sm:$0xff] %v5000_v55  ;;  %5770 = vst [vmem:[#allocation8_spill] sm:$0xff] %v5003_v22  ;;  %v524_v7 = vrot.slane %v4741_v28, 2  ;;  %v528_v5 = vrot.slane %v4801_v54, 2  ;;  %v5029_v29 = vpack.c.bf16 %v4854_v31, %v4775_v40  ;;  %v530_v32 = vrot.slane %v4811_v57, 2 }
  0x35   : >> { %4142 = vmatprep.subr.bf16.mxu0 %v4544_v38  ;;  %3986 = vmatprep.subr.bf16.mxu1 %v4545_v39  ;;  %v531_v49 = vrot.slane %v4814_v58, 2  ;;  %v534_v52 = vrot.slane %v4823_v61, 2  ;;  %v5043_v9 = vpack.c.bf16 %v4918_v20, %v4882_v46  ;;  %v5060_v58 = vld [vmem:[%s4692_s17 + $0x130] sm:$0xff]  ;;  %v1425_v23 = vrot.slane %v4882_v46, 1 }
  0x36   : >> { %v5032_v54 = vsel %vm511_vm4, %v524_v7, %v525_v17  ;;  %v5035_v41 = vsel %vm511_vm4, %v527_v35, %v528_v5  ;;  %v2123_v35 = vsel %vm353_vm1, %v4546_v14, 0  ;;  %v679_v5 = vsel %vm353_vm1, %v4547_v63, 0  ;;  %v5382_v20 = vld [vmem:[%s4692_s17 + $0x90] sm:$0xff] }
  0x37   : >> { %4127 = vmatmul.mubr.msk.bf16.gmra.mrb[4].mxu0 %vm340_vm3, %v1904_v4  ;;  %3971 = vmatmul.mubr.msk.bf16.gmra.mrb[4].mxu1 %vm340_vm3, %v4986_v51  ;;  %v5025_v4 = vpack.c.bf16 %v5018_v3, %v5015_v25  ;;  %v5053_v7 = vpack.c.bf16 %v5035_v41, %v5032_v54  ;;  %v5063_v61 = vsel %vm511_vm4, %v530_v32, %v531_v49  ;;  %v1426_v37 = vrot.slane %v4885_v47, 1 }
  0x38   : >> { %4134 = vmatprep.mubr.msk.bf16.mxu0 %vm340_vm3, %v4996_v10  ;;  %3978 = vmatprep.mubr.msk.bf16.mxu1 %vm340_vm3, %v544_v48  ;;  %v533_v48 = vrot.slane %v4832_v2, 2  ;;  %v2006_v32 = vpack.c.bf16 %v5060_v58, %v4921_v21 }
  0x3a   : >> { %v5066_v17 = vsel %vm511_vm4, %v533_v48, %v534_v52  ;;  %v1422_v48 = vrot.slane %v4854_v31, 1  ;;  %v1423_v52 = vrot.slane %v4857_v34, 1  ;;  %v2101_v34 = vrot.slane %v5060_v58, 1 }
  0x3b   : >> { %v5086_v49 = vpack.c.bf16 %v5066_v17, %v5063_v61 }
  0x3c   : >> { %v5102_v31 = vsel %vm290_vm2, %v1422_v48, %v1423_v52  ;;  %v5157_v48 = vpack.c.bf16 %v4912_v15, %v4896_v50  ;;  %v2198_v50 = vrot.slane %v5060_v58, 2  ;;  %v5204_v58 = vld [vmem:[%s4692_s17 + $0x150] sm:$0xff] }
  0x3f   : >> { %4135 = vmatmul.mubr.msk.bf16.vlgmr.msra.gmra.mrb[0].mxu0 %vm340_vm3, %v5029_v29  ;;  %3979 = vmatmul.mubr.msk.bf16.vlgmr.msra.gmra.mrb[0].mxu1 %vm340_vm3, %v5025_v4 }
  0x40   : >> { %4143 = vmatpush3.bf16.msra.mxu0 %v4544_v38  ;;  %3987 = vmatpush3.bf16.msra.mxu1 %v4545_v39  ;;  %v4548_v38 = vld [vmem:[%s5752_s1 + $0xcc] sm:$0xff]  }
  0x41   : >> { %4138 = vmatprep.mubr.msk.bf16.mxu0 %vm340_vm3, %v5043_v9  ;;  %4503 = vmatprep.subr.msk.bf16.mxu0 %vm353_vm1, %v4546_v14  ;;  %v4549_v39 = vld [vmem:[%s5752_s1 + $0x30] sm:$0xff]   ;;  %v5092_v14 = vpack.c.bf16 %v4817_v59, %v4807_v56  ;;  %v5113_v56 = vpack.c.bf16 %v5102_v31, %v4820_v60  ;;  %v650_v59 = vpack.c.bf16 %v4741_v28, %v4720_v16  ;;  %v5135_v28 = vld [vmem:[%s4692_s17 + $0x80] sm:$0xff] }
  0x42   : >> { %3982 = vmatprep.mubr.msk.bf16.mxu1 %vm340_vm3, %v5053_v7  ;;  %4489 = vmatprep.subr.msk.bf16.mxu1 %vm353_vm1, %v4547_v63  ;;  %v649_v63 = vpack.c.bf16 %v4712_v13, %v4706_v11  ;;  %v3601_v11 = vld [vmem:[%s4692_s17 + $0x138] sm:$0x3]  ;;  %v5109_v13 = vsel %vm290_vm2, %v1425_v23, %v1426_v37  ;;  %v651_v60 = vpack.c.bf16 %v4811_v57, %v4798_v53  ;;  %v756_v52 = vrot.slane %v5135_v28, 1 }
  0x43   : >> { %v2102_v46 = vrot.slane %v3601_v11, 1  ;;  %v5120_v47 = vpack.c.bf16 %v5000_v55, %v5109_v13  ;;  %v4551_v37 = vld [vmem:[%s5752_s1 + $0x38] ss:$0 sps:$4 sm:$0xff]   ;;  %v2199_v15 = vrot.slane %v3601_v11, 2  ;;  %v4556_v11 = vld [vmem:[%s5752_s1 + $0xe4] sm:$0xff]  }
  0x44   : >> { %4145 = vmatpush3.bf16.msra.mxu0 %v2123_v35  ;;  %3989 = vmatpush3.bf16.msra.mxu1 %v679_v5  ;;  %v4550_v35 = vld [vmem:[%s5752_s1 + $0xd4] ss:$0 sps:$4 sm:$0xff]   ;;  %v790_v53 = vsel %vm353_vm1, %v4551_v37, 0  ;;  %v4552_v57 = vld [vmem:[%s5752_s1 + $0xd8] sm:$0xff]  }
  0x45   : >> { %4154 = vmatprep.subr.bf16.mxu0 %v4548_v38  ;;  %3998 = vmatprep.subr.bf16.mxu1 %v4549_v39  ;;  %v2103_v16 = vsel %vm290_vm2, %v2101_v34, %v2102_v46  ;;  %v2220_v23 = vsel %vm353_vm1, %v4550_v35, 0  ;;  %v4553_v5 = vld [vmem:[%s5752_s1 + $0x3c] sm:$0xff]   ;;  %v4557_v34 = vld [vmem:[%s5752_s1 + $0x48] sm:$0xff]  }
  0x47   : >> { %4139 = vmatmul.mubr.msk.bf16.gmra.mrb[4].mxu0 %vm340_vm3, %v2006_v32  ;;  %3983 = vmatmul.mubr.msk.bf16.gmra.mrb[4].mxu1 %vm340_vm3, %v5086_v49  ;;  %v760_v32 = vpack.c.bf16 %v4738_v27, %v4735_v26  ;;  %v761_v26 = vpack.c.bf16 %v4826_v62, %v4747_v30  ;;  %v5171_v27 = vpack.c.bf16 %v4927_v24, %v4915_v19  ;;  %v4554_v30 = vld [vmem:[%s5752_s1 + $0xe0] ss:$0 sps:$4 sm:$0xff]   ;;  %v4555_v62 = vld [vmem:[%s5752_s1 + $0x44] ss:$0 sps:$4 sm:$0xff]  }
  0x48   : >> { %4146 = vmatprep.mubr.msk.bf16.mxu0 %vm340_vm3, %v5092_v14  ;;  %3990 = vmatprep.mubr.msk.bf16.mxu1 %vm340_vm3, %v649_v63  ;;  %v762_v19 = vpack.c.bf16 %v4875_v44, %v4861_v36  ;;  %v2200_v24 = vsel %vm511_vm4, %v2198_v50, %v2199_v15  ;;  %v2348_v36 = vsel %vm353_vm1, %v4554_v30, 0  ;;  %v899_v44 = vsel %vm353_vm1, %v4555_v62, 0 }
  0x49   : >> { %v2202_v46 = vpack.c.bf16 %v2200_v24, %v4963_v6  ;;  %v2442_v15 = vrot.slane %v5204_v58, 1 }
  0x4f   : >> { %4147 = vmatmul.mubr.msk.bf16.vlgmr.msra.gmra.mrb[0].mxu0 %vm340_vm3, %v5113_v56  ;;  %3991 = vmatmul.mubr.msk.bf16.vlgmr.msra.gmra.mrb[0].mxu1 %vm340_vm3, %v650_v59  ;;  %v5178_v59 = vpack.c.bf16 %v4960_v12, %v4930_v18  ;;  %v5196_v12 = vld [vmem:[%s4692_s17 + $0x140] sm:$0xff] }
  0x50   : >> { %4155 = vmatpush3.bf16.msra.mxu0 %v4548_v38  ;;  %3999 = vmatpush3.bf16.msra.mxu1 %v4549_v39  ;;  %v2105_v38 = vpack.c.bf16 %v2103_v16, %v5003_v22  ;;  %v652_v39 = vpack.c.bf16 %v5135_v28, %v4832_v2  ;;  %v5165_v2 = vld [vmem:[%s4692_s17 + $0x88] sm:$0x3]  ;;  %v5230_v16 = vld [vmem:[%s4692_s17 + $0x170] sm:$0xff] }
  0x51   : >> { %4150 = vmatprep.mubr.msk.bf16.mxu0 %vm340_vm3, %v5120_v47  ;;  %4504 = vmatprep.subr.msk.bf16.mxu0 %vm353_vm1, %v4550_v35  ;;  %v757_v63 = vrot.slane %v5165_v2, 1 }
  0x52   : >> { %3994 = vmatprep.mubr.msk.bf16.mxu1 %vm340_vm3, %v651_v60  ;;  %4490 = vmatprep.subr.msk.bf16.mxu1 %vm353_vm1, %v4551_v37  ;;  %v2318_v37 = vpack.c.bf16 %v5204_v58, %v5196_v12  ;;  %v869_v60 = vpack.c.bf16 %v5015_v25, %v4974_v42  ;;  %v5237_v42 = vld [vmem:[%s4692_s17 + $0x190] sm:$0xff]  ;;  %v5240_v25 = vld [vmem:[%s4692_s17 + $0x148] sm:$0x3] }
  0x53   : >> { %v5193_v18 = vsel %vm290_vm2, %v756_v52, %v757_v63  ;;  %v2440_v50 = vrot.slane %v5240_v25, 1  ;;  %v871_v63 = vpack.c.bf16 %v5063_v61, %v5035_v41 }
  0x54   : >> { %4157 = vmatpush3.bf16.msra.mxu0 %v2220_v23  ;;  %4001 = vmatpush3.bf16.msra.mxu1 %v790_v53  ;;  %v763_v35 = vpack.c.bf16 %v5193_v18, %v4878_v45  ;;  %v5227_v45 = vld [vmem:[%s4692_s17 + $0x160] sm:$0xff]  ;;  %v5243_v53 = vld [vmem:[%s4692_s17 + $0x158] sm:$0x3] }
  0x55   : >> { %4166 = vmatprep.subr.bf16.mxu0 %v4552_v57  ;;  %4010 = vmatprep.subr.bf16.mxu1 %v4553_v5  ;;  %v5234_v23 = vld [vmem:[%s4692_s17 + $0x180] sm:$0xff]  ;;  %v2443_v52 = vrot.slane %v5243_v53, 1  ;;  %v2580_v6 = vrot.slane %v5243_v53, 2 }
  0x57   : >> { %4151 = vmatmul.mubr.msk.bf16.gmra.mrb[4].mxu0 %vm340_vm3, %v2105_v38  ;;  %3995 = vmatmul.mubr.msk.bf16.gmra.mrb[4].mxu1 %vm340_vm3, %v652_v39  ;;  %v2439_v38 = vrot.slane %v5196_v12, 1  ;;  %v4558_v39 = vld [vmem:[%s5752_s1 + $0xec] ss:$0 sps:$4 sm:$0xff]  }
  0x58   : >> { %4158 = vmatprep.mubr.msk.bf16.mxu0 %vm340_vm3, %v5157_v48  ;;  %4002 = vmatprep.mubr.msk.bf16.mxu1 %vm340_vm3, %v760_v32  ;;  %v865_v32 = vrot.slane %v5135_v28, 2  ;;  %v2501_v41 = vsel %vm353_vm1, %v4558_v39, 0 }
  0x59   : >> { %v2441_v24 = vsel %vm290_vm2, %v2439_v38, %v2440_v50  ;;  %v2454_v50 = vrot.slane %v5237_v42, 1 }
  0x5f   : >> { %4159 = vmatmul.mubr.msk.bf16.vlgmr.msra.gmra.mrb[0].mxu0 %vm340_vm3, %v5171_v27  ;;  %4003 = vmatmul.mubr.msk.bf16.vlgmr.msra.gmra.mrb[0].mxu1 %vm340_vm3, %v761_v26  ;;  %v866_v26 = vrot.slane %v5165_v2, 2  ;;  %v5273_v2 = vld [vmem:[%s4692_s17 + $0x1a0] sm:$0xff] }
  0x60   : >> { %4167 = vmatpush3.bf16.msra.mxu0 %v4552_v57  ;;  %4011 = vmatpush3.bf16.msra.mxu1 %v4553_v5  ;;  %v870_v57 = vpack.c.bf16 %v5032_v54, %v5018_v3  ;;  %v5249_v5 = vpack.c.bf16 %v5230_v16, %v5227_v45  ;;  %v5259_v3 = vpack.c.bf16 %v5237_v42, %v5234_v23  ;;  %v4559_v54 = vld [vmem:[%s5752_s1 + $0x50] ss:$0 sps:$4 sm:$0xff]  }
  0x61   : >> { %4162 = vmatprep.mubr.msk.bf16.mxu0 %vm340_vm3, %v5178_v59  ;;  %4505 = vmatprep.subr.msk.bf16.mxu0 %vm353_vm1, %v4554_v30  ;;  %v5276_v30 = vld [vmem:[%s4692_s17 + $0x1b0] sm:$0xff]  ;;  %v992_v61 = vsel %vm353_vm1, %v4559_v54, 0 }
  0x62   : >> { %4006 = vmatprep.mubr.msk.bf16.mxu1 %vm340_vm3, %v762_v19  ;;  %4491 = vmatprep.subr.msk.bf16.mxu1 %vm353_vm1, %v4555_v62  ;;  %v5279_v62 = vsel %vm511_vm4, %v865_v32, %v866_v26  ;;  %v5282_v19 = vld [vmem:[%s4692_s17 + $0x168] sm:$0x3]  ;;  %v2448_v32 = vrot.slane %v5230_v16, 1 }
  0x64   : >> { %4169 = vmatpush3.bf16.msra.mxu0 %v2348_v36  ;;  %4013 = vmatpush3.bf16.msra.mxu1 %v899_v44  ;;  %v5291_v36 = vsel %vm290_vm2, %v2442_v15, %v2443_v52  ;;  %v4560_v44 = vld [vmem:[%s5752_s1 + $0xf0] sm:$0xff]  }
  0x65   : >> { %4178 = vmatprep.subr.bf16.mxu0 %v4556_v11  ;;  %4022 = vmatprep.subr.bf16.mxu1 %v4557_v34  ;;  %v2471_v38 = vpack.c.bf16 %v5291_v36, %v2441_v24 }
  0x67   : >> { %4163 = vmatmul.mubr.msk.bf16.gmra.mrb[4].mxu0 %vm340_vm3, %v2202_v46  ;;  %4007 = vmatmul.mubr.msk.bf16.gmra.mrb[4].mxu1 %vm340_vm3, %v763_v35  ;;  %v5306_v46 = vpack.c.bf16 %v5276_v30, %v5273_v2  ;;  %v872_v35 = vpack.c.bf16 %v5279_v62, %v5066_v17  ;;  %v2451_v17 = vrot.slane %v5234_v23, 1 }
  0x68   : >> { %4170 = vmatprep.mubr.msk.bf16.mxu0 %vm340_vm3, %v2318_v37  ;;  %4014 = vmatprep.mubr.msk.bf16.mxu1 %vm340_vm3, %v869_v60  ;;  %v2445_v37 = vrot.slane %v5227_v45, 1  ;;  %v5312_v60 = vld [vmem:[%s4692_s17 + $0x188] sm:$0x3] }
  0x6f   : >> { %4171 = vmatmul.mubr.msk.bf16.vlgmr.msra.gmra.mrb[0].mxu0 %vm340_vm3, %v5249_v5  ;;  %4015 = vmatmul.mubr.msk.bf16.vlgmr.msra.gmra.mrb[0].mxu1 %vm340_vm3, %v870_v57  ;;  %v5315_v57 = vld [vmem:[%s4692_s17 + $0x198] sm:$0x3] }
  0x70   : >> { %4179 = vmatpush3.bf16.msra.mxu0 %v4556_v11  ;;  %4023 = vmatpush3.bf16.msra.mxu1 %v4557_v34  ;;  %v5297_v11 = vld [vmem:[%s4692_s17 + $0x178] sm:$0x3]  ;;  %v2455_v15 = vrot.slane %v5315_v57, 1 }
  0x71   : >> { %4174 = vmatprep.mubr.msk.bf16.mxu0 %vm340_vm3, %v5259_v3  ;;  %4506 = vmatprep.subr.msk.bf16.mxu0 %vm353_vm1, %v4558_v39  ;;  %v4561_v34 = vld [vmem:[%s5752_s1 + $0x54] sm:$0xff]   ;;  %v2446_v39 = vrot.slane %v5282_v19, 1  ;;  %v2449_v26 = vrot.slane %v5297_v11, 1 }
  0x72   : >> { %4018 = vmatprep.mubr.msk.bf16.mxu1 %vm340_vm3, %v871_v63  ;;  %4492 = vmatprep.subr.msk.bf16.mxu1 %vm353_vm1, %v4559_v54  ;;  %v2452_v54 = vrot.slane %v5312_v60, 1 }
  0x73   : >> { %v5330_v52 = vsel %vm290_vm2, %v2445_v37, %v2446_v39  ;;  %v5333_v63 = vsel %vm290_vm2, %v2448_v32, %v2449_v26  ;;  %v2457_v39 = vrot.slane %v5273_v2, 1  ;;  %v2460_v26 = vrot.slane %v5276_v30, 1 }
  0x74   : >> { %4181 = vmatpush3.bf16.msra.mxu0 %v2501_v41  ;;  %4025 = vmatpush3.bf16.msra.mxu1 %v992_v61  ;;  %v5338_v41 = vld [vmem:[%s4692_s17 + $0x1a8] sm:$0x3]  ;;  %v5341_v61 = vld [vmem:[%s4692_s17 + $0x1b8] sm:$0x3]  ;;  %v5344_v24 = vsel %vm290_vm2, %v2451_v17, %v2452_v54  ;;  %v5352_v37 = vpack.c.bf16 %v5333_v63, %v5330_v52  ;;  %v4563_v54 = vld [vmem:[%s5752_s1 + $0x5c] ss:$0 sps:$4 sm:$0xff]  }
  0x75   : >> { %4190 = vmatprep.subr.bf16.mxu0 %v4560_v44  ;;  %4034 = vmatprep.subr.bf16.mxu1 %v4561_v34  ;;  %v2458_v32 = vrot.slane %v5338_v41, 1  ;;  %v2461_v17 = vrot.slane %v5341_v61, 1  ;;  %v1091_v53 = vsel %vm353_vm1, %v4563_v54, 0 }
  0x77   : >> { %4175 = vmatmul.mubr.msk.bf16.gmra.mrb[4].mxu0 %vm340_vm3, %v5306_v46  ;;  %4019 = vmatmul.mubr.msk.bf16.gmra.mrb[4].mxu1 %vm340_vm3, %v872_v35  ;;  %v5347_v35 = vsel %vm290_vm2, %v2454_v50, %v2455_v15  ;;  %v2577_v50 = vrot.slane %v5240_v25, 2  ;;  %v2579_v15 = vrot.slane %v5204_v58, 2  ;;  %v5376_v55 = vsel %vm290_vm2, %v2457_v39, %v2458_v32  ;;  %v4565_v39 = vld [vmem:[%s5752_s1 + $0x60] sm:$0xff]  }
  0x78   : >> { %4182 = vmatprep.mubr.msk.bf16.mxu0 %vm340_vm3, %v2471_v38  ;;  %4026 = vmatprep.mubr.msk.bf16.mxu1 %vm340_vm3, %v4934_v1  ;;  %v2576_v38 = vrot.slane %v5196_v12, 2  ;;  %v4562_v1 = vld [vmem:[%s5752_s1 + $0xf8] ss:$0 sps:$4 sm:$0xff]   ;;  %v5363_v12 = vpack.c.bf16 %v5347_v35, %v5344_v24  ;;  %v5379_v22 = vsel %vm290_vm2, %v2460_v26, %v2461_v17  ;;  %v2583_v26 = vrot.slane %v5282_v19, 2 }
  0x79   : >> { %v2638_v25 = vsel %vm353_vm1, %v4562_v1, 0  ;;  %v2586_v17 = vrot.slane %v5297_v11, 2 }
  0x7f   : >> { %4183 = vmatmul.mubr.msk.bf16.vlgmr.msra.gmra.mrb[0].mxu0 %vm340_vm3, %v5352_v37  ;;  %4027 = vmatmul.mubr.msk.bf16.vlgmr.msra.gmra.mrb[0].mxu1 %vm340_vm3, %v4954_v0  ;;  %v2578_v0 = vsel %vm511_vm4, %v2576_v38, %v2577_v50  ;;  %v2582_v38 = vrot.slane %v5227_v45, 2  ;;  %v2589_v50 = vrot.slane %v5312_v60, 2  ;;  %v266_v60 = vld [vmem:[%s4692_s17 + $0x98] sm:$0x3] }
  0x80   : >> { %4191 = vmatpush3.bf16.msra.mxu0 %v4560_v44  ;;  %4035 = vmatpush3.bf16.msra.mxu1 %v4561_v34  ;;  %v5391_v44 = vsel %vm511_vm4, %v2579_v15, %v2580_v6  ;;  %v4564_v34 = vld [vmem:[%s5752_s1 + $0xfc] sm:$0xff]   ;;  %v974_v6 = vpack.c.bf16 %v5382_v20, %v5135_v28  ;;  %v2591_v28 = vrot.slane %v5237_v42, 2  ;;  %v2592_v15 = vrot.slane %v5315_v57, 2 }
  0x81   : >> { %4186 = vmatprep.mubr.msk.bf16.mxu0 %vm340_vm3, %v5363_v12  ;;  %4507 = vmatprep.subr.msk.bf16.mxu0 %vm353_vm1, %v4562_v1  ;;  %v5404_v1 = vpack.c.bf16 %v5379_v22, %v5376_v55  ;;  %v2608_v32 = vpack.c.bf16 %v5391_v44, %v2578_v0  ;;  %v5422_v19 = vsel %vm511_vm4, %v2582_v38, %v2583_v26  ;;  %v2595_v38 = vrot.slane %v5338_v41, 2 }
  0x82   : >> { %4030 = vmatprep.mubr.msk.bf16.mxu1 %vm340_vm3, %v4986_v51  ;;  %4493 = vmatprep.subr.msk.bf16.mxu1 %vm353_vm1, %v4563_v54  ;;  %v2585_v51 = vrot.slane %v5230_v16, 2  ;;  %v2588_v54 = vrot.slane %v5234_v23, 2  ;;  %v5434_v57 = vsel %vm511_vm4, %v2591_v28, %v2592_v15  ;;  %v1070_v26 = vrot.slane %v266_v60, 1 }
  0x84   : >> { %4193 = vmatpush3.bf16.msra.mxu0 %v2638_v25  ;;  %4037 = vmatpush3.bf16.msra.mxu1 %v1091_v53  ;;  %v5425_v11 = vsel %vm511_vm4, %v2585_v51, %v2586_v17  ;;  %v5431_v25 = vsel %vm511_vm4, %v2588_v54, %v2589_v50  ;;  %v1069_v53 = vrot.slane %v5382_v20, 1  ;;  %v4566_v17 = vld [vmem:[%s5752_s1 + $0x104] ss:$0 sps:$4 sm:$0xff]   ;;  %v4567_v54 = vld [vmem:[%s5752_s1 + $0x68] ss:$0 sps:$4 sm:$0xff]  }
  0x85   : >> { %4202 = vmatprep.subr.bf16.mxu0 %v4564_v34  ;;  %4046 = vmatprep.subr.bf16.mxu1 %v4565_v39  ;;  %v5439_v0 = vpack.c.bf16 %v5425_v11, %v5422_v19  ;;  %v5447_v51 = vpack.c.bf16 %v5434_v57, %v5431_v25  ;;  %v2743_v28 = vsel %vm353_vm1, %v4566_v17, 0  ;;  %v1188_v15 = vsel %vm353_vm1, %v4567_v54, 0 }
  0x86   : >> { %v1071_v50 = vsel %vm290_vm2, %v1069_v53, %v1070_v26  ;;  %v2824_v26 = vpack.c.bf16 %v5330_v52, %v5291_v36 }
  0x87   : >> { %4187 = vmatmul.mubr.msk.bf16.gmra.mrb[4].mxu0 %vm340_vm3, %v5404_v1  ;;  %4031 = vmatmul.mubr.msk.bf16.gmra.mrb[4].mxu1 %vm340_vm3, %v974_v6  ;;  %v2594_v6 = vrot.slane %v5273_v2, 2  ;;  %v1073_v53 = vpack.c.bf16 %v1071_v50, %v5193_v18  ;;  %v1166_v18 = vrot.slane %v5382_v20, 2  ;;  %v5508_v20 = vld [vmem:[%s4692_s17 + $0x1c0] sm:$0xff] }
  0x88   : >> { %4194 = vmatprep.mubr.msk.bf16.mxu0 %vm340_vm3, %v2608_v32  ;;  %4038 = vmatprep.mubr.msk.bf16.mxu1 %vm340_vm3, %v4755_v33  ;;  %v2597_v32 = vrot.slane %v5276_v30, 2  ;;  %v2598_v33 = vrot.slane %v5341_v61, 2  ;;  %v2820_v36 = vrot.slane %v5508_v20, 1 }
  0x89   : >> { %v5460_v41 = vsel %vm511_vm4, %v2594_v6, %v2595_v38  ;;  %v2713_v6 = vpack.c.bf16 %v5227_v45, %v5204_v58  ;;  %v1167_v58 = vrot.slane %v266_v60, 2  ;;  %v2715_v45 = vpack.c.bf16 %v5273_v2, %v5237_v42  ;;  %v4570_v38 = vld [vmem:[%s5752_s1 + $0x110] ss:$0 sps:$4 sm:$0xff]   ;;  %v4573_v2 = vld [vmem:[%s5752_s1 + $0x78] sm:$0xff]  }
  0x8a   : >> { %v5463_v61 = vsel %vm511_vm4, %v2597_v32, %v2598_v33  ;;  %v4571_v32 = vld [vmem:[%s5752_s1 + $0x74] ss:$0 sps:$4 sm:$0xff]   ;;  %v2716_v60 = vpack.c.bf16 %v5508_v20, %v5276_v30  ;;  %v3583_v30 = vld [vmem:[%s4692_s17 + $0xa8] sm:$0x3] }
  0x8b   : >> { %v1316_v42 = vsel %vm353_vm1, %v4571_v32, 0 }
  0x8f   : >> { %4195 = vmatmul.mubr.msk.bf16.vlgmr.msra.gmra.mrb[0].mxu0 %vm340_vm3, %v5439_v0  ;;  %4039 = vmatmul.mubr.msk.bf16.vlgmr.msra.gmra.mrb[0].mxu1 %vm340_vm3, %v4872_v43  ;;  %v4568_v43 = vld [vmem:[%s5752_s1 + $0x108] sm:$0xff]  }
  0x90   : >> { %4203 = vmatpush3.bf16.msra.mxu0 %v4564_v34  ;;  %4047 = vmatpush3.bf16.msra.mxu1 %v4565_v39  ;;  %v4569_v34 = vld [vmem:[%s5752_s1 + $0x6c] sm:$0xff]   ;;  %v5482_v39 = vpack.c.bf16 %v5463_v61, %v5460_v41 }
  0x91   : >> { %4198 = vmatprep.mubr.msk.bf16.mxu0 %vm340_vm3, %v5447_v51  ;;  %4508 = vmatprep.subr.msk.bf16.mxu0 %vm353_vm1, %v4566_v17  ;;  %v5533_v17 = vld [vmem:[%s4692_s17 + $0xb0] sm:$0xff] }
  0x92   : >> { %4042 = vmatprep.mubr.msk.bf16.mxu1 %vm340_vm3, %v4890_v8  ;;  %4494 = vmatprep.subr.msk.bf16.mxu1 %vm353_vm1, %v4567_v54  ;;  %v2714_v8 = vpack.c.bf16 %v5234_v23, %v5230_v16  ;;  %v5512_v16 = vld [vmem:[%s4692_s17 + $0xa0] sm:$0xff]  ;;  %v2854_v23 = vsel %vm353_vm1, %v4570_v38, 0 }
  0x93   : >> { %v1286_v54 = vpack.c.bf16 %v5533_v17, %v5512_v16  ;;  %v1407_v50 = vrot.slane %v5512_v16, 1 }
  0x94   : >> { %4205 = vmatpush3.bf16.msra.mxu0 %v2743_v28  ;;  %4049 = vmatpush3.bf16.msra.mxu1 %v1188_v15  ;;  %v1408_v28 = vrot.slane %v3583_v30, 1  ;;  %v2826_v15 = vpack.c.bf16 %v5376_v55, %v5347_v35 }
  0x95   : >> { %4214 = vmatprep.subr.bf16.mxu0 %v4568_v43  ;;  %4058 = vmatprep.subr.bf16.mxu1 %v4569_v34 }
  0x96   : >> { %v1409_v55 = vsel %vm290_vm2, %v1407_v50, %v1408_v28 }
  0x97   : >> { %4199 = vmatmul.mubr.msk.bf16.gmra.mrb[4].mxu0 %vm340_vm3, %v5482_v39  ;;  %4043 = vmatmul.mubr.msk.bf16.gmra.mrb[4].mxu1 %vm340_vm3, %v1073_v53  ;;  %v4576_v53 = vld [vmem:[%s5752_s1 + $0x120] sm:$0xff]  }
  0x98   : >> { %4206 = vmatprep.mubr.msk.bf16.mxu0 %vm340_vm3, %v2713_v6  ;;  %4050 = vmatprep.mubr.msk.bf16.mxu1 %vm340_vm3, %v5025_v4  ;;  %v1168_v4 = vsel %vm511_vm4, %v1166_v18, %v1167_v58  ;;  %v2933_v58 = vpack.c.bf16 %v5422_v19, %v5391_v44  ;;  %v2935_v44 = vpack.c.bf16 %v5460_v41, %v5434_v57  ;;  %v4578_v19 = vld [vmem:[%s5752_s1 + $0x128] ss:$0 sps:$4 sm:$0xff]   ;;  %v4580_v41 = vld [vmem:[%s5752_s1 + $0x12c] sm:$0xff]  }
  0x99   : >> { %v1170_v33 = vpack.c.bf16 %v1168_v4, %v5279_v62  ;;  %v2825_v62 = vpack.c.bf16 %v5344_v24, %v5333_v63 }
  0x9f   : >> { %4207 = vmatmul.mubr.msk.bf16.vlgmr.msra.gmra.mrb[0].mxu0 %vm340_vm3, %v2714_v8  ;;  %4051 = vmatmul.mubr.msk.bf16.vlgmr.msra.gmra.mrb[0].mxu1 %vm340_vm3, %v5053_v7  ;;  %v4572_v7 = vld [vmem:[%s5752_s1 + $0x114] sm:$0xff]  }
  0xa0   : >> { %4215 = vmatpush3.bf16.msra.mxu0 %v4568_v43  ;;  %4059 = vmatpush3.bf16.msra.mxu1 %v4569_v34  ;;  %v4574_v43 = vld [vmem:[%s5752_s1 + $0x11c] ss:$0 sps:$4 sm:$0xff]   ;;  %v4575_v34 = vld [vmem:[%s5752_s1 + $0x80] ss:$0 sps:$4 sm:$0xff]   ;;  %v5771_v8 = vld [vmem:[#allocation4_spill] sm:$0xff] }
  0xa1   : >> { %4210 = vmatprep.mubr.msk.bf16.mxu0 %vm340_vm3, %v2715_v45  ;;  %4509 = vmatprep.subr.msk.bf16.mxu0 %vm353_vm1, %v4570_v38  ;;  %v2963_v24 = vsel %vm353_vm1, %v4574_v43, 0  ;;  %v1469_v35 = vsel %vm353_vm1, %v4575_v34, 0  ;;  %v1439_v18 = vpack.c.bf16 %v5771_v8, %v1409_v55  ;;  %v1545_v38 = vrot.slane %v3583_v30, 2 }
  0xa2   : >> { %4054 = vmatprep.mubr.msk.bf16.mxu1 %vm340_vm3, %v5086_v49  ;;  %4495 = vmatprep.subr.msk.bf16.mxu1 %vm353_vm1, %v4571_v32  ;;  %v3700_v49 = vld [vmem:[%s4692_s17 + $0x1c8] sm:$0x3]  ;;  %v1544_v32 = vrot.slane %v5512_v16, 2 }
  0xa3   : >> { %v2821_v52 = vrot.slane %v3700_v49, 1  ;;  %v2930_v45 = vrot.slane %v3700_v49, 2 }
  0xa4   : >> { %4217 = vmatpush3.bf16.msra.mxu0 %v2854_v23  ;;  %4061 = vmatpush3.bf16.msra.mxu1 %v1316_v42  ;;  %v1546_v4 = vsel %vm511_vm4, %v1544_v32, %v1545_v38  ;;  %v5772_v23 = vld [vmem:[#allocation5_spill] sm:$0xff] }
  0xa5   : >> { %4226 = vmatprep.subr.bf16.mxu0 %v4572_v7  ;;  %4070 = vmatprep.subr.bf16.mxu1 %v4573_v2  ;;  %v5559_v63 = vsel %vm290_vm2, %v2820_v36, %v2821_v52  ;;  %v1576_v42 = vpack.c.bf16 %v5772_v23, %v1546_v4  ;;  %v5775_v36 = vld [vmem:[#allocation2_spill] sm:$0xff] }
  0xa6   : >> { %v2827_v6 = vpack.c.bf16 %v5559_v63, %v5379_v22  ;;  %v2934_v22 = vpack.c.bf16 %v5431_v25, %v5425_v11  ;;  %v3056_v25 = vsel %vm353_vm1, %v4578_v19, 0  ;;  %v5776_v52 = vld [vmem:[#allocation6_spill] sm:$0xff] }
  0xa7   : >> { %4211 = vmatmul.mubr.msk.bf16.gmra.mrb[4].mxu0 %vm340_vm3, %v2716_v60  ;;  %4055 = vmatmul.mubr.msk.bf16.gmra.mrb[4].mxu1 %vm340_vm3, %v1170_v33  ;;  %v4588_v60 = vld [vmem:[%s5752_s1 + $0x9c] sm:$0xff]   ;;  %v5777_v50 = vpack.c.bf16 %v4921_v21, %v5776_v52  ;;  %v5778_v21 = vld [vmem:[#allocation8_spill] sm:$0xff] }
  0xa8   : >> { %4218 = vmatprep.mubr.msk.bf16.mxu0 %vm340_vm3, %v2824_v26  ;;  %4062 = vmatprep.mubr.msk.bf16.mxu1 %vm340_vm3, %v1286_v54  ;;  %v4585_v26 = vld [vmem:[%s5752_s1 + $0x140] ss:$0 sps:$4 sm:$0xff]  }
  0xa9   : >> { %v4590_v54 = vld [vmem:[%s4692_s17 + $0x100] sm:$0xff] }
  0xaf   : >> { %4219 = vmatmul.mubr.msk.bf16.vlgmr.msra.gmra.mrb[0].mxu0 %vm340_vm3, %v2825_v62  ;;  %4063 = vmatmul.mubr.msk.bf16.vlgmr.msra.gmra.mrb[0].mxu1 %vm340_vm3, %v4996_v10  ;;  %v4577_v10 = vld [vmem:[%s5752_s1 + $0x84] sm:$0xff]   ;;  %v3252_v62 = vsel %vm353_vm1, %v4585_v26, 0 }
  0xb0   : >> { %4227 = vmatpush3.bf16.msra.mxu0 %v4572_v7  ;;  %4071 = vmatpush3.bf16.msra.mxu1 %v4573_v2 }
  0xb1   : >> { %4222 = vmatprep.mubr.msk.bf16.mxu0 %vm340_vm3, %v2826_v15  ;;  %4510 = vmatprep.subr.msk.bf16.mxu0 %vm353_vm1, %v4574_v43 }
  0xb2   : >> { %4066 = vmatprep.mubr.msk.bf16.mxu1 %vm340_vm3, %v5029_v29  ;;  %4496 = vmatprep.subr.msk.bf16.mxu1 %vm353_vm1, %v4575_v34  ;;  %v2929_v29 = vrot.slane %v5508_v20, 2 }
  0xb4   : >> { %4229 = vmatpush3.bf16.msra.mxu0 %v2963_v24  ;;  %4073 = vmatpush3.bf16.msra.mxu1 %v1469_v35  ;;  %v5601_v11 = vsel %vm511_vm4, %v2929_v29, %v2930_v45 }
  0xb5   : >> { %4238 = vmatprep.subr.bf16.mxu0 %v4576_v53  ;;  %4082 = vmatprep.subr.bf16.mxu1 %v4577_v10  ;;  %v2936_v16 = vpack.c.bf16 %v5601_v11, %v5463_v61  ;;  %v4583_v61 = vld [vmem:[%s5752_s1 + $0x98] ss:$0 sps:$4 sm:$0xff]  }
  0xb6   : >> { %v1711_v7 = vsel %vm353_vm1, %v4583_v61, 0 }
  0xb7   : >> { %4223 = vmatmul.mubr.msk.bf16.gmra.mrb[4].mxu0 %vm340_vm3, %v2827_v6  ;;  %4067 = vmatmul.mubr.msk.bf16.gmra.mrb[4].mxu1 %vm340_vm3, %v5043_v9  ;;  %v4579_v9 = vld [vmem:[%s5752_s1 + $0x8c] ss:$0 sps:$4 sm:$0xff]  }
  0xb8   : >> { %4230 = vmatprep.mubr.msk.bf16.mxu0 %vm340_vm3, %v2933_v58  ;;  %4074 = vmatprep.mubr.msk.bf16.mxu1 %vm340_vm3, %v1439_v18  ;;  %v1606_v57 = vsel %vm353_vm1, %v4579_v9, 0 }
  0xbf   : >> { %4231 = vmatmul.mubr.msk.bf16.vlgmr.msra.gmra.mrb[0].mxu0 %vm340_vm3, %v2934_v22  ;;  %4075 = vmatmul.mubr.msk.bf16.vlgmr.msra.gmra.mrb[0].mxu1 %vm340_vm3, %v5092_v14  ;;  %v4581_v14 = vld [vmem:[%s5752_s1 + $0x90] sm:$0xff]  }
  0xc0   : >> { %4239 = vmatpush3.bf16.msra.mxu0 %v4576_v53  ;;  %4083 = vmatpush3.bf16.msra.mxu1 %v4577_v10 }
  0xc1   : >> { %4234 = vmatprep.mubr.msk.bf16.mxu0 %vm340_vm3, %v2935_v44  ;;  %4511 = vmatprep.subr.msk.bf16.mxu0 %vm353_vm1, %v4578_v19 }
  0xc2   : >> { %4078 = vmatprep.mubr.msk.bf16.mxu1 %vm340_vm3, %v5113_v56  ;;  %4497 = vmatprep.subr.msk.bf16.mxu1 %vm353_vm1, %v4579_v9  ;;  %v4582_v56 = vld [vmem:[%s5752_s1 + $0x134] ss:$0 sps:$4 sm:$0xff]  }
  0xc4   : >> { %4241 = vmatpush3.bf16.msra.mxu0 %v3056_v25  ;;  %4085 = vmatpush3.bf16.msra.mxu1 %v1606_v57 }
  0xc5   : >> { %4250 = vmatprep.subr.bf16.mxu0 %v4580_v41  ;;  %4094 = vmatprep.subr.bf16.mxu1 %v4581_v14 }
  0xc7   : >> { %4235 = vmatmul.mubr.msk.bf16.gmra.mrb[4].mxu0 %vm340_vm3, %v2936_v16  ;;  %4079 = vmatmul.mubr.msk.bf16.gmra.mrb[4].mxu1 %vm340_vm3, %v5120_v47  ;;  %v3701_v47 = vld [vmem:[%s4692_s17 + $0x1d0] sm:$0xff] }
  0xc8   : >> { %4242 = vmatprep.mubr.msk.bf16.mxu0 %vm340_vm3, %v5249_v5  ;;  %4086 = vmatprep.mubr.msk.bf16.mxu1 %vm340_vm3, %v1576_v42  ;;  %v3155_v5 = vsel %vm353_vm1, %v4582_v56, 0  ;;  %v3230_v28 = vrot.slane %v3701_v47, 2 }
  0xcf   : >> { %4243 = vmatmul.mubr.msk.bf16.vlgmr.msra.gmra.mrb[0].mxu0 %vm340_vm3, %v5259_v3  ;;  %4087 = vmatmul.mubr.msk.bf16.vlgmr.msra.gmra.mrb[0].mxu1 %vm340_vm3, %v5157_v48  ;;  %v4584_v3 = vld [vmem:[%s5752_s1 + $0x138] sm:$0xff]   ;;  %v3038_v48 = vpack.c.bf16 %v3701_v47, %v5508_v20  ;;  %v3133_v20 = vrot.slane %v3701_v47, 1 }
  0xd0   : >> { %4251 = vmatpush3.bf16.msra.mxu0 %v4580_v41  ;;  %4095 = vmatpush3.bf16.msra.mxu1 %v4581_v14 }
  0xd1   : >> { %4246 = vmatprep.mubr.msk.bf16.mxu0 %vm340_vm3, %v5306_v46  ;;  %4512 = vmatprep.subr.msk.bf16.mxu0 %vm353_vm1, %v4582_v56  ;;  %v4587_v46 = vld [vmem:[%s4692_s17 + $0xc0] sm:$0xff] }
  0xd2   : >> { %4090 = vmatprep.mubr.msk.bf16.mxu1 %vm340_vm3, %v5171_v27  ;;  %4498 = vmatprep.subr.msk.bf16.mxu1 %vm353_vm1, %v4583_v61  ;;  %v1681_v2 = vpack.c.bf16 %v4587_v46, %v5533_v17  ;;  %v3702_v27 = vld [vmem:[%s4692_s17 + $0x1d8] sm:$0x3]  ;;  %v4589_v17 = vld [vmem:[%s4692_s17 + $0xf0] sm:$0xff] }
  0xd3   : >> { %v3134_v33 = vrot.slane %v3702_v27, 1  ;;  %v1683_v49 = vpack.c.bf16 %v4590_v54, %v4589_v17  ;;  %v3231_v15 = vrot.slane %v3702_v27, 2 }
  0xd4   : >> { %4253 = vmatpush3.bf16.msra.mxu0 %v3155_v5  ;;  %4097 = vmatpush3.bf16.msra.mxu1 %v1711_v7 }
  0xd5   : >> { %4262 = vmatprep.subr.bf16.mxu0 %v4584_v3  ;;  %4274 = vmatprep.subr.bf16.mxu1 %v4588_v60 }
  0xd7   : >> { %4247 = vmatmul.mubr.msk.bf16.gmra.mrb[4].mxu0 %vm340_vm3, %v3038_v48  ;;  %4091 = vmatmul.mubr.msk.bf16.gmra.mrb[4].mxu1 %vm340_vm3, %v5178_v59  ;;  %v5773_v59 = vld [vmem:[#allocation3_spill] sm:$0xff] }
  0xd8   : >> { %4254 = vmatprep.mubr.msk.bf16.mxu0 %vm340_vm3, %v5352_v37  ;;  %4098 = vmatprep.mubr.msk.bf16.mxu1 %vm340_vm3, %v1681_v2  ;;  %v5774_v30 = vpack.c.bf16 %v4775_v40, %v5773_v59  ;;  %v3135_v37 = vsel %vm290_vm2, %v3133_v20, %v3134_v33 }
  0xd9   : >> { %v3137_v40 = vpack.c.bf16 %v3135_v37, %v5559_v63 }
  0xdf   : >> { %4255 = vmatmul.mubr.msk.bf16.vlgmr.msra.gmra.mrb[0].mxu0 %vm340_vm3, %v5363_v12  ;;  %4099 = vmatmul.mubr.msk.bf16.vlgmr.msra.gmra.mrb[0].mxu1 %vm340_vm3, %v5774_v30  ;;  %v4591_v12 = vld [vmem:[%s5752_s1 + $0xa4] ss:$0 sps:$4 sm:$0xff]  }
  0xe0   : >> { %4263 = vmatpush3.bf16.msra.mxu0 %v4584_v3  ;;  %4276 = vmatpush3.bf16.msra.mxu1 %v4588_v60 }
  0xe1   : >> { %4258 = vmatprep.mubr.msk.bf16.mxu0 %vm340_vm3, %v5404_v1  ;;  %4513 = vmatprep.subr.msk.bf16.mxu0 %vm353_vm1, %v4585_v26  ;;  %v1794_v1 = vpack.c.bf16 %v5109_v13, %v5102_v31  ;;  %v3232_v31 = vsel %vm511_vm4, %v3230_v28, %v3231_v15  ;;  %v5779_v13 = vld [vmem:[#allocation7_spill] sm:$0xff] }
  0xe2   : >> { %4102 = vmatprep.mubr.msk.bf16.mxu1 %vm340_vm3, %v1683_v49  ;;  %4500 = vmatprep.subr.msk.bf16.mxu1 %vm353_vm1, %v4591_v12  ;;  %v5780_v43 = vpack.c.bf16 %v5778_v21, %v5779_v13 }
  0xe4   : >> { %4265 = vmatpush3.bf16.msra.mxu0 %v3252_v62  ;;  %4277 = vmatpush3.bf16.msra.mxu1 %v5775_v36 }
  0xe7   : >> { %4259 = vmatmul.mubr.msk.bf16.gmra.mrb[4].mxu0 %vm340_vm3, %v3137_v40  ;;  %4103 = vmatmul.mubr.msk.bf16.gmra.mrb[4].mxu1 %vm340_vm3, %v5777_v50 }
  0xe8   : >> { %4266 = vmatprep.mubr.msk.bf16.mxu0 %vm340_vm3, %v5439_v0  ;;  %4114 = vmatprep.mubr.msk.bf16.mxu1 %vm340_vm3, %v1794_v1  ;;  %v3234_v0 = vpack.c.bf16 %v3232_v31, %v5601_v11 }
  0xef   : >> { %4267 = vmatmul.mubr.msk.bf16.vlgmr.msra.gmra.mrb[0].mxu0 %vm340_vm3, %v5447_v51 }
  0xf0   : >> { %4270 = vmatprep.mubr.msk.bf16.mxu0 %vm340_vm3, %v5482_v39 }
  0xf3   : >> { %4115 = vmatmul.mubr.msk.bf16.vlgmr.msra.gmra.mrb[4].mxu1 %vm340_vm3, %v5780_v43 }
  0xf7   : >> { %4271 = vmatmul.mubr.msk.bf16.gmra.mrb[4].mxu0 %vm340_vm3, %v3234_v0 }
 0x1b2   : >> { %v4100_v34 = vpop.f32.mrb[0].mxu1 }
 0x1b3   : >> { %v1747_v63 = vpop.f32.mrb[1].mxu1 }
 0x1b4   : >> { %v4101_v55 = vpop.f32.mrb[2].mxu1 }
 0x1b5   : >> { %v1750_v24 = vpop.f32.mrb[3].mxu1 }
 0x1c2   : >> { %v4268_v51 = vpop.f32.mrb[0].mxu0 }
 0x1c3   : >> { %v4278_v39 = vadd.f32 %v4268_v51, %v4100_v34  ;;  %v3288_v35 = vpop.f32.mrb[1].mxu0 }
 0x1c4   : >> { %v4279_v53 = vadd.f32 %v3288_v35, %v1747_v63  ;;  %v4269_v10 = vpop.f32.mrb[2].mxu0  ;;  %v3337_v35 = vld [vmem:[%s4660_s29] sm:$0x1] }
 0x1c5   : >> { %3331 = vst.msk [vmem:[%s5707_s14 + $0x10] sm:$0xff] %vm237_vm0, %v4278_v39  ;;  %v4280_v6 = vadd.f32 %v4269_v10, %v4101_v55  ;;  %v3291_v8 = vpop.f32.mrb[3].mxu0  ;;  %v3365_v45 = vmul.f32 %v4278_v39, %v4278_v39  ;;  %v3341_v57 = vsel %vm237_vm0, %v4278_v39, 0.0 }
 0x1c6   : >> { %3329 = vst.msk [vmem:[%s5707_s14] sm:$0xff] %vm237_vm0, %v4279_v53  ;;  %v3363_v18 = vmul.f32 %v4279_v53, %v4279_v53  ;;  %v4281_v58 = vadd.f32 %v3291_v8, %v1750_v24  ;;  %v4116_v22 = vpop.f32.mrb[4].mxu1  ;;  %v3338_v38 = vsel %vm237_vm0, %v4279_v53, 0.0 }
 0x1c7   : >> { %3332 = vst.msk [vmem:[%s5707_s14 + $0x18] sm:$0xff] %vm237_vm0, %v4280_v6  ;;  %v1874_v29 = vpop.f32.mrb[5].mxu1  ;;  %v3366_v32 = vmul.f32 %v4280_v6, %v4280_v6  ;;  %v3374_v61 = vsel %vm237_vm0, %v3365_v45, 0.0  ;;  %v3343_v47 = vsel %vm237_vm0, %v4280_v6, 0.0 }
 0x1c8   : >> { %3330 = vst.msk [vmem:[%s5707_s14 + $0x8] sm:$0xff] %vm237_vm0, %v4281_v58  ;;  %v3339_v44 = vsel %vm237_vm0, %v4281_v58, 0.0  ;;  %v3364_v19 = vmul.f32 %v4281_v58, %v4281_v58  ;;  %v4117_v9 = vpop.f32.mrb[6].mxu1  ;;  %v3371_v41 = vsel %vm237_vm0, %v3363_v18, 0.0  ;;  %v3362_v18 = vld [vmem:[%s4660_s29 + $0x1] sm:$0x1] }
 0x1c9   : >> { %v3340_v11 = vadd.f32 %v3339_v44, %v3338_v38  ;;  %v1877_v25 = vpop.f32.mrb[7].mxu1  ;;  %v3376_v3 = vsel %vm237_vm0, %v3366_v32, 0.0 }
 0x1ca   : >> { %v3372_v4 = vsel %vm237_vm0, %v3364_v19, 0.0  ;;  %v4272_v14 = vpop.f32.mrb[4].mxu0 }
 0x1cb   : >> { %v3342_v16 = vadd.f32 %v3341_v57, %v3340_v11  ;;  %v3373_v23 = vadd.f32 %v3372_v4, %v3371_v41  ;;  %v4282_v42 = vadd.f32 %v4272_v14, %v4116_v22  ;;  %v3304_v56 = vpop.f32.mrb[5].mxu0 }
 0x1cc   : >> { %v4283_v5 = vadd.f32 %v3304_v56, %v1874_v29  ;;  %v4273_v7 = vpop.f32.mrb[6].mxu0 }
 0x1cd   : >> { %v3375_v48 = vadd.f32 %v3374_v61, %v3373_v23  ;;  %3335 = vst.msk [vmem:[%s5707_s14 + $0x30] sm:$0xff] %vm237_vm0, %v4282_v42  ;;  %v3344_v46 = vadd.f32 %v3343_v47, %v3342_v16  ;;  %v3307_v2 = vpop.f32.mrb[7].mxu0  ;;  %v4284_v20 = vadd.f32 %v4273_v7, %v4117_v9  ;;  %v3369_v59 = vmul.f32 %v4282_v42, %v4282_v42 }
 0x1ce   : >> { %3333 = vst.msk [vmem:[%s5707_s14 + $0x20] sm:$0xff] %vm237_vm0, %v4283_v5  ;;  %v3345_v60 = vsel %vm237_vm0, %v4283_v5, 0.0  ;;  %v3367_v27 = vmul.f32 %v4283_v5, %v4283_v5  ;;  %v4285_v33 = vadd.f32 %v3307_v2, %v1877_v25  ;;  %v3349_v12 = vsel %vm237_vm0, %v4282_v42, 0.0 }
 0x1cf   : >> { %v3346_v26 = vadd.f32 %v3345_v60, %v3344_v46  ;;  %v3377_v17 = vadd.f32 %v3376_v3, %v3375_v48  ;;  %3336 = vst.msk [vmem:[%s5707_s14 + $0x38] sm:$0xff] %vm237_vm0, %v4284_v20  ;;  %v3370_v40 = vmul.f32 %v4284_v20, %v4284_v20  ;;  %v3351_v52 = vsel %vm237_vm0, %v4284_v20, 0.0 }
 0x1d0   : >> { %v3378_v54 = vsel %vm237_vm0, %v3367_v27, 0.0  ;;  %3334 = vst.msk [vmem:[%s5707_s14 + $0x28] sm:$0xff] %vm237_vm0, %v4285_v33  ;;  %v3347_v49 = vsel %vm237_vm0, %v4285_v33, 0.0  ;;  %v3368_v62 = vmul.f32 %v4285_v33, %v4285_v33  ;;  %v3382_v28 = vsel %vm237_vm0, %v3369_v59, 0.0 }
 0x1d1   : >> { %v3379_v30 = vadd.f32 %v3378_v54, %v3377_v17  ;;  %v3348_v37 = vadd.f32 %v3347_v49, %v3346_v26  ;;  %v3384_v21 = vsel %vm237_vm0, %v3370_v40, 0.0 }
 0x1d2   : >> { %v3380_v1 = vsel %vm237_vm0, %v3368_v62, 0.0 }
 0x1d3   : >> { %v3350_v36 = vadd.f32 %v3349_v12, %v3348_v37  ;;  %v3381_v50 = vadd.f32 %v3380_v1, %v3379_v30 }
 0x1d5   : >> { %v3352_v15 = vadd.f32 %v3351_v52, %v3350_v36  ;;  %v3383_v31 = vadd.f32 %v3382_v28, %v3381_v50 }
 0x1d7   : >> { %v3353_v13 = vrot.slane %v3352_v15, 4  ;;  %v3385_v43 = vadd.f32 %v3384_v21, %v3383_v31 }
 0x1d9   : >> { %v3354_v0 = vadd.f32 %v3353_v13, %v3352_v15  ;;  %v3386_v34 = vrot.slane %v3385_v43, 4 }
 0x1db   : >> { %v3355_v63 = vrot.slane %v3354_v0, 2  ;;  %v3387_v55 = vadd.f32 %v3386_v34, %v3385_v43 }
 0x1dd   : >> { %v3356_v24 = vadd.f32 %v3355_v63, %v3354_v0  ;;  %v3388_v51 = vrot.slane %v3387_v55, 2 }
 0x1df   : >> { %v3357_v39 = vrot.slane %v3356_v24, 1  ;;  %v3389_v53 = vadd.f32 %v3388_v51, %v3387_v55 }
 0x1e1   : >> { %v3358_v10 = vadd.f32 %v3357_v39, %v3356_v24  ;;  %v3390_v6 = vrot.slane %v3389_v53, 1  ;;  %243 = sbr.rel (!%p241_p4) target bundleno = 18 (0x12), region = 115 }
 0x1e3   : >> { %v3359_v8 = vadd.f32 %v3358_v10, %v3337_v35  ;;  %v3391_v58 = vadd.f32 %v3390_v6, %v3389_v53 }
 0x1e5   : >> { %3361 = vst.msk [vmem:[%s4660_s29] sm:$0x1] %vm3360_vm5, %v3359_v8  ;;  %v3392_v22 = vadd.f32 %v3391_v58, %v3362_v18 }
 0x1e7   : >> { %3393 = vst.msk [vmem:[%s4660_s29 + $0x1] sm:$0x1] %vm3360_vm5, %v3392_v22 }
 0x1e8 PF: > { %s16_s18 = sadd.s32 1, %s4602_s18  }
 0x1e9   : > { %p13_p5 = scmp.ge.s32.totalorder %s16_s18, 4  }
 0x1eb   :  { %15 = sbr.rel (!%p13_p5) target bundleno = 1 (0x1), region = 126 }

// kernel: _lambda_.11
= control target key start
LH: loop header
LB: loop body
LE: loop exit
PB: predicated region body
PF: predicated region fallthrough
CT: control target
= control target key end

     0   :  { %s466_s0 = inlined_call_operand.vmem [shape: f32[128,128], index: 0, kind: input, shape index: {}]   ;;  %s467_s1 = inlined_call_operand.vmem [shape: f32[1,128], index: 1, kind: input, shape index: {}]   ;;  %s468_s2 = inlined_call_operand.vmem [shape: f32[1,128], index: 2, kind: input, shape index: {}]   ;;  %s469_s3 = inlined_call_operand.vmem [shape: f32[128,128], index: 3, kind: input, shape index: {}]   ;;  %s470_s4 = inlined_call_operand.vmem [shape: f32[1,128], index: 4, kind: input, shape index: {}]   ;;  %s471_s5 = inlined_call_operand.vmem [shape: f32[1,128], index: 5, kind: input, shape index: {}]   ;;  %s472_s6 = inlined_call_operand.vmem [shape: f32[128,128], index: 6, kind: output, shape index: {}]  }
   0x1   :  { %v23_v0 = vld [vmem:[%s466_s0] sm:$0xff]  ;;  %v24_v8 = vld [vmem:[%s466_s0 + $0x8] sm:$0xff]  ;;  %v25_v10 = vld [vmem:[%s466_s0 + $0x10] sm:$0xff] }
   0x2   :  { %v244_v1 = vld [vmem:[%s467_s1] ss:$0 sm:$0xff]  ;;  %v102_v9 = vld [vmem:[%s469_s3 + $0x8] sm:$0xff]  ;;  %v103_v15 = vld [vmem:[%s469_s3 + $0x10] sm:$0xff] }
   0x3   :  { %v249_v2 = vld [vmem:[%s468_s2] ss:$0 sm:$0xff]  ;;  %v46_v3 = vmul.f32 %v244_v1, %v23_v0  ;;  %v47_v12 = vmul.f32 %v244_v1, %v24_v8  ;;  %v48_v14 = vmul.f32 %v244_v1, %v25_v10  ;;  %v26_v16 = vld [vmem:[%s466_s0 + $0x18] sm:$0xff]  ;;  %v28_v28 = vld [vmem:[%s466_s0 + $0x28] sm:$0xff] }
   0x4   :  { %v101_v4 = vld [vmem:[%s469_s3] sm:$0xff]  ;;  %v104_v17 = vld [vmem:[%s469_s3 + $0x18] sm:$0xff]  ;;  %v49_v20 = vmul.f32 %v244_v1, %v26_v16  ;;  %v106_v29 = vld [vmem:[%s469_s3 + $0x28] sm:$0xff]  ;;  %v51_v41 = vmul.f32 %v244_v1, %v28_v28 }
   0x5   :  { %v258_v5 = vld [vmem:[%s470_s4] ss:$0 sm:$0xff]  ;;  %v69_v11 = vadd.f32 %v249_v2, %v46_v3  ;;  %v70_v25 = vadd.f32 %v249_v2, %v47_v12  ;;  %v71_v27 = vadd.f32 %v249_v2, %v48_v14  ;;  %v29_v34 = vld [vmem:[%s466_s0 + $0x30] sm:$0xff]  ;;  %v30_v44 = vld [vmem:[%s466_s0 + $0x38] sm:$0xff] }
   0x6   :  { %v263_v6 = vld [vmem:[%s471_s5] ss:$0 sm:$0xff]  ;;  %v124_v7 = vmul.f32 %v258_v5, %v101_v4  ;;  %v125_v13 = vmul.f32 %v258_v5, %v102_v9  ;;  %v126_v19 = vmul.f32 %v258_v5, %v103_v15  ;;  %v127_v21 = vmul.f32 %v258_v5, %v104_v17  ;;  %v107_v43 = vld [vmem:[%s469_s3 + $0x30] sm:$0xff]  ;;  %v108_v45 = vld [vmem:[%s469_s3 + $0x38] sm:$0xff] }
   0x7   :  { %v27_v22 = vld [vmem:[%s466_s0 + $0x20] sm:$0xff]  ;;  %v85_v24 = vmax.f32 %v69_v11, 0.0  ;;  %v72_v31 = vadd.f32 %v249_v2, %v49_v20  ;;  %v86_v36 = vmax.f32 %v70_v25, 0.0  ;;  %v87_v37 = vmax.f32 %v71_v27, 0.0  ;;  %v32_v60 = vld [vmem:[%s466_s0 + $0x48] sm:$0xff]  ;;  %v33_v4 = vld [vmem:[%s466_s0 + $0x50] sm:$0xff] }
   0x8   :  { %v147_v18 = vadd.f32 %v263_v6, %v124_v7  ;;  %v105_v23 = vld [vmem:[%s469_s3 + $0x20] sm:$0xff]  ;;  %v148_v26 = vadd.f32 %v263_v6, %v125_v13  ;;  %v149_v30 = vadd.f32 %v263_v6, %v126_v19  ;;  %v150_v32 = vadd.f32 %v263_v6, %v127_v21  ;;  %v110_v3 = vld [vmem:[%s469_s3 + $0x48] sm:$0xff]  ;;  %v111_v11 = vld [vmem:[%s469_s3 + $0x50] sm:$0xff] }
   0x9   :  { %v50_v33 = vmul.f32 %v244_v1, %v27_v22  ;;  %v128_v38 = vmul.f32 %v258_v5, %v105_v23  ;;  %v88_v39 = vmax.f32 %v72_v31, 0.0  ;;  %v129_v42 = vmul.f32 %v258_v5, %v106_v29  ;;  %v31_v50 = vld [vmem:[%s466_s0 + $0x40] sm:$0xff]  ;;  %v34_v12 = vld [vmem:[%s466_s0 + $0x58] sm:$0xff] }
   0xa   :  { %v163_v35 = vadd.f32 %v147_v18, %v85_v24  ;;  %v164_v46 = vadd.f32 %v148_v26, %v86_v36  ;;  %v165_v47 = vadd.f32 %v149_v30, %v87_v37  ;;  %v52_v49 = vmul.f32 %v244_v1, %v29_v34  ;;  %v109_v51 = vld [vmem:[%s469_s3 + $0x40] sm:$0xff]  ;;  %v112_v17 = vld [vmem:[%s469_s3 + $0x58] sm:$0xff] }
   0xb   :  { %v73_v40 = vadd.f32 %v249_v2, %v50_v33  ;;  %v151_v48 = vadd.f32 %v263_v6, %v128_v38  ;;  %v166_v52 = vadd.f32 %v150_v32, %v88_v39  ;;  %v74_v54 = vadd.f32 %v249_v2, %v51_v41  ;;  %v35_v26 = vld [vmem:[%s466_s0 + $0x60] sm:$0xff]  ;;  %v36_v32 = vld [vmem:[%s466_s0 + $0x68] sm:$0xff]  ;;  %v37_v38 = vld [vmem:[%s466_s0 + $0x70] sm:$0xff] }
   0xc   :  { %179 = vst [vmem:[%s472_s6] sm:$0xff] %v163_v35  ;;  %v152_v55 = vadd.f32 %v263_v6, %v129_v42  ;;  %180 = vst [vmem:[%s472_s6 + $0x8] sm:$0xff] %v164_v46  ;;  %v75_v56 = vadd.f32 %v249_v2, %v52_v49  ;;  %v130_v57 = vmul.f32 %v258_v5, %v107_v43  ;;  %v113_v27 = vld [vmem:[%s469_s3 + $0x60] sm:$0xff]  ;;  %v114_v33 = vld [vmem:[%s469_s3 + $0x68] sm:$0xff] }
   0xd   :  { %v89_v53 = vmax.f32 %v73_v40, 0.0  ;;  %181 = vst [vmem:[%s472_s6 + $0x10] sm:$0xff] %v165_v47  ;;  %v53_v58 = vmul.f32 %v244_v1, %v30_v44  ;;  %v131_v59 = vmul.f32 %v258_v5, %v108_v45  ;;  %182 = vst [vmem:[%s472_s6 + $0x18] sm:$0xff] %v166_v52  ;;  %v90_v62 = vmax.f32 %v74_v54, 0.0  ;;  %v115_v43 = vld [vmem:[%s469_s3 + $0x70] sm:$0xff]  ;;  %v116_v49 = vld [vmem:[%s469_s3 + $0x78] sm:$0xff] }
   0xe   :  { %v54_v63 = vmul.f32 %v244_v1, %v31_v50  ;;  %v132_v0 = vmul.f32 %v258_v5, %v109_v51  ;;  %v91_v7 = vmax.f32 %v75_v56, 0.0  ;;  %v153_v8 = vadd.f32 %v263_v6, %v130_v57 }
   0xf   :  { %v167_v61 = vadd.f32 %v151_v48, %v89_v53  ;;  %v76_v9 = vadd.f32 %v249_v2, %v53_v58  ;;  %v154_v10 = vadd.f32 %v263_v6, %v131_v59  ;;  %v168_v13 = vadd.f32 %v152_v55, %v90_v62  ;;  %v38_v48 = vld [vmem:[%s466_s0 + $0x78] sm:$0xff] }
  0x10   :  { %v77_v14 = vadd.f32 %v249_v2, %v54_v63  ;;  %v155_v15 = vadd.f32 %v263_v6, %v132_v0  ;;  %v55_v16 = vmul.f32 %v244_v1, %v32_v60  ;;  %v169_v18 = vadd.f32 %v153_v8, %v91_v7 }
  0x11   :  { %183 = vst [vmem:[%s472_s6 + $0x20] sm:$0xff] %v167_v61  ;;  %v92_v19 = vmax.f32 %v76_v9, 0.0  ;;  %v133_v20 = vmul.f32 %v258_v5, %v110_v3  ;;  %v56_v21 = vmul.f32 %v244_v1, %v33_v4  ;;  %184 = vst [vmem:[%s472_s6 + $0x28] sm:$0xff] %v168_v13  ;;  %v134_v24 = vmul.f32 %v258_v5, %v111_v11 }
  0x12   :  { %v93_v22 = vmax.f32 %v77_v14, 0.0  ;;  %v78_v23 = vadd.f32 %v249_v2, %v55_v16  ;;  %v57_v25 = vmul.f32 %v244_v1, %v34_v12  ;;  %185 = vst [vmem:[%s472_s6 + $0x30] sm:$0xff] %v169_v18  ;;  %v135_v31 = vmul.f32 %v258_v5, %v112_v17 }
  0x13   :  { %v170_v28 = vadd.f32 %v154_v10, %v92_v19  ;;  %v156_v29 = vadd.f32 %v263_v6, %v133_v20  ;;  %v79_v30 = vadd.f32 %v249_v2, %v56_v21  ;;  %v157_v36 = vadd.f32 %v263_v6, %v134_v24 }
  0x14   :  { %v171_v34 = vadd.f32 %v155_v15, %v93_v22  ;;  %v94_v35 = vmax.f32 %v78_v23, 0.0  ;;  %v80_v37 = vadd.f32 %v249_v2, %v57_v25  ;;  %v158_v40 = vadd.f32 %v263_v6, %v135_v31 }
  0x15   :  { %186 = vst [vmem:[%s472_s6 + $0x38] sm:$0xff] %v170_v28  ;;  %v95_v39 = vmax.f32 %v79_v30, 0.0  ;;  %v58_v41 = vmul.f32 %v244_v1, %v35_v26  ;;  %v136_v42 = vmul.f32 %v258_v5, %v113_v27  ;;  %v59_v46 = vmul.f32 %v244_v1, %v36_v32 }
  0x16   :  { %187 = vst [vmem:[%s472_s6 + $0x40] sm:$0xff] %v171_v34  ;;  %v172_v44 = vadd.f32 %v156_v29, %v94_v35  ;;  %v96_v45 = vmax.f32 %v80_v37, 0.0  ;;  %v137_v47 = vmul.f32 %v258_v5, %v114_v33  ;;  %v60_v53 = vmul.f32 %v244_v1, %v37_v38 }
  0x17   :  { %v173_v50 = vadd.f32 %v157_v36, %v95_v39  ;;  %v81_v51 = vadd.f32 %v249_v2, %v58_v41  ;;  %v159_v52 = vadd.f32 %v263_v6, %v136_v42  ;;  %v82_v55 = vadd.f32 %v249_v2, %v59_v46 }
  0x18   :  { %188 = vst [vmem:[%s472_s6 + $0x48] sm:$0xff] %v172_v44  ;;  %v174_v54 = vadd.f32 %v158_v40, %v96_v45  ;;  %v160_v56 = vadd.f32 %v263_v6, %v137_v47  ;;  %v138_v57 = vmul.f32 %v258_v5, %v115_v43  ;;  %v83_v59 = vadd.f32 %v249_v2, %v60_v53 }
  0x19   :  { %189 = vst [vmem:[%s472_s6 + $0x50] sm:$0xff] %v173_v50  ;;  %v97_v58 = vmax.f32 %v81_v51, 0.0  ;;  %v61_v60 = vmul.f32 %v244_v1, %v38_v48  ;;  %v139_v61 = vmul.f32 %v258_v5, %v116_v49  ;;  %v98_v62 = vmax.f32 %v82_v55, 0.0 }
  0x1a   :  { %190 = vst [vmem:[%s472_s6 + $0x58] sm:$0xff] %v174_v54  ;;  %v161_v63 = vadd.f32 %v263_v6, %v138_v57  ;;  %v99_v3 = vmax.f32 %v83_v59, 0.0 }
  0x1b   :  { %v175_v0 = vadd.f32 %v159_v52, %v97_v58  ;;  %v84_v4 = vadd.f32 %v249_v2, %v61_v60  ;;  %v162_v7 = vadd.f32 %v263_v6, %v139_v61  ;;  %v176_v8 = vadd.f32 %v160_v56, %v98_v62 }
  0x1c   :  { %v177_v1 = vadd.f32 %v161_v63, %v99_v3 }
  0x1d   :  { %191 = vst [vmem:[%s472_s6 + $0x60] sm:$0xff] %v175_v0  ;;  %v100_v5 = vmax.f32 %v84_v4, 0.0  ;;  %192 = vst [vmem:[%s472_s6 + $0x68] sm:$0xff] %v176_v8 }
  0x1e   :  { %193 = vst [vmem:[%s472_s6 + $0x70] sm:$0xff] %v177_v1 }
  0x1f   :  { %v178_v9 = vadd.f32 %v162_v7, %v100_v5 }
  0x21   :  { %194 = vst [vmem:[%s472_s6 + $0x78] sm:$0xff] %v178_v9 }

// kernel: _lambda_.9
= control target key start
LH: loop header
LB: loop body
LE: loop exit
PB: predicated region body
PF: predicated region fallthrough
CT: control target
= control target key end

     0   :  { %s4585_s18 = smov 0   ;;  %s5841_s0 = inlined_call_operand.vmem [shape: f32[2,10,10,10,16], index: 0, kind: input, shape index: {}]   ;;  %s5842_s1 = inlined_call_operand.vmem [shape: bf16[27,16,16], index: 1, kind: input, shape index: {}]   ;;  %s5843_s2 = inlined_call_operand.vmem [shape: f32[1,16], index: 2, kind: input, shape index: {}]   ;;  %s5844_s3 = inlined_call_operand.vmem [shape: f32[1,16], index: 3, kind: input, shape index: {}]   ;;  %s5845_s4 = inlined_call_operand.vmem [shape: f32[2,8,64,16], index: 4, kind: output, shape index: {0}]   ;;  %s5846_s5 = inlined_call_operand.vmem [shape: f32[2,8,16], index: 5, kind: output, shape index: {1}]  }
   0x1 LB: > { %s3630_s19 = sadd.s32 4294967295, %s4547_s18   ;;  %p3634_p0 = scmp.ge.s32.totalorder %s4547_s18, 1  ;;  %s4547_s18 = sphi %s4585_s18, %s16_s18  }
   0x2   : > { %p190_p1 = scmp.lt.s32.totalorder %s4547_s18, 3 }
   0x4   : > { %p191_p2 = pnand %p3634_p0, %p190_p1 }
   0x5   : > { %p222_p3 = scmp.lt.s32.totalorder (!%p191_p2), %s3630_s19, 1  ;;  %v4596_v0 = vld [vmem:[%s5843_s2] ss:$0 sm:$0xff] (!%p191_p2)  ;;  %v241_v1 = vlaneseq (!%p191_p2)  ;;  %vm237_vm0 = vcmask (!%p191_p2), 130048   ;;  %v4553_v5 = vmov (!%p191_p2), 0.0   ;;  %s4627_s11 = smov (!%p191_p2), 0  }
   0x6   : > { %194 = sbr.rel (%p191_p2) target bundleno = 509 (0x1fd), region = 36  ;;  %5877 = vst [vmem:[#allocation2_spill] sm:$0xff] (!%p191_p2), %v4596_v0  ;;  %v4601_v2 = vld [vmem:[%s5844_s3] ss:$0 sm:$0xff] (!%p191_p2) }
   0x7   : > { %5878 = vst [vmem:[#allocation3_spill] sm:$0xff] (!%p191_p2), %v4601_v2  ;;  %v4603_v3 = vshrl.u32 (!%p191_p2), %v241_v1, 7 }
   0x9   : > { %5879 = vst [vmem:[#allocation4_spill] sm:$0xff] (!%p191_p2), %v4603_v3  ;;  %v4606_v4 = vadd.s32 (!%p191_p2), 8, %v4603_v3  ;;  %vm244_vm1 = vcmp.ge.s32.totalorder (!%p191_p2), %v4603_v3, 1 }
   0xb   : > { %5880 = vst [vmem:[#allocation5_spill] sm:$0xff] (!%p191_p2), %v4606_v4  ;;  %vm251_vm2 = vcmp.le.s32.totalorder (!%p191_p2), %v4606_v4, 8 }
   0xd   : > { %s5952_s19 = smov (!%p222_p3, %s3630_s19), 1 }
   0xe   : > { %s4490_s24 = smul.u32 1600, %s5952_s19  ;;  %s3874_s25 = sshll.u32 %s5952_s19, 9 }
   0xf   : > { %s4612_s28 = scalar_lea.vmem %s5845_s4, %s3874_s25  ;;  %s3638_s29 = sshll.u32 %s5952_s19, 3 }
  0x10   : > { %s4617_s7 = scalar_lea.vmem %s5841_s0, %s4490_s24  ;;  %s4622_s10 = scalar_lea.vmem %s5846_s5, %s3638_s29 }
  0x11   : > { %238 = vst.msk [vmem:[%s4622_s10] sm:$0xff] %vm237_vm0, %v4553_v5 }
  0x12 LB: >> { %v5881_v2 = vld [vmem:[#allocation3_spill] sm:$0xff]  ;;  %v5882_v0 = vld [vmem:[#allocation2_spill] sm:$0xff]  ;;  %s262_s16 = smul.u32 160, %s4551_s11  ;;  %p356_p4 = scmp.ge.s32.totalorder %s4551_s11, 1  ;;  %v4656_v9 = vld [vmem:[%s5842_s1 + $0x70] sm:$0xff]   ;;  %vm417_vm3 = vcmask 1046528   ;;  %s4551_s11 = sphi %s4627_s11, %s5950_s11  }
  0x13   : >> { %v4509_v6 = vld [vmem:[%s5842_s1 + $0x8] sm:$0xff]   ;;  %v4643_v8 = vld [vmem:[%s5842_s1] sm:$0xff]   ;;  %p357_p5 = scmp.le.s32.totalorder %s4551_s11, 8  ;;  %s4647_s20 = sadd.s32 1, %s4551_s11   ;;  %v5847_v32 = vmov 0.0   ;;  %vm623_vm10 = vcmask 1045504  }
  0x14   : >> { %v4510_v7 = vld [vmem:[%s5842_s1 + $0x68] sm:$0xff]   ;;  %4010 = vmatprep.subr.bf16.mxu1 %v4509_v6  ;;  %s4650_s21 = scalar_lea.vmem %s4617_s7, %s262_s16  ;;  %p1409_p7 = scmp.ge.s32.totalorder %s4647_s20, 1  ;;  %v4691_v33 = vrot.slane %v5847_v32, 1  ;;  %vm3495_vm14 = vcmask 122880  }
  0x15   : >> { %4140 = vmatprep.subr.bf16.mxu0 %v4510_v7  ;;  %4011 = vmatpush3.bf16.msra.mxu1 %v4509_v6  ;;  %v266_v10 = vld [vmem:[%s4650_s21 + $0x10] sm:$0xff]  ;;  %v267_v11 = vld [vmem:[%s4650_s21 + $0x18] sm:$0x3]  ;;  %v268_v12 = vld [vmem:[%s4650_s21 + $0x20] sm:$0xff]  ;;  %p4663_p6 = pnand %p357_p5, %p356_p4  ;;  %p1410_p8 = scmp.le.s32.totalorder %s4647_s20, 8 }
  0x16   : >> { %4141 = vmatpush3.bf16.msra.mxu0 %v4510_v7  ;;  %4020 = vmatprep.subr.bf16.mxu1 %v4643_v8  ;;  %v269_v13 = vld [vmem:[%s4650_s21 + $0x28] sm:$0x3]  ;;  %v292_v14 = vmul.f32 %v5882_v0, %v266_v10  ;;  %v293_v15 = vmul.f32 %v5882_v0, %v267_v11  ;;  %v294_v16 = vmul.f32 %v5882_v0, %v268_v12  ;;  %v3705_v17 = vld [vmem:[%s4650_s21 + $0xb0] sm:$0xff]  ;;  %v3706_v18 = vld [vmem:[%s4650_s21 + $0xb8] sm:$0x3]  ;;  %s2394_s15 = sadd.s32 2, %s4551_s11 }
  0x17   : >> { %4150 = vmatprep.subr.bf16.mxu0 %v4656_v9  ;;  %v295_v19 = vmul.f32 %v5882_v0, %v269_v13  ;;  %s3641_s25 = scalar_select %p4663_p6, 0, 1  ;;  %v3707_v20 = vld [vmem:[%s4650_s21 + $0xc0] sm:$0xff]  ;;  %v3708_v21 = vld [vmem:[%s4650_s21 + $0xc8] sm:$0x3]  ;;  %v1351_v22 = vmul.f32 %v3705_v17, %v5882_v0  ;;  %v1352_v23 = vmul.f32 %v3706_v18, %v5882_v0  ;;  %v3709_v27 = vld [vmem:[%s4650_s21 + $0xd0] sm:$0xff] }
  0x18   : >> { %v318_v24 = vadd.f32 %v5881_v2, %v292_v14  ;;  %v319_v25 = vadd.f32 %v5881_v2, %v293_v15  ;;  %v320_v26 = vadd.f32 %v5881_v2, %v294_v16  ;;  %v3710_v28 = vld [vmem:[%s4650_s21 + $0xd8] sm:$0x3]  ;;  %v1353_v29 = vmul.f32 %v3707_v20, %v5882_v0  ;;  %p4698_p9 = pnand %p1410_p8, %p1409_p7  ;;  %v270_v56 = vld [vmem:[%s4650_s21 + $0x30] sm:$0xff]  ;;  %v3711_v62 = vld [vmem:[%s4650_s21 + $0xe0] sm:$0xff]  ;;  %p5182_p10 = scmp.ge.s32.totalorder %s2394_s15, 1 }
  0x19   : >> { %v321_v30 = vadd.f32 %v5881_v2, %v295_v19  ;;  %v361_v31 = vstv %s3641_s25  ;;  %v1354_v34 = vmul.f32 %v3708_v21, %v5882_v0  ;;  %v1355_v40 = vmul.f32 %v3709_v27, %v5882_v0  ;;  %v271_v57 = vld [vmem:[%s4650_s21 + $0x38] sm:$0x3]  ;;  %v3712_v13 = vld [vmem:[%s4650_s21 + $0xe8] sm:$0x3]  ;;  %v3713_v17 = vld [vmem:[%s4650_s21 + $0xf0] sm:$0xff]  ;;  %p5186_p11 = scmp.le.s32.totalorder %s2394_s15, 8 }
  0x1a   : >> { %v338_v35 = vmax.f32 %v318_v24, 0.0  ;;  %v339_v36 = vmax.f32 %v319_v25, 0.0  ;;  %v340_v37 = vmax.f32 %v320_v26, 0.0  ;;  %vm362_vm4 = vcmp.eq.s32.totalorder %v361_v31, 1  ;;  %s3723_s27 = scalar_select %p4698_p9, 0, 1 }
  0x1b   : >> { %v341_v38 = vmax.f32 %v321_v30, 0.0  ;;  %vm4704_vm5 = vmand %vm244_vm1, %vm362_vm4  ;;  %v1356_v41 = vmul.f32 %v3710_v28, %v5882_v0  ;;  %v1371_v42 = vadd.f32 %v5881_v2, %v1351_v22  ;;  %v1372_v46 = vadd.f32 %v5881_v2, %v1352_v23  ;;  %v3714_v24 = vld [vmem:[%s4650_s21 + $0xf8] sm:$0x3]  ;;  %p2479_p12 = pnand %p5186_p11, %p5182_p10  ;;  %v3796_v3 = vld [vmem:[%s4650_s21 + $0x188] sm:$0x3]  ;;  %s3871_s24 = sshll.u32 %s4551_s11, 6 }
  0x1c   : >> { %vm4713_vm6 = vmand %vm251_vm2, %vm362_vm4  ;;  %v4719_v44 = vsel %vm4704_vm5, %v338_v35, 0.0  ;;  %v4723_v45 = vsel %vm4704_vm5, %v340_v37, 0.0  ;;  %v1373_v47 = vadd.f32 %v5881_v2, %v1353_v29  ;;  %v1374_v54 = vadd.f32 %v5881_v2, %v1354_v34  ;;  %p258_p13 = scmp.ge.s32.totalorder %s4647_s20, 8   ;;  %s5950_s11 = smov %s4647_s20 }
  0x1d   : >> { %v4729_v48 = vsel %vm4713_vm6, %v339_v36, 0.0  ;;  %v4733_v49 = vsel %vm4713_vm6, %v341_v38, 0.0  ;;  %v421_v50 = vrot.slane %v4719_v44, 1  ;;  %v424_v51 = vrot.slane %v4723_v45, 1  ;;  %s3807_s25 = scalar_select %p2479_p12, 0, 1 }
  0x1e   : >> { %v422_v52 = vrot.slane %v4729_v48, 1  ;;  %v425_v53 = vrot.slane %v4733_v49, 1  ;;  %v1375_v55 = vadd.f32 %v5881_v2, %v1355_v40  ;;  %v1376_v60 = vadd.f32 %v5881_v2, %v1356_v41  ;;  %v272_v40 = vld [vmem:[%s4650_s21 + $0x40] sm:$0xff]  ;;  %v273_v41 = vld [vmem:[%s4650_s21 + $0x48] sm:$0x3] }
  0x1f   : >> { %v1391_v61 = vmax.f32 %v1371_v42, 0.0  ;;  %v1392_v5 = vmax.f32 %v1372_v46, 0.0  ;;  %v1393_v6 = vmax.f32 %v1373_v47, 0.0  ;;  %v1394_v7 = vmax.f32 %v1374_v54, 0.0 }
  0x20   : >> { %v4746_v58 = vsel %vm417_vm3, %v421_v50, %v422_v52  ;;  %v4749_v59 = vsel %vm417_vm3, %v424_v51, %v425_v53  ;;  %v1414_v10 = vstv %s3723_s27  ;;  %v296_v11 = vmul.f32 %v5882_v0, %v270_v56  ;;  %v274_v53 = vld [vmem:[%s4650_s21 + $0x50] sm:$0xff] }
  0x21   : >> { %v450_v63 = vpack.c.bf16 %v4746_v58, %v4691_v33  ;;  %v297_v12 = vmul.f32 %v5882_v0, %v271_v57  ;;  %vm1415_vm7 = vcmp.eq.s32.totalorder %v1414_v10, 1  ;;  %v1395_v14 = vmax.f32 %v1375_v55, 0.0  ;;  %v275_v57 = vld [vmem:[%s4650_s21 + $0x58] sm:$0x3] }
  0x22   : >> { %v1396_v15 = vmax.f32 %v1376_v60, 0.0  ;;  %vm4763_vm8 = vmand %vm244_vm1, %vm1415_vm7  ;;  %v1357_v18 = vmul.f32 %v3711_v62, %v5882_v0  ;;  %v322_v22 = vadd.f32 %v5881_v2, %v296_v11  ;;  %v1358_v28 = vmul.f32 %v3712_v13, %v5882_v0 }
  0x23   : >> { %4012 = vmatprep.mubr.msk.bf16.mxu1 %vm237_vm0, %v450_v63  ;;  %vm4771_vm9 = vmand %vm251_vm2, %vm1415_vm7  ;;  %v4777_v20 = vsel %vm4763_vm8, %v1391_v61, 0.0  ;;  %v4781_v21 = vsel %vm4763_vm8, %v1393_v6, 0.0  ;;  %v323_v23 = vadd.f32 %v5881_v2, %v297_v12  ;;  %v1359_v34 = vmul.f32 %v3713_v17, %v5882_v0 }
  0x24   : >> { %5895 = vst [vmem:[#allocation6_spill] sm:$0xff] %v4777_v20  ;;  %5896 = vst [vmem:[#allocation7_spill] sm:$0xff] %v4781_v21  ;;  %v4788_v25 = vsel %vm4771_vm9, %v1392_v5, 0.0  ;;  %v4792_v26 = vsel %vm4771_vm9, %v1394_v7, 0.0  ;;  %v1565_v27 = vrot.slane %v4777_v20, 1  ;;  %v1568_v30 = vrot.slane %v4781_v21, 1 }
  0x25   : >> { %v1566_v29 = vrot.slane %v4788_v25, 1  ;;  %v1569_v31 = vrot.slane %v4792_v26, 1  ;;  %v4802_v35 = vsel %vm4763_vm8, %v1395_v14, 0.0  ;;  %v4806_v36 = vsel %vm4771_vm9, %v1396_v15, 0.0 }
  0x26   : >> { %5897 = vst [vmem:[#allocation8_spill] sm:$0xff] %v4802_v35  ;;  %v1360_v37 = vmul.f32 %v3714_v24, %v5882_v0  ;;  %v1377_v38 = vadd.f32 %v5881_v2, %v1357_v18  ;;  %v342_v47 = vmax.f32 %v322_v22, 0.0  ;;  %v343_v50 = vmax.f32 %v323_v23, 0.0  ;;  %v4863_v24 = vld [vmem:[%s5842_s1 + $0x10] sm:$0xff]  }
  0x27   : >> { %v4813_v42 = vsel %vm417_vm3, %v1565_v27, %v1566_v29  ;;  %v4816_v46 = vsel %vm417_vm3, %v1568_v30, %v1569_v31  ;;  %v1378_v52 = vadd.f32 %v5881_v2, %v1358_v28  ;;  %v1379_v56 = vadd.f32 %v5881_v2, %v1359_v34  ;;  %v276_v30 = vld [vmem:[%s4650_s21 + $0x60] sm:$0xff] }
  0x28   : >> { %5898 = vst [vmem:[#allocation9_spill] sm:$0xff] %v4813_v42  ;;  %v1926_v51 = vpack.c.bf16 %v4816_v46, %v4813_v42  ;;  %v4824_v54 = vsel %vm4704_vm5, %v342_v47, 0.0  ;;  %v4828_v55 = vsel %vm4713_vm6, %v343_v50, 0.0  ;;  %v298_v60 = vmul.f32 %v5882_v0, %v272_v40  ;;  %v277_v40 = vld [vmem:[%s4650_s21 + $0x68] sm:$0x3] }
  0x29   : >> { %v1571_v61 = vrot.slane %v4802_v35, 1  ;;  %v1572_v62 = vrot.slane %v4806_v36, 1  ;;  %v427_v63 = vrot.slane %v4824_v54, 1  ;;  %v428_v5 = vrot.slane %v4828_v55, 1 }
  0x2a   : >> { %4142 = vmatprep.mubr.msk.bf16.mxu0 %vm237_vm0, %v1926_v51  ;;  %v4839_v6 = vadd.f32 %v5881_v2, %v1360_v37  ;;  %v1397_v7 = vmax.f32 %v1377_v38, 0.0  ;;  %v1398_v10 = vmax.f32 %v1378_v52, 0.0  ;;  %v299_v11 = vmul.f32 %v5882_v0, %v273_v41  ;;  %v278_v52 = vld [vmem:[%s4650_s21 + $0x70] sm:$0xff] }
  0x2b   : >> { %v4843_v12 = vsel %vm417_vm3, %v427_v63, %v428_v5  ;;  %v1399_v13 = vmax.f32 %v1379_v56, 0.0  ;;  %v300_v14 = vmul.f32 %v5882_v0, %v274_v53  ;;  %v301_v15 = vmul.f32 %v5882_v0, %v275_v57  ;;  %v279_v53 = vld [vmem:[%s4650_s21 + $0x78] sm:$0x3] }
  0x2c   : >> { %v1696_v17 = vrot.slane %v4788_v25, 2  ;;  %v4850_v18 = vpack.c.bf16 %v4843_v12, %v4749_v59  ;;  %v4854_v22 = vsel %vm4763_vm8, %v1397_v7, 0.0  ;;  %v4858_v23 = vsel %vm4771_vm9, %v1398_v10, 0.0 }
  0x2d   : >> { %5900 = vst [vmem:[#allocation11_spill] sm:$0xff] %v4854_v22  ;;  %v4866_v25 = vsel %vm417_vm3, %v1571_v61, %v1572_v62  ;;  %v1699_v27 = vrot.slane %v4792_v26, 2  ;;  %v1574_v28 = vrot.slane %v4854_v22, 1  ;;  %v1575_v29 = vrot.slane %v4858_v23, 1  ;;  %v4897_v61 = vld [vmem:[%s5842_s1 + $0x78] sm:$0xff]   ;;  %v3719_v26 = vld [vmem:[%s4650_s21 + $0x120] sm:$0xff] }
  0x2e   : >> { %5899 = vst [vmem:[#allocation10_spill] sm:$0xff] %v4850_v18  ;;  %v1702_v31 = vrot.slane %v4806_v36, 2  ;;  %4013 = vmatmul.mubr.msk.bf16.vlgmr.msra.gmra.mrb[0].mxu1 %vm237_vm0, %v4850_v18  ;;  %v1400_v34 = vmax.f32 %v4839_v6, 0.0  ;;  %v324_v37 = vadd.f32 %v5881_v2, %v298_v60  ;;  %v325_v38 = vadd.f32 %v5881_v2, %v299_v11  ;;  %v5005_v36 = vld [vmem:[%s5842_s1 + $0x80] sm:$0xff]  }
  0x2f   : >> { %4021 = vmatpush3.bf16.msra.mxu1 %v4643_v8  ;;  %v4882_v41 = vsel %vm4763_vm8, %v1399_v13, 0.0  ;;  %v4885_v47 = vsel %vm417_vm3, %v1574_v28, %v1575_v29  ;;  %v326_v50 = vadd.f32 %v5881_v2, %v300_v14  ;;  %v327_v51 = vadd.f32 %v5881_v2, %v301_v15 }
  0x30   : >> { %v1927_v56 = vpack.c.bf16 %v4885_v47, %v4866_v25  ;;  %v344_v57 = vmax.f32 %v324_v37, 0.0  ;;  %v345_v60 = vmax.f32 %v325_v38, 0.0  ;;  %v302_v8 = vmul.f32 %v5882_v0, %v276_v30  ;;  %4030 = vmatprep.subr.bf16.mxu1 %v4863_v24 }
  0x31   : >> { %v346_v62 = vmax.f32 %v326_v50, 0.0  ;;  %v347_v63 = vmax.f32 %v327_v51, 0.0  ;;  %v303_v5 = vmul.f32 %v5882_v0, %v277_v40  ;;  %v304_v10 = vmul.f32 %v5882_v0, %v278_v52 }
  0x32   : >> { %4143 = vmatmul.mubr.msk.bf16.vlgmr.msra.gmra.mrb[0].mxu0 %vm237_vm0, %v1927_v56  ;;  %v4904_v6 = vsel %vm4704_vm5, %v344_v57, 0.0  ;;  %v4908_v7 = vsel %vm4713_vm6, %v345_v60, 0.0  ;;  %v305_v11 = vmul.f32 %v5882_v0, %v279_v53  ;;  %v328_v37 = vadd.f32 %v5881_v2, %v302_v8 }
  0x33   : >> { %4151 = vmatpush3.bf16.msra.mxu0 %v4656_v9  ;;  %v4915_v13 = vsel %vm4704_vm5, %v346_v62, 0.0  ;;  %v4919_v14 = vsel %vm4713_vm6, %v347_v63, 0.0  ;;  %v430_v15 = vrot.slane %v4904_v6, 1  ;;  %v431_v28 = vrot.slane %v4908_v7, 1 }
  0x34   : >> { %v433_v29 = vrot.slane %v4915_v13, 1  ;;  %v434_v30 = vrot.slane %v4919_v14, 1  ;;  %v329_v9 = vadd.f32 %v5881_v2, %v303_v5  ;;  %4160 = vmatprep.subr.bf16.mxu0 %v4897_v61  ;;  %v330_v40 = vadd.f32 %v5881_v2, %v304_v10  ;;  %v3715_v5 = vld [vmem:[%s4650_s21 + $0x100] sm:$0xff]  ;;  %v3716_v10 = vld [vmem:[%s4650_s21 + $0x108] sm:$0x3] }
  0x35   : >> { %v4929_v38 = vsel %vm417_vm3, %v430_v15, %v431_v28  ;;  %v331_v50 = vadd.f32 %v5881_v2, %v305_v11  ;;  %v1695_v51 = vrot.slane %v4777_v20, 2  ;;  %v1705_v52 = vrot.slane %v4858_v23, 2 }
  0x36   : >> { %v4936_v53 = vsel %vm417_vm3, %v433_v29, %v434_v30  ;;  %v348_v56 = vmax.f32 %v328_v37, 0.0  ;;  %v349_v57 = vmax.f32 %v329_v9, 0.0  ;;  %v350_v8 = vmax.f32 %v330_v40, 0.0 }
  0x37   : >> { %v4940_v60 = vpack.c.bf16 %v4936_v53, %v4929_v38  ;;  %v351_v62 = vmax.f32 %v331_v50, 0.0  ;;  %v4943_v63 = vsel %vm623_vm10, %v1695_v51, %v1696_v17  ;;  %v1698_v15 = vrot.slane %v4781_v21, 2 }
  0x38   : >> { %5902 = vst [vmem:[#allocation13_spill] sm:$0xff] %v4943_v63  ;;  %v4949_v23 = vsel %vm4704_vm5, %v348_v56, 0.0  ;;  %v4953_v11 = vsel %vm4713_vm6, %v349_v57, 0.0  ;;  %v1701_v28 = vrot.slane %v4802_v35, 2  ;;  %v4961_v17 = vsel %vm4704_vm5, %v350_v8, 0.0  ;;  %v3717_v56 = vld [vmem:[%s4650_s21 + $0x110] sm:$0xff] }
  0x39   : >> { %5901 = vst [vmem:[#allocation12_spill] sm:$0xff] %v4940_v60  ;;  %4016 = vmatprep.mubr.msk.bf16.mxu1 %vm237_vm0, %v4940_v60  ;;  %v4965_v29 = vsel %vm4713_vm6, %v351_v62, 0.0  ;;  %v436_v30 = vrot.slane %v4949_v23, 1  ;;  %v437_v37 = vrot.slane %v4953_v11, 1  ;;  %v4971_v9 = vsel %vm4771_vm9, %v1400_v34, 0.0 }
  0x3a   : >> { %v439_v40 = vrot.slane %v4961_v17, 1  ;;  %v440_v50 = vrot.slane %v4965_v29, 1  ;;  %v4978_v51 = vsel %vm623_vm10, %v1698_v15, %v1699_v27  ;;  %v3718_v57 = vld [vmem:[%s4650_s21 + $0x118] sm:$0x3]  ;;  %v3720_v8 = vld [vmem:[%s4650_s21 + $0x128] sm:$0x3]  ;;  %v4991_v34 = vsel %vm623_vm10, %v1701_v28, %v1702_v31 }
  0x3b   : >> { %v4984_v62 = vsel %vm417_vm3, %v436_v30, %v437_v37  ;;  %v2028_v1 = vpack.c.bf16 %v4978_v51, %v4943_v63  ;;  %v1704_v32 = vrot.slane %v4854_v22, 2  ;;  %v5903_v15 = vmov 0.0  }
  0x3c   : >> { %v4996_v27 = vsel %vm417_vm3, %v439_v40, %v440_v50  ;;  %v395_v42 = vpack.c.bf16 %v4719_v44, %v5903_v15  ;;  %v1361_v30 = vmul.f32 %v3715_v5, %v5882_v0  ;;  %v1362_v37 = vmul.f32 %v3716_v10, %v5882_v0 }
  0x3d   : >> { %v5009_v31 = vpack.c.bf16 %v4996_v27, %v4984_v62  ;;  %4152 = vmatprep.mubr.msk.bf16.mxu0 %vm237_vm0, %v2028_v1  ;;  %v5013_v28 = vsel %vm623_vm10, %v1704_v32, %v1705_v52  ;;  %v1707_v40 = vrot.slane %v4882_v41, 2  ;;  %v1708_v5 = vrot.slane %v4971_v9, 2 }
  0x3e   : >> { %v2029_v10 = vpack.c.bf16 %v5013_v28, %v4991_v34  ;;  %v1381_v50 = vadd.f32 %v5881_v2, %v1361_v30  ;;  %v1382_v20 = vadd.f32 %v5881_v2, %v1362_v37  ;;  %v1363_v60 = vmul.f32 %v3717_v56, %v5882_v0 }
  0x3f   : >> { %5904 = vst [vmem:[#allocation14_spill] sm:$0xff] %v5009_v31  ;;  %4017 = vmatmul.mubr.msk.bf16.gmra.mrb[4].mxu1 %vm237_vm0, %v5009_v31  ;;  %v1364_v1 = vmul.f32 %v3718_v57, %v5882_v0  ;;  %v1365_v32 = vmul.f32 %v3719_v26, %v5882_v0  ;;  %v1366_v52 = vmul.f32 %v3720_v8, %v5882_v0  ;;  %v639_v31 = vrot.slane %v4915_v13, 2 }
  0x40   : >> { %4153 = vmatmul.mubr.msk.bf16.vlgmr.msra.gmra.mrb[0].mxu0 %vm237_vm0, %v2029_v10  ;;  %4022 = vmatprep.mubr.msk.bf16.mxu1 %vm237_vm0, %v395_v42  ;;  %v1401_v18 = vmax.f32 %v1381_v50, 0.0  ;;  %v1402_v63 = vmax.f32 %v1382_v20, 0.0  ;;  %v1383_v30 = vadd.f32 %v5881_v2, %v1363_v60  ;;  %v5033_v56 = vpack.c.bf16 %v4824_v54, %v4723_v45 }
  0x41   : >> { %4161 = vmatpush3.bf16.msra.mxu0 %v4897_v61  ;;  %v1384_v57 = vadd.f32 %v5881_v2, %v1364_v1  ;;  %v1385_v26 = vadd.f32 %v5881_v2, %v1365_v32  ;;  %v1386_v8 = vadd.f32 %v5881_v2, %v1366_v52  ;;  %v5047_v42 = vsel %vm623_vm10, %v1707_v40, %v1708_v5 }
  0x42   : >> { %5905 = vst [vmem:[#allocation15_spill] sm:$0xff] %v5033_v56  ;;  %v5040_v37 = vsel %vm4763_vm8, %v1401_v18, 0.0  ;;  %v5044_v20 = vsel %vm4771_vm9, %v1402_v63, 0.0  ;;  %v1403_v61 = vmax.f32 %v1383_v30, 0.0  ;;  %4170 = vmatprep.subr.bf16.mxu0 %v5005_v36  ;;  %v628_v32 = vrot.slane %v4729_v48, 2 }
  0x43   : >> { %v1710_v60 = vrot.slane %v5040_v37, 2  ;;  %v1711_v10 = vrot.slane %v5044_v20, 2  ;;  %v1404_v50 = vmax.f32 %v1384_v57, 0.0  ;;  %v1405_v1 = vmax.f32 %v1385_v26, 0.0  ;;  %v5074_v57 = vld [vmem:[%s5842_s1 + $0x18] sm:$0xff]  }
  0x44   : >> { %v1406_v18 = vmax.f32 %v1386_v8, 0.0  ;;  %v5055_v52 = vsel %vm4763_vm8, %v1403_v61, 0.0  ;;  %v5059_v63 = vpack.c.bf16 %v4915_v13, %v4904_v6 }
  0x45   : >> { %5906 = vst [vmem:[#allocation16_spill] sm:$0xff] %v5055_v52  ;;  %v5062_v40 = vsel %vm623_vm10, %v1710_v60, %v1711_v10  ;;  %v1443_v5 = vsel %vm4771_vm9, %v1404_v50, 0.0  ;;  %v5068_v30 = vsel %vm4763_vm8, %v1405_v1, 0.0  ;;  %v1713_v48 = vrot.slane %v5055_v52, 2 }
  0x46   : >> { %5907 = vst [vmem:[#allocation17_spill] sm:$0xff] %v5059_v63  ;;  %5908 = vst [vmem:[#allocation18_spill] sm:$0xff] %v5068_v30  ;;  %v2030_v26 = vpack.c.bf16 %v5062_v40, %v5047_v42  ;;  %v1445_v8 = vsel %vm4771_vm9, %v1406_v18, 0.0  ;;  %v1714_v61 = vrot.slane %v1443_v5, 2  ;;  %v2024_v60 = vrot.slane %v5068_v30, 2 }
  0x47   : >> { %4023 = vmatmul.mubr.msk.bf16.vlgmr.msra.gmra.mrb[0].mxu1 %vm237_vm0, %v5033_v56  ;;  %v2025_v16 = vrot.slane %v1445_v8, 2  ;;  %v627_v10 = vrot.slane %v4719_v44, 2  ;;  %v5090_v1 = vrot.slane %v5903_v15, 2  ;;  %v5099_v18 = vpack.c.bf16 %v4802_v35, %v4781_v21 }
  0x48   : >> { %4031 = vmatpush3.bf16.msra.mxu1 %v4863_v24  ;;  %4156 = vmatprep.mubr.msk.bf16.mxu0 %vm237_vm0, %v2030_v26  ;;  %v5087_v50 = vsel %vm623_vm10, %v1713_v48, %v1714_v61  ;;  %v630_v26 = vrot.slane %v4723_v45, 2  ;;  %v5110_v61 = vpack.c.bf16 %v4961_v17, %v4949_v23  ;;  %v636_v35 = vrot.slane %v4904_v6, 2 }
  0x49   : >> { %v5093_v19 = vsel %vm623_vm10, %v2024_v60, %v2025_v16  ;;  %4026 = vmatprep.mubr.msk.bf16.mxu1 %vm237_vm0, %v5059_v63  ;;  %5910 = vst [vmem:[#allocation20_spill] sm:$0xff] %v5099_v18  ;;  %v5102_v24 = vsel %vm623_vm10, %v627_v10, %v628_v32  ;;  %4040 = vmatprep.subr.bf16.mxu1 %v5074_v57  ;;  %v631_v60 = vrot.slane %v4733_v49, 2  ;;  %v634_v16 = vrot.slane %v4828_v55, 2  ;;  %v280_v55 = vld [vmem:[%s4650_s21 + $0x80] sm:$0xff] }
  0x4a   : >> { %5909 = vst [vmem:[#allocation19_spill] sm:$0xff] %v5093_v19  ;;  %5911 = vst [vmem:[#allocation21_spill] sm:$0xff] %v5102_v24  ;;  %v2031_v48 = vpack.c.bf16 %v5093_v19, %v5087_v50  ;;  %v656_v32 = vpack.c.bf16 %v5102_v24, %v5090_v1  ;;  %v633_v10 = vrot.slane %v4824_v54, 2  ;;  %v637_v21 = vrot.slane %v4908_v7, 2 }
  0x4b   : >> { %5912 = vst [vmem:[#allocation22_spill] sm:$0xff] %v5110_v61  ;;  %v640_v49 = vrot.slane %v4919_v14, 2  ;;  %v5130_v63 = vpack.c.bf16 %v4882_v41, %v4854_v22  ;;  %v1922_v56 = vrot.slane %v5068_v30, 1  ;;  %v1923_v24 = vrot.slane %v1445_v8, 1  ;;  %v281_v22 = vld [vmem:[%s4650_s21 + $0x88] sm:$0x3] }
  0x4c   : >> { %4157 = vmatmul.mubr.msk.bf16.gmra.mrb[4].mxu0 %vm237_vm0, %v2031_v48  ;;  %v1583_v48 = vrot.slane %v5055_v52, 1  ;;  %v5135_v7 = vsel %vm623_vm10, %v630_v26, %v631_v60  ;;  %v5138_v14 = vsel %vm623_vm10, %v633_v10, %v634_v16  ;;  %v5142_v19 = vpack.c.bf16 %v5055_v52, %v5040_v37  ;;  %v5162_v60 = vld [vmem:[%s5842_s1 + $0x88] sm:$0xff]   ;;  %v3789_v16 = vld [vmem:[%s4650_s21 + $0x150] sm:$0xff] }
  0x4d   : >> { %4162 = vmatprep.mubr.msk.bf16.mxu0 %vm237_vm0, %v5099_v18  ;;  %v1584_v18 = vrot.slane %v1443_v5, 1  ;;  %v5147_v5 = vsel %vm623_vm10, %v636_v35, %v637_v21  ;;  %v5150_v8 = vsel %vm623_vm10, %v639_v31, %v640_v49  ;;  %v5156_v26 = vsel %vm417_vm3, %v1922_v56, %v1923_v24 }
  0x4e   : >> { %5914 = vst [vmem:[#allocation24_spill] sm:$0xff] %v5156_v26  ;;  %v5169_v35 = vpack.c.bf16 %v5138_v14, %v5135_v7  ;;  %v642_v31 = vrot.slane %v4949_v23, 2  ;;  %v643_v56 = vrot.slane %v4953_v11, 2  ;;  %v5178_v24 = vpack.c.bf16 %v5150_v8, %v5147_v5 }
  0x4f   : >> { %4027 = vmatmul.mubr.msk.bf16.gmra.mrb[4].mxu1 %vm237_vm0, %v5110_v61  ;;  %v306_v61 = vmul.f32 %v5882_v0, %v280_v55  ;;  %v645_v10 = vrot.slane %v4961_v17, 2 }
  0x50   : >> { %4032 = vmatprep.mubr.msk.bf16.mxu1 %vm237_vm0, %v656_v32  ;;  %v5153_v32 = vsel %vm417_vm3, %v1583_v48, %v1584_v18  ;;  %v307_v18 = vmul.f32 %v5882_v0, %v281_v22  ;;  %v4518_v22 = vld [vmem:[%s5842_s1 + $0x20] sm:$0xff]   ;;  %v5210_v48 = vsel %vm623_vm10, %v642_v31, %v643_v56  ;;  %v1580_v56 = vrot.slane %v5040_v37, 1 }
  0x51   : >> { %5913 = vst [vmem:[#allocation23_spill] sm:$0xff] %v5153_v32  ;;  %v332_v21 = vadd.f32 %v5881_v2, %v306_v61  ;;  %v646_v61 = vrot.slane %v4965_v29, 2 }
  0x52   : >> { %v333_v11 = vadd.f32 %v5881_v2, %v307_v18  ;;  %v1577_v18 = vrot.slane %v4882_v41, 1 }
  0x53   : >> { %v352_v49 = vmax.f32 %v332_v21, 0.0  ;;  %v5213_v39 = vsel %vm623_vm10, %v645_v10, %v646_v61  ;;  %v1581_v10 = vrot.slane %v5044_v20, 1 }
  0x54   : >> { %4163 = vmatmul.mubr.msk.bf16.vlgmr.msra.gmra.mrb[0].mxu0 %vm237_vm0, %v5130_v63  ;;  %v353_v55 = vmax.f32 %v333_v11, 0.0  ;;  %v5232_v11 = vpack.c.bf16 %v5213_v39, %v5210_v48 }
  0x55   : >> { %4171 = vmatpush3.bf16.msra.mxu0 %v5005_v36  ;;  %4166 = vmatprep.mubr.msk.bf16.mxu0 %vm237_vm0, %v5142_v19  ;;  %v5200_v29 = vsel %vm4704_vm5, %v352_v49, 0.0  ;;  %v2126_v36 = vpack.c.bf16 %v5903_v15, %v5068_v30  ;;  %v1578_v49 = vrot.slane %v4971_v9, 1 }
  0x56   : >> { %4180 = vmatprep.subr.bf16.mxu0 %v5162_v60  ;;  %v854_v21 = vrot.slane %v5200_v29, 1  ;;  %v392_v31 = vsel %vm4713_vm6, %v353_v55, 0.0  ;;  %v956_v43 = vrot.slane %v5200_v29, 2  ;;  %v1058_v30 = vpack.c.bf16 %v5903_v15, %v5200_v29 }
  0x57   : >> { %4033 = vmatmul.mubr.msk.bf16.vlgmr.msra.gmra.mrb[0].mxu1 %vm237_vm0, %v5169_v35  ;;  %v855_v61 = vrot.slane %v392_v31, 1  ;;  %v5249_v20 = vsel %vm417_vm3, %v1577_v18, %v1578_v49  ;;  %v2482_v49 = vstv %s3807_s25  ;;  %s5796_s25 = scalar_lea.vmem %s4612_s28, %s3871_s24 }
  0x58   : >> { %4041 = vmatpush3.bf16.msra.mxu1 %v5074_v57  ;;  %4036 = vmatprep.mubr.msk.bf16.mxu1 %vm237_vm0, %v5178_v24  ;;  %v5222_v57 = vpack.c.bf16 %v4866_v25, %v4816_v46  ;;  %v3790_v46 = vld [vmem:[%s4650_s21 + $0x158] sm:$0x3]  ;;  %v754_v25 = vpack.c.bf16 %v4723_v45, %v4719_v44  ;;  %v5256_v44 = vsel %vm417_vm3, %v1580_v56, %v1581_v10  ;;  %vm2483_vm11 = vcmp.eq.s32.totalorder %v2482_v49, 1 }
  0x59   : >> { %4050 = vmatprep.subr.bf16.mxu1 %v4518_v22  ;;  %v5240_v9 = vsel %vm417_vm3, %v854_v21, %v855_v61  ;;  %5917 = vst [vmem:[#allocation25_spill] sm:$0xff] %v5256_v44  ;;  %v2419_v45 = vmul.f32 %v3789_v16, %v5882_v0  ;;  %v2420_v21 = vmul.f32 %v3790_v46, %v5882_v0  ;;  %v4519_v16 = vld [vmem:[%s5842_s1 + $0x90] sm:$0xff]   ;;  %vm5293_vm12 = vmand %vm244_vm1, %vm2483_vm11 }
  0x5a   : >> { %v5264_v18 = vpack.c.bf16 %v5249_v20, %v4885_v47  ;;  %v5272_v56 = vpack.c.bf16 %v5153_v32, %v5256_v44  ;;  %v755_v47 = vpack.c.bf16 %v4904_v6, %v4824_v54  ;;  %v756_v46 = vpack.c.bf16 %v4949_v23, %v4915_v13  ;;  %vm5300_vm13 = vmand %vm251_vm2, %vm2483_vm11  ;;  %v5931_v44 = vld [vmem:[#allocation10_spill] sm:$0xff] }
  0x5b   : >> { %v2440_v10 = vadd.f32 %v5881_v2, %v2420_v21  ;;  %v2218_v23 = vpack.c.bf16 %v4691_v33, %v5156_v26 }
  0x5c   : >> { %4167 = vmatmul.mubr.msk.bf16.gmra.mrb[4].mxu0 %vm237_vm0, %v2126_v36  ;;  %v957_v36 = vrot.slane %v392_v31, 2  ;;  %v2439_v31 = vadd.f32 %v5881_v2, %v2419_v45 }
  0x5d   : >> { %4172 = vmatprep.mubr.msk.bf16.mxu0 %vm237_vm0, %v5222_v57  ;;  %v2460_v6 = vmax.f32 %v2440_v10, 0.0 }
  0x5e   : >> { %v5268_v61 = vsel %vm623_vm10, %v956_v43, %v957_v36  ;;  %v2459_v43 = vmax.f32 %v2439_v31, 0.0 }
  0x5f   : >> { %4037 = vmatmul.mubr.msk.bf16.gmra.mrb[4].mxu1 %vm237_vm0, %v5232_v11  ;;  %v5317_v36 = vsel %vm5300_vm13, %v2460_v6, 0.0  ;;  %v5340_v6 = vpack.c.bf16 %v5047_v42, %v5013_v28 }
  0x60   : >> { %4042 = vmatprep.mubr.msk.bf16.mxu1 %vm237_vm0, %v754_v25  ;;  %v4520_v25 = vld [vmem:[%s5842_s1 + $0x28] sm:$0xff]   ;;  %v5313_v45 = vsel %vm5293_vm12, %v2459_v43, 0.0  ;;  %v2764_v49 = vrot.slane %v5317_v36, 2  ;;  %v3797_v43 = vld [vmem:[%s4650_s21 + $0x190] sm:$0xff] }
  0x61   : >> { %v2763_v21 = vrot.slane %v5313_v45, 2  ;;  %v2427_v28 = vmul.f32 %v3797_v43, %v5882_v0  ;;  %v3794_v43 = vld [vmem:[%s4650_s21 + $0x178] sm:$0x3] }
  0x63   : >> { %v5329_v31 = vsel %vm623_vm10, %v2763_v21, %v2764_v49  ;;  %v5353_v21 = vld [vmem:[%s5842_s1 + $0x98] sm:$0xff]  }
  0x64   : >> { %4173 = vmatmul.mubr.msk.bf16.vlgmr.msra.gmra.mrb[0].mxu0 %vm237_vm0, %v5264_v18 }
  0x65   : >> { %4181 = vmatpush3.bf16.msra.mxu0 %v5162_v60  ;;  %4176 = vmatprep.mubr.msk.bf16.mxu0 %vm237_vm0, %v5272_v56  ;;  %v5309_v60 = vpack.c.bf16 %v4991_v34, %v4978_v51  ;;  %v3791_v51 = vld [vmem:[%s4650_s21 + $0x160] sm:$0xff]  ;;  %v3793_v34 = vld [vmem:[%s4650_s21 + $0x170] sm:$0xff] }
  0x66   : >> { %4190 = vmatprep.subr.bf16.mxu0 %v4519_v16 }
  0x67   : >> { %4043 = vmatmul.mubr.msk.bf16.vlgmr.msra.gmra.mrb[0].mxu1 %vm237_vm0, %v755_v47  ;;  %v2423_v47 = vmul.f32 %v3793_v34, %v5882_v0 }
  0x68   : >> { %4051 = vmatpush3.bf16.msra.mxu1 %v4518_v22  ;;  %4046 = vmatprep.mubr.msk.bf16.mxu1 %vm237_vm0, %v756_v46  ;;  %v757_v22 = vpack.c.bf16 %v5200_v29, %v4961_v17  ;;  %v2421_v17 = vmul.f32 %v3791_v51, %v5882_v0  ;;  %v3795_v46 = vld [vmem:[%s4650_s21 + $0x180] sm:$0xff]  ;;  %v3801_v51 = vld [vmem:[%s4650_s21 + $0x1b0] sm:$0xff] }
  0x69   : >> { %4060 = vmatprep.subr.bf16.mxu1 %v4520_v25  ;;  %v2425_v49 = vmul.f32 %v3795_v46, %v5882_v0  ;;  %v2443_v42 = vadd.f32 %v5881_v2, %v2423_v47  ;;  %v5923_v47 = vld [vmem:[#allocation19_spill] sm:$0xff]  ;;  %v2431_v34 = vmul.f32 %v3801_v51, %v5882_v0 }
  0x6a   : >> { %v3792_v46 = vld [vmem:[%s4650_s21 + $0x168] sm:$0x3] }
  0x6b   : >> { %v2463_v10 = vmax.f32 %v2443_v42, 0.0  ;;  %v2424_v42 = vmul.f32 %v3794_v43, %v5882_v0  ;;  %v2634_v43 = vrot.slane %v5317_v36, 1 }
  0x6c   : >> { %4177 = vmatmul.mubr.msk.bf16.gmra.mrb[4].mxu0 %vm237_vm0, %v2218_v23  ;;  %v5922_v23 = vpack.c.bf16 %v4749_v59, %v4746_v58  ;;  %v859_v58 = vpack.c.bf16 %v4929_v38, %v4843_v12  ;;  %v2441_v59 = vadd.f32 %v5881_v2, %v2421_v17  ;;  %v5372_v12 = vld [vmem:[%s5842_s1 + $0x30] sm:$0xff]   ;;  %v3803_v38 = vld [vmem:[%s4650_s21 + $0x1c0] sm:$0xff]  ;;  %v3804_v17 = vld [vmem:[%s4650_s21 + $0x1c8] sm:$0x3] }
  0x6d   : >> { %4182 = vmatprep.mubr.msk.bf16.mxu0 %vm237_vm0, %v5309_v60  ;;  %v2433_v4 = vmul.f32 %v3803_v38, %v5882_v0  ;;  %v5407_v38 = vsel %vm5293_vm12, %v2463_v10, 0.0 }
  0x6f   : >> { %4047 = vmatmul.mubr.msk.bf16.gmra.mrb[4].mxu1 %vm237_vm0, %v757_v22  ;;  %v5348_v22 = vpack.c.bf16 %v5087_v50, %v5062_v40  ;;  %v860_v40 = vpack.c.bf16 %v4984_v62, %v4936_v53  ;;  %v3799_v50 = vld [vmem:[%s4650_s21 + $0x1a0] sm:$0xff]  ;;  %v2308_v53 = vpack.c.bf16 %v5090_v1, %v5923_v47  ;;  %v2445_v62 = vadd.f32 %v5881_v2, %v2425_v49  ;;  %v3798_v47 = vld [vmem:[%s4650_s21 + $0x198] sm:$0x3] }
  0x70   : >> { %4052 = vmatprep.mubr.msk.bf16.mxu1 %vm237_vm0, %v5922_v23  ;;  %v2461_v23 = vmax.f32 %v2441_v59, 0.0  ;;  %v2429_v55 = vmul.f32 %v3799_v50, %v5882_v0  ;;  %v2434_v49 = vmul.f32 %v3804_v17, %v5882_v0  ;;  %v2422_v59 = vmul.f32 %v3792_v46, %v5882_v0  ;;  %v5925_v17 = vld [vmem:[#allocation21_spill] sm:$0xff] }
  0x71   : >> { %v960_v32 = vpack.c.bf16 %v5135_v7, %v5925_v17  ;;  %v2428_v26 = vmul.f32 %v3798_v47, %v5882_v0  ;;  %v2444_v7 = vadd.f32 %v5881_v2, %v2424_v42 }
  0x72   : >> { %v5403_v51 = vsel %vm5293_vm12, %v2461_v23, 0.0  ;;  %v2454_v46 = vadd.f32 %v5881_v2, %v2434_v49  ;;  %v2442_v10 = vadd.f32 %v5881_v2, %v2422_v59  ;;  %v3800_v49 = vld [vmem:[%s4650_s21 + $0x1a8] sm:$0x3] }
  0x73   : >> { %v5437_v23 = vpack.c.bf16 %v5407_v38, %v5403_v51  ;;  %v2448_v47 = vadd.f32 %v5881_v2, %v2428_v26  ;;  %v4523_v26 = vld [vmem:[%s5842_s1 + $0xa0] sm:$0xff]  }
  0x74   : >> { %4183 = vmatmul.mubr.msk.bf16.vlgmr.msra.gmra.mrb[0].mxu0 %vm237_vm0, %v5340_v6  ;;  %v2462_v17 = vmax.f32 %v2442_v10, 0.0 }
  0x75   : >> { %4191 = vmatpush3.bf16.msra.mxu0 %v4519_v16  ;;  %4186 = vmatprep.mubr.msk.bf16.mxu0 %vm237_vm0, %v5348_v22  ;;  %v2447_v16 = vadd.f32 %v5881_v2, %v2427_v28  ;;  %v5924_v28 = vld [vmem:[#allocation13_spill] sm:$0xff] }
  0x76   : >> { %4200 = vmatprep.subr.bf16.mxu0 %v5353_v21 }
  0x77   : >> { %4053 = vmatmul.mubr.msk.bf16.vlgmr.msra.gmra.mrb[0].mxu1 %vm237_vm0, %v859_v58  ;;  %v2516_v58 = vpack.c.bf16 %v5313_v45, %v5903_v15  ;;  %v2467_v50 = vmax.f32 %v2447_v16, 0.0  ;;  %v2453_v16 = vadd.f32 %v5881_v2, %v2433_v4 }
  0x78   : >> { %4061 = vmatpush3.bf16.msra.mxu1 %v4520_v25  ;;  %4056 = vmatprep.mubr.msk.bf16.mxu1 %vm237_vm0, %v860_v40  ;;  %v2465_v25 = vmax.f32 %v2445_v62, 0.0  ;;  %v2426_v40 = vmul.f32 %v3796_v3, %v5882_v0  ;;  %v2449_v62 = vadd.f32 %v5881_v2, %v2429_v55  ;;  %v2451_v3 = vadd.f32 %v5881_v2, %v2431_v34 }
  0x79   : >> { %4070 = vmatprep.subr.bf16.mxu1 %v5372_v12  ;;  %v5428_v55 = vsel %vm5293_vm12, %v2467_v50, 0.0  ;;  %v5926_v34 = vpack.c.bf16 %v5240_v9, %v4996_v27  ;;  %v2474_v50 = vmax.f32 %v2454_v46, 0.0  ;;  %v2633_v27 = vrot.slane %v5313_v45, 1 }
  0x7a   : >> { %v2446_v4 = vadd.f32 %v5881_v2, %v2426_v40  ;;  %v2469_v59 = vmax.f32 %v2449_v62, 0.0  ;;  %v2471_v42 = vmax.f32 %v2451_v3, 0.0  ;;  %v961_v3 = vpack.c.bf16 %v5147_v5, %v5138_v14 }
  0x7b   : >> { %v2468_v46 = vmax.f32 %v2448_v47, 0.0  ;;  %v5474_v14 = vsel %vm5300_vm13, %v2474_v50, 0.0  ;;  %v5481_v5 = vsel %vm5300_vm13, %v2462_v17, 0.0 }
  0x7c   : >> { %4187 = vmatmul.mubr.msk.bf16.gmra.mrb[4].mxu0 %vm237_vm0, %v2308_v53  ;;  %v5424_v53 = vsel %vm5293_vm12, %v2465_v25, 0.0  ;;  %v2473_v25 = vmax.f32 %v2453_v16, 0.0  ;;  %v2466_v52 = vmax.f32 %v2446_v4, 0.0  ;;  %v962_v16 = vpack.c.bf16 %v5210_v48, %v5150_v8  ;;  %v4524_v48 = vld [vmem:[%s5842_s1 + $0x38] sm:$0xff]  }
  0x7d   : >> { %4192 = vmatprep.mubr.msk.bf16.mxu0 %vm237_vm0, %v2516_v58  ;;  %v3802_v58 = vld [vmem:[%s4650_s21 + $0x1b8] sm:$0x3]  ;;  %v5445_v40 = vpack.c.bf16 %v5428_v55, %v5424_v53  ;;  %v5462_v36 = vsel %vm5293_vm12, %v2469_v59, 0.0  ;;  %v5466_v10 = vsel %vm5293_vm12, %v2471_v42, 0.0  ;;  %v3093_v4 = vrot.slane %v5474_v14, 2 }
  0x7e   : >> { %v2432_v62 = vmul.f32 %v3802_v58, %v5882_v0  ;;  %v5497_v47 = vsel %vm5300_vm13, %v2466_v52, 0.0  ;;  %v5504_v59 = vpack.c.bf16 %v5466_v10, %v5462_v36  ;;  %v2636_v42 = vrot.slane %v5403_v51, 1 }
  0x7f   : >> { %4057 = vmatmul.mubr.msk.bf16.gmra.mrb[4].mxu1 %vm237_vm0, %v5926_v34  ;;  %v2464_v34 = vmax.f32 %v2444_v7, 0.0  ;;  %v5470_v7 = vsel %vm5293_vm12, %v2473_v25, 0.0  ;;  %v2637_v52 = vrot.slane %v5481_v5, 1  ;;  %v2639_v25 = vrot.slane %v5407_v38, 1 }
  0x80   : >> { %4062 = vmatprep.mubr.msk.bf16.mxu1 %vm237_vm0, %v960_v32  ;;  %v2430_v32 = vmul.f32 %v3800_v49, %v5882_v0  ;;  %v3092_v54 = vrot.slane %v5470_v7, 2  ;;  %v2452_v58 = vadd.f32 %v5881_v2, %v2432_v62  ;;  %v2642_v50 = vrot.slane %v5424_v53, 1 }
  0x81   : >> { %v5485_v8 = vsel %vm5300_vm13, %v2464_v34, 0.0  ;;  %v963_v0 = vpack.c.bf16 %v5268_v61, %v5213_v39 }
  0x82   : >> { %v2450_v49 = vadd.f32 %v5881_v2, %v2430_v32  ;;  %v2640_v34 = vrot.slane %v5485_v8, 1  ;;  %v2643_v32 = vrot.slane %v5497_v47, 1  ;;  %v5530_v2 = vsel %vm417_vm3, %v2636_v42, %v2637_v52  ;;  %v5927_v52 = vld [vmem:[#allocation15_spill] sm:$0xff] }
  0x84   : >> { %4193 = vmatmul.mubr.msk.bf16.vlgmr.msra.gmra.mrb[0].mxu0 %vm237_vm0, %v5437_v23 }
  0x85   : >> { %4201 = vmatpush3.bf16.msra.mxu0 %v5353_v21  ;;  %4196 = vmatprep.mubr.msk.bf16.mxu0 %vm237_vm0, %v5445_v40  ;;  %v5493_v21 = vsel %vm417_vm3, %v2633_v27, %v2634_v43  ;;  %v2507_v43 = vsel %vm5300_vm13, %v2468_v46, 0.0  ;;  %v2645_v27 = vrot.slane %v5428_v55, 1 }
  0x86   : >> { %4210 = vmatprep.subr.bf16.mxu0 %v4523_v26  ;;  %v2662_v17 = vpack.c.bf16 %v5493_v21, %v4691_v33  ;;  %v2646_v62 = vrot.slane %v2507_v43, 1  ;;  %v2776_v46 = vrot.slane %v2507_v43, 2 }
  0x87   : >> { %4063 = vmatmul.mubr.msk.bf16.vlgmr.msra.gmra.mrb[0].mxu1 %vm237_vm0, %v961_v3  ;;  %v2470_v3 = vmax.f32 %v2450_v49, 0.0 }
  0x88   : >> { %4071 = vmatpush3.bf16.msra.mxu1 %v5372_v12  ;;  %4066 = vmatprep.mubr.msk.bf16.mxu1 %vm237_vm0, %v962_v16  ;;  %v5520_v12 = vsel %vm623_vm10, %v3092_v54, %v3093_v4  ;;  %v2472_v16 = vmax.f32 %v2452_v58, 0.0  ;;  %v5533_v54 = vsel %vm417_vm3, %v2639_v25, %v2640_v34  ;;  %v5536_v4 = vsel %vm417_vm3, %v2642_v50, %v2643_v32 }
  0x89   : >> { %4080 = vmatprep.subr.bf16.mxu1 %v4524_v48  ;;  %v5539_v49 = vsel %vm417_vm3, %v2645_v27, %v2646_v62  ;;  %v2509_v39 = vsel %vm5300_vm13, %v2470_v3, 0.0  ;;  %v5548_v42 = vpack.c.bf16 %v5533_v54, %v5530_v2  ;;  %v2648_v25 = vrot.slane %v5462_v36, 1  ;;  %v4526_v62 = vld [vmem:[%s5842_s1 + $0x40] sm:$0xff]   ;;  %v5928_v3 = vld [vmem:[#allocation17_spill] sm:$0xff] }
  0x8a   : >> { %v2511_v58 = vsel %vm5300_vm13, %v2472_v16, 0.0  ;;  %v5555_v50 = vpack.c.bf16 %v5539_v49, %v5536_v4  ;;  %v2649_v27 = vrot.slane %v2509_v39, 1  ;;  %v5929_v16 = vld [vmem:[#allocation22_spill] sm:$0xff] }
  0x8b   : >> { %v2652_v13 = vrot.slane %v2511_v58, 1 }
  0x8c   : >> { %4197 = vmatmul.mubr.msk.bf16.gmra.mrb[4].mxu0 %vm237_vm0, %v5504_v59  ;;  %v5566_v34 = vsel %vm417_vm3, %v2648_v25, %v2649_v27  ;;  %v2767_v25 = vrot.slane %v5481_v5, 2  ;;  %v2769_v27 = vrot.slane %v5407_v38, 2  ;;  %v5930_v5 = vpack.c.bf16 %v5329_v31, %v5090_v1 }
  0x8d   : >> { %4202 = vmatprep.mubr.msk.bf16.mxu0 %vm237_vm0, %v2662_v17  ;;  %v2651_v17 = vrot.slane %v5466_v10, 1 }
  0x8f   : >> { %4067 = vmatmul.mubr.msk.bf16.gmra.mrb[4].mxu1 %vm237_vm0, %v963_v0  ;;  %v4525_v0 = vld [vmem:[%s5842_s1 + $0xa8] sm:$0xff]   ;;  %v5569_v32 = vsel %vm417_vm3, %v2651_v17, %v2652_v13  ;;  %v2770_v17 = vrot.slane %v5485_v8, 2  ;;  %v2772_v13 = vrot.slane %v5424_v53, 2 }
  0x90   : >> { %4072 = vmatprep.mubr.msk.bf16.mxu1 %vm237_vm0, %v5927_v52  ;;  %v2766_v52 = vrot.slane %v5403_v51, 2 }
  0x92   : >> { %v5598_v8 = vsel %vm623_vm10, %v2766_v52, %v2767_v25  ;;  %v2778_v52 = vrot.slane %v5462_v36, 2 }
  0x94   : >> { %4203 = vmatmul.mubr.msk.bf16.vlgmr.msra.gmra.mrb[0].mxu0 %vm237_vm0, %v5548_v42 }
  0x95   : >> { %4211 = vmatpush3.bf16.msra.mxu0 %v4523_v26  ;;  %4206 = vmatprep.mubr.msk.bf16.mxu0 %vm237_vm0, %v5555_v50  ;;  %v5578_v26 = vpack.c.bf16 %v5569_v32, %v5566_v34 }
  0x96   : >> { %4220 = vmatprep.subr.bf16.mxu0 %v4525_v0 }
  0x97   : >> { %4073 = vmatmul.mubr.msk.bf16.vlgmr.msra.gmra.mrb[0].mxu1 %vm237_vm0, %v5928_v3  ;;  %v2775_v3 = vrot.slane %v5428_v55, 2 }
  0x98   : >> { %4081 = vmatpush3.bf16.msra.mxu1 %v4524_v48  ;;  %4076 = vmatprep.mubr.msk.bf16.mxu1 %vm237_vm0, %v5929_v16  ;;  %v2773_v48 = vrot.slane %v5497_v47, 2  ;;  %v5601_v16 = vsel %vm623_vm10, %v2769_v27, %v2770_v17  ;;  %v2779_v27 = vrot.slane %v2509_v39, 2  ;;  %v2781_v17 = vrot.slane %v5466_v10, 2  ;;  %v4528_v39 = vld [vmem:[%s5842_s1 + $0x48] sm:$0xff]  }
  0x99   : >> { %4090 = vmatprep.subr.bf16.mxu1 %v4526_v62  ;;  %v5607_v43 = vsel %vm623_vm10, %v2775_v3, %v2776_v46  ;;  %v5612_v29 = vpack.c.bf16 %v5601_v16, %v5598_v8  ;;  %v2782_v46 = vrot.slane %v2511_v58, 2  ;;  %v5932_v58 = vld [vmem:[#allocation12_spill] sm:$0xff]  ;;  %v2890_v3 = vpack.c.bf16 %v5403_v51, %v5313_v45 }
  0x9a   : >> { %v5604_v47 = vsel %vm623_vm10, %v2772_v13, %v2773_v48  ;;  %v2892_v45 = vpack.c.bf16 %v5462_v36, %v5428_v55  ;;  %v4530_v51 = vld [vmem:[%s5842_s1 + $0x50] sm:$0xff]   ;;  %v2995_v36 = vpack.c.bf16 %v5536_v4, %v5533_v54  ;;  %v4532_v54 = vld [vmem:[%s5842_s1 + $0x58] sm:$0xff]  }
  0x9b   : >> { %v5619_v25 = vpack.c.bf16 %v5607_v43, %v5604_v47  ;;  %v5631_v13 = vsel %vm623_vm10, %v2781_v17, %v2782_v46  ;;  %v5936_v4 = vld [vmem:[#allocation20_spill] sm:$0xff] }
  0x9c   : >> { %4207 = vmatmul.mubr.msk.bf16.gmra.mrb[4].mxu0 %vm237_vm0, %v5578_v26 }
  0x9d   : >> { %4212 = vmatprep.mubr.msk.bf16.mxu0 %vm237_vm0, %v5930_v5  ;;  %v1150_v5 = vpack.c.bf16 %v4691_v33, %v5240_v9  ;;  %v4529_v9 = vld [vmem:[%s5842_s1 + $0xb8] sm:$0xff]  }
  0x9f   : >> { %4077 = vmatmul.mubr.msk.bf16.gmra.mrb[4].mxu1 %vm237_vm0, %v1058_v30  ;;  %v4527_v30 = vld [vmem:[%s5842_s1 + $0xb0] sm:$0xff]  }
  0xa0   : >> { %4082 = vmatprep.mubr.msk.bf16.mxu1 %vm237_vm0, %v5931_v44  ;;  %v2780_v44 = vsel %vm623_vm10, %v2778_v52, %v2779_v27 }
  0xa1   : >> { %v5639_v48 = vpack.c.bf16 %v5631_v13, %v2780_v44 }
  0xa4   : >> { %4213 = vmatmul.mubr.msk.bf16.vlgmr.msra.gmra.mrb[0].mxu0 %vm237_vm0, %v5612_v29 }
  0xa5   : >> { %4221 = vmatpush3.bf16.msra.mxu0 %v4525_v0  ;;  %4216 = vmatprep.mubr.msk.bf16.mxu0 %vm237_vm0, %v5619_v25  ;;  %v5933_v0 = vld [vmem:[#allocation14_spill] sm:$0xff] }
  0xa6   : >> { %4230 = vmatprep.subr.bf16.mxu0 %v4527_v30 }
  0xa7   : >> { %4083 = vmatmul.mubr.msk.bf16.vlgmr.msra.gmra.mrb[0].mxu1 %vm237_vm0, %v5932_v58 }
  0xa8   : >> { %4091 = vmatpush3.bf16.msra.mxu1 %v4526_v62  ;;  %4086 = vmatprep.mubr.msk.bf16.mxu1 %vm237_vm0, %v5933_v0  ;;  %v2891_v62 = vpack.c.bf16 %v5424_v53, %v5407_v38  ;;  %v2994_v38 = vpack.c.bf16 %v5530_v2, %v5493_v21  ;;  %v5934_v53 = vld [vmem:[#allocation6_spill] sm:$0xff]  ;;  %v2996_v2 = vpack.c.bf16 %v5566_v34, %v5539_v49  ;;  %v5937_v34 = vld [vmem:[#allocation9_spill] sm:$0xff] }
  0xa9   : >> { %4100 = vmatprep.subr.bf16.mxu1 %v4528_v39  ;;  %v1448_v55 = vpack.c.bf16 %v5934_v53, %v5903_v15  ;;  %v4531_v21 = vld [vmem:[%s5842_s1 + $0xc0] sm:$0xff]   ;;  %v3096_v49 = vpack.c.bf16 %v5598_v8, %v5329_v31  ;;  %v1594_v52 = vpack.c.bf16 %v5937_v34, %v4691_v33  ;;  %v4533_v31 = vld [vmem:[%s5842_s1 + $0xc8] sm:$0xff]   ;;  %v3099_v8 = vpack.c.bf16 %v5520_v12, %v5631_v13 }
  0xac   : >> { %4217 = vmatmul.mubr.msk.bf16.gmra.mrb[4].mxu0 %vm237_vm0, %v5639_v48 }
  0xad   : >> { %4222 = vmatprep.mubr.msk.bf16.mxu0 %vm237_vm0, %v2890_v3 }
  0xaf   : >> { %4087 = vmatmul.mubr.msk.bf16.gmra.mrb[4].mxu1 %vm237_vm0, %v1150_v5 }
  0xb0   : >> { %4092 = vmatprep.mubr.msk.bf16.mxu1 %vm237_vm0, %v5169_v35  ;;  %v2893_v35 = vpack.c.bf16 %v5470_v7, %v5466_v10  ;;  %v2991_v10 = vrot.slane %v5474_v14, 1 }
  0xb4   : >> { %4223 = vmatmul.mubr.msk.bf16.vlgmr.msra.gmra.mrb[0].mxu0 %vm237_vm0, %v2891_v62 }
  0xb5   : >> { %4231 = vmatpush3.bf16.msra.mxu0 %v4527_v30  ;;  %4226 = vmatprep.mubr.msk.bf16.mxu0 %vm237_vm0, %v2892_v45 }
  0xb6   : >> { %4240 = vmatprep.subr.bf16.mxu0 %v4529_v9 }
  0xb7   : >> { %4093 = vmatmul.mubr.msk.bf16.vlgmr.msra.gmra.mrb[0].mxu1 %vm237_vm0, %v5178_v24  ;;  %v5935_v24 = vpack.c.bf16 %v5090_v1, %v5268_v61 }
  0xb8   : >> { %4101 = vmatpush3.bf16.msra.mxu1 %v4528_v39  ;;  %4096 = vmatprep.mubr.msk.bf16.mxu1 %vm237_vm0, %v5232_v11  ;;  %v2990_v11 = vrot.slane %v5470_v7, 1 }
  0xb9   : >> { %4110 = vmatprep.subr.bf16.mxu1 %v4530_v51 }
  0xba   : >> { %v2992_v61 = vsel %vm417_vm3, %v2990_v11, %v2991_v10 }
  0xbb   : >> { %v2997_v14 = vpack.c.bf16 %v2992_v61, %v5569_v32  ;;  %v3097_v32 = vpack.c.bf16 %v5604_v47, %v5601_v16  ;;  %v5938_v16 = vpack.c.bf16 %v5924_v28, %v5090_v1  ;;  %v5939_v28 = vld [vmem:[#allocation7_spill] sm:$0xff] }
  0xbc   : >> { %4227 = vmatmul.mubr.msk.bf16.gmra.mrb[4].mxu0 %vm237_vm0, %v2893_v35 }
  0xbd   : >> { %4232 = vmatprep.mubr.msk.bf16.mxu0 %vm237_vm0, %v2994_v38 }
  0xbf   : >> { %4097 = vmatmul.mubr.msk.bf16.gmra.mrb[4].mxu1 %vm237_vm0, %v5935_v24 }
  0xc0   : >> { %4102 = vmatprep.mubr.msk.bf16.mxu1 %vm237_vm0, %v1448_v55 }
  0xc4   : >> { %4233 = vmatmul.mubr.msk.bf16.vlgmr.msra.gmra.mrb[0].mxu0 %vm237_vm0, %v2995_v36 }
  0xc5   : >> { %4241 = vmatpush3.bf16.msra.mxu0 %v4529_v9  ;;  %4236 = vmatprep.mubr.msk.bf16.mxu0 %vm237_vm0, %v2996_v2 }
  0xc6   : >> { %4250 = vmatprep.subr.bf16.mxu0 %v4531_v21 }
  0xc7   : >> { %4103 = vmatmul.mubr.msk.bf16.vlgmr.msra.gmra.mrb[0].mxu1 %vm237_vm0, %v5936_v4 }
  0xc8   : >> { %4111 = vmatpush3.bf16.msra.mxu1 %v4530_v51  ;;  %4106 = vmatprep.mubr.msk.bf16.mxu1 %vm237_vm0, %v5130_v63  ;;  %v3098_v63 = vpack.c.bf16 %v2780_v44, %v5607_v43 }
  0xc9   : >> { %4120 = vmatprep.subr.bf16.mxu1 %v4532_v54 }
  0xcc   : >> { %4237 = vmatmul.mubr.msk.bf16.gmra.mrb[4].mxu0 %vm237_vm0, %v2997_v14 }
  0xcd   : >> { %4242 = vmatprep.mubr.msk.bf16.mxu0 %vm237_vm0, %v3096_v49 }
  0xcf   : >> { %4107 = vmatmul.mubr.msk.bf16.gmra.mrb[4].mxu1 %vm237_vm0, %v5142_v19  ;;  %v4534_v19 = vld [vmem:[%s5842_s1 + $0x60] sm:$0xff]  }
  0xd0   : >> { %4112 = vmatprep.mubr.msk.bf16.mxu1 %vm237_vm0, %v1594_v52 }
  0xd4   : >> { %4243 = vmatmul.mubr.msk.bf16.vlgmr.msra.gmra.mrb[0].mxu0 %vm237_vm0, %v3097_v32 }
  0xd5   : >> { %4251 = vmatpush3.bf16.msra.mxu0 %v4531_v21  ;;  %4246 = vmatprep.mubr.msk.bf16.mxu0 %vm237_vm0, %v3098_v63 }
  0xd6   : >> { %4260 = vmatprep.subr.bf16.mxu0 %v4533_v31 }
  0xd7   : >> { %4113 = vmatmul.mubr.msk.bf16.vlgmr.msra.gmra.mrb[0].mxu1 %vm237_vm0, %v5222_v57  ;;  %v4535_v57 = vld [vmem:[%s5842_s1 + $0xd0] sm:$0xff]  }
  0xd8   : >> { %4121 = vmatpush3.bf16.msra.mxu1 %v4532_v54  ;;  %4116 = vmatprep.mubr.msk.bf16.mxu1 %vm237_vm0, %v5264_v18  ;;  %v3194_v18 = vpack.c.bf16 %v5903_v15, %v5470_v7  ;;  %v5940_v15 = vld [vmem:[#allocation8_spill] sm:$0xff]  ;;  %v5942_v7 = vld [vmem:[#allocation25_spill] sm:$0xff] }
  0xd9   : >> { %4130 = vmatprep.subr.bf16.mxu1 %v4534_v19 }
  0xdc   : >> { %4247 = vmatmul.mubr.msk.bf16.gmra.mrb[4].mxu0 %vm237_vm0, %v3099_v8 }
  0xdd   : >> { %4252 = vmatprep.mubr.msk.bf16.mxu0 %vm237_vm0, %v5437_v23  ;;  %v1822_v23 = vpack.c.bf16 %v5939_v28, %v5934_v53 }
  0xdf   : >> { %4117 = vmatmul.mubr.msk.bf16.gmra.mrb[4].mxu1 %vm237_vm0, %v5272_v56  ;;  %v4536_v56 = vld [vmem:[%s5842_s1 + $0x68] sm:$0xff]  }
  0xe0   : >> { %4122 = vmatprep.mubr.msk.bf16.mxu1 %vm237_vm0, %v5938_v16 }
  0xe4   : >> { %4253 = vmatmul.mubr.msk.bf16.vlgmr.msra.gmra.mrb[0].mxu0 %vm237_vm0, %v5445_v40  ;;  %v1824_v40 = vpack.c.bf16 %v5040_v37, %v4882_v41  ;;  %v5943_v41 = vld [vmem:[#allocation18_spill] sm:$0xff]  ;;  %v5944_v37 = vld [vmem:[#allocation16_spill] sm:$0xff] }
  0xe5   : >> { %4261 = vmatpush3.bf16.msra.mxu0 %v4533_v31  ;;  %4256 = vmatprep.mubr.msk.bf16.mxu0 %vm237_vm0, %v5504_v59  ;;  %v1928_v59 = vpack.c.bf16 %v5942_v7, %v5249_v20  ;;  %v5949_v20 = vpack.c.bf16 %v5090_v1, %v5520_v12 }
  0xe6   : >> { %4270 = vmatprep.subr.bf16.mxu0 %v4535_v57 }
  0xe7   : >> { %4123 = vmatmul.mubr.msk.bf16.vlgmr.msra.gmra.mrb[0].mxu1 %vm237_vm0, %v5309_v60  ;;  %v5941_v60 = vld [vmem:[#allocation11_spill] sm:$0xff] }
  0xe8   : >> { %4131 = vmatpush3.bf16.msra.mxu1 %v4534_v19  ;;  %4126 = vmatprep.mubr.msk.bf16.mxu1 %vm237_vm0, %v5340_v6  ;;  %v1823_v6 = vpack.c.bf16 %v5941_v60, %v5940_v15 }
  0xe9   : >> { %4280 = vmatprep.subr.bf16.mxu1 %v4536_v56 }
  0xec   : >> { %4257 = vmatmul.mubr.msk.bf16.gmra.mrb[4].mxu0 %vm237_vm0, %v3194_v18 }
  0xed   : >> { %4262 = vmatprep.mubr.msk.bf16.mxu0 %vm237_vm0, %v5548_v42  ;;  %v5945_v42 = vpack.c.bf16 %v5943_v41, %v5944_v37 }
  0xef   : >> { %4127 = vmatmul.mubr.msk.bf16.gmra.mrb[4].mxu1 %vm237_vm0, %v5348_v22  ;;  %v3286_v22 = vpack.c.bf16 %v4691_v33, %v2992_v61  ;;  %v5946_v33 = vld [vmem:[#allocation24_spill] sm:$0xff] }
  0xf0   : >> { %4132 = vmatprep.mubr.msk.bf16.mxu1 %vm237_vm0, %v1822_v23 }
  0xf4   : >> { %4263 = vmatmul.mubr.msk.bf16.vlgmr.msra.gmra.mrb[0].mxu0 %vm237_vm0, %v5555_v50  ;;  %v5947_v50 = vld [vmem:[#allocation23_spill] sm:$0xff] }
  0xf5   : >> { %4271 = vmatpush3.bf16.msra.mxu0 %v4535_v57  ;;  %4266 = vmatprep.mubr.msk.bf16.mxu0 %vm237_vm0, %v5578_v26  ;;  %v5948_v26 = vpack.c.bf16 %v5946_v33, %v5947_v50 }
  0xf7   : >> { %4133 = vmatmul.mubr.msk.bf16.vlgmr.msra.gmra.mrb[0].mxu1 %vm237_vm0, %v1823_v6 }
  0xf8   : >> { %4281 = vmatpush3.bf16.msra.mxu1 %v4536_v56  ;;  %4136 = vmatprep.mubr.msk.bf16.mxu1 %vm237_vm0, %v1824_v40 }
  0xfc   : >> { %4267 = vmatmul.mubr.msk.bf16.gmra.mrb[4].mxu0 %vm237_vm0, %v3286_v22 }
  0xfd   : >> { %4272 = vmatprep.mubr.msk.bf16.mxu0 %vm237_vm0, %v5612_v29 }
  0xff   : >> { %4137 = vmatmul.mubr.msk.bf16.gmra.mrb[4].mxu1 %vm237_vm0, %v5945_v42 }
 0x100   : >> { %4146 = vmatprep.mubr.msk.bf16.mxu1 %vm237_vm0, %v1928_v59 }
 0x104   : >> { %4273 = vmatmul.mubr.msk.bf16.vlgmr.msra.gmra.mrb[0].mxu0 %vm237_vm0, %v5619_v25 }
 0x105   : >> { %4276 = vmatprep.mubr.msk.bf16.mxu0 %vm237_vm0, %v5639_v48 }
 0x10b   : >> { %4147 = vmatmul.mubr.msk.bf16.vlgmr.msra.gmra.mrb[4].mxu1 %vm237_vm0, %v5948_v26 }
 0x10c   : >> { %4277 = vmatmul.mubr.msk.bf16.gmra.mrb[4].mxu0 %vm237_vm0, %v5949_v20 }
 0x1ca   : >> { %v4134_v47 = vpop.f32.mrb[0].mxu1 }
 0x1cb   : >> { %v1881_v43 = vpop.f32.mrb[1].mxu1 }
 0x1cc   : >> { %v4135_v29 = vpop.f32.mrb[2].mxu1 }
 0x1cd   : >> { %v1884_v27 = vpop.f32.mrb[3].mxu1 }
 0x1d7   : >> { %v4274_v17 = vpop.f32.mrb[0].mxu0 }
 0x1d8   : >> { %v4282_v25 = vadd.f32 %v4274_v17, %v4134_v47  ;;  %v3423_v46 = vpop.f32.mrb[1].mxu0 }
 0x1d9   : >> { %v4283_v30 = vadd.f32 %v3423_v46, %v1881_v43  ;;  %v4275_v44 = vpop.f32.mrb[2].mxu0  ;;  %v3472_v46 = vld [vmem:[%s4622_s10] sm:$0x1] }
 0x1da   : >> { %3466 = vst.msk [vmem:[%s5796_s25 + $0x10] sm:$0xff] %vm237_vm0, %v4282_v25  ;;  %v4284_v1 = vadd.f32 %v4275_v44, %v4135_v29  ;;  %v3426_v12 = vpop.f32.mrb[3].mxu0  ;;  %v3500_v58 = vmul.f32 %v4282_v25, %v4282_v25  ;;  %v3476_v9 = vsel %vm237_vm0, %v4282_v25, 0.0 }
 0x1db   : >> { %3464 = vst.msk [vmem:[%s5796_s25] sm:$0xff] %vm237_vm0, %v4283_v30  ;;  %v3498_v13 = vmul.f32 %v4283_v30, %v4283_v30  ;;  %v4285_v39 = vadd.f32 %v3426_v12, %v1884_v27  ;;  %v3473_v48 = vsel %vm237_vm0, %v4283_v30, 0.0 }
 0x1dc   : >> { %3467 = vst.msk [vmem:[%s5796_s25 + $0x18] sm:$0xff] %vm237_vm0, %v4284_v1  ;;  %v3501_v5 = vmul.f32 %v4284_v1, %v4284_v1  ;;  %v3509_v10 = vsel %vm237_vm0, %v3500_v58, 0.0  ;;  %v3478_v21 = vsel %vm237_vm0, %v4284_v1, 0.0 }
 0x1dd   : >> { %3465 = vst.msk [vmem:[%s5796_s25 + $0x8] sm:$0xff] %vm237_vm0, %v4285_v39  ;;  %v3474_v0 = vsel %vm237_vm0, %v4285_v39, 0.0  ;;  %v3499_v3 = vmul.f32 %v4285_v39, %v4285_v39  ;;  %v3506_v51 = vsel %vm237_vm0, %v3498_v13, 0.0  ;;  %v3497_v13 = vld [vmem:[%s4622_s10 + $0x1] sm:$0x1] }
 0x1de   : >> { %v3475_v62 = vadd.f32 %v3474_v0, %v3473_v48  ;;  %v4148_v45 = vpop.f32.mrb[4].mxu1  ;;  %v3511_v14 = vsel %vm237_vm0, %v3501_v5, 0.0 }
 0x1df   : >> { %v3507_v35 = vsel %vm237_vm0, %v3499_v3, 0.0  ;;  %v4278_v38 = vpop.f32.mrb[4].mxu0  ;;  %v2001_v53 = vpop.f32.mrb[5].mxu1 }
 0x1e0   : >> { %v3477_v55 = vadd.f32 %v3476_v9, %v3475_v62  ;;  %v3508_v24 = vadd.f32 %v3507_v35, %v3506_v51  ;;  %v4286_v36 = vadd.f32 %v4278_v38, %v4148_v45  ;;  %v3439_v2 = vpop.f32.mrb[5].mxu0  ;;  %v4149_v11 = vpop.f32.mrb[6].mxu1 }
 0x1e1   : >> { %v4287_v61 = vadd.f32 %v3439_v2, %v2001_v53  ;;  %v4279_v54 = vpop.f32.mrb[6].mxu0  ;;  %v2004_v4 = vpop.f32.mrb[7].mxu1 }
 0x1e2   : >> { %v3510_v49 = vadd.f32 %v3509_v10, %v3508_v24  ;;  %3470 = vst.msk [vmem:[%s5796_s25 + $0x30] sm:$0xff] %vm237_vm0, %v4286_v36  ;;  %v3479_v34 = vadd.f32 %v3478_v21, %v3477_v55  ;;  %v3442_v52 = vpop.f32.mrb[7].mxu0  ;;  %v4288_v31 = vadd.f32 %v4279_v54, %v4149_v11  ;;  %v3504_v56 = vmul.f32 %v4286_v36, %v4286_v36 }
 0x1e3   : >> { %3468 = vst.msk [vmem:[%s5796_s25 + $0x20] sm:$0xff] %vm237_vm0, %v4287_v61  ;;  %v3480_v32 = vsel %vm237_vm0, %v4287_v61, 0.0  ;;  %v3502_v63 = vmul.f32 %v4287_v61, %v4287_v61  ;;  %v4289_v19 = vadd.f32 %v3442_v52, %v2004_v4  ;;  %v3484_v60 = vsel %vm237_vm0, %v4286_v36, 0.0 }
 0x1e4   : >> { %v3481_v8 = vadd.f32 %v3480_v32, %v3479_v34  ;;  %v3512_v16 = vadd.f32 %v3511_v14, %v3510_v49  ;;  %3471 = vst.msk [vmem:[%s5796_s25 + $0x38] sm:$0xff] %vm237_vm0, %v4288_v31  ;;  %v3505_v6 = vmul.f32 %v4288_v31, %v4288_v31  ;;  %v3486_v7 = vsel %vm237_vm0, %v4288_v31, 0.0 }
 0x1e5   : >> { %v3513_v57 = vsel %vm237_vm0, %v3502_v63, 0.0  ;;  %3469 = vst.msk [vmem:[%s5796_s25 + $0x28] sm:$0xff] %vm237_vm0, %v4289_v19  ;;  %v3482_v18 = vsel %vm237_vm0, %v4289_v19, 0.0  ;;  %v3503_v15 = vmul.f32 %v4289_v19, %v4289_v19  ;;  %v3517_v41 = vsel %vm237_vm0, %v3504_v56, 0.0 }
 0x1e6   : >> { %v3514_v28 = vadd.f32 %v3513_v57, %v3512_v16  ;;  %v3483_v23 = vadd.f32 %v3482_v18, %v3481_v8  ;;  %v3519_v33 = vsel %vm237_vm0, %v3505_v6, 0.0 }
 0x1e7   : >> { %v3515_v22 = vsel %vm237_vm0, %v3503_v15, 0.0 }
 0x1e8   : >> { %v3485_v40 = vadd.f32 %v3484_v60, %v3483_v23  ;;  %v3516_v59 = vadd.f32 %v3515_v22, %v3514_v28 }
 0x1ea   : >> { %v3487_v37 = vadd.f32 %v3486_v7, %v3485_v40  ;;  %v3518_v42 = vadd.f32 %v3517_v41, %v3516_v59 }
 0x1ec   : >> { %v3488_v50 = vrot.slane %v3487_v37, 4  ;;  %v3520_v26 = vadd.f32 %v3519_v33, %v3518_v42 }
 0x1ee   : >> { %v3489_v20 = vadd.f32 %v3488_v50, %v3487_v37  ;;  %v3521_v47 = vrot.slane %v3520_v26, 4 }
 0x1f0   : >> { %v3490_v43 = vrot.slane %v3489_v20, 2  ;;  %v3522_v29 = vadd.f32 %v3521_v47, %v3520_v26 }
 0x1f2   : >> { %v3491_v27 = vadd.f32 %v3490_v43, %v3489_v20  ;;  %v3523_v17 = vrot.slane %v3522_v29, 2 }
 0x1f4   : >> { %v3492_v25 = vrot.slane %v3491_v27, 1  ;;  %v3524_v30 = vadd.f32 %v3523_v17, %v3522_v29 }
 0x1f6   : >> { %v3493_v44 = vadd.f32 %v3492_v25, %v3491_v27  ;;  %v3525_v1 = vrot.slane %v3524_v30, 1  ;;  %260 = sbr.rel (!%p258_p13) target bundleno = 18 (0x12), region = 115 }
 0x1f8   : >> { %v3494_v12 = vadd.f32 %v3493_v44, %v3472_v46  ;;  %v3526_v39 = vadd.f32 %v3525_v1, %v3524_v30 }
 0x1fa   : >> { %3496 = vst.msk [vmem:[%s4622_s10] sm:$0x1] %vm3495_vm14, %v3494_v12  ;;  %v3527_v58 = vadd.f32 %v3526_v39, %v3497_v13 }
 0x1fc   : >> { %3528 = vst.msk [vmem:[%s4622_s10 + $0x1] sm:$0x1] %vm3495_vm14, %v3527_v58 }
 0x1fd PF: > { %s16_s18 = sadd.s32 1, %s4547_s18  }
 0x1fe   : > { %p13_p0 = scmp.ge.s32.totalorder %s16_s18, 4  }
 0x200   :  { %15 = sbr.rel (!%p13_p0) target bundleno = 1 (0x1), region = 126 }

</bundles_post_ra>
